<compile_context>
chip_gen: v7x
topology: tpu7x:2x2x1
jax: 0.10.0
libtpu: 0.0.40
codegen_flags: <defaults>
</compile_context>

<pallas_src>
import math

import jax
import jax.numpy as jnp
from jax.experimental import pallas as pl
from jax.experimental.pallas import tpu as pltpu

# ----------------------------- hyper-parameters ------------------------------
BATCH = 2
SEQ = 16                    # stand-in for max_length = 77
VOCAB = 256                 # stand-in for 49408 (CLIP) / 32128 (T5)
M_TOKENS = BATCH * SEQ      # batch folded into the matmul M dimension

# CLIP text transformer (stand-in for openai/clip-vit-large-patch14 text model)
CLIP_DIM = 128
CLIP_HEADS = 4
CLIP_DIM_HEAD = CLIP_DIM // CLIP_HEADS      # 32
CLIP_LAYERS = 2
CLIP_MLP = 4 * CLIP_DIM                     # 512
CLIP_LN_EPS = 1e-5

# T5 v1.1 encoder (stand-in for google/t5-v1_1-xl)
T5_DIM = 128
T5_HEADS = 4
T5_DIM_HEAD = 32
T5_INNER = T5_HEADS * T5_DIM_HEAD           # 128
T5_LAYERS = 2
T5_FF = 256                                 # gated-gelu: wi_0, wi_1, wo
T5_LN_EPS = 1e-6
T5_REL_BUCKETS = 32
T5_REL_MAX_DIST = 128

# Both stacks share one fused pallas_call here (same S and hidden width).
assert CLIP_DIM == T5_DIM

NEG_INF = -1e30


# ------------------------------ kernel helpers --------------------------------
def _mm(a, b):
    # MXU matmul: bf16 operands, fp32 accumulation. Weights are already stored
    # bf16 (halves weight DMA); activations are cast right at the matmul so all
    # normalization / softmax math stays fp32 (v5e-safe).
    return jnp.dot(a.astype(jnp.bfloat16), b.astype(jnp.bfloat16),
                   preferred_element_type=jnp.float32)


def _layer_norm(v, g, b, eps):
    # g, b are (1, N) lane-dense rows -> sublane broadcast, no relayout.
    mu = jnp.mean(v, axis=-1, keepdims=True)
    var = jnp.mean(jnp.square(v - mu), axis=-1, keepdims=True)
    return (v - mu) * jax.lax.rsqrt(var + eps) * g + b


def _rms_norm(v, g, eps):
    # T5LayerNorm: no mean subtraction, no bias.
    var = jnp.mean(jnp.square(v), axis=-1, keepdims=True)
    return v * jax.lax.rsqrt(var + eps) * g


def _attention(qkv, wo, heads, dim_head, bias):
    """Multi-head self-attention on batch-folded activations.

    qkv : (M, 3*heads*dim_head) fp32, columns grouped [q heads | k heads | v heads]
    wo  : (heads*dim_head, D) bf16 output projection
    bias: (heads, M, M) fp32 additive bias (causal / rel-pos / cross-batch mask)
    returns (M, D) fp32
    """
    m = qkv.shape[0]
    d_out = wo.shape[-1]
    # Single packed head-split relayout for Q, K and V together (one einshape per
    # layer instead of per-tensor swapaxes); lane-layout aware.
    t = pltpu.einshape("mhd->hmd", qkv.reshape(m, 3 * heads, dim_head))
    t = t.astype(jnp.bfloat16)                                      # (3H, M, dh)
    q, k, v = t[:heads], t[heads:2 * heads], t[2 * heads:]
    # Leading-batch einsums (batch = heads), fp32 accumulation.
    s = jnp.einsum("hqd,hkd->hqk", q, k,
                   preferred_element_type=jnp.float32) + bias       # (H, M, M)
    mx = jnp.max(s, axis=-1, keepdims=True)                         # fp32 softmax
    e = jnp.exp(s - mx)
    p = e * pl.reciprocal(jnp.sum(e, axis=-1, keepdims=True), approx=True)
    ctx = jnp.einsum("hqk,hkd->hqd", p.astype(jnp.bfloat16), v,
                     preferred_element_type=jnp.float32)            # (H, M, dh)
    # Head merge + output projection with NO transpose back:
    #   out = sum_h ctx_h @ Wo_h  (head-batched matmul, summed over heads).
    wo_h = wo.reshape(heads, dim_head, d_out)                       # free split
    o = jnp.einsum("hqd,hdn->hqn", ctx.astype(jnp.bfloat16), wo_h,
                   preferred_element_type=jnp.float32)              # (H, M, D)
    out = o[0]
    for h in range(1, heads):                                       # static unroll
        out = out + o[h]
    return out


# --------------------------------- kernel --------------------------------------
def fused_encoder_kernel(
    x_ref, clip_bias_ref, t5_bias_ref,
    # CLIP weights (stacked per-layer, leading L axis)
    c_ln1g_ref, c_ln1b_ref, c_wqkv_ref, c_bqkv_ref, c_wo_ref, c_bo_ref,
    c_ln2g_ref, c_ln2b_ref, c_w1_ref, c_b1_ref, c_w2_ref, c_b2_ref,
    c_lnfg_ref, c_lnfb_ref,
    # T5 weights (stacked per-layer)
    t_ln1_ref, t_wqkv_ref, t_wo_ref, t_ln2_ref, t_wi_ref, t_wffo_ref, t_lnf_ref,
    o_ref,
):
    # Grid step 0 runs the whole CLIP stack, step 1 the whole T5 stack
    # ("parallel" -> on v7x each encoder lands on its own TensorCore).
    enc = pl.program_id(0)
    D = CLIP_DIM

    @pl.when(enc == 0)
    def _clip():
        x = x_ref[0].astype(jnp.float32)                   # (M, D), batch folded
        bias = clip_bias_ref[...]                          # (H, M, M), hoisted
        for l in range(CLIP_LAYERS):                       # static unroll
            # pre-LN causal self-attention (q scale folded into wqkv on host)
            h = _layer_norm(x, c_ln1g_ref[l], c_ln1b_ref[l], CLIP_LN_EPS)
            qkv = _mm(h, c_wqkv_ref[l]) + c_bqkv_ref[l]    # (M, 3D)
            x = (x + _attention(qkv, c_wo_ref[l], CLIP_HEADS, CLIP_DIM_HEAD, bias)
                 + c_bo_ref[l])
            # MLP with quick_gelu (x * sigmoid(1.702 x))
            h = _layer_norm(x, c_ln2g_ref[l], c_ln2b_ref[l], CLIP_LN_EPS)
            h = _mm(h, c_w1_ref[l]) + c_b1_ref[l]
            h = h * jax.nn.sigmoid(1.702 * h)
            x = x + _mm(h, c_w2_ref[l]) + c_b2_ref[l]
        # layer='last' => final_layer_norm output.
        o_ref[0] = _layer_norm(x, c_lnfg_ref[...], c_lnfb_ref[...],
                               CLIP_LN_EPS).astype(o_ref.dtype)

    @pl.when(enc == 1)
    def _t5():
        x = x_ref[0].astype(jnp.float32)                   # (M, D)
        bias = t5_bias_ref[...]                            # (H, M, M), shared by layers
        for l in range(T5_LAYERS):                         # static unroll
            # self-attention: RMSNorm, no q scaling, additive relative bias
            h = _rms_norm(x, t_ln1_ref[l], T5_LN_EPS)
            qkv = _mm(h, t_wqkv_ref[l])                    # (M, 3I), no biases
            x = x + _attention(qkv, t_wo_ref[l], T5_HEADS, T5_DIM_HEAD, bias)
            # gated-GELU feed-forward (T5 v1.1): fused [wi_0 | wi_1] matmul
            h = _rms_norm(x, t_ln2_ref[l], T5_LN_EPS)
            hh = _mm(h, t_wi_ref[l])                       # (M, 2F)
            hg = jax.nn.gelu(hh[:, :T5_FF], approximate=True) * hh[:, T5_FF:]
            x = x + _mm(hg, t_wffo_ref[l])
        o_ref[0] = _rms_norm(x, t_lnf_ref[...], T5_LN_EPS).astype(o_ref.dtype)


# ------------------------- host-side attention biases --------------------------
def _clip_attn_bias(batch, seq, heads):
    # Additive bias for the batch-folded (B*S) layout: causal within each batch
    # element, -inf across batch elements (block-diagonal). Built once on host.
    m = batch * seq
    pos = jnp.arange(m, dtype=jnp.int32)
    same_batch = (pos[:, None] // seq) == (pos[None, :] // seq)
    causal = (pos[None, :] % seq) <= (pos[:, None] % seq)
    bias = jnp.where(same_batch & causal, 0.0, NEG_INF).astype(jnp.float32)
    return jnp.broadcast_to(bias[None], (heads, m, m))


def _t5_relative_position_bias(rel_bias_table, seq_len,
                               num_buckets=T5_REL_BUCKETS,
                               max_distance=T5_REL_MAX_DIST):
    # HF T5Attention._relative_position_bucket (bidirectional), batch-independent,
    # shared across layers -> precompute once in plain JAX, returns (H, S, S).
    ctx = jnp.arange(seq_len, dtype=jnp.int32)[:, None]
    mem = jnp.arange(seq_len, dtype=jnp.int32)[None, :]
    rel = mem - ctx
    nb = num_buckets // 2
    bucket = jnp.where(rel > 0, nb, 0).astype(jnp.int32)
    n = jnp.abs(rel)
    max_exact = nb // 2
    is_small = n < max_exact
    large = max_exact + (
        jnp.log(jnp.maximum(n, 1).astype(jnp.float32) / max_exact)
        / math.log(max_distance / max_exact) * (nb - max_exact)
    ).astype(jnp.int32)
    large = jnp.minimum(large, nb - 1)
    bucket = bucket + jnp.where(is_small, n, large)
    values = rel_bias_table[bucket]                           # (S, S, H)
    return jnp.transpose(values, (2, 0, 1))                   # (H, S, S)


def _t5_attn_bias(rel_bias_table, batch, seq):
    # Relative-position bias tiled to the batch-folded layout, cross-batch masked.
    pb = _t5_relative_position_bias(rel_bias_table, seq)      # (H, S, S)
    m = batch * seq
    pos = jnp.arange(m, dtype=jnp.int32)
    same_batch = (pos[:, None] // seq) == (pos[None, :] // seq)
    tiled = jnp.tile(pb, (1, batch, batch))                   # (H, M, M)
    return jnp.where(same_batch[None], tiled, NEG_INF).astype(jnp.float32)


# ------------------------------ pallas wrapper ----------------------------------
def _wspec(shape):
    # Grid-invariant (weight-like) operand: whole array resident in VMEM.
    # TODO(synk): at real CLIP-L / T5-XL scale add a layer grid axis instead
    # (stream one layer per step) and mark these pipeline_mode=pl.Buffered(1);
    # the stacked-resident layout only fits VMEM at these toy dims.
    zeros = (0,) * len(shape)
    return pl.BlockSpec(shape, lambda i: zeros)


def frozen_clip_t5_encode(tokens, cp, tp):
    # FrozenCLIPT5Encoder.forward: run both frozen encoders, return both outputs.
    B, S = tokens.shape
    M, D = B * S, CLIP_DIM

    # TODO(synk): embedding-table row gather is data-dependent; done in plain JAX
    # (at full scale: scalar-prefetch token ids + pl.Element row gather in-kernel).
    clip_x = (cp["tok_emb"][tokens] + cp["pos_emb"][None]).reshape(M, D)
    t5_x = tp["tok_emb"][tokens].reshape(M, D)
    x_both = jnp.stack([clip_x, t5_x], axis=0)                # (2, M, D) fp32

    clip_bias = _clip_attn_bias(B, S, CLIP_HEADS)             # (Hc, M, M)
    t5_bias = _t5_attn_bias(tp["rel_bias"], B, S)             # (Ht, M, M)

    Lc, Lt = CLIP_LAYERS, T5_LAYERS
    out = pl.pallas_call(
        fused_encoder_kernel,
        out_shape=jax.ShapeDtypeStruct((2, M, D), jnp.float32),
        grid=(2,),
        in_specs=[
            pl.BlockSpec((1, M, D), lambda i: (i, 0, 0)),     # per-encoder embeddings
            _wspec((CLIP_HEADS, M, M)),                        # CLIP additive mask
            _wspec((T5_HEADS, M, M)),                          # T5 rel-pos bias + mask
            # CLIP weights
            _wspec((Lc, 1, D)),                                # ln1_g
            _wspec((Lc, 1, D)),                                # ln1_b
            _wspec((Lc, D, 3 * D)),                            # wqkv (q pre-scaled)
            _wspec((Lc, 1, 3 * D)),                            # bqkv
            _wspec((Lc, D, D)),                                # wo
            _wspec((Lc, 1, D)),                                # bo
            _wspec((Lc, 1, D)),                                # ln2_g
            _wspec((Lc, 1, D)),                                # ln2_b
            _wspec((Lc, D, CLIP_MLP)),                         # w1
            _wspec((Lc, 1, CLIP_MLP)),                         # b1
            _wspec((Lc, CLIP_MLP, D)),                         # w2
            _wspec((Lc, 1, D)),                                # b2
            _wspec((1, D)),                                    # lnf_g
            _wspec((1, D)),                                    # lnf_b
            # T5 weights
            _wspec((Lt, 1, D)),                                # ln1
            _wspec((Lt, D, 3 * T5_INNER)),                     # wqkv
            _wspec((Lt, T5_INNER, D)),                         # wo
            _wspec((Lt, 1, D)),                                # ln2
            _wspec((Lt, D, 2 * T5_FF)),                        # wi = [wi_0 | wi_1]
            _wspec((Lt, T5_FF, D)),                            # wff_o
            _wspec((1, D)),                                    # lnf
        ],
        out_specs=pl.BlockSpec((1, M, D), lambda i: (i, 0, 0)),
        compiler_params=pltpu.CompilerParams(
            dimension_semantics=("parallel",),   # v7x: CLIP / T5 on different TCs
            vmem_limit_bytes=32 * 1024 * 1024,   # explicit; raise (or stream layers) at scale
        ),
    )(
        x_both, clip_bias, t5_bias,
        cp["ln1_g"], cp["ln1_b"], cp["wqkv"], cp["bqkv"], cp["wo"], cp["bo"],
        cp["ln2_g"], cp["ln2_b"], cp["w1"], cp["b1"], cp["w2"], cp["b2"],
        cp["lnf_g"], cp["lnf_b"],
        tp["ln1"], tp["wqkv"], tp["wo"], tp["ln2"], tp["wi"], tp["wff_o"], tp["lnf"],
    )
    clip_z = out[0].reshape(B, S, D)
    t5_z = out[1].reshape(B, S, D)
    return [clip_z, t5_z]


# -------------------------------- parameters -----------------------------------
# TODO(synk): pretrained clip-vit-large-patch14 / t5-v1_1-xl checkpoints have no
# in-script equivalent; random scaled-down weights stand in.
def init_clip_params(key):
    keys = iter(jax.random.split(key, 16))

    def nrm(shape, s=0.02):
        return (s * jax.random.normal(next(keys), shape)).astype(jnp.float32)

    L, D, MLP = CLIP_LAYERS, CLIP_DIM, CLIP_MLP
    scale = CLIP_DIM_HEAD ** -0.5
    wqkv = nrm((L, D, 3 * D))
    bqkv = jnp.zeros((L, 1, 3 * D), jnp.float32)
    # Fold attention scale into the q projection (weights + bias) on the host:
    # ((x Wq + bq) * s) k^T == (x (Wq*s) + bq*s) k^T.
    wqkv = wqkv.at[:, :, :D].multiply(scale)
    bqkv = bqkv.at[:, :, :D].multiply(scale)
    return {
        "tok_emb": nrm((VOCAB, D)),
        "pos_emb": nrm((SEQ, D)),
        "ln1_g": jnp.ones((L, 1, D), jnp.float32),
        "ln1_b": jnp.zeros((L, 1, D), jnp.float32),
        "wqkv": wqkv.astype(jnp.bfloat16),
        "bqkv": bqkv,
        "wo": nrm((L, D, D)).astype(jnp.bfloat16),
        "bo": jnp.zeros((L, 1, D), jnp.float32),
        "ln2_g": jnp.ones((L, 1, D), jnp.float32),
        "ln2_b": jnp.zeros((L, 1, D), jnp.float32),
        "w1": nrm((L, D, MLP)).astype(jnp.bfloat16),
        "b1": jnp.zeros((L, 1, MLP), jnp.float32),
        "w2": nrm((L, MLP, D)).astype(jnp.bfloat16),
        "b2": jnp.zeros((L, 1, D), jnp.float32),
        "lnf_g": jnp.ones((1, D), jnp.float32),
        "lnf_b": jnp.zeros((1, D), jnp.float32),
    }


def init_t5_params(key):
    keys = iter(jax.random.split(key, 16))

    def nrm(shape, s=0.02):
        return (s * jax.random.normal(next(keys), shape)).astype(jnp.float32)

    L, D, I, F = T5_LAYERS, T5_DIM, T5_INNER, T5_FF
    wi0 = nrm((L, D, F))
    wi1 = nrm((L, D, F))
    return {
        "tok_emb": nrm((VOCAB, D), 1.0),
        "rel_bias": nrm((T5_REL_BUCKETS, T5_HEADS)),
        "ln1": jnp.ones((L, 1, D), jnp.float32),
        "wqkv": nrm((L, D, 3 * I)).astype(jnp.bfloat16),
        "wo": nrm((L, I, D)).astype(jnp.bfloat16),
        "ln2": jnp.ones((L, 1, D), jnp.float32),
        # wi_0 | wi_1 concatenated on host -> one (D, 2F) up-projection matmul.
        "wi": jnp.concatenate([wi0, wi1], axis=-1).astype(jnp.bfloat16),
        "wff_o": nrm((L, F, D)).astype(jnp.bfloat16),
        "lnf": jnp.ones((1, D), jnp.float32),
    }


# ----------------------------------- main ---------------------------------------
if __name__ == "__main__":
    root = jax.random.PRNGKey(0)
    k_tok, k_clip, k_t5 = jax.random.split(root, 3)

    # TODO(synk): HF CLIPTokenizer / T5Tokenizer (text -> token ids) have no Pallas
    # equivalent; deterministic random token ids stand in for the tokenized text
    # (the same ids are fed to both encoders, as both encode the same text).
    tokens = jax.random.randint(k_tok, (BATCH, SEQ), 0, VOCAB, dtype=jnp.int32)

    clip_params = init_clip_params(k_clip)
    t5_params = init_t5_params(k_t5)

    encode = jax.jit(frozen_clip_t5_encode)
    clip_z, t5_z = encode(tokens, clip_params, t5_params)
    clip_z = jax.block_until_ready(clip_z)
    t5_z = jax.block_until_ready(t5_z)

    assert clip_z.shape == (BATCH, SEQ, CLIP_DIM), clip_z.shape
    assert t5_z.shape == (BATCH, SEQ, T5_DIM), t5_z.shape
    assert bool(jnp.all(jnp.isfinite(clip_z)))
    assert bool(jnp.all(jnp.isfinite(t5_z)))
    print("KERNEL_OK")
</pallas_src>

<mosaic_0001>
module attributes {stable_mosaic.version = 11 : i64} {
  func.func @fused_encoder_kernel(%arg0: i32, %arg1: memref<1x32x128xf32, #tpu.memory_space<vmem>>, %arg2: memref<4x32x32xf32, #tpu.memory_space<vmem>>, %arg3: memref<4x32x32xf32, #tpu.memory_space<vmem>>, %arg4: memref<2x1x128xf32, #tpu.memory_space<vmem>>, %arg5: memref<2x1x128xf32, #tpu.memory_space<vmem>>, %arg6: memref<2x128x384xbf16, #tpu.memory_space<vmem>>, %arg7: memref<2x1x384xf32, #tpu.memory_space<vmem>>, %arg8: memref<2x128x128xbf16, #tpu.memory_space<vmem>>, %arg9: memref<2x1x128xf32, #tpu.memory_space<vmem>>, %arg10: memref<2x1x128xf32, #tpu.memory_space<vmem>>, %arg11: memref<2x1x128xf32, #tpu.memory_space<vmem>>, %arg12: memref<2x128x512xbf16, #tpu.memory_space<vmem>>, %arg13: memref<2x1x512xf32, #tpu.memory_space<vmem>>, %arg14: memref<2x512x128xbf16, #tpu.memory_space<vmem>>, %arg15: memref<2x1x128xf32, #tpu.memory_space<vmem>>, %arg16: memref<1x128xf32, #tpu.memory_space<vmem>>, %arg17: memref<1x128xf32, #tpu.memory_space<vmem>>, %arg18: memref<2x1x128xf32, #tpu.memory_space<vmem>>, %arg19: memref<2x128x384xbf16, #tpu.memory_space<vmem>>, %arg20: memref<2x128x128xbf16, #tpu.memory_space<vmem>>, %arg21: memref<2x1x128xf32, #tpu.memory_space<vmem>>, %arg22: memref<2x128x512xbf16, #tpu.memory_space<vmem>>, %arg23: memref<2x256x128xbf16, #tpu.memory_space<vmem>>, %arg24: memref<1x128xf32, #tpu.memory_space<vmem>>, %arg25: memref<1x32x128xf32, #tpu.memory_space<vmem>>) attributes {dimension_semantics = [#tpu.dimension_semantics<parallel>], iteration_bounds = array<i64: 2>, scalar_prefetch = 0 : i64, scratch_operands = 0 : i64, tpu.core_type = #tpu.core_type<tc>, window_params = [{transform_indices = @transform_0, window_bounds = array<i64: 1, 32, 128>}, {pipeline_mode = #tpu.pipeline_mode<synchronous>, transform_indices = @transform_1, window_bounds = array<i64: 4, 32, 32>}, {pipeline_mode = #tpu.pipeline_mode<synchronous>, transform_indices = @transform_2, window_bounds = array<i64: 4, 32, 32>}, {pipeline_mode = #tpu.pipeline_mode<synchronous>, transform_indices = @transform_3, window_bounds = array<i64: 2, 1, 128>}, {pipeline_mode = #tpu.pipeline_mode<synchronous>, transform_indices = @transform_4, window_bounds = array<i64: 2, 1, 128>}, {pipeline_mode = #tpu.pipeline_mode<synchronous>, transform_indices = @transform_5, window_bounds = array<i64: 2, 128, 384>}, {pipeline_mode = #tpu.pipeline_mode<synchronous>, transform_indices = @transform_6, window_bounds = array<i64: 2, 1, 384>}, {pipeline_mode = #tpu.pipeline_mode<synchronous>, transform_indices = @transform_7, window_bounds = array<i64: 2, 128, 128>}, {pipeline_mode = #tpu.pipeline_mode<synchronous>, transform_indices = @transform_8, window_bounds = array<i64: 2, 1, 128>}, {pipeline_mode = #tpu.pipeline_mode<synchronous>, transform_indices = @transform_9, window_bounds = array<i64: 2, 1, 128>}, {pipeline_mode = #tpu.pipeline_mode<synchronous>, transform_indices = @transform_10, window_bounds = array<i64: 2, 1, 128>}, {pipeline_mode = #tpu.pipeline_mode<synchronous>, transform_indices = @transform_11, window_bounds = array<i64: 2, 128, 512>}, {pipeline_mode = #tpu.pipeline_mode<synchronous>, transform_indices = @transform_12, window_bounds = array<i64: 2, 1, 512>}, {pipeline_mode = #tpu.pipeline_mode<synchronous>, transform_indices = @transform_13, window_bounds = array<i64: 2, 512, 128>}, {pipeline_mode = #tpu.pipeline_mode<synchronous>, transform_indices = @transform_14, window_bounds = array<i64: 2, 1, 128>}, {pipeline_mode = #tpu.pipeline_mode<synchronous>, transform_indices = @transform_15, window_bounds = array<i64: 1, 128>}, {pipeline_mode = #tpu.pipeline_mode<synchronous>, transform_indices = @transform_16, window_bounds = array<i64: 1, 128>}, {pipeline_mode = #tpu.pipeline_mode<synchronous>, transform_indices = @transform_17, window_bounds = array<i64: 2, 1, 128>}, {pipeline_mode = #tpu.pipeline_mode<synchronous>, transform_indices = @transform_18, window_bounds = array<i64: 2, 128, 384>}, {pipeline_mode = #tpu.pipeline_mode<synchronous>, transform_indices = @transform_19, window_bounds = array<i64: 2, 128, 128>}, {pipeline_mode = #tpu.pipeline_mode<synchronous>, transform_indices = @transform_20, window_bounds = array<i64: 2, 1, 128>}, {pipeline_mode = #tpu.pipeline_mode<synchronous>, transform_indices = @transform_21, window_bounds = array<i64: 2, 128, 512>}, {pipeline_mode = #tpu.pipeline_mode<synchronous>, transform_indices = @transform_22, window_bounds = array<i64: 2, 256, 128>}, {pipeline_mode = #tpu.pipeline_mode<synchronous>, transform_indices = @transform_23, window_bounds = array<i64: 1, 128>}, {transform_indices = @transform_24, window_bounds = array<i64: 1, 32, 128>}]} {
    %c0_i32 = arith.constant 0 : i32
    %0 = arith.cmpi eq, %arg0, %c0_i32 : i32
    %1 = arith.extui %0 : i1 to i32
    %c0_i32_0 = arith.constant 0 : i32
    %2 = arith.cmpi ne, %1, %c0_i32_0 : i32
    scf.if %2 {
      %c0 = arith.constant 0 : index
      %c0_2 = arith.constant 0 : index
      %c0_3 = arith.constant 0 : index
      %6 = vector.load %arg1[%c0, %c0_2, %c0_3] : memref<1x32x128xf32, #tpu.memory_space<vmem>>, vector<1x32x128xf32>
      %7 = vector.shape_cast %6 : vector<1x32x128xf32> to vector<32x128xf32>
      %c0_4 = arith.constant 0 : index
      %c0_5 = arith.constant 0 : index
      %c0_6 = arith.constant 0 : index
      %8 = vector.load %arg2[%c0_4, %c0_5, %c0_6] : memref<4x32x32xf32, #tpu.memory_space<vmem>>, vector<4x32x32xf32>
      %c0_7 = arith.constant 0 : index
      %c0_8 = arith.constant 0 : index
      %c0_9 = arith.constant 0 : index
      %9 = vector.load %arg4[%c0_7, %c0_8, %c0_9] : memref<2x1x128xf32, #tpu.memory_space<vmem>>, vector<1x1x128xf32>
      %10 = vector.shape_cast %9 : vector<1x1x128xf32> to vector<1x128xf32>
      %c0_10 = arith.constant 0 : index
      %c0_11 = arith.constant 0 : index
      %c0_12 = arith.constant 0 : index
      %11 = vector.load %arg5[%c0_10, %c0_11, %c0_12] : memref<2x1x128xf32, #tpu.memory_space<vmem>>, vector<1x1x128xf32>
      %12 = vector.shape_cast %11 : vector<1x1x128xf32> to vector<1x128xf32>
      %cst = arith.constant dense<0.000000e+00> : vector<32xf32>
      %13 = vector.multi_reduction <add>, %7, %cst [1] : vector<32x128xf32> to vector<32xf32>
      %14 = vector.shape_cast %13 : vector<32xf32> to vector<32x1xf32>
      %cst_13 = arith.constant 1.280000e+02 : f32
      %15 = vector.broadcast %cst_13 : f32 to vector<32x1xf32>
      %16 = arith.divf %14, %15 : vector<32x1xf32>
      %17 = vector.broadcast %16 : vector<32x1xf32> to vector<32x128xf32>
      %18 = arith.subf %7, %17 : vector<32x128xf32>
      %19 = arith.mulf %18, %18 : vector<32x128xf32>
      %cst_14 = arith.constant dense<0.000000e+00> : vector<32xf32>
      %20 = vector.multi_reduction <add>, %19, %cst_14 [1] : vector<32x128xf32> to vector<32xf32>
      %21 = vector.shape_cast %20 : vector<32xf32> to vector<32x1xf32>
      %cst_15 = arith.constant 1.280000e+02 : f32
      %22 = vector.broadcast %cst_15 : f32 to vector<32x1xf32>
      %23 = arith.divf %21, %22 : vector<32x1xf32>
      %24 = vector.broadcast %16 : vector<32x1xf32> to vector<32x128xf32>
      %25 = arith.subf %7, %24 : vector<32x128xf32>
      %cst_16 = arith.constant 9.99999974E-6 : f32
      %26 = vector.broadcast %cst_16 : f32 to vector<32x1xf32>
      %27 = arith.addf %23, %26 : vector<32x1xf32>
      %28 = math.rsqrt %27 : vector<32x1xf32>
      %29 = vector.broadcast %28 : vector<32x1xf32> to vector<32x128xf32>
      %30 = arith.mulf %25, %29 : vector<32x128xf32>
      %31 = vector.broadcast %10 : vector<1x128xf32> to vector<32x128xf32>
      %32 = arith.mulf %30, %31 : vector<32x128xf32>
      %33 = vector.broadcast %12 : vector<1x128xf32> to vector<32x128xf32>
      %34 = arith.addf %32, %33 : vector<32x128xf32>
      %c0_17 = arith.constant 0 : index
      %c0_18 = arith.constant 0 : index
      %c0_19 = arith.constant 0 : index
      %35 = vector.load %arg6[%c0_17, %c0_18, %c0_19] : memref<2x128x384xbf16, #tpu.memory_space<vmem>>, vector<1x128x384xbf16>
      %36 = vector.shape_cast %35 : vector<1x128x384xbf16> to vector<128x384xbf16>
      %37 = arith.truncf %34 : vector<32x128xf32> to vector<32x128xbf16>
      %cst_20 = arith.constant dense<0.000000e+00> : vector<32x384xf32>
      %38 = tpu.matmul %37, %36, %cst_20 {dimension_numbers = #tpu.dot_dimension_numbers<[1], [0], [0], [1], [0, 0, 1, 1], [], []>} : vector<32x128xbf16>, vector<128x384xbf16>, vector<32x384xf32> -> vector<32x384xf32>
      %c0_21 = arith.constant 0 : index
      %c0_22 = arith.constant 0 : index
      %c0_23 = arith.constant 0 : index
      %39 = vector.load %arg7[%c0_21, %c0_22, %c0_23] : memref<2x1x384xf32, #tpu.memory_space<vmem>>, vector<1x1x384xf32>
      %40 = vector.shape_cast %39 : vector<1x1x384xf32> to vector<1x384xf32>
      %41 = vector.broadcast %40 : vector<1x384xf32> to vector<32x384xf32>
      %42 = arith.addf %38, %41 : vector<32x384xf32>
      %c0_24 = arith.constant 0 : index
      %c0_25 = arith.constant 0 : index
      %c0_26 = arith.constant 0 : index
      %43 = vector.load %arg8[%c0_24, %c0_25, %c0_26] : memref<2x128x128xbf16, #tpu.memory_space<vmem>>, vector<1x128x128xbf16>
      %44 = vector.shape_cast %43 : vector<1x128x128xbf16> to vector<128x128xbf16>
      %45 = vector.shape_cast %42 : vector<32x384xf32> to vector<32x12x32xf32>
      %46 = tpu.transpose %45, [1, 0, 2] : vector<32x12x32xf32> -> vector<12x32x32xf32>
      %47 = arith.truncf %46 : vector<12x32x32xf32> to vector<12x32x32xbf16>
      %48 = vector.extract_strided_slice %47 {offsets = [0, 0, 0], sizes = [4, 32, 32], strides = [1, 1, 1]} : vector<12x32x32xbf16> to vector<4x32x32xbf16>
      %49 = vector.extract_strided_slice %47 {offsets = [4, 0, 0], sizes = [4, 32, 32], strides = [1, 1, 1]} : vector<12x32x32xbf16> to vector<4x32x32xbf16>
      %50 = vector.extract_strided_slice %47 {offsets = [8, 0, 0], sizes = [4, 32, 32], strides = [1, 1, 1]} : vector<12x32x32xbf16> to vector<4x32x32xbf16>
      "tpu.trace_start"() <{level = 10 : i32, message = "hqd,hkd->hqk"}> : () -> ()
      %cst_27 = arith.constant dense<0.000000e+00> : vector<4x32x32xf32>
      %51 = tpu.matmul %48, %49, %cst_27 {dimension_numbers = #tpu.dot_dimension_numbers<[2], [2], [1], [1], [0, 0, 0, 1, 1, 1], [0], [0]>} : vector<4x32x32xbf16>, vector<4x32x32xbf16>, vector<4x32x32xf32> -> vector<4x32x32xf32>
      "tpu.trace_stop"() : () -> ()
      %52 = arith.addf %51, %8 : vector<4x32x32xf32>
      %cst_28 = arith.constant dense<0xFF800000> : vector<4x32xf32>
      %53 = vector.multi_reduction <maximumf>, %52, %cst_28 [2] : vector<4x32x32xf32> to vector<4x32xf32>
      %54 = vector.shape_cast %53 : vector<4x32xf32> to vector<4x32x1xf32>
      %55 = vector.broadcast %54 : vector<4x32x1xf32> to vector<4x32x32xf32>
      %56 = arith.subf %52, %55 : vector<4x32x32xf32>
      %57 = math.exp %56 : vector<4x32x32xf32>
      %cst_29 = arith.constant dense<0.000000e+00> : vector<4x32xf32>
      %58 = vector.multi_reduction <add>, %57, %cst_29 [2] : vector<4x32x32xf32> to vector<4x32xf32>
      %59 = vector.shape_cast %58 : vector<4x32xf32> to vector<4x32x1xf32>
      %60 = tpu.reciprocal %59 {approx = true} : vector<4x32x1xf32> -> vector<4x32x1xf32>
      %61 = vector.broadcast %60 : vector<4x32x1xf32> to vector<4x32x32xf32>
      %62 = arith.mulf %57, %61 : vector<4x32x32xf32>
      %63 = arith.truncf %62 : vector<4x32x32xf32> to vector<4x32x32xbf16>
      "tpu.trace_start"() <{level = 10 : i32, message = "hqk,hkd->hqd"}> : () -> ()
      %cst_30 = arith.constant dense<0.000000e+00> : vector<4x32x32xf32>
      %64 = tpu.matmul %63, %50, %cst_30 {dimension_numbers = #tpu.dot_dimension_numbers<[2], [1], [1], [2], [0, 0, 0, 1, 1, 2], [0], [0]>} : vector<4x32x32xbf16>, vector<4x32x32xbf16>, vector<4x32x32xf32> -> vector<4x32x32xf32>
      "tpu.trace_stop"() : () -> ()
      %65 = vector.shape_cast %44 : vector<128x128xbf16> to vector<4x32x128xbf16>
      %66 = arith.truncf %64 : vector<4x32x32xf32> to vector<4x32x32xbf16>
      "tpu.trace_start"() <{level = 10 : i32, message = "hqd,hdn->hqn"}> : () -> ()
      %cst_31 = arith.constant dense<0.000000e+00> : vector<4x32x128xf32>
      %67 = tpu.matmul %66, %65, %cst_31 {dimension_numbers = #tpu.dot_dimension_numbers<[2], [1], [1], [2], [0, 0, 0, 1, 1, 2], [0], [0]>} : vector<4x32x32xbf16>, vector<4x32x128xbf16>, vector<4x32x128xf32> -> vector<4x32x128xf32>
      "tpu.trace_stop"() : () -> ()
      %68 = vector.extract_strided_slice %67 {offsets = [0, 0, 0], sizes = [1, 32, 128], strides = [1, 1, 1]} : vector<4x32x128xf32> to vector<1x32x128xf32>
      %69 = vector.shape_cast %68 : vector<1x32x128xf32> to vector<32x128xf32>
      %70 = vector.extract_strided_slice %67 {offsets = [1, 0, 0], sizes = [1, 32, 128], strides = [1, 1, 1]} : vector<4x32x128xf32> to vector<1x32x128xf32>
      %71 = vector.shape_cast %70 : vector<1x32x128xf32> to vector<32x128xf32>
      %72 = arith.addf %69, %71 : vector<32x128xf32>
      %73 = vector.extract_strided_slice %67 {offsets = [2, 0, 0], sizes = [1, 32, 128], strides = [1, 1, 1]} : vector<4x32x128xf32> to vector<1x32x128xf32>
      %74 = vector.shape_cast %73 : vector<1x32x128xf32> to vector<32x128xf32>
      %75 = arith.addf %72, %74 : vector<32x128xf32>
      %76 = vector.extract_strided_slice %67 {offsets = [3, 0, 0], sizes = [1, 32, 128], strides = [1, 1, 1]} : vector<4x32x128xf32> to vector<1x32x128xf32>
      %77 = vector.shape_cast %76 : vector<1x32x128xf32> to vector<32x128xf32>
      %78 = arith.addf %75, %77 : vector<32x128xf32>
      %79 = arith.addf %7, %78 : vector<32x128xf32>
      %c0_32 = arith.constant 0 : index
      %c0_33 = arith.constant 0 : index
      %c0_34 = arith.constant 0 : index
      %80 = vector.load %arg9[%c0_32, %c0_33, %c0_34] : memref<2x1x128xf32, #tpu.memory_space<vmem>>, vector<1x1x128xf32>
      %81 = vector.shape_cast %80 : vector<1x1x128xf32> to vector<1x128xf32>
      %82 = vector.broadcast %81 : vector<1x128xf32> to vector<32x128xf32>
      %83 = arith.addf %79, %82 : vector<32x128xf32>
      %c0_35 = arith.constant 0 : index
      %c0_36 = arith.constant 0 : index
      %c0_37 = arith.constant 0 : index
      %84 = vector.load %arg10[%c0_35, %c0_36, %c0_37] : memref<2x1x128xf32, #tpu.memory_space<vmem>>, vector<1x1x128xf32>
      %85 = vector.shape_cast %84 : vector<1x1x128xf32> to vector<1x128xf32>
      %c0_38 = arith.constant 0 : index
      %c0_39 = arith.constant 0 : index
      %c0_40 = arith.constant 0 : index
      %86 = vector.load %arg11[%c0_38, %c0_39, %c0_40] : memref<2x1x128xf32, #tpu.memory_space<vmem>>, vector<1x1x128xf32>
      %87 = vector.shape_cast %86 : vector<1x1x128xf32> to vector<1x128xf32>
      %cst_41 = arith.constant dense<0.000000e+00> : vector<32xf32>
      %88 = vector.multi_reduction <add>, %83, %cst_41 [1] : vector<32x128xf32> to vector<32xf32>
      %89 = vector.shape_cast %88 : vector<32xf32> to vector<32x1xf32>
      %cst_42 = arith.constant 1.280000e+02 : f32
      %90 = vector.broadcast %cst_42 : f32 to vector<32x1xf32>
      %91 = arith.divf %89, %90 : vector<32x1xf32>
      %92 = vector.broadcast %91 : vector<32x1xf32> to vector<32x128xf32>
      %93 = arith.subf %83, %92 : vector<32x128xf32>
      %94 = arith.mulf %93, %93 : vector<32x128xf32>
      %cst_43 = arith.constant dense<0.000000e+00> : vector<32xf32>
      %95 = vector.multi_reduction <add>, %94, %cst_43 [1] : vector<32x128xf32> to vector<32xf32>
      %96 = vector.shape_cast %95 : vector<32xf32> to vector<32x1xf32>
      %cst_44 = arith.constant 1.280000e+02 : f32
      %97 = vector.broadcast %cst_44 : f32 to vector<32x1xf32>
      %98 = arith.divf %96, %97 : vector<32x1xf32>
      %99 = vector.broadcast %91 : vector<32x1xf32> to vector<32x128xf32>
      %100 = arith.subf %83, %99 : vector<32x128xf32>
      %cst_45 = arith.constant 9.99999974E-6 : f32
      %101 = vector.broadcast %cst_45 : f32 to vector<32x1xf32>
      %102 = arith.addf %98, %101 : vector<32x1xf32>
      %103 = math.rsqrt %102 : vector<32x1xf32>
      %104 = vector.broadcast %103 : vector<32x1xf32> to vector<32x128xf32>
      %105 = arith.mulf %100, %104 : vector<32x128xf32>
      %106 = vector.broadcast %85 : vector<1x128xf32> to vector<32x128xf32>
      %107 = arith.mulf %105, %106 : vector<32x128xf32>
      %108 = vector.broadcast %87 : vector<1x128xf32> to vector<32x128xf32>
      %109 = arith.addf %107, %108 : vector<32x128xf32>
      %c0_46 = arith.constant 0 : index
      %c0_47 = arith.constant 0 : index
      %c0_48 = arith.constant 0 : index
      %110 = vector.load %arg12[%c0_46, %c0_47, %c0_48] : memref<2x128x512xbf16, #tpu.memory_space<vmem>>, vector<1x128x512xbf16>
      %111 = vector.shape_cast %110 : vector<1x128x512xbf16> to vector<128x512xbf16>
      %112 = arith.truncf %109 : vector<32x128xf32> to vector<32x128xbf16>
      %cst_49 = arith.constant dense<0.000000e+00> : vector<32x512xf32>
      %113 = tpu.matmul %112, %111, %cst_49 {dimension_numbers = #tpu.dot_dimension_numbers<[1], [0], [0], [1], [0, 0, 1, 1], [], []>} : vector<32x128xbf16>, vector<128x512xbf16>, vector<32x512xf32> -> vector<32x512xf32>
      %c0_50 = arith.constant 0 : index
      %c0_51 = arith.constant 0 : index
      %c0_52 = arith.constant 0 : index
      %114 = vector.load %arg13[%c0_50, %c0_51, %c0_52] : memref<2x1x512xf32, #tpu.memory_space<vmem>>, vector<1x1x512xf32>
      %115 = vector.shape_cast %114 : vector<1x1x512xf32> to vector<1x512xf32>
      %116 = vector.broadcast %115 : vector<1x512xf32> to vector<32x512xf32>
      %117 = arith.addf %113, %116 : vector<32x512xf32>
      %cst_53 = arith.constant 1.702000e+00 : f32
      %118 = vector.broadcast %cst_53 : f32 to vector<32x512xf32>
      %119 = arith.mulf %118, %117 : vector<32x512xf32>
      %120 = arith.negf %119 : vector<32x512xf32>
      %121 = math.exp %120 : vector<32x512xf32>
      %cst_54 = arith.constant 1.000000e+00 : f32
      %122 = vector.broadcast %cst_54 : f32 to vector<32x512xf32>
      %123 = arith.addf %122, %121 : vector<32x512xf32>
      %124 = arith.divf %122, %123 : vector<32x512xf32>
      %125 = arith.mulf %117, %124 : vector<32x512xf32>
      %c0_55 = arith.constant 0 : index
      %c0_56 = arith.constant 0 : index
      %c0_57 = arith.constant 0 : index
      %126 = vector.load %arg14[%c0_55, %c0_56, %c0_57] : memref<2x512x128xbf16, #tpu.memory_space<vmem>>, vector<1x512x128xbf16>
      %127 = vector.shape_cast %126 : vector<1x512x128xbf16> to vector<512x128xbf16>
      %128 = arith.truncf %125 : vector<32x512xf32> to vector<32x512xbf16>
      %cst_58 = arith.constant dense<0.000000e+00> : vector<32x128xf32>
      %129 = tpu.matmul %128, %127, %cst_58 {dimension_numbers = #tpu.dot_dimension_numbers<[1], [0], [0], [1], [0, 0, 1, 1], [], []>} : vector<32x512xbf16>, vector<512x128xbf16>, vector<32x128xf32> -> vector<32x128xf32>
      %130 = arith.addf %83, %129 : vector<32x128xf32>
      %c0_59 = arith.constant 0 : index
      %c0_60 = arith.constant 0 : index
      %c0_61 = arith.constant 0 : index
      %131 = vector.load %arg15[%c0_59, %c0_60, %c0_61] : memref<2x1x128xf32, #tpu.memory_space<vmem>>, vector<1x1x128xf32>
      %132 = vector.shape_cast %131 : vector<1x1x128xf32> to vector<1x128xf32>
      %133 = vector.broadcast %132 : vector<1x128xf32> to vector<32x128xf32>
      %134 = arith.addf %130, %133 : vector<32x128xf32>
      %c1 = arith.constant 1 : index
      %c0_62 = arith.constant 0 : index
      %c0_63 = arith.constant 0 : index
      %135 = vector.load %arg4[%c1, %c0_62, %c0_63] : memref<2x1x128xf32, #tpu.memory_space<vmem>>, vector<1x1x128xf32>
      %136 = vector.shape_cast %135 : vector<1x1x128xf32> to vector<1x128xf32>
      %c1_64 = arith.constant 1 : index
      %c0_65 = arith.constant 0 : index
      %c0_66 = arith.constant 0 : index
      %137 = vector.load %arg5[%c1_64, %c0_65, %c0_66] : memref<2x1x128xf32, #tpu.memory_space<vmem>>, vector<1x1x128xf32>
      %138 = vector.shape_cast %137 : vector<1x1x128xf32> to vector<1x128xf32>
      %cst_67 = arith.constant dense<0.000000e+00> : vector<32xf32>
      %139 = vector.multi_reduction <add>, %134, %cst_67 [1] : vector<32x128xf32> to vector<32xf32>
      %140 = vector.shape_cast %139 : vector<32xf32> to vector<32x1xf32>
      %cst_68 = arith.constant 1.280000e+02 : f32
      %141 = vector.broadcast %cst_68 : f32 to vector<32x1xf32>
      %142 = arith.divf %140, %141 : vector<32x1xf32>
      %143 = vector.broadcast %142 : vector<32x1xf32> to vector<32x128xf32>
      %144 = arith.subf %134, %143 : vector<32x128xf32>
      %145 = arith.mulf %144, %144 : vector<32x128xf32>
      %cst_69 = arith.constant dense<0.000000e+00> : vector<32xf32>
      %146 = vector.multi_reduction <add>, %145, %cst_69 [1] : vector<32x128xf32> to vector<32xf32>
      %147 = vector.shape_cast %146 : vector<32xf32> to vector<32x1xf32>
      %cst_70 = arith.constant 1.280000e+02 : f32
      %148 = vector.broadcast %cst_70 : f32 to vector<32x1xf32>
      %149 = arith.divf %147, %148 : vector<32x1xf32>
      %150 = vector.broadcast %142 : vector<32x1xf32> to vector<32x128xf32>
      %151 = arith.subf %134, %150 : vector<32x128xf32>
      %cst_71 = arith.constant 9.99999974E-6 : f32
      %152 = vector.broadcast %cst_71 : f32 to vector<32x1xf32>
      %153 = arith.addf %149, %152 : vector<32x1xf32>
      %154 = math.rsqrt %153 : vector<32x1xf32>
      %155 = vector.broadcast %154 : vector<32x1xf32> to vector<32x128xf32>
      %156 = arith.mulf %151, %155 : vector<32x128xf32>
      %157 = vector.broadcast %136 : vector<1x128xf32> to vector<32x128xf32>
      %158 = arith.mulf %156, %157 : vector<32x128xf32>
      %159 = vector.broadcast %138 : vector<1x128xf32> to vector<32x128xf32>
      %160 = arith.addf %158, %159 : vector<32x128xf32>
      %c1_72 = arith.constant 1 : index
      %c0_73 = arith.constant 0 : index
      %c0_74 = arith.constant 0 : index
      %161 = vector.load %arg6[%c1_72, %c0_73, %c0_74] : memref<2x128x384xbf16, #tpu.memory_space<vmem>>, vector<1x128x384xbf16>
      %162 = vector.shape_cast %161 : vector<1x128x384xbf16> to vector<128x384xbf16>
      %163 = arith.truncf %160 : vector<32x128xf32> to vector<32x128xbf16>
      %cst_75 = arith.constant dense<0.000000e+00> : vector<32x384xf32>
      %164 = tpu.matmul %163, %162, %cst_75 {dimension_numbers = #tpu.dot_dimension_numbers<[1], [0], [0], [1], [0, 0, 1, 1], [], []>} : vector<32x128xbf16>, vector<128x384xbf16>, vector<32x384xf32> -> vector<32x384xf32>
      %c1_76 = arith.constant 1 : index
      %c0_77 = arith.constant 0 : index
      %c0_78 = arith.constant 0 : index
      %165 = vector.load %arg7[%c1_76, %c0_77, %c0_78] : memref<2x1x384xf32, #tpu.memory_space<vmem>>, vector<1x1x384xf32>
      %166 = vector.shape_cast %165 : vector<1x1x384xf32> to vector<1x384xf32>
      %167 = vector.broadcast %166 : vector<1x384xf32> to vector<32x384xf32>
      %168 = arith.addf %164, %167 : vector<32x384xf32>
      %c1_79 = arith.constant 1 : index
      %c0_80 = arith.constant 0 : index
      %c0_81 = arith.constant 0 : index
      %169 = vector.load %arg8[%c1_79, %c0_80, %c0_81] : memref<2x128x128xbf16, #tpu.memory_space<vmem>>, vector<1x128x128xbf16>
      %170 = vector.shape_cast %169 : vector<1x128x128xbf16> to vector<128x128xbf16>
      %171 = vector.shape_cast %168 : vector<32x384xf32> to vector<32x12x32xf32>
      %172 = tpu.transpose %171, [1, 0, 2] : vector<32x12x32xf32> -> vector<12x32x32xf32>
      %173 = arith.truncf %172 : vector<12x32x32xf32> to vector<12x32x32xbf16>
      %174 = vector.extract_strided_slice %173 {offsets = [0, 0, 0], sizes = [4, 32, 32], strides = [1, 1, 1]} : vector<12x32x32xbf16> to vector<4x32x32xbf16>
      %175 = vector.extract_strided_slice %173 {offsets = [4, 0, 0], sizes = [4, 32, 32], strides = [1, 1, 1]} : vector<12x32x32xbf16> to vector<4x32x32xbf16>
      %176 = vector.extract_strided_slice %173 {offsets = [8, 0, 0], sizes = [4, 32, 32], strides = [1, 1, 1]} : vector<12x32x32xbf16> to vector<4x32x32xbf16>
      "tpu.trace_start"() <{level = 10 : i32, message = "hqd,hkd->hqk"}> : () -> ()
      %cst_82 = arith.constant dense<0.000000e+00> : vector<4x32x32xf32>
      %177 = tpu.matmul %174, %175, %cst_82 {dimension_numbers = #tpu.dot_dimension_numbers<[2], [2], [1], [1], [0, 0, 0, 1, 1, 1], [0], [0]>} : vector<4x32x32xbf16>, vector<4x32x32xbf16>, vector<4x32x32xf32> -> vector<4x32x32xf32>
      "tpu.trace_stop"() : () -> ()
      %178 = arith.addf %177, %8 : vector<4x32x32xf32>
      %cst_83 = arith.constant dense<0xFF800000> : vector<4x32xf32>
      %179 = vector.multi_reduction <maximumf>, %178, %cst_83 [2] : vector<4x32x32xf32> to vector<4x32xf32>
      %180 = vector.shape_cast %179 : vector<4x32xf32> to vector<4x32x1xf32>
      %181 = vector.broadcast %180 : vector<4x32x1xf32> to vector<4x32x32xf32>
      %182 = arith.subf %178, %181 : vector<4x32x32xf32>
      %183 = math.exp %182 : vector<4x32x32xf32>
      %cst_84 = arith.constant dense<0.000000e+00> : vector<4x32xf32>
      %184 = vector.multi_reduction <add>, %183, %cst_84 [2] : vector<4x32x32xf32> to vector<4x32xf32>
      %185 = vector.shape_cast %184 : vector<4x32xf32> to vector<4x32x1xf32>
      %186 = tpu.reciprocal %185 {approx = true} : vector<4x32x1xf32> -> vector<4x32x1xf32>
      %187 = vector.broadcast %186 : vector<4x32x1xf32> to vector<4x32x32xf32>
      %188 = arith.mulf %183, %187 : vector<4x32x32xf32>
      %189 = arith.truncf %188 : vector<4x32x32xf32> to vector<4x32x32xbf16>
      "tpu.trace_start"() <{level = 10 : i32, message = "hqk,hkd->hqd"}> : () -> ()
      %cst_85 = arith.constant dense<0.000000e+00> : vector<4x32x32xf32>
      %190 = tpu.matmul %189, %176, %cst_85 {dimension_numbers = #tpu.dot_dimension_numbers<[2], [1], [1], [2], [0, 0, 0, 1, 1, 2], [0], [0]>} : vector<4x32x32xbf16>, vector<4x32x32xbf16>, vector<4x32x32xf32> -> vector<4x32x32xf32>
      "tpu.trace_stop"() : () -> ()
      %191 = vector.shape_cast %170 : vector<128x128xbf16> to vector<4x32x128xbf16>
      %192 = arith.truncf %190 : vector<4x32x32xf32> to vector<4x32x32xbf16>
      "tpu.trace_start"() <{level = 10 : i32, message = "hqd,hdn->hqn"}> : () -> ()
      %cst_86 = arith.constant dense<0.000000e+00> : vector<4x32x128xf32>
      %193 = tpu.matmul %192, %191, %cst_86 {dimension_numbers = #tpu.dot_dimension_numbers<[2], [1], [1], [2], [0, 0, 0, 1, 1, 2], [0], [0]>} : vector<4x32x32xbf16>, vector<4x32x128xbf16>, vector<4x32x128xf32> -> vector<4x32x128xf32>
      "tpu.trace_stop"() : () -> ()
      %194 = vector.extract_strided_slice %193 {offsets = [0, 0, 0], sizes = [1, 32, 128], strides = [1, 1, 1]} : vector<4x32x128xf32> to vector<1x32x128xf32>
      %195 = vector.shape_cast %194 : vector<1x32x128xf32> to vector<32x128xf32>
      %196 = vector.extract_strided_slice %193 {offsets = [1, 0, 0], sizes = [1, 32, 128], strides = [1, 1, 1]} : vector<4x32x128xf32> to vector<1x32x128xf32>
      %197 = vector.shape_cast %196 : vector<1x32x128xf32> to vector<32x128xf32>
      %198 = arith.addf %195, %197 : vector<32x128xf32>
      %199 = vector.extract_strided_slice %193 {offsets = [2, 0, 0], sizes = [1, 32, 128], strides = [1, 1, 1]} : vector<4x32x128xf32> to vector<1x32x128xf32>
      %200 = vector.shape_cast %199 : vector<1x32x128xf32> to vector<32x128xf32>
      %201 = arith.addf %198, %200 : vector<32x128xf32>
      %202 = vector.extract_strided_slice %193 {offsets = [3, 0, 0], sizes = [1, 32, 128], strides = [1, 1, 1]} : vector<4x32x128xf32> to vector<1x32x128xf32>
      %203 = vector.shape_cast %202 : vector<1x32x128xf32> to vector<32x128xf32>
      %204 = arith.addf %201, %203 : vector<32x128xf32>
      %205 = arith.addf %134, %204 : vector<32x128xf32>
      %c1_87 = arith.constant 1 : index
      %c0_88 = arith.constant 0 : index
      %c0_89 = arith.constant 0 : index
      %206 = vector.load %arg9[%c1_87, %c0_88, %c0_89] : memref<2x1x128xf32, #tpu.memory_space<vmem>>, vector<1x1x128xf32>
      %207 = vector.shape_cast %206 : vector<1x1x128xf32> to vector<1x128xf32>
      %208 = vector.broadcast %207 : vector<1x128xf32> to vector<32x128xf32>
      %209 = arith.addf %205, %208 : vector<32x128xf32>
      %c1_90 = arith.constant 1 : index
      %c0_91 = arith.constant 0 : index
      %c0_92 = arith.constant 0 : index
      %210 = vector.load %arg10[%c1_90, %c0_91, %c0_92] : memref<2x1x128xf32, #tpu.memory_space<vmem>>, vector<1x1x128xf32>
      %211 = vector.shape_cast %210 : vector<1x1x128xf32> to vector<1x128xf32>
      %c1_93 = arith.constant 1 : index
      %c0_94 = arith.constant 0 : index
      %c0_95 = arith.constant 0 : index
      %212 = vector.load %arg11[%c1_93, %c0_94, %c0_95] : memref<2x1x128xf32, #tpu.memory_space<vmem>>, vector<1x1x128xf32>
      %213 = vector.shape_cast %212 : vector<1x1x128xf32> to vector<1x128xf32>
      %cst_96 = arith.constant dense<0.000000e+00> : vector<32xf32>
      %214 = vector.multi_reduction <add>, %209, %cst_96 [1] : vector<32x128xf32> to vector<32xf32>
      %215 = vector.shape_cast %214 : vector<32xf32> to vector<32x1xf32>
      %cst_97 = arith.constant 1.280000e+02 : f32
      %216 = vector.broadcast %cst_97 : f32 to vector<32x1xf32>
      %217 = arith.divf %215, %216 : vector<32x1xf32>
      %218 = vector.broadcast %217 : vector<32x1xf32> to vector<32x128xf32>
      %219 = arith.subf %209, %218 : vector<32x128xf32>
      %220 = arith.mulf %219, %219 : vector<32x128xf32>
      %cst_98 = arith.constant dense<0.000000e+00> : vector<32xf32>
      %221 = vector.multi_reduction <add>, %220, %cst_98 [1] : vector<32x128xf32> to vector<32xf32>
      %222 = vector.shape_cast %221 : vector<32xf32> to vector<32x1xf32>
      %cst_99 = arith.constant 1.280000e+02 : f32
      %223 = vector.broadcast %cst_99 : f32 to vector<32x1xf32>
      %224 = arith.divf %222, %223 : vector<32x1xf32>
      %225 = vector.broadcast %217 : vector<32x1xf32> to vector<32x128xf32>
      %226 = arith.subf %209, %225 : vector<32x128xf32>
      %cst_100 = arith.constant 9.99999974E-6 : f32
      %227 = vector.broadcast %cst_100 : f32 to vector<32x1xf32>
      %228 = arith.addf %224, %227 : vector<32x1xf32>
      %229 = math.rsqrt %228 : vector<32x1xf32>
      %230 = vector.broadcast %229 : vector<32x1xf32> to vector<32x128xf32>
      %231 = arith.mulf %226, %230 : vector<32x128xf32>
      %232 = vector.broadcast %211 : vector<1x128xf32> to vector<32x128xf32>
      %233 = arith.mulf %231, %232 : vector<32x128xf32>
      %234 = vector.broadcast %213 : vector<1x128xf32> to vector<32x128xf32>
      %235 = arith.addf %233, %234 : vector<32x128xf32>
      %c1_101 = arith.constant 1 : index
      %c0_102 = arith.constant 0 : index
      %c0_103 = arith.constant 0 : index
      %236 = vector.load %arg12[%c1_101, %c0_102, %c0_103] : memref<2x128x512xbf16, #tpu.memory_space<vmem>>, vector<1x128x512xbf16>
      %237 = vector.shape_cast %236 : vector<1x128x512xbf16> to vector<128x512xbf16>
      %238 = arith.truncf %235 : vector<32x128xf32> to vector<32x128xbf16>
      %cst_104 = arith.constant dense<0.000000e+00> : vector<32x512xf32>
      %239 = tpu.matmul %238, %237, %cst_104 {dimension_numbers = #tpu.dot_dimension_numbers<[1], [0], [0], [1], [0, 0, 1, 1], [], []>} : vector<32x128xbf16>, vector<128x512xbf16>, vector<32x512xf32> -> vector<32x512xf32>
      %c1_105 = arith.constant 1 : index
      %c0_106 = arith.constant 0 : index
      %c0_107 = arith.constant 0 : index
      %240 = vector.load %arg13[%c1_105, %c0_106, %c0_107] : memref<2x1x512xf32, #tpu.memory_space<vmem>>, vector<1x1x512xf32>
      %241 = vector.shape_cast %240 : vector<1x1x512xf32> to vector<1x512xf32>
      %242 = vector.broadcast %241 : vector<1x512xf32> to vector<32x512xf32>
      %243 = arith.addf %239, %242 : vector<32x512xf32>
      %cst_108 = arith.constant 1.702000e+00 : f32
      %244 = vector.broadcast %cst_108 : f32 to vector<32x512xf32>
      %245 = arith.mulf %244, %243 : vector<32x512xf32>
      %246 = arith.negf %245 : vector<32x512xf32>
      %247 = math.exp %246 : vector<32x512xf32>
      %cst_109 = arith.constant 1.000000e+00 : f32
      %248 = vector.broadcast %cst_109 : f32 to vector<32x512xf32>
      %249 = arith.addf %248, %247 : vector<32x512xf32>
      %250 = arith.divf %248, %249 : vector<32x512xf32>
      %251 = arith.mulf %243, %250 : vector<32x512xf32>
      %c1_110 = arith.constant 1 : index
      %c0_111 = arith.constant 0 : index
      %c0_112 = arith.constant 0 : index
      %252 = vector.load %arg14[%c1_110, %c0_111, %c0_112] : memref<2x512x128xbf16, #tpu.memory_space<vmem>>, vector<1x512x128xbf16>
      %253 = vector.shape_cast %252 : vector<1x512x128xbf16> to vector<512x128xbf16>
      %254 = arith.truncf %251 : vector<32x512xf32> to vector<32x512xbf16>
      %cst_113 = arith.constant dense<0.000000e+00> : vector<32x128xf32>
      %255 = tpu.matmul %254, %253, %cst_113 {dimension_numbers = #tpu.dot_dimension_numbers<[1], [0], [0], [1], [0, 0, 1, 1], [], []>} : vector<32x512xbf16>, vector<512x128xbf16>, vector<32x128xf32> -> vector<32x128xf32>
      %256 = arith.addf %209, %255 : vector<32x128xf32>
      %c1_114 = arith.constant 1 : index
      %c0_115 = arith.constant 0 : index
      %c0_116 = arith.constant 0 : index
      %257 = vector.load %arg15[%c1_114, %c0_115, %c0_116] : memref<2x1x128xf32, #tpu.memory_space<vmem>>, vector<1x1x128xf32>
      %258 = vector.shape_cast %257 : vector<1x1x128xf32> to vector<1x128xf32>
      %259 = vector.broadcast %258 : vector<1x128xf32> to vector<32x128xf32>
      %260 = arith.addf %256, %259 : vector<32x128xf32>
      %c0_117 = arith.constant 0 : index
      %c0_118 = arith.constant 0 : index
      %261 = vector.load %arg16[%c0_117, %c0_118] : memref<1x128xf32, #tpu.memory_space<vmem>>, vector<1x128xf32>
      %c0_119 = arith.constant 0 : index
      %c0_120 = arith.constant 0 : index
      %262 = vector.load %arg17[%c0_119, %c0_120] : memref<1x128xf32, #tpu.memory_space<vmem>>, vector<1x128xf32>
      %cst_121 = arith.constant dense<0.000000e+00> : vector<32xf32>
      %263 = vector.multi_reduction <add>, %260, %cst_121 [1] : vector<32x128xf32> to vector<32xf32>
      %264 = vector.shape_cast %263 : vector<32xf32> to vector<32x1xf32>
      %cst_122 = arith.constant 1.280000e+02 : f32
      %265 = vector.broadcast %cst_122 : f32 to vector<32x1xf32>
      %266 = arith.divf %264, %265 : vector<32x1xf32>
      %267 = vector.broadcast %266 : vector<32x1xf32> to vector<32x128xf32>
      %268 = arith.subf %260, %267 : vector<32x128xf32>
      %269 = arith.mulf %268, %268 : vector<32x128xf32>
      %cst_123 = arith.constant dense<0.000000e+00> : vector<32xf32>
      %270 = vector.multi_reduction <add>, %269, %cst_123 [1] : vector<32x128xf32> to vector<32xf32>
      %271 = vector.shape_cast %270 : vector<32xf32> to vector<32x1xf32>
      %cst_124 = arith.constant 1.280000e+02 : f32
      %272 = vector.broadcast %cst_124 : f32 to vector<32x1xf32>
      %273 = arith.divf %271, %272 : vector<32x1xf32>
      %274 = vector.broadcast %266 : vector<32x1xf32> to vector<32x128xf32>
      %275 = arith.subf %260, %274 : vector<32x128xf32>
      %cst_125 = arith.constant 9.99999974E-6 : f32
      %276 = vector.broadcast %cst_125 : f32 to vector<32x1xf32>
      %277 = arith.addf %273, %276 : vector<32x1xf32>
      %278 = math.rsqrt %277 : vector<32x1xf32>
      %279 = vector.broadcast %278 : vector<32x1xf32> to vector<32x128xf32>
      %280 = arith.mulf %275, %279 : vector<32x128xf32>
      %281 = vector.broadcast %261 : vector<1x128xf32> to vector<32x128xf32>
      %282 = arith.mulf %280, %281 : vector<32x128xf32>
      %283 = vector.broadcast %262 : vector<1x128xf32> to vector<32x128xf32>
      %284 = arith.addf %282, %283 : vector<32x128xf32>
      %c0_126 = arith.constant 0 : index
      %c0_127 = arith.constant 0 : index
      %c0_128 = arith.constant 0 : index
      %285 = vector.load %arg25[%c0_126, %c0_127, %c0_128] : memref<1x32x128xf32, #tpu.memory_space<vmem>>, vector<1x32x128xf32>
      %286 = vector.shape_cast %285 : vector<1x32x128xf32> to vector<32x128xf32>
      %287 = vector.shape_cast %284 : vector<32x128xf32> to vector<1x32x128xf32>
      tpu.vector_store %arg25[%c0_126, %c0_127, %c0_128], %287 {strides = array<i32>} : memref<1x32x128xf32, #tpu.memory_space<vmem>>, vector<1x32x128xf32>,
    } else {
    }
    %c1_i32 = arith.constant 1 : i32
    %3 = arith.cmpi eq, %arg0, %c1_i32 : i32
    %4 = arith.extui %3 : i1 to i32
    %c0_i32_1 = arith.constant 0 : i32
    %5 = arith.cmpi ne, %4, %c0_i32_1 : i32
    scf.if %5 {
      %c0 = arith.constant 0 : index
      %c0_2 = arith.constant 0 : index
      %c0_3 = arith.constant 0 : index
      %6 = vector.load %arg1[%c0, %c0_2, %c0_3] : memref<1x32x128xf32, #tpu.memory_space<vmem>>, vector<1x32x128xf32>
      %7 = vector.shape_cast %6 : vector<1x32x128xf32> to vector<32x128xf32>
      %c0_4 = arith.constant 0 : index
      %c0_5 = arith.constant 0 : index
      %c0_6 = arith.constant 0 : index
      %8 = vector.load %arg3[%c0_4, %c0_5, %c0_6] : memref<4x32x32xf32, #tpu.memory_space<vmem>>, vector<4x32x32xf32>
      %c0_7 = arith.constant 0 : index
      %c0_8 = arith.constant 0 : index
      %c0_9 = arith.constant 0 : index
      %9 = vector.load %arg18[%c0_7, %c0_8, %c0_9] : memref<2x1x128xf32, #tpu.memory_space<vmem>>, vector<1x1x128xf32>
      %10 = vector.shape_cast %9 : vector<1x1x128xf32> to vector<1x128xf32>
      %11 = arith.mulf %7, %7 : vector<32x128xf32>
      %cst = arith.constant dense<0.000000e+00> : vector<32xf32>
      %12 = vector.multi_reduction <add>, %11, %cst [1] : vector<32x128xf32> to vector<32xf32>
      %13 = vector.shape_cast %12 : vector<32xf32> to vector<32x1xf32>
      %cst_10 = arith.constant 1.280000e+02 : f32
      %14 = vector.broadcast %cst_10 : f32 to vector<32x1xf32>
      %15 = arith.divf %13, %14 : vector<32x1xf32>
      %cst_11 = arith.constant 9.99999997E-7 : f32
      %16 = vector.broadcast %cst_11 : f32 to vector<32x1xf32>
      %17 = arith.addf %15, %16 : vector<32x1xf32>
      %18 = math.rsqrt %17 : vector<32x1xf32>
      %19 = vector.broadcast %18 : vector<32x1xf32> to vector<32x128xf32>
      %20 = arith.mulf %7, %19 : vector<32x128xf32>
      %21 = vector.broadcast %10 : vector<1x128xf32> to vector<32x128xf32>
      %22 = arith.mulf %20, %21 : vector<32x128xf32>
      %c0_12 = arith.constant 0 : index
      %c0_13 = arith.constant 0 : index
      %c0_14 = arith.constant 0 : index
      %23 = vector.load %arg19[%c0_12, %c0_13, %c0_14] : memref<2x128x384xbf16, #tpu.memory_space<vmem>>, vector<1x128x384xbf16>
      %24 = vector.shape_cast %23 : vector<1x128x384xbf16> to vector<128x384xbf16>
      %25 = arith.truncf %22 : vector<32x128xf32> to vector<32x128xbf16>
      %cst_15 = arith.constant dense<0.000000e+00> : vector<32x384xf32>
      %26 = tpu.matmul %25, %24, %cst_15 {dimension_numbers = #tpu.dot_dimension_numbers<[1], [0], [0], [1], [0, 0, 1, 1], [], []>} : vector<32x128xbf16>, vector<128x384xbf16>, vector<32x384xf32> -> vector<32x384xf32>
      %c0_16 = arith.constant 0 : index
      %c0_17 = arith.constant 0 : index
      %c0_18 = arith.constant 0 : index
      %27 = vector.load %arg20[%c0_16, %c0_17, %c0_18] : memref<2x128x128xbf16, #tpu.memory_space<vmem>>, vector<1x128x128xbf16>
      %28 = vector.shape_cast %27 : vector<1x128x128xbf16> to vector<128x128xbf16>
      %29 = vector.shape_cast %26 : vector<32x384xf32> to vector<32x12x32xf32>
      %30 = tpu.transpose %29, [1, 0, 2] : vector<32x12x32xf32> -> vector<12x32x32xf32>
      %31 = arith.truncf %30 : vector<12x32x32xf32> to vector<12x32x32xbf16>
      %32 = vector.extract_strided_slice %31 {offsets = [0, 0, 0], sizes = [4, 32, 32], strides = [1, 1, 1]} : vector<12x32x32xbf16> to vector<4x32x32xbf16>
      %33 = vector.extract_strided_slice %31 {offsets = [4, 0, 0], sizes = [4, 32, 32], strides = [1, 1, 1]} : vector<12x32x32xbf16> to vector<4x32x32xbf16>
      %34 = vector.extract_strided_slice %31 {offsets = [8, 0, 0], sizes = [4, 32, 32], strides = [1, 1, 1]} : vector<12x32x32xbf16> to vector<4x32x32xbf16>
      "tpu.trace_start"() <{level = 10 : i32, message = "hqd,hkd->hqk"}> : () -> ()
      %cst_19 = arith.constant dense<0.000000e+00> : vector<4x32x32xf32>
      %35 = tpu.matmul %32, %33, %cst_19 {dimension_numbers = #tpu.dot_dimension_numbers<[2], [2], [1], [1], [0, 0, 0, 1, 1, 1], [0], [0]>} : vector<4x32x32xbf16>, vector<4x32x32xbf16>, vector<4x32x32xf32> -> vector<4x32x32xf32>
      "tpu.trace_stop"() : () -> ()
      %36 = arith.addf %35, %8 : vector<4x32x32xf32>
      %cst_20 = arith.constant dense<0xFF800000> : vector<4x32xf32>
      %37 = vector.multi_reduction <maximumf>, %36, %cst_20 [2] : vector<4x32x32xf32> to vector<4x32xf32>
      %38 = vector.shape_cast %37 : vector<4x32xf32> to vector<4x32x1xf32>
      %39 = vector.broadcast %38 : vector<4x32x1xf32> to vector<4x32x32xf32>
      %40 = arith.subf %36, %39 : vector<4x32x32xf32>
      %41 = math.exp %40 : vector<4x32x32xf32>
      %cst_21 = arith.constant dense<0.000000e+00> : vector<4x32xf32>
      %42 = vector.multi_reduction <add>, %41, %cst_21 [2] : vector<4x32x32xf32> to vector<4x32xf32>
      %43 = vector.shape_cast %42 : vector<4x32xf32> to vector<4x32x1xf32>
      %44 = tpu.reciprocal %43 {approx = true} : vector<4x32x1xf32> -> vector<4x32x1xf32>
      %45 = vector.broadcast %44 : vector<4x32x1xf32> to vector<4x32x32xf32>
      %46 = arith.mulf %41, %45 : vector<4x32x32xf32>
      %47 = arith.truncf %46 : vector<4x32x32xf32> to vector<4x32x32xbf16>
      "tpu.trace_start"() <{level = 10 : i32, message = "hqk,hkd->hqd"}> : () -> ()
      %cst_22 = arith.constant dense<0.000000e+00> : vector<4x32x32xf32>
      %48 = tpu.matmul %47, %34, %cst_22 {dimension_numbers = #tpu.dot_dimension_numbers<[2], [1], [1], [2], [0, 0, 0, 1, 1, 2], [0], [0]>} : vector<4x32x32xbf16>, vector<4x32x32xbf16>, vector<4x32x32xf32> -> vector<4x32x32xf32>
      "tpu.trace_stop"() : () -> ()
      %49 = vector.shape_cast %28 : vector<128x128xbf16> to vector<4x32x128xbf16>
      %50 = arith.truncf %48 : vector<4x32x32xf32> to vector<4x32x32xbf16>
      "tpu.trace_start"() <{level = 10 : i32, message = "hqd,hdn->hqn"}> : () -> ()
      %cst_23 = arith.constant dense<0.000000e+00> : vector<4x32x128xf32>
      %51 = tpu.matmul %50, %49, %cst_23 {dimension_numbers = #tpu.dot_dimension_numbers<[2], [1], [1], [2], [0, 0, 0, 1, 1, 2], [0], [0]>} : vector<4x32x32xbf16>, vector<4x32x128xbf16>, vector<4x32x128xf32> -> vector<4x32x128xf32>
      "tpu.trace_stop"() : () -> ()
      %52 = vector.extract_strided_slice %51 {offsets = [0, 0, 0], sizes = [1, 32, 128], strides = [1, 1, 1]} : vector<4x32x128xf32> to vector<1x32x128xf32>
      %53 = vector.shape_cast %52 : vector<1x32x128xf32> to vector<32x128xf32>
      %54 = vector.extract_strided_slice %51 {offsets = [1, 0, 0], sizes = [1, 32, 128], strides = [1, 1, 1]} : vector<4x32x128xf32> to vector<1x32x128xf32>
      %55 = vector.shape_cast %54 : vector<1x32x128xf32> to vector<32x128xf32>
      %56 = arith.addf %53, %55 : vector<32x128xf32>
      %57 = vector.extract_strided_slice %51 {offsets = [2, 0, 0], sizes = [1, 32, 128], strides = [1, 1, 1]} : vector<4x32x128xf32> to vector<1x32x128xf32>
      %58 = vector.shape_cast %57 : vector<1x32x128xf32> to vector<32x128xf32>
      %59 = arith.addf %56, %58 : vector<32x128xf32>
      %60 = vector.extract_strided_slice %51 {offsets = [3, 0, 0], sizes = [1, 32, 128], strides = [1, 1, 1]} : vector<4x32x128xf32> to vector<1x32x128xf32>
      %61 = vector.shape_cast %60 : vector<1x32x128xf32> to vector<32x128xf32>
      %62 = arith.addf %59, %61 : vector<32x128xf32>
      %63 = arith.addf %7, %62 : vector<32x128xf32>
      %c0_24 = arith.constant 0 : index
      %c0_25 = arith.constant 0 : index
      %c0_26 = arith.constant 0 : index
      %64 = vector.load %arg21[%c0_24, %c0_25, %c0_26] : memref<2x1x128xf32, #tpu.memory_space<vmem>>, vector<1x1x128xf32>
      %65 = vector.shape_cast %64 : vector<1x1x128xf32> to vector<1x128xf32>
      %66 = arith.mulf %63, %63 : vector<32x128xf32>
      %cst_27 = arith.constant dense<0.000000e+00> : vector<32xf32>
      %67 = vector.multi_reduction <add>, %66, %cst_27 [1] : vector<32x128xf32> to vector<32xf32>
      %68 = vector.shape_cast %67 : vector<32xf32> to vector<32x1xf32>
      %cst_28 = arith.constant 1.280000e+02 : f32
      %69 = vector.broadcast %cst_28 : f32 to vector<32x1xf32>
      %70 = arith.divf %68, %69 : vector<32x1xf32>
      %cst_29 = arith.constant 9.99999997E-7 : f32
      %71 = vector.broadcast %cst_29 : f32 to vector<32x1xf32>
      %72 = arith.addf %70, %71 : vector<32x1xf32>
      %73 = math.rsqrt %72 : vector<32x1xf32>
      %74 = vector.broadcast %73 : vector<32x1xf32> to vector<32x128xf32>
      %75 = arith.mulf %63, %74 : vector<32x128xf32>
      %76 = vector.broadcast %65 : vector<1x128xf32> to vector<32x128xf32>
      %77 = arith.mulf %75, %76 : vector<32x128xf32>
      %c0_30 = arith.constant 0 : index
      %c0_31 = arith.constant 0 : index
      %c0_32 = arith.constant 0 : index
      %78 = vector.load %arg22[%c0_30, %c0_31, %c0_32] : memref<2x128x512xbf16, #tpu.memory_space<vmem>>, vector<1x128x512xbf16>
      %79 = vector.shape_cast %78 : vector<1x128x512xbf16> to vector<128x512xbf16>
      %80 = arith.truncf %77 : vector<32x128xf32> to vector<32x128xbf16>
      %cst_33 = arith.constant dense<0.000000e+00> : vector<32x512xf32>
      %81 = tpu.matmul %80, %79, %cst_33 {dimension_numbers = #tpu.dot_dimension_numbers<[1], [0], [0], [1], [0, 0, 1, 1], [], []>} : vector<32x128xbf16>, vector<128x512xbf16>, vector<32x512xf32> -> vector<32x512xf32>
      %82 = vector.extract_strided_slice %81 {offsets = [0, 0], sizes = [32, 256], strides = [1, 1]} : vector<32x512xf32> to vector<32x256xf32>
      %83 = arith.mulf %82, %82 : vector<32x256xf32>
      %84 = arith.mulf %82, %83 : vector<32x256xf32>
      %cst_34 = arith.constant 4.471500e-02 : f32
      %85 = vector.broadcast %cst_34 : f32 to vector<32x256xf32>
      %86 = arith.mulf %85, %84 : vector<32x256xf32>
      %87 = arith.addf %82, %86 : vector<32x256xf32>
      %cst_35 = arith.constant 0.797884583 : f32
      %88 = vector.broadcast %cst_35 : f32 to vector<32x256xf32>
      %89 = arith.mulf %88, %87 : vector<32x256xf32>
      %90 = math.tanh %89 : vector<32x256xf32>
      %cst_36 = arith.constant 1.000000e+00 : f32
      %91 = vector.broadcast %cst_36 : f32 to vector<32x256xf32>
      %92 = arith.addf %91, %90 : vector<32x256xf32>
      %cst_37 = arith.constant 5.000000e-01 : f32
      %93 = vector.broadcast %cst_37 : f32 to vector<32x256xf32>
      %94 = arith.mulf %93, %92 : vector<32x256xf32>
      %95 = arith.mulf %82, %94 : vector<32x256xf32>
      %96 = vector.extract_strided_slice %81 {offsets = [0, 256], sizes = [32, 256], strides = [1, 1]} : vector<32x512xf32> to vector<32x256xf32>
      %97 = arith.mulf %95, %96 : vector<32x256xf32>
      %c0_38 = arith.constant 0 : index
      %c0_39 = arith.constant 0 : index
      %c0_40 = arith.constant 0 : index
      %98 = vector.load %arg23[%c0_38, %c0_39, %c0_40] : memref<2x256x128xbf16, #tpu.memory_space<vmem>>, vector<1x256x128xbf16>
      %99 = vector.shape_cast %98 : vector<1x256x128xbf16> to vector<256x128xbf16>
      %100 = arith.truncf %97 : vector<32x256xf32> to vector<32x256xbf16>
      %cst_41 = arith.constant dense<0.000000e+00> : vector<32x128xf32>
      %101 = tpu.matmul %100, %99, %cst_41 {dimension_numbers = #tpu.dot_dimension_numbers<[1], [0], [0], [1], [0, 0, 1, 1], [], []>} : vector<32x256xbf16>, vector<256x128xbf16>, vector<32x128xf32> -> vector<32x128xf32>
      %102 = arith.addf %63, %101 : vector<32x128xf32>
      %c1 = arith.constant 1 : index
      %c0_42 = arith.constant 0 : index
      %c0_43 = arith.constant 0 : index
      %103 = vector.load %arg18[%c1, %c0_42, %c0_43] : memref<2x1x128xf32, #tpu.memory_space<vmem>>, vector<1x1x128xf32>
      %104 = vector.shape_cast %103 : vector<1x1x128xf32> to vector<1x128xf32>
      %105 = arith.mulf %102, %102 : vector<32x128xf32>
      %cst_44 = arith.constant dense<0.000000e+00> : vector<32xf32>
      %106 = vector.multi_reduction <add>, %105, %cst_44 [1] : vector<32x128xf32> to vector<32xf32>
      %107 = vector.shape_cast %106 : vector<32xf32> to vector<32x1xf32>
      %cst_45 = arith.constant 1.280000e+02 : f32
      %108 = vector.broadcast %cst_45 : f32 to vector<32x1xf32>
      %109 = arith.divf %107, %108 : vector<32x1xf32>
      %cst_46 = arith.constant 9.99999997E-7 : f32
      %110 = vector.broadcast %cst_46 : f32 to vector<32x1xf32>
      %111 = arith.addf %109, %110 : vector<32x1xf32>
      %112 = math.rsqrt %111 : vector<32x1xf32>
      %113 = vector.broadcast %112 : vector<32x1xf32> to vector<32x128xf32>
      %114 = arith.mulf %102, %113 : vector<32x128xf32>
      %115 = vector.broadcast %104 : vector<1x128xf32> to vector<32x128xf32>
      %116 = arith.mulf %114, %115 : vector<32x128xf32>
      %c1_47 = arith.constant 1 : index
      %c0_48 = arith.constant 0 : index
      %c0_49 = arith.constant 0 : index
      %117 = vector.load %arg19[%c1_47, %c0_48, %c0_49] : memref<2x128x384xbf16, #tpu.memory_space<vmem>>, vector<1x128x384xbf16>
      %118 = vector.shape_cast %117 : vector<1x128x384xbf16> to vector<128x384xbf16>
      %119 = arith.truncf %116 : vector<32x128xf32> to vector<32x128xbf16>
      %cst_50 = arith.constant dense<0.000000e+00> : vector<32x384xf32>
      %120 = tpu.matmul %119, %118, %cst_50 {dimension_numbers = #tpu.dot_dimension_numbers<[1], [0], [0], [1], [0, 0, 1, 1], [], []>} : vector<32x128xbf16>, vector<128x384xbf16>, vector<32x384xf32> -> vector<32x384xf32>
      %c1_51 = arith.constant 1 : index
      %c0_52 = arith.constant 0 : index
      %c0_53 = arith.constant 0 : index
      %121 = vector.load %arg20[%c1_51, %c0_52, %c0_53] : memref<2x128x128xbf16, #tpu.memory_space<vmem>>, vector<1x128x128xbf16>
      %122 = vector.shape_cast %121 : vector<1x128x128xbf16> to vector<128x128xbf16>
      %123 = vector.shape_cast %120 : vector<32x384xf32> to vector<32x12x32xf32>
      %124 = tpu.transpose %123, [1, 0, 2] : vector<32x12x32xf32> -> vector<12x32x32xf32>
      %125 = arith.truncf %124 : vector<12x32x32xf32> to vector<12x32x32xbf16>
      %126 = vector.extract_strided_slice %125 {offsets = [0, 0, 0], sizes = [4, 32, 32], strides = [1, 1, 1]} : vector<12x32x32xbf16> to vector<4x32x32xbf16>
      %127 = vector.extract_strided_slice %125 {offsets = [4, 0, 0], sizes = [4, 32, 32], strides = [1, 1, 1]} : vector<12x32x32xbf16> to vector<4x32x32xbf16>
      %128 = vector.extract_strided_slice %125 {offsets = [8, 0, 0], sizes = [4, 32, 32], strides = [1, 1, 1]} : vector<12x32x32xbf16> to vector<4x32x32xbf16>
      "tpu.trace_start"() <{level = 10 : i32, message = "hqd,hkd->hqk"}> : () -> ()
      %cst_54 = arith.constant dense<0.000000e+00> : vector<4x32x32xf32>
      %129 = tpu.matmul %126, %127, %cst_54 {dimension_numbers = #tpu.dot_dimension_numbers<[2], [2], [1], [1], [0, 0, 0, 1, 1, 1], [0], [0]>} : vector<4x32x32xbf16>, vector<4x32x32xbf16>, vector<4x32x32xf32> -> vector<4x32x32xf32>
      "tpu.trace_stop"() : () -> ()
      %130 = arith.addf %129, %8 : vector<4x32x32xf32>
      %cst_55 = arith.constant dense<0xFF800000> : vector<4x32xf32>
      %131 = vector.multi_reduction <maximumf>, %130, %cst_55 [2] : vector<4x32x32xf32> to vector<4x32xf32>
      %132 = vector.shape_cast %131 : vector<4x32xf32> to vector<4x32x1xf32>
      %133 = vector.broadcast %132 : vector<4x32x1xf32> to vector<4x32x32xf32>
      %134 = arith.subf %130, %133 : vector<4x32x32xf32>
      %135 = math.exp %134 : vector<4x32x32xf32>
      %cst_56 = arith.constant dense<0.000000e+00> : vector<4x32xf32>
      %136 = vector.multi_reduction <add>, %135, %cst_56 [2] : vector<4x32x32xf32> to vector<4x32xf32>
      %137 = vector.shape_cast %136 : vector<4x32xf32> to vector<4x32x1xf32>
      %138 = tpu.reciprocal %137 {approx = true} : vector<4x32x1xf32> -> vector<4x32x1xf32>
      %139 = vector.broadcast %138 : vector<4x32x1xf32> to vector<4x32x32xf32>
      %140 = arith.mulf %135, %139 : vector<4x32x32xf32>
      %141 = arith.truncf %140 : vector<4x32x32xf32> to vector<4x32x32xbf16>
      "tpu.trace_start"() <{level = 10 : i32, message = "hqk,hkd->hqd"}> : () -> ()
      %cst_57 = arith.constant dense<0.000000e+00> : vector<4x32x32xf32>
      %142 = tpu.matmul %141, %128, %cst_57 {dimension_numbers = #tpu.dot_dimension_numbers<[2], [1], [1], [2], [0, 0, 0, 1, 1, 2], [0], [0]>} : vector<4x32x32xbf16>, vector<4x32x32xbf16>, vector<4x32x32xf32> -> vector<4x32x32xf32>
      "tpu.trace_stop"() : () -> ()
      %143 = vector.shape_cast %122 : vector<128x128xbf16> to vector<4x32x128xbf16>
      %144 = arith.truncf %142 : vector<4x32x32xf32> to vector<4x32x32xbf16>
      "tpu.trace_start"() <{level = 10 : i32, message = "hqd,hdn->hqn"}> : () -> ()
      %cst_58 = arith.constant dense<0.000000e+00> : vector<4x32x128xf32>
      %145 = tpu.matmul %144, %143, %cst_58 {dimension_numbers = #tpu.dot_dimension_numbers<[2], [1], [1], [2], [0, 0, 0, 1, 1, 2], [0], [0]>} : vector<4x32x32xbf16>, vector<4x32x128xbf16>, vector<4x32x128xf32> -> vector<4x32x128xf32>
      "tpu.trace_stop"() : () -> ()
      %146 = vector.extract_strided_slice %145 {offsets = [0, 0, 0], sizes = [1, 32, 128], strides = [1, 1, 1]} : vector<4x32x128xf32> to vector<1x32x128xf32>
      %147 = vector.shape_cast %146 : vector<1x32x128xf32> to vector<32x128xf32>
      %148 = vector.extract_strided_slice %145 {offsets = [1, 0, 0], sizes = [1, 32, 128], strides = [1, 1, 1]} : vector<4x32x128xf32> to vector<1x32x128xf32>
      %149 = vector.shape_cast %148 : vector<1x32x128xf32> to vector<32x128xf32>
      %150 = arith.addf %147, %149 : vector<32x128xf32>
      %151 = vector.extract_strided_slice %145 {offsets = [2, 0, 0], sizes = [1, 32, 128], strides = [1, 1, 1]} : vector<4x32x128xf32> to vector<1x32x128xf32>
      %152 = vector.shape_cast %151 : vector<1x32x128xf32> to vector<32x128xf32>
      %153 = arith.addf %150, %152 : vector<32x128xf32>
      %154 = vector.extract_strided_slice %145 {offsets = [3, 0, 0], sizes = [1, 32, 128], strides = [1, 1, 1]} : vector<4x32x128xf32> to vector<1x32x128xf32>
      %155 = vector.shape_cast %154 : vector<1x32x128xf32> to vector<32x128xf32>
      %156 = arith.addf %153, %155 : vector<32x128xf32>
      %157 = arith.addf %102, %156 : vector<32x128xf32>
      %c1_59 = arith.constant 1 : index
      %c0_60 = arith.constant 0 : index
      %c0_61 = arith.constant 0 : index
      %158 = vector.load %arg21[%c1_59, %c0_60, %c0_61] : memref<2x1x128xf32, #tpu.memory_space<vmem>>, vector<1x1x128xf32>
      %159 = vector.shape_cast %158 : vector<1x1x128xf32> to vector<1x128xf32>
      %160 = arith.mulf %157, %157 : vector<32x128xf32>
      %cst_62 = arith.constant dense<0.000000e+00> : vector<32xf32>
      %161 = vector.multi_reduction <add>, %160, %cst_62 [1] : vector<32x128xf32> to vector<32xf32>
      %162 = vector.shape_cast %161 : vector<32xf32> to vector<32x1xf32>
      %cst_63 = arith.constant 1.280000e+02 : f32
      %163 = vector.broadcast %cst_63 : f32 to vector<32x1xf32>
      %164 = arith.divf %162, %163 : vector<32x1xf32>
      %cst_64 = arith.constant 9.99999997E-7 : f32
      %165 = vector.broadcast %cst_64 : f32 to vector<32x1xf32>
      %166 = arith.addf %164, %165 : vector<32x1xf32>
      %167 = math.rsqrt %166 : vector<32x1xf32>
      %168 = vector.broadcast %167 : vector<32x1xf32> to vector<32x128xf32>
      %169 = arith.mulf %157, %168 : vector<32x128xf32>
      %170 = vector.broadcast %159 : vector<1x128xf32> to vector<32x128xf32>
      %171 = arith.mulf %169, %170 : vector<32x128xf32>
      %c1_65 = arith.constant 1 : index
      %c0_66 = arith.constant 0 : index
      %c0_67 = arith.constant 0 : index
      %172 = vector.load %arg22[%c1_65, %c0_66, %c0_67] : memref<2x128x512xbf16, #tpu.memory_space<vmem>>, vector<1x128x512xbf16>
      %173 = vector.shape_cast %172 : vector<1x128x512xbf16> to vector<128x512xbf16>
      %174 = arith.truncf %171 : vector<32x128xf32> to vector<32x128xbf16>
      %cst_68 = arith.constant dense<0.000000e+00> : vector<32x512xf32>
      %175 = tpu.matmul %174, %173, %cst_68 {dimension_numbers = #tpu.dot_dimension_numbers<[1], [0], [0], [1], [0, 0, 1, 1], [], []>} : vector<32x128xbf16>, vector<128x512xbf16>, vector<32x512xf32> -> vector<32x512xf32>
      %176 = vector.extract_strided_slice %175 {offsets = [0, 0], sizes = [32, 256], strides = [1, 1]} : vector<32x512xf32> to vector<32x256xf32>
      %177 = arith.mulf %176, %176 : vector<32x256xf32>
      %178 = arith.mulf %176, %177 : vector<32x256xf32>
      %cst_69 = arith.constant 4.471500e-02 : f32
      %179 = vector.broadcast %cst_69 : f32 to vector<32x256xf32>
      %180 = arith.mulf %179, %178 : vector<32x256xf32>
      %181 = arith.addf %176, %180 : vector<32x256xf32>
      %cst_70 = arith.constant 0.797884583 : f32
      %182 = vector.broadcast %cst_70 : f32 to vector<32x256xf32>
      %183 = arith.mulf %182, %181 : vector<32x256xf32>
      %184 = math.tanh %183 : vector<32x256xf32>
      %cst_71 = arith.constant 1.000000e+00 : f32
      %185 = vector.broadcast %cst_71 : f32 to vector<32x256xf32>
      %186 = arith.addf %185, %184 : vector<32x256xf32>
      %cst_72 = arith.constant 5.000000e-01 : f32
      %187 = vector.broadcast %cst_72 : f32 to vector<32x256xf32>
      %188 = arith.mulf %187, %186 : vector<32x256xf32>
      %189 = arith.mulf %176, %188 : vector<32x256xf32>
      %190 = vector.extract_strided_slice %175 {offsets = [0, 256], sizes = [32, 256], strides = [1, 1]} : vector<32x512xf32> to vector<32x256xf32>
      %191 = arith.mulf %189, %190 : vector<32x256xf32>
      %c1_73 = arith.constant 1 : index
      %c0_74 = arith.constant 0 : index
      %c0_75 = arith.constant 0 : index
      %192 = vector.load %arg23[%c1_73, %c0_74, %c0_75] : memref<2x256x128xbf16, #tpu.memory_space<vmem>>, vector<1x256x128xbf16>
      %193 = vector.shape_cast %192 : vector<1x256x128xbf16> to vector<256x128xbf16>
      %194 = arith.truncf %191 : vector<32x256xf32> to vector<32x256xbf16>
      %cst_76 = arith.constant dense<0.000000e+00> : vector<32x128xf32>
      %195 = tpu.matmul %194, %193, %cst_76 {dimension_numbers = #tpu.dot_dimension_numbers<[1], [0], [0], [1], [0, 0, 1, 1], [], []>} : vector<32x256xbf16>, vector<256x128xbf16>, vector<32x128xf32> -> vector<32x128xf32>
      %196 = arith.addf %157, %195 : vector<32x128xf32>
      %c0_77 = arith.constant 0 : index
      %c0_78 = arith.constant 0 : index
      %197 = vector.load %arg24[%c0_77, %c0_78] : memref<1x128xf32, #tpu.memory_space<vmem>>, vector<1x128xf32>
      %198 = arith.mulf %196, %196 : vector<32x128xf32>
      %cst_79 = arith.constant dense<0.000000e+00> : vector<32xf32>
      %199 = vector.multi_reduction <add>, %198, %cst_79 [1] : vector<32x128xf32> to vector<32xf32>
      %200 = vector.shape_cast %199 : vector<32xf32> to vector<32x1xf32>
      %cst_80 = arith.constant 1.280000e+02 : f32
      %201 = vector.broadcast %cst_80 : f32 to vector<32x1xf32>
      %202 = arith.divf %200, %201 : vector<32x1xf32>
      %cst_81 = arith.constant 9.99999997E-7 : f32
      %203 = vector.broadcast %cst_81 : f32 to vector<32x1xf32>
      %204 = arith.addf %202, %203 : vector<32x1xf32>
      %205 = math.rsqrt %204 : vector<32x1xf32>
      %206 = vector.broadcast %205 : vector<32x1xf32> to vector<32x128xf32>
      %207 = arith.mulf %196, %206 : vector<32x128xf32>
      %208 = vector.broadcast %197 : vector<1x128xf32> to vector<32x128xf32>
      %209 = arith.mulf %207, %208 : vector<32x128xf32>
      %c0_82 = arith.constant 0 : index
      %c0_83 = arith.constant 0 : index
      %c0_84 = arith.constant 0 : index
      %210 = vector.load %arg25[%c0_82, %c0_83, %c0_84] : memref<1x32x128xf32, #tpu.memory_space<vmem>>, vector<1x32x128xf32>
      %211 = vector.shape_cast %210 : vector<1x32x128xf32> to vector<32x128xf32>
      %212 = vector.shape_cast %209 : vector<32x128xf32> to vector<1x32x128xf32>
      tpu.vector_store %arg25[%c0_82, %c0_83, %c0_84], %212 {strides = array<i32>} : memref<1x32x128xf32, #tpu.memory_space<vmem>>, vector<1x32x128xf32>,
    } else {
    }
    return
  }
  func.func @transform_0(%arg0: i32) -> (i32, i32, i32) {
    %c0_i32 = arith.constant 0 : i32
    %c0_i32_0 = arith.constant 0 : i32
    %c0_i32_1 = arith.constant 0 : i32
    return %arg0, %c0_i32, %c0_i32_0 : i32, i32, i32
  }
  func.func @transform_1(%arg0: i32) -> (i32, i32, i32) {
    %c0_i32 = arith.constant 0 : i32
    %c0_i32_0 = arith.constant 0 : i32
    %c0_i32_1 = arith.constant 0 : i32
    %c0_i32_2 = arith.constant 0 : i32
    return %c0_i32, %c0_i32_0, %c0_i32_1 : i32, i32, i32
  }
  func.func @transform_2(%arg0: i32) -> (i32, i32, i32) {
    %c0_i32 = arith.constant 0 : i32
    %c0_i32_0 = arith.constant 0 : i32
    %c0_i32_1 = arith.constant 0 : i32
    %c0_i32_2 = arith.constant 0 : i32
    return %c0_i32, %c0_i32_0, %c0_i32_1 : i32, i32, i32
  }
  func.func @transform_3(%arg0: i32) -> (i32, i32, i32) {
    %c0_i32 = arith.constant 0 : i32
    %c0_i32_0 = arith.constant 0 : i32
    %c0_i32_1 = arith.constant 0 : i32
    %c0_i32_2 = arith.constant 0 : i32
    return %c0_i32, %c0_i32_0, %c0_i32_1 : i32, i32, i32
  }
  func.func @transform_4(%arg0: i32) -> (i32, i32, i32) {
    %c0_i32 = arith.constant 0 : i32
    %c0_i32_0 = arith.constant 0 : i32
    %c0_i32_1 = arith.constant 0 : i32
    %c0_i32_2 = arith.constant 0 : i32
    return %c0_i32, %c0_i32_0, %c0_i32_1 : i32, i32, i32
  }
  func.func @transform_5(%arg0: i32) -> (i32, i32, i32) {
    %c0_i32 = arith.constant 0 : i32
    %c0_i32_0 = arith.constant 0 : i32
    %c0_i32_1 = arith.constant 0 : i32
    %c0_i32_2 = arith.constant 0 : i32
    return %c0_i32, %c0_i32_0, %c0_i32_1 : i32, i32, i32
  }
  func.func @transform_6(%arg0: i32) -> (i32, i32, i32) {
    %c0_i32 = arith.constant 0 : i32
    %c0_i32_0 = arith.constant 0 : i32
    %c0_i32_1 = arith.constant 0 : i32
    %c0_i32_2 = arith.constant 0 : i32
    return %c0_i32, %c0_i32_0, %c0_i32_1 : i32, i32, i32
  }
  func.func @transform_7(%arg0: i32) -> (i32, i32, i32) {
    %c0_i32 = arith.constant 0 : i32
    %c0_i32_0 = arith.constant 0 : i32
    %c0_i32_1 = arith.constant 0 : i32
    %c0_i32_2 = arith.constant 0 : i32
    return %c0_i32, %c0_i32_0, %c0_i32_1 : i32, i32, i32
  }
  func.func @transform_8(%arg0: i32) -> (i32, i32, i32) {
    %c0_i32 = arith.constant 0 : i32
    %c0_i32_0 = arith.constant 0 : i32
    %c0_i32_1 = arith.constant 0 : i32
    %c0_i32_2 = arith.constant 0 : i32
    return %c0_i32, %c0_i32_0, %c0_i32_1 : i32, i32, i32
  }
  func.func @transform_9(%arg0: i32) -> (i32, i32, i32) {
    %c0_i32 = arith.constant 0 : i32
    %c0_i32_0 = arith.constant 0 : i32
    %c0_i32_1 = arith.constant 0 : i32
    %c0_i32_2 = arith.constant 0 : i32
    return %c0_i32, %c0_i32_0, %c0_i32_1 : i32, i32, i32
  }
  func.func @transform_10(%arg0: i32) -> (i32, i32, i32) {
    %c0_i32 = arith.constant 0 : i32
    %c0_i32_0 = arith.constant 0 : i32
    %c0_i32_1 = arith.constant 0 : i32
    %c0_i32_2 = arith.constant 0 : i32
    return %c0_i32, %c0_i32_0, %c0_i32_1 : i32, i32, i32
  }
  func.func @transform_11(%arg0: i32) -> (i32, i32, i32) {
    %c0_i32 = arith.constant 0 : i32
    %c0_i32_0 = arith.constant 0 : i32
    %c0_i32_1 = arith.constant 0 : i32
    %c0_i32_2 = arith.constant 0 : i32
    return %c0_i32, %c0_i32_0, %c0_i32_1 : i32, i32, i32
  }
  func.func @transform_12(%arg0: i32) -> (i32, i32, i32) {
    %c0_i32 = arith.constant 0 : i32
    %c0_i32_0 = arith.constant 0 : i32
    %c0_i32_1 = arith.constant 0 : i32
    %c0_i32_2 = arith.constant 0 : i32
    return %c0_i32, %c0_i32_0, %c0_i32_1 : i32, i32, i32
  }
  func.func @transform_13(%arg0: i32) -> (i32, i32, i32) {
    %c0_i32 = arith.constant 0 : i32
    %c0_i32_0 = arith.constant 0 : i32
    %c0_i32_1 = arith.constant 0 : i32
    %c0_i32_2 = arith.constant 0 : i32
    return %c0_i32, %c0_i32_0, %c0_i32_1 : i32, i32, i32
  }
  func.func @transform_14(%arg0: i32) -> (i32, i32, i32) {
    %c0_i32 = arith.constant 0 : i32
    %c0_i32_0 = arith.constant 0 : i32
    %c0_i32_1 = arith.constant 0 : i32
    %c0_i32_2 = arith.constant 0 : i32
    return %c0_i32, %c0_i32_0, %c0_i32_1 : i32, i32, i32
  }
  func.func @transform_15(%arg0: i32) -> (i32, i32) {
    %c0_i32 = arith.constant 0 : i32
    %c0_i32_0 = arith.constant 0 : i32
    %c0_i32_1 = arith.constant 0 : i32
    return %c0_i32, %c0_i32_0 : i32, i32
  }
  func.func @transform_16(%arg0: i32) -> (i32, i32) {
    %c0_i32 = arith.constant 0 : i32
    %c0_i32_0 = arith.constant 0 : i32
    %c0_i32_1 = arith.constant 0 : i32
    return %c0_i32, %c0_i32_0 : i32, i32
  }
  func.func @transform_17(%arg0: i32) -> (i32, i32, i32) {
    %c0_i32 = arith.constant 0 : i32
    %c0_i32_0 = arith.constant 0 : i32
    %c0_i32_1 = arith.constant 0 : i32
    %c0_i32_2 = arith.constant 0 : i32
    return %c0_i32, %c0_i32_0, %c0_i32_1 : i32, i32, i32
  }
  func.func @transform_18(%arg0: i32) -> (i32, i32, i32) {
    %c0_i32 = arith.constant 0 : i32
    %c0_i32_0 = arith.constant 0 : i32
    %c0_i32_1 = arith.constant 0 : i32
    %c0_i32_2 = arith.constant 0 : i32
    return %c0_i32, %c0_i32_0, %c0_i32_1 : i32, i32, i32
  }
  func.func @transform_19(%arg0: i32) -> (i32, i32, i32) {
    %c0_i32 = arith.constant 0 : i32
    %c0_i32_0 = arith.constant 0 : i32
    %c0_i32_1 = arith.constant 0 : i32
    %c0_i32_2 = arith.constant 0 : i32
    return %c0_i32, %c0_i32_0, %c0_i32_1 : i32, i32, i32
  }
  func.func @transform_20(%arg0: i32) -> (i32, i32, i32) {
    %c0_i32 = arith.constant 0 : i32
    %c0_i32_0 = arith.constant 0 : i32
    %c0_i32_1 = arith.constant 0 : i32
    %c0_i32_2 = arith.constant 0 : i32
    return %c0_i32, %c0_i32_0, %c0_i32_1 : i32, i32, i32
  }
  func.func @transform_21(%arg0: i32) -> (i32, i32, i32) {
    %c0_i32 = arith.constant 0 : i32
    %c0_i32_0 = arith.constant 0 : i32
    %c0_i32_1 = arith.constant 0 : i32
    %c0_i32_2 = arith.constant 0 : i32
    return %c0_i32, %c0_i32_0, %c0_i32_1 : i32, i32, i32
  }
  func.func @transform_22(%arg0: i32) -> (i32, i32, i32) {
    %c0_i32 = arith.constant 0 : i32
    %c0_i32_0 = arith.constant 0 : i32
    %c0_i32_1 = arith.constant 0 : i32
    %c0_i32_2 = arith.constant 0 : i32
    return %c0_i32, %c0_i32_0, %c0_i32_1 : i32, i32, i32
  }
  func.func @transform_23(%arg0: i32) -> (i32, i32) {
    %c0_i32 = arith.constant 0 : i32
    %c0_i32_0 = arith.constant 0 : i32
    %c0_i32_1 = arith.constant 0 : i32
    return %c0_i32, %c0_i32_0 : i32, i32
  }
  func.func @transform_24(%arg0: i32) -> (i32, i32, i32) {
    %c0_i32 = arith.constant 0 : i32
    %c0_i32_0 = arith.constant 0 : i32
    %c0_i32_1 = arith.constant 0 : i32
    return %arg0, %c0_i32, %c0_i32_0 : i32, i32, i32
  }
}

</mosaic_0001>

<bundles_post_ra>
// kernel: tile.9
= control target key start
LH: loop header
LB: loop body
LE: loop exit
PB: predicated region body
PF: predicated region fallthrough
CT: control target
= control target key end

     0   :  { %vm642_vm0 = vcmask 1047556   ;;  %s1240_s10 = smov 16   ;;  %vm644_vm1 = vcmask 130048   ;;  %vm789_vm2 = vcmask 261248   ;;  %s1811_s0 = inlined_call_operand.vmem [shape: f32[4,2,16,2,16], index: 0, kind: input, shape index: {}]   ;;  %s1812_s1 = inlined_call_operand.vmem [shape: f32[4,32,32], index: 1, kind: output, shape index: {}]  }
   0x1   :  { %v1202_v0 = vld [vmem:[%s1811_s0 + $0xe] sm:$0x3]  ;;  %v1203_v1 = vld [vmem:[%s1811_s0 + $0xc] sm:$0x3]  ;;  %v1204_v2 = vld [vmem:[%s1811_s0 + $0xa] sm:$0x3] }
   0x2   :  { %608 = vst [vmem:[#allocation0 + $0x38] sm:$0x3] %v1202_v0  ;;  %613 = vst [vmem:[#allocation0 + $0x30] sm:$0x3] %v1203_v1  ;;  %v1205_v3 = vld [vmem:[%s1811_s0 + $0x8] sm:$0x3] }
   0x3   :  { %618 = vst [vmem:[#allocation0 + $0x28] sm:$0x3] %v1204_v2  ;;  %v1206_v4 = vld [vmem:[%s1811_s0 + $0x6] sm:$0x3]  ;;  %v1207_v5 = vld [vmem:[%s1811_s0 + $0x4] sm:$0x3] }
   0x4   :  { %623 = vst [vmem:[#allocation0 + $0x20] sm:$0x3] %v1205_v3  ;;  %628 = vst [vmem:[#allocation0 + $0x18] sm:$0x3] %v1206_v4  ;;  %v1208_v6 = vld [vmem:[%s1811_s0 + $0x2] sm:$0x3] }
   0x5   :  { %633 = vst [vmem:[#allocation0 + $0x10] sm:$0x3] %v1207_v5  ;;  %v638_v7 = vld [vmem:[%s1811_s0] sm:$0x3]  ;;  %637 = vst [vmem:[#allocation0 + $0x8] sm:$0x3] %v1208_v6 }
   0x6   :  { %639 = vst [vmem:[#allocation0] sm:$0x3] %v638_v7  ;;  %v1138_v8 = vld [vmem:[%s1811_s0 + $0x8e] sm:$0x3]  ;;  %v1139_v9 = vld [vmem:[%s1811_s0 + $0x8c] sm:$0x3] }
   0x7   :  { %v1140_v10 = vld [vmem:[%s1811_s0 + $0x8a] sm:$0x3]  ;;  %288 = vst [vmem:[#allocation0 + $0x238] sm:$0x3] %v1138_v8  ;;  %293 = vst [vmem:[#allocation0 + $0x230] sm:$0x3] %v1139_v9 }
   0x8   :  { %298 = vst [vmem:[#allocation0 + $0x228] sm:$0x3] %v1140_v10  ;;  %v1141_v11 = vld [vmem:[%s1811_s0 + $0x88] sm:$0x3]  ;;  %v1142_v12 = vld [vmem:[%s1811_s0 + $0x86] sm:$0x3] }
   0x9   :  { %v1143_v13 = vld [vmem:[%s1811_s0 + $0x84] sm:$0x3]  ;;  %303 = vst [vmem:[#allocation0 + $0x220] sm:$0x3] %v1141_v11  ;;  %308 = vst [vmem:[#allocation0 + $0x218] sm:$0x3] %v1142_v12 }
   0xa   :  { %313 = vst [vmem:[#allocation0 + $0x210] sm:$0x3] %v1143_v13  ;;  %v1144_v14 = vld [vmem:[%s1811_s0 + $0x82] sm:$0x3]  ;;  %v1145_v15 = vld [vmem:[%s1811_s0 + $0x80] sm:$0x3] }
   0xb   :  { %v1170_v16 = vld [vmem:[%s1811_s0 + $0x4e] sm:$0x3]  ;;  %318 = vst [vmem:[#allocation0 + $0x208] sm:$0x3] %v1144_v14  ;;  %323 = vst [vmem:[#allocation0 + $0x200] sm:$0x3] %v1145_v15 }
   0xc   :  { %448 = vst [vmem:[#allocation0 + $0x138] sm:$0x3] %v1170_v16  ;;  %v1171_v17 = vld [vmem:[%s1811_s0 + $0x4c] sm:$0x3]  ;;  %v1172_v18 = vld [vmem:[%s1811_s0 + $0x4a] sm:$0x3] }
   0xd   :  { %v1173_v19 = vld [vmem:[%s1811_s0 + $0x48] sm:$0x3]  ;;  %453 = vst [vmem:[#allocation0 + $0x130] sm:$0x3] %v1171_v17  ;;  %458 = vst [vmem:[#allocation0 + $0x128] sm:$0x3] %v1172_v18 }
   0xe   :  { %463 = vst [vmem:[#allocation0 + $0x120] sm:$0x3] %v1173_v19  ;;  %v1174_v20 = vld [vmem:[%s1811_s0 + $0x46] sm:$0x3]  ;;  %v1175_v21 = vld [vmem:[%s1811_s0 + $0x44] sm:$0x3] }
   0xf   :  { %v1176_v22 = vld [vmem:[%s1811_s0 + $0x42] sm:$0x3]  ;;  %468 = vst [vmem:[#allocation0 + $0x118] sm:$0x3] %v1174_v20  ;;  %473 = vst [vmem:[#allocation0 + $0x110] sm:$0x3] %v1175_v21 }
  0x10   :  { %478 = vst [vmem:[#allocation0 + $0x108] sm:$0x3] %v1176_v22  ;;  %v1177_v23 = vld [vmem:[%s1811_s0 + $0x40] sm:$0x3]  ;;  %v1106_v24 = vld [vmem:[%s1811_s0 + $0xce] sm:$0x3] }
  0x11   :  { %v1107_v25 = vld [vmem:[%s1811_s0 + $0xcc] sm:$0x3]  ;;  %v784_v26 = vld [vmem:[#allocation0 + $0x1] ss:$8 sm:$0xf0]  }
  0x12   :  { %483 = vst [vmem:[#allocation0 + $0x100] sm:$0x3] %v1177_v23  ;;  %128 = vst [vmem:[#allocation0 + $0x338] sm:$0x3] %v1106_v24  ;;  %v1108_v27 = vld [vmem:[%s1811_s0 + $0xca] sm:$0x3] }
  0x13   :  { %133 = vst [vmem:[#allocation0 + $0x330] sm:$0x3] %v1107_v25  ;;  %v782_v28 = vld [vmem:[#allocation0 + $0x1] ss:$8 sm:$0xf]  }
  0x14   :  { %138 = vst [vmem:[#allocation0 + $0x328] sm:$0x3] %v1108_v27  ;;  %v1109_v29 = vld [vmem:[%s1811_s0 + $0xc8] sm:$0x3]  ;;  %v786_v30 = vsel %vm642_vm0, %v784_v26, %v782_v28  ;;  %v1110_v31 = vld [vmem:[%s1811_s0 + $0xc6] sm:$0x3] }
  0x15   :  { %143 = vst [vmem:[#allocation0 + $0x320] sm:$0x3] %v1109_v29  ;;  %v1111_v32 = vld [vmem:[%s1811_s0 + $0xc4] sm:$0x3]  ;;  %v1112_v33 = vld [vmem:[%s1811_s0 + $0xc2] sm:$0x3]  ;;  %787 = vrot.lane.b32.xlu0 %v786_v30, %s1240_s10 }
  0x16   :  { %v805_v34 = vld [vmem:[#allocation0 + $0x201] ss:$8 sm:$0xf0]   ;;  %148 = vst [vmem:[#allocation0 + $0x318] sm:$0x3] %v1110_v31 }
  0x17   :  { %153 = vst [vmem:[#allocation0 + $0x310] sm:$0x3] %v1111_v32  ;;  %158 = vst [vmem:[#allocation0 + $0x308] sm:$0x3] %v1112_v33  ;;  %v1113_v35 = vld [vmem:[%s1811_s0 + $0xc0] sm:$0x3] }
  0x18   :  { %v803_v36 = vld [vmem:[#allocation0 + $0x201] ss:$8 sm:$0xf]   ;;  %163 = vst [vmem:[#allocation0 + $0x300] sm:$0x3] %v1113_v35 }
  0x19   :  { %v1194_v37 = vld [vmem:[%s1811_s0 + $0x1e] sm:$0x3]  ;;  %v807_v38 = vsel %vm642_vm0, %v805_v34, %v803_v36  ;;  %v794_v39 = vld [vmem:[#allocation0 + $0x101] ss:$8 sm:$0xf0]  }
  0x1a   :  { %568 = vst [vmem:[#allocation0 + $0x78] sm:$0x3] %v1194_v37  ;;  %v1195_v40 = vld [vmem:[%s1811_s0 + $0x1c] sm:$0x3]  ;;  %808 = vrot.lane.b32.xlu1 %v807_v38, %s1240_s10  ;;  %v1196_v41 = vld [vmem:[%s1811_s0 + $0x1a] sm:$0x3] }
  0x1b   :  { %573 = vst [vmem:[#allocation0 + $0x70] sm:$0x3] %v1195_v40  ;;  %v1197_v42 = vld [vmem:[%s1811_s0 + $0x18] sm:$0x3]  ;;  %v1198_v43 = vld [vmem:[%s1811_s0 + $0x16] sm:$0x3] }
  0x1c   :  { %v792_v44 = vld [vmem:[#allocation0 + $0x101] ss:$8 sm:$0xf]   ;;  %578 = vst [vmem:[#allocation0 + $0x68] sm:$0x3] %v1196_v41 }
  0x1d   :  { %583 = vst [vmem:[#allocation0 + $0x60] sm:$0x3] %v1197_v42  ;;  %588 = vst [vmem:[#allocation0 + $0x58] sm:$0x3] %v1198_v43  ;;  %v1199_v45 = vld [vmem:[%s1811_s0 + $0x14] sm:$0x3]  ;;  %v796_v46 = vsel %vm642_vm0, %v794_v39, %v792_v44 }
  0x1e   :  { %593 = vst [vmem:[#allocation0 + $0x50] sm:$0x3] %v1199_v45  ;;  %v1200_v47 = vld [vmem:[%s1811_s0 + $0x12] sm:$0x3]  ;;  %v1201_v48 = vld [vmem:[%s1811_s0 + $0x10] sm:$0x3]  ;;  %797 = vrot.lane.b32.xlu0 %v796_v46, %s1240_s10 }
  0x1f   :  { %v1162_v49 = vld [vmem:[%s1811_s0 + $0x5e] sm:$0x3]  ;;  %v816_v50 = vld [vmem:[#allocation0 + $0x301] ss:$8 sm:$0xf0]  }
  0x20   :  { %598 = vst [vmem:[#allocation0 + $0x48] sm:$0x3] %v1200_v47  ;;  %603 = vst [vmem:[#allocation0 + $0x40] sm:$0x3] %v1201_v48  ;;  %v1163_v51 = vld [vmem:[%s1811_s0 + $0x5c] sm:$0x3] }
  0x21   :  { %408 = vst [vmem:[#allocation0 + $0x178] sm:$0x3] %v1162_v49  ;;  %413 = vst [vmem:[#allocation0 + $0x170] sm:$0x3] %v1163_v51  ;;  %v1164_v52 = vld [vmem:[%s1811_s0 + $0x5a] sm:$0x3] }
  0x22   :  { %v1165_v53 = vld [vmem:[%s1811_s0 + $0x58] sm:$0x3]  ;;  %v1166_v54 = vld [vmem:[%s1811_s0 + $0x56] sm:$0x3]  ;;  %418 = vst [vmem:[#allocation0 + $0x168] sm:$0x3] %v1164_v52 }
  0x23   :  { %v814_v55 = vld [vmem:[#allocation0 + $0x301] ss:$8 sm:$0xf]   ;;  %423 = vst [vmem:[#allocation0 + $0x160] sm:$0x3] %v1165_v53 }
  0x24   :  { %428 = vst [vmem:[#allocation0 + $0x158] sm:$0x3] %v1166_v54  ;;  %v1167_v56 = vld [vmem:[%s1811_s0 + $0x54] sm:$0x3]  ;;  %v818_v57 = vsel %vm642_vm0, %v816_v50, %v814_v55  ;;  %v1168_v58 = vld [vmem:[%s1811_s0 + $0x52] sm:$0x3] }
  0x25   :  { %433 = vst [vmem:[#allocation0 + $0x150] sm:$0x3] %v1167_v56  ;;  %v1169_v59 = vld [vmem:[%s1811_s0 + $0x50] sm:$0x3]  ;;  %v1130_v60 = vld [vmem:[%s1811_s0 + $0x9e] sm:$0x3]  ;;  %819 = vrot.lane.b32.xlu1 %v818_v57, %s1240_s10 }
  0x26   :  { %438 = vst [vmem:[#allocation0 + $0x148] sm:$0x3] %v1168_v58  ;;  %443 = vst [vmem:[#allocation0 + $0x140] sm:$0x3] %v1169_v59  ;;  %v1131_v61 = vld [vmem:[%s1811_s0 + $0x9c] sm:$0x3] }
  0x27   :  { %248 = vst [vmem:[#allocation0 + $0x278] sm:$0x3] %v1130_v60  ;;  %v1132_v62 = vld [vmem:[%s1811_s0 + $0x9a] sm:$0x3]  ;;  %v1133_v63 = vld [vmem:[%s1811_s0 + $0x98] sm:$0x3] }
  0x28   :  { %v827_v0 = vld [vmem:[#allocation0 + $0x41] ss:$8 sm:$0xf0]   ;;  %253 = vst [vmem:[#allocation0 + $0x270] sm:$0x3] %v1131_v61 }
  0x29   :  { %258 = vst [vmem:[#allocation0 + $0x268] sm:$0x3] %v1132_v62  ;;  %263 = vst [vmem:[#allocation0 + $0x260] sm:$0x3] %v1133_v63  ;;  %v1134_v1 = vld [vmem:[%s1811_s0 + $0x96] sm:$0x3] }
  0x2a   :  { %268 = vst [vmem:[#allocation0 + $0x258] sm:$0x3] %v1134_v1  ;;  %v1135_v2 = vld [vmem:[%s1811_s0 + $0x94] sm:$0x3]  ;;  %v1136_v3 = vld [vmem:[%s1811_s0 + $0x92] sm:$0x3] }
  0x2b   :  { %v1137_v4 = vld [vmem:[%s1811_s0 + $0x90] sm:$0x3]  ;;  %273 = vst [vmem:[#allocation0 + $0x250] sm:$0x3] %v1135_v2  ;;  %278 = vst [vmem:[#allocation0 + $0x248] sm:$0x3] %v1136_v3 }
  0x2c   :  { %v825_v5 = vld [vmem:[#allocation0 + $0x41] ss:$8 sm:$0xf]   ;;  %283 = vst [vmem:[#allocation0 + $0x240] sm:$0x3] %v1137_v4 }
  0x2d   :  { %v1098_v6 = vld [vmem:[%s1811_s0 + $0xde] sm:$0x3]  ;;  %v829_v7 = vsel %vm642_vm0, %v827_v0, %v825_v5  ;;  %v1099_v8 = vld [vmem:[%s1811_s0 + $0xdc] sm:$0x3]  ;;  %v1100_v9 = vld [vmem:[%s1811_s0 + $0xda] sm:$0x3] }
  0x2e   :  { %88 = vst [vmem:[#allocation0 + $0x378] sm:$0x3] %v1098_v6  ;;  %v1101_v10 = vld [vmem:[%s1811_s0 + $0xd8] sm:$0x3]  ;;  %830 = vrot.lane.b32.xlu0 %v829_v7, %s1240_s10  ;;  %93 = vst [vmem:[#allocation0 + $0x370] sm:$0x3] %v1099_v8 }
  0x2f   :  { %v838_v11 = vld [vmem:[#allocation0 + $0x141] ss:$8 sm:$0xf0]   ;;  %98 = vst [vmem:[#allocation0 + $0x368] sm:$0x3] %v1100_v9 }
  0x30   :  { %103 = vst [vmem:[#allocation0 + $0x360] sm:$0x3] %v1101_v10  ;;  %v1102_v12 = vld [vmem:[%s1811_s0 + $0xd6] sm:$0x3]  ;;  %v1103_v13 = vld [vmem:[%s1811_s0 + $0xd4] sm:$0x3] }
  0x31   :  { %108 = vst [vmem:[#allocation0 + $0x358] sm:$0x3] %v1102_v12  ;;  %v1104_v14 = vld [vmem:[%s1811_s0 + $0xd2] sm:$0x3]  ;;  %v1105_v15 = vld [vmem:[%s1811_s0 + $0xd0] sm:$0x3] }
  0x32   :  { %v836_v16 = vld [vmem:[#allocation0 + $0x141] ss:$8 sm:$0xf]   ;;  %113 = vst [vmem:[#allocation0 + $0x350] sm:$0x3] %v1103_v13 }
  0x33   :  { %118 = vst [vmem:[#allocation0 + $0x348] sm:$0x3] %v1104_v14  ;;  %123 = vst [vmem:[#allocation0 + $0x340] sm:$0x3] %v1105_v15  ;;  %v1186_v17 = vld [vmem:[%s1811_s0 + $0x2e] sm:$0x3]  ;;  %v840_v18 = vsel %vm642_vm0, %v838_v11, %v836_v16 }
  0x34   :  { %v849_v19 = vld [vmem:[#allocation0 + $0x241] ss:$8 sm:$0xf0]   ;;  %528 = vst [vmem:[#allocation0 + $0xb8] sm:$0x3] %v1186_v17  ;;  %841 = vrot.lane.b32.xlu1 %v840_v18, %s1240_s10 }
  0x35   :  { %v1187_v20 = vld [vmem:[%s1811_s0 + $0x2c] sm:$0x3]  ;;  %v1188_v21 = vld [vmem:[%s1811_s0 + $0x2a] sm:$0x3]  ;;  %v1189_v22 = vld [vmem:[%s1811_s0 + $0x28] sm:$0x3] }
  0x36   :  { %533 = vst [vmem:[#allocation0 + $0xb0] sm:$0x3] %v1187_v20  ;;  %v1190_v23 = vld [vmem:[%s1811_s0 + $0x26] sm:$0x3]  ;;  %538 = vst [vmem:[#allocation0 + $0xa8] sm:$0x3] %v1188_v21 }
  0x37   :  { %v847_v24 = vld [vmem:[#allocation0 + $0x241] ss:$8 sm:$0xf]   ;;  %543 = vst [vmem:[#allocation0 + $0xa0] sm:$0x3] %v1189_v22 }
  0x38   :  { %548 = vst [vmem:[#allocation0 + $0x98] sm:$0x3] %v1190_v23  ;;  %v1191_v25 = vld [vmem:[%s1811_s0 + $0x24] sm:$0x3]  ;;  %v851_v26 = vsel %vm642_vm0, %v849_v19, %v847_v24  ;;  %v1192_v27 = vld [vmem:[%s1811_s0 + $0x22] sm:$0x3] }
  0x39   :  { %553 = vst [vmem:[#allocation0 + $0x90] sm:$0x3] %v1191_v25  ;;  %v1193_v28 = vld [vmem:[%s1811_s0 + $0x20] sm:$0x3]  ;;  %v1154_v29 = vld [vmem:[%s1811_s0 + $0x6e] sm:$0x3]  ;;  %852 = vrot.lane.b32.xlu0 %v851_v26, %s1240_s10 }
  0x3a   :  { %v860_v30 = vld [vmem:[#allocation0 + $0x341] ss:$8 sm:$0xf0]   ;;  %558 = vst [vmem:[#allocation0 + $0x88] sm:$0x3] %v1192_v27 }
  0x3b   :  { %563 = vst [vmem:[#allocation0 + $0x80] sm:$0x3] %v1193_v28  ;;  %368 = vst [vmem:[#allocation0 + $0x1b8] sm:$0x3] %v1154_v29  ;;  %v1155_v31 = vld [vmem:[%s1811_s0 + $0x6c] sm:$0x3] }
  0x3c   :  { %373 = vst [vmem:[#allocation0 + $0x1b0] sm:$0x3] %v1155_v31  ;;  %v1156_v32 = vld [vmem:[%s1811_s0 + $0x6a] sm:$0x3]  ;;  %v1157_v33 = vld [vmem:[%s1811_s0 + $0x68] sm:$0x3] }
  0x3d   :  { %v1158_v34 = vld [vmem:[%s1811_s0 + $0x66] sm:$0x3]  ;;  %v858_v35 = vld [vmem:[#allocation0 + $0x341] ss:$8 sm:$0xf]  }
  0x3e   :  { %378 = vst [vmem:[#allocation0 + $0x1a8] sm:$0x3] %v1156_v32  ;;  %383 = vst [vmem:[#allocation0 + $0x1a0] sm:$0x3] %v1157_v33  ;;  %v1159_v36 = vld [vmem:[%s1811_s0 + $0x64] sm:$0x3]  ;;  %v862_v37 = vsel %vm642_vm0, %v860_v30, %v858_v35 }
  0x3f   :  { %388 = vst [vmem:[#allocation0 + $0x198] sm:$0x3] %v1158_v34  ;;  %393 = vst [vmem:[#allocation0 + $0x190] sm:$0x3] %v1159_v36  ;;  %v1160_v38 = vld [vmem:[%s1811_s0 + $0x62] sm:$0x3]  ;;  %863 = vrot.lane.b32.xlu1 %v862_v37, %s1240_s10 }
  0x40   :  { %v1161_v39 = vld [vmem:[%s1811_s0 + $0x60] sm:$0x3]  ;;  %v1122_v40 = vld [vmem:[%s1811_s0 + $0xae] sm:$0x3]  ;;  %398 = vst [vmem:[#allocation0 + $0x188] sm:$0x3] %v1160_v38 }
  0x41   :  { %403 = vst [vmem:[#allocation0 + $0x180] sm:$0x3] %v1161_v39  ;;  %208 = vst [vmem:[#allocation0 + $0x2b8] sm:$0x3] %v1122_v40  ;;  %v1123_v41 = vld [vmem:[%s1811_s0 + $0xac] sm:$0x3] }
  0x42   :  { %v1124_v42 = vld [vmem:[%s1811_s0 + $0xaa] sm:$0x3]  ;;  %v1125_v43 = vld [vmem:[%s1811_s0 + $0xa8] sm:$0x3]  ;;  %213 = vst [vmem:[#allocation0 + $0x2b0] sm:$0x3] %v1123_v41 }
  0x43   :  { %v871_v44 = vld [vmem:[#allocation0 + $0x81] ss:$8 sm:$0xf0]   ;;  %218 = vst [vmem:[#allocation0 + $0x2a8] sm:$0x3] %v1124_v42 }
  0x44   :  { %223 = vst [vmem:[#allocation0 + $0x2a0] sm:$0x3] %v1125_v43  ;;  %v1126_v45 = vld [vmem:[%s1811_s0 + $0xa6] sm:$0x3]  ;;  %v1127_v46 = vld [vmem:[%s1811_s0 + $0xa4] sm:$0x3] }
  0x45   :  { %228 = vst [vmem:[#allocation0 + $0x298] sm:$0x3] %v1126_v45  ;;  %v1128_v47 = vld [vmem:[%s1811_s0 + $0xa2] sm:$0x3]  ;;  %v1129_v48 = vld [vmem:[%s1811_s0 + $0xa0] sm:$0x3] }
  0x46   :  { %v869_v49 = vld [vmem:[#allocation0 + $0x81] ss:$8 sm:$0xf]   ;;  %233 = vst [vmem:[#allocation0 + $0x290] sm:$0x3] %v1127_v46 }
  0x47   :  { %238 = vst [vmem:[#allocation0 + $0x288] sm:$0x3] %v1128_v47  ;;  %243 = vst [vmem:[#allocation0 + $0x280] sm:$0x3] %v1129_v48  ;;  %v1090_v50 = vld [vmem:[%s1811_s0 + $0xee] sm:$0x3]  ;;  %v873_v51 = vsel %vm642_vm0, %v871_v44, %v869_v49 }
  0x48   :  { %48 = vst [vmem:[#allocation0 + $0x3b8] sm:$0x3] %v1090_v50  ;;  %v1091_v52 = vld [vmem:[%s1811_s0 + $0xec] sm:$0x3]  ;;  %v1092_v53 = vld [vmem:[%s1811_s0 + $0xea] sm:$0x3]  ;;  %874 = vrot.lane.b32.xlu0 %v873_v51, %s1240_s10 }
  0x49   :  { %v1093_v54 = vld [vmem:[%s1811_s0 + $0xe8] sm:$0x3]  ;;  %53 = vst [vmem:[#allocation0 + $0x3b0] sm:$0x3] %v1091_v52  ;;  %58 = vst [vmem:[#allocation0 + $0x3a8] sm:$0x3] %v1092_v53 }
  0x4a   :  { %v882_v55 = vld [vmem:[#allocation0 + $0x181] ss:$8 sm:$0xf0]   ;;  %63 = vst [vmem:[#allocation0 + $0x3a0] sm:$0x3] %v1093_v54 }
  0x4b   :  { %v1094_v56 = vld [vmem:[%s1811_s0 + $0xe6] sm:$0x3]  ;;  %v1095_v57 = vld [vmem:[%s1811_s0 + $0xe4] sm:$0x3]  ;;  %v1096_v58 = vld [vmem:[%s1811_s0 + $0xe2] sm:$0x3] }
  0x4c   :  { %68 = vst [vmem:[#allocation0 + $0x398] sm:$0x3] %v1094_v56  ;;  %v1097_v59 = vld [vmem:[%s1811_s0 + $0xe0] sm:$0x3]  ;;  %73 = vst [vmem:[#allocation0 + $0x390] sm:$0x3] %v1095_v57 }
  0x4d   :  { %v880_v60 = vld [vmem:[#allocation0 + $0x181] ss:$8 sm:$0xf]   ;;  %78 = vst [vmem:[#allocation0 + $0x388] sm:$0x3] %v1096_v58 }
  0x4e   :  { %83 = vst [vmem:[#allocation0 + $0x380] sm:$0x3] %v1097_v59  ;;  %v1178_v61 = vld [vmem:[%s1811_s0 + $0x3e] sm:$0x3]  ;;  %v884_v62 = vsel %vm642_vm0, %v882_v55, %v880_v60  ;;  %v1179_v0 = vld [vmem:[%s1811_s0 + $0x3c] sm:$0x3] }
  0x4f   :  { %v893_v63 = vld [vmem:[#allocation0 + $0x281] ss:$8 sm:$0xf0]   ;;  %488 = vst [vmem:[#allocation0 + $0xf8] sm:$0x3] %v1178_v61  ;;  %885 = vrot.lane.b32.xlu1 %v884_v62, %s1240_s10 }
  0x50   :  { %493 = vst [vmem:[#allocation0 + $0xf0] sm:$0x3] %v1179_v0  ;;  %v1180_v1 = vld [vmem:[%s1811_s0 + $0x3a] sm:$0x3]  ;;  %v1181_v2 = vld [vmem:[%s1811_s0 + $0x38] sm:$0x3] }
  0x51   :  { %v1182_v3 = vld [vmem:[%s1811_s0 + $0x36] sm:$0x3]  ;;  %v891_v4 = vld [vmem:[#allocation0 + $0x281] ss:$8 sm:$0xf]  }
  0x52   :  { %498 = vst [vmem:[#allocation0 + $0xe8] sm:$0x3] %v1180_v1  ;;  %503 = vst [vmem:[#allocation0 + $0xe0] sm:$0x3] %v1181_v2  ;;  %v1183_v5 = vld [vmem:[%s1811_s0 + $0x34] sm:$0x3]  ;;  %v895_v6 = vsel %vm642_vm0, %v893_v63, %v891_v4 }
  0x53   :  { %508 = vst [vmem:[#allocation0 + $0xd8] sm:$0x3] %v1182_v3  ;;  %513 = vst [vmem:[#allocation0 + $0xd0] sm:$0x3] %v1183_v5  ;;  %v1184_v7 = vld [vmem:[%s1811_s0 + $0x32] sm:$0x3]  ;;  %896 = vrot.lane.b32.xlu0 %v895_v6, %s1240_s10 }
  0x54   :  { %v1185_v8 = vld [vmem:[%s1811_s0 + $0x30] sm:$0x3]  ;;  %v1146_v9 = vld [vmem:[%s1811_s0 + $0x7e] sm:$0x3]  ;;  %518 = vst [vmem:[#allocation0 + $0xc8] sm:$0x3] %v1184_v7 }
  0x55   :  { %v904_v10 = vld [vmem:[#allocation0 + $0x381] ss:$8 sm:$0xf0]   ;;  %523 = vst [vmem:[#allocation0 + $0xc0] sm:$0x3] %v1185_v8 }
  0x56   :  { %328 = vst [vmem:[#allocation0 + $0x1f8] sm:$0x3] %v1146_v9  ;;  %v1147_v11 = vld [vmem:[%s1811_s0 + $0x7c] sm:$0x3]  ;;  %v1148_v12 = vld [vmem:[%s1811_s0 + $0x7a] sm:$0x3] }
  0x57   :  { %333 = vst [vmem:[#allocation0 + $0x1f0] sm:$0x3] %v1147_v11  ;;  %v1149_v13 = vld [vmem:[%s1811_s0 + $0x78] sm:$0x3]  ;;  %v1150_v14 = vld [vmem:[%s1811_s0 + $0x76] sm:$0x3] }
  0x58   :  { %v902_v15 = vld [vmem:[#allocation0 + $0x381] ss:$8 sm:$0xf]   ;;  %338 = vst [vmem:[#allocation0 + $0x1e8] sm:$0x3] %v1148_v12 }
  0x59   :  { %343 = vst [vmem:[#allocation0 + $0x1e0] sm:$0x3] %v1149_v13  ;;  %348 = vst [vmem:[#allocation0 + $0x1d8] sm:$0x3] %v1150_v14  ;;  %v1151_v16 = vld [vmem:[%s1811_s0 + $0x74] sm:$0x3]  ;;  %v906_v17 = vsel %vm642_vm0, %v904_v10, %v902_v15 }
  0x5a   :  { %353 = vst [vmem:[#allocation0 + $0x1d0] sm:$0x3] %v1151_v16  ;;  %v1152_v18 = vld [vmem:[%s1811_s0 + $0x72] sm:$0x3]  ;;  %v1153_v19 = vld [vmem:[%s1811_s0 + $0x70] sm:$0x3]  ;;  %907 = vrot.lane.b32.xlu1 %v906_v17, %s1240_s10 }
  0x5b   :  { %v1114_v20 = vld [vmem:[%s1811_s0 + $0xbe] sm:$0x3]  ;;  %358 = vst [vmem:[#allocation0 + $0x1c8] sm:$0x3] %v1152_v18  ;;  %363 = vst [vmem:[#allocation0 + $0x1c0] sm:$0x3] %v1153_v19 }
  0x5c   :  { %168 = vst [vmem:[#allocation0 + $0x2f8] sm:$0x3] %v1114_v20  ;;  %v1115_v21 = vld [vmem:[%s1811_s0 + $0xbc] sm:$0x3]  ;;  %v1116_v22 = vld [vmem:[%s1811_s0 + $0xba] sm:$0x3] }
  0x5d   :  { %v1117_v23 = vld [vmem:[%s1811_s0 + $0xb8] sm:$0x3]  ;;  %173 = vst [vmem:[#allocation0 + $0x2f0] sm:$0x3] %v1115_v21  ;;  %178 = vst [vmem:[#allocation0 + $0x2e8] sm:$0x3] %v1116_v22 }
  0x5e   :  { %v915_v24 = vld [vmem:[#allocation0 + $0xc1] ss:$8 sm:$0xf0]   ;;  %183 = vst [vmem:[#allocation0 + $0x2e0] sm:$0x3] %v1117_v23 }
  0x5f   :  { %v1118_v25 = vld [vmem:[%s1811_s0 + $0xb6] sm:$0x3]  ;;  %v1119_v26 = vld [vmem:[%s1811_s0 + $0xb4] sm:$0x3]  ;;  %v1120_v27 = vld [vmem:[%s1811_s0 + $0xb2] sm:$0x3] }
  0x60   :  { %188 = vst [vmem:[#allocation0 + $0x2d8] sm:$0x3] %v1118_v25  ;;  %v1121_v28 = vld [vmem:[%s1811_s0 + $0xb0] sm:$0x3]  ;;  %193 = vst [vmem:[#allocation0 + $0x2d0] sm:$0x3] %v1119_v26 }
  0x61   :  { %v913_v29 = vld [vmem:[#allocation0 + $0xc1] ss:$8 sm:$0xf]   ;;  %198 = vst [vmem:[#allocation0 + $0x2c8] sm:$0x3] %v1120_v27 }
  0x62   :  { %203 = vst [vmem:[#allocation0 + $0x2c0] sm:$0x3] %v1121_v28  ;;  %v1082_v30 = vld [vmem:[%s1811_s0 + $0xfe] sm:$0x3]  ;;  %v917_v31 = vsel %vm642_vm0, %v915_v24, %v913_v29  ;;  %v1083_v32 = vld [vmem:[%s1811_s0 + $0xfc] sm:$0x3] }
  0x63   :  { %8 = vst [vmem:[#allocation0 + $0x3f8] sm:$0x3] %v1082_v30  ;;  %v1084_v33 = vld [vmem:[%s1811_s0 + $0xfa] sm:$0x3]  ;;  %v1085_v34 = vld [vmem:[%s1811_s0 + $0xf8] sm:$0x3]  ;;  %918 = vrot.lane.b32.xlu0 %v917_v31, %s1240_s10 }
  0x64   :  { %v926_v35 = vld [vmem:[#allocation0 + $0x1c1] ss:$8 sm:$0xf0]   ;;  %13 = vst [vmem:[#allocation0 + $0x3f0] sm:$0x3] %v1083_v32 }
  0x65   :  { %18 = vst [vmem:[#allocation0 + $0x3e8] sm:$0x3] %v1084_v33  ;;  %23 = vst [vmem:[#allocation0 + $0x3e0] sm:$0x3] %v1085_v34  ;;  %v1086_v36 = vld [vmem:[%s1811_s0 + $0xf6] sm:$0x3] }
  0x66   :  { %28 = vst [vmem:[#allocation0 + $0x3d8] sm:$0x3] %v1086_v36  ;;  %v1087_v37 = vld [vmem:[%s1811_s0 + $0xf4] sm:$0x3]  ;;  %v1088_v38 = vld [vmem:[%s1811_s0 + $0xf2] sm:$0x3] }
  0x67   :  { %v1089_v39 = vld [vmem:[%s1811_s0 + $0xf0] sm:$0x3]  ;;  %33 = vst [vmem:[#allocation0 + $0x3d0] sm:$0x3] %v1087_v37  ;;  %38 = vst [vmem:[#allocation0 + $0x3c8] sm:$0x3] %v1088_v38 }
  0x68   :  { %v924_v40 = vld [vmem:[#allocation0 + $0x1c1] ss:$8 sm:$0xf]   ;;  %43 = vst [vmem:[#allocation0 + $0x3c0] sm:$0x3] %v1089_v39 }
  0x69   :  { %v640_v41 = vld [vmem:[#allocation0] ss:$8 sm:$0xf]   ;;  %v928_v42 = vsel %vm642_vm0, %v926_v35, %v924_v40  ;;  %v937_v43 = vld [vmem:[#allocation0 + $0x2c1] ss:$8 sm:$0xf0]  }
  0x6a   :  { %v641_v44 = vld [vmem:[#allocation0] ss:$8 sm:$0xf0]   ;;  %929 = vrot.lane.b32.xlu1 %v928_v42, %s1240_s10  ;;  %v935_v48 = vld [vmem:[#allocation0 + $0x2c1] ss:$8 sm:$0xf]  }
  0x6b   :  { %v643_v45 = vsel %vm642_vm0, %v641_v44, %v640_v41  ;;  %v710_v46 = vld [vmem:[#allocation0 + $0x200] ss:$8 sm:$0xf]   ;;  %v939_v51 = vsel %vm642_vm0, %v937_v43, %v935_v48 }
  0x6c   :  { %v712_v47 = vld [vmem:[#allocation0 + $0x200] ss:$8 sm:$0xf0]   ;;  %645 = vst.msk [vmem:[%s1812_s1] sm:$0xff] %vm644_vm1, %v643_v45   ;;  %940 = vrot.lane.b32.xlu0 %v939_v51, %s1240_s10 }
  0x6d   :  { %v714_v49 = vsel %vm642_vm0, %v712_v47, %v710_v46  ;;  %v674_v50 = vld [vmem:[#allocation0 + $0x100] ss:$8 sm:$0xf]   ;;  %v948_v54 = vld [vmem:[#allocation0 + $0x3c1] ss:$8 sm:$0xf0]  }
  0x6e   :  { %1216 = vst.msk [vmem:[%s1812_s1 + $0x40] sm:$0xff] %vm644_vm1, %v714_v49   ;;  %v676_v52 = vld [vmem:[#allocation0 + $0x100] ss:$8 sm:$0xf0]  }
  0x6f   :  { %v746_v53 = vld [vmem:[#allocation0 + $0x300] ss:$8 sm:$0xf]   ;;  %v678_v55 = vsel %vm642_vm0, %v676_v52, %v674_v50  ;;  %v946_v60 = vld [vmem:[#allocation0 + $0x3c1] ss:$8 sm:$0xf]  }
  0x70   :  { %v748_v56 = vld [vmem:[#allocation0 + $0x300] ss:$8 sm:$0xf0]   ;;  %1212 = vst.msk [vmem:[%s1812_s1 + $0x20] sm:$0xff] %vm644_vm1, %v678_v55   ;;  %v950_v63 = vsel %vm642_vm0, %v948_v54, %v946_v60 }
  0x71   :  { %v750_v57 = vsel %vm642_vm0, %v748_v56, %v746_v53  ;;  %v647_v58 = vld [vmem:[#allocation0 + $0x40] ss:$8 sm:$0xf]   ;;  %951 = vrot.lane.b32.xlu1 %v950_v63, %s1240_s10 }
  0x72   :  { %v649_v59 = vld [vmem:[#allocation0 + $0x40] ss:$8 sm:$0xf0]   ;;  %1220 = vst.msk [vmem:[%s1812_s1 + $0x60] sm:$0xff] %vm644_vm1, %v750_v57  }
  0x73   :  { %v651_v61 = vsel %vm642_vm0, %v649_v59, %v647_v58  ;;  %v683_v62 = vld [vmem:[#allocation0 + $0x140] ss:$8 sm:$0xf]  }
  0x74   :  { %1209 = vst.msk [vmem:[%s1812_s1 + $0x8] sm:$0xff] %vm644_vm1, %v651_v61   ;;  %v685_v0 = vld [vmem:[#allocation0 + $0x140] ss:$8 sm:$0xf0]  }
  0x75   :  { %v719_v1 = vld [vmem:[#allocation0 + $0x240] ss:$8 sm:$0xf]   ;;  %v687_v2 = vsel %vm642_vm0, %v685_v0, %v683_v62 }
  0x76   :  { %v721_v3 = vld [vmem:[#allocation0 + $0x240] ss:$8 sm:$0xf0]   ;;  %1213 = vst.msk [vmem:[%s1812_s1 + $0x28] sm:$0xff] %vm644_vm1, %v687_v2  }
  0x77   :  { %v755_v4 = vld [vmem:[#allocation0 + $0x340] ss:$8 sm:$0xf]   ;;  %v723_v5 = vsel %vm642_vm0, %v721_v3, %v719_v1 }
  0x78   :  { %v757_v6 = vld [vmem:[#allocation0 + $0x340] ss:$8 sm:$0xf0]   ;;  %1217 = vst.msk [vmem:[%s1812_s1 + $0x48] sm:$0xff] %vm644_vm1, %v723_v5  }
  0x79   :  { %v656_v7 = vld [vmem:[#allocation0 + $0x80] ss:$8 sm:$0xf]   ;;  %v759_v8 = vsel %vm642_vm0, %v757_v6, %v755_v4 }
  0x7a   :  { %v658_v9 = vld [vmem:[#allocation0 + $0x80] ss:$8 sm:$0xf0]   ;;  %1221 = vst.msk [vmem:[%s1812_s1 + $0x68] sm:$0xff] %vm644_vm1, %v759_v8  }
  0x7b   :  { %v692_v10 = vld [vmem:[#allocation0 + $0x180] ss:$8 sm:$0xf]   ;;  %v660_v11 = vsel %vm642_vm0, %v658_v9, %v656_v7 }
  0x7c   :  { %v694_v12 = vld [vmem:[#allocation0 + $0x180] ss:$8 sm:$0xf0]   ;;  %1210 = vst.msk [vmem:[%s1812_s1 + $0x10] sm:$0xff] %vm644_vm1, %v660_v11  }
  0x7d   :  { %v728_v13 = vld [vmem:[#allocation0 + $0x280] ss:$8 sm:$0xf]   ;;  %v696_v14 = vsel %vm642_vm0, %v694_v12, %v692_v10 }
  0x7e   :  { %v730_v15 = vld [vmem:[#allocation0 + $0x280] ss:$8 sm:$0xf0]   ;;  %1214 = vst.msk [vmem:[%s1812_s1 + $0x30] sm:$0xff] %vm644_vm1, %v696_v14  }
  0x7f   :  { %v764_v16 = vld [vmem:[#allocation0 + $0x380] ss:$8 sm:$0xf]   ;;  %v732_v17 = vsel %vm642_vm0, %v730_v15, %v728_v13 }
  0x80   :  { %v766_v18 = vld [vmem:[#allocation0 + $0x380] ss:$8 sm:$0xf0]   ;;  %1218 = vst.msk [vmem:[%s1812_s1 + $0x50] sm:$0xff] %vm644_vm1, %v732_v17  }
  0x81   :  { %v665_v19 = vld [vmem:[#allocation0 + $0xc0] ss:$8 sm:$0xf]   ;;  %v768_v20 = vsel %vm642_vm0, %v766_v18, %v764_v16 }
  0x82   :  { %v667_v21 = vld [vmem:[#allocation0 + $0xc0] ss:$8 sm:$0xf0]   ;;  %1222 = vst.msk [vmem:[%s1812_s1 + $0x70] sm:$0xff] %vm644_vm1, %v768_v20  }
  0x83   :  { %v701_v22 = vld [vmem:[#allocation0 + $0x1c0] ss:$8 sm:$0xf]   ;;  %v669_v23 = vsel %vm642_vm0, %v667_v21, %v665_v19 }
  0x84   :  { %v703_v24 = vld [vmem:[#allocation0 + $0x1c0] ss:$8 sm:$0xf0]   ;;  %1211 = vst.msk [vmem:[%s1812_s1 + $0x18] sm:$0xff] %vm644_vm1, %v669_v23  }
  0x85   :  { %v737_v25 = vld [vmem:[#allocation0 + $0x2c0] ss:$8 sm:$0xf]   ;;  %v705_v26 = vsel %vm642_vm0, %v703_v24, %v701_v22 }
  0x86   :  { %v739_v27 = vld [vmem:[#allocation0 + $0x2c0] ss:$8 sm:$0xf0]   ;;  %1215 = vst.msk [vmem:[%s1812_s1 + $0x38] sm:$0xff] %vm644_vm1, %v705_v26  }
  0x87   :  { %v773_v28 = vld [vmem:[#allocation0 + $0x3c0] ss:$8 sm:$0xf]   ;;  %v741_v29 = vsel %vm642_vm0, %v739_v27, %v737_v25  ;;  %v788_v32 = vpop.permute.xlu0 %787  }
  0x88   :  { %v775_v30 = vld [vmem:[#allocation0 + $0x3c0] ss:$8 sm:$0xf0]   ;;  %1219 = vst.msk [vmem:[%s1812_s1 + $0x58] sm:$0xff] %vm644_vm1, %v741_v29  }
  0x89   :  { %v777_v31 = vsel %vm642_vm0, %v775_v30, %v773_v28  ;;  %790 = vst.msk [vmem:[%s1812_s1] sm:$0xff] %vm789_vm2, %v788_v32  }
  0x8a   :  { %1223 = vst.msk [vmem:[%s1812_s1 + $0x78] sm:$0xff] %vm644_vm1, %v777_v31  }
  0x8c   :  { %v809_v33 = vpop.permute.xlu1 %808  }
  0x8d   :  { %1225 = vst.msk [vmem:[%s1812_s1 + $0x40] sm:$0xff] %vm789_vm2, %v809_v33  }
  0x90   :  { %v798_v34 = vpop.permute.xlu0 %797  }
  0x91   :  { %1224 = vst.msk [vmem:[%s1812_s1 + $0x20] sm:$0xff] %vm789_vm2, %v798_v34  }
  0x97   :  { %v820_v35 = vpop.permute.xlu1 %819  }
  0x98   :  { %1226 = vst.msk [vmem:[%s1812_s1 + $0x60] sm:$0xff] %vm789_vm2, %v820_v35  }
  0xa0   :  { %v831_v36 = vpop.permute.xlu0 %830  }
  0xa1   :  { %1227 = vst.msk [vmem:[%s1812_s1 + $0x8] sm:$0xff] %vm789_vm2, %v831_v36  }
  0xa6   :  { %v842_v37 = vpop.permute.xlu1 %841  }
  0xa7   :  { %1228 = vst.msk [vmem:[%s1812_s1 + $0x28] sm:$0xff] %vm789_vm2, %v842_v37  }
  0xab   :  { %v853_v38 = vpop.permute.xlu0 %852  }
  0xac   :  { %1229 = vst.msk [vmem:[%s1812_s1 + $0x48] sm:$0xff] %vm789_vm2, %v853_v38  }
  0xb1   :  { %v864_v39 = vpop.permute.xlu1 %863  }
  0xb2   :  { %1230 = vst.msk [vmem:[%s1812_s1 + $0x68] sm:$0xff] %vm789_vm2, %v864_v39  }
  0xba   :  { %v875_v40 = vpop.permute.xlu0 %874  }
  0xbb   :  { %1231 = vst.msk [vmem:[%s1812_s1 + $0x10] sm:$0xff] %vm789_vm2, %v875_v40  }
  0xc1   :  { %v886_v41 = vpop.permute.xlu1 %885  }
  0xc2   :  { %1232 = vst.msk [vmem:[%s1812_s1 + $0x30] sm:$0xff] %vm789_vm2, %v886_v41  }
  0xc5   :  { %v897_v42 = vpop.permute.xlu0 %896  }
  0xc6   :  { %1233 = vst.msk [vmem:[%s1812_s1 + $0x50] sm:$0xff] %vm789_vm2, %v897_v42  }
  0xcc   :  { %v908_v43 = vpop.permute.xlu1 %907  }
  0xcd   :  { %1234 = vst.msk [vmem:[%s1812_s1 + $0x70] sm:$0xff] %vm789_vm2, %v908_v43  }
  0xd5   :  { %v919_v44 = vpop.permute.xlu0 %918  }
  0xd6   :  { %1235 = vst.msk [vmem:[%s1812_s1 + $0x18] sm:$0xff] %vm789_vm2, %v919_v44  }
  0xdc   :  { %v930_v45 = vpop.permute.xlu1 %929  }
  0xdd   :  { %1236 = vst.msk [vmem:[%s1812_s1 + $0x38] sm:$0xff] %vm789_vm2, %v930_v45  }
  0xde   :  { %v941_v46 = vpop.permute.xlu0 %940  }
  0xdf   :  { %1237 = vst.msk [vmem:[%s1812_s1 + $0x58] sm:$0xff] %vm789_vm2, %v941_v46  }
  0xe3   :  { %v952_v47 = vpop.permute.xlu1 %951  }
  0xe4   :  { %1238 = vst.msk [vmem:[%s1812_s1 + $0x78] sm:$0xff] %vm789_vm2, %v952_v47  }

// kernel: frozen_clip_t5_encode.1
= control target key start
LH: loop header
LB: loop body
LE: loop exit
PB: predicated region body
PF: predicated region fallthrough
CT: control target
= control target key end

     0   :  { %s24400_s0 = inlined_call_operand.vmem [shape: f32[2,32,128], index: 0, kind: input, shape index: {}]   ;;  %s24401_s1 = inlined_call_operand.vmem [shape: f32[4,32,32], index: 1, kind: input, shape index: {}]   ;;  %s24402_s2 = inlined_call_operand.vmem [shape: f32[4,32,32], index: 2, kind: input, shape index: {}]   ;;  %s24403_s3 = inlined_call_operand.vmem [shape: f32[2,1,128], index: 3, kind: input, shape index: {}]   ;;  %s24404_s4 = inlined_call_operand.vmem [shape: f32[2,1,128], index: 4, kind: input, shape index: {}]   ;;  %s24405_s5 = inlined_call_operand.vmem [shape: bf16[2,128,384], index: 5, kind: input, shape index: {}]   ;;  %s24406_s6 = inlined_call_operand.vmem [shape: f32[2,1,384], index: 6, kind: input, shape index: {}]   ;;  %s24407_s7 = inlined_call_operand.vmem [shape: bf16[2,128,128], index: 7, kind: input, shape index: {}]   ;;  %s24408_s8 = inlined_call_operand.vmem [shape: f32[2,1,128], index: 8, kind: input, shape index: {}]   ;;  %s24409_s9 = inlined_call_operand.vmem [shape: f32[2,1,128], index: 9, kind: input, shape index: {}]   ;;  %s24410_s10 = inlined_call_operand.vmem [shape: f32[2,1,128], index: 10, kind: input, shape index: {}]   ;;  %s24411_s11 = inlined_call_operand.vmem [shape: bf16[2,128,512], index: 11, kind: input, shape index: {}]   ;;  %s24412_s12 = inlined_call_operand.vmem [shape: f32[2,1,512], index: 12, kind: input, shape index: {}]   ;;  %s24413_s13 = inlined_call_operand.vmem [shape: bf16[2,512,128], index: 13, kind: input, shape index: {}]   ;;  %s24414_s14 = inlined_call_operand.vmem [shape: f32[2,1,128], index: 14, kind: input, shape index: {}]   ;;  %s24415_s15 = inlined_call_operand.vmem [shape: f32[1,128], index: 15, kind: input, shape index: {}]   ;;  %s24416_s16 = inlined_call_operand.vmem [shape: f32[1,128], index: 16, kind: input, shape index: {}]   ;;  %s24417_s17 = inlined_call_operand.vmem [shape: f32[2,1,128], index: 17, kind: input, shape index: {}]   ;;  %s24418_s18 = inlined_call_operand.vmem [shape: bf16[2,128,384], index: 18, kind: input, shape index: {}]   ;;  %s24419_s19 = inlined_call_operand.vmem [shape: bf16[2,128,128], index: 19, kind: input, shape index: {}]   ;;  %s24420_s20 = inlined_call_operand.vmem [shape: f32[2,1,128], index: 20, kind: input, shape index: {}]   ;;  %s24421_s21 = inlined_call_operand.vmem [shape: bf16[2,128,512], index: 21, kind: input, shape index: {}]   ;;  %s24422_s22 = inlined_call_operand.vmem [shape: bf16[2,256,128], index: 22, kind: input, shape index: {}]   ;;  %s24423_s23 = inlined_call_operand.vmem [shape: f32[1,128], index: 23, kind: input, shape index: {}]   ;;  %s24424_s24 = inlined_call_operand.vmem [shape: f32[2,32,128], index: 24, kind: output, shape index: {}]  }
   0x1   :  { %24469 = sst [smem:[#allocation10_spill]] %s24400_s0 }
   0x2   :  { %24470 = sst [smem:[#allocation11_spill]] %s24401_s1 }
   0x3   :  { %24471 = sst [smem:[#allocation12_spill]] %s24402_s2 }
   0x4   :  { %24472 = sst [smem:[#allocation13_spill]] %s24403_s3 }
   0x5   :  { %24473 = sst [smem:[#allocation14_spill]] %s24404_s4 }
   0x6   :  { %24474 = sst [smem:[#allocation15_spill]] %s24405_s5  ;;  %s19254_s5 = smov 0  }
   0x7   :  { %24475 = sst [smem:[#allocation16_spill]] %s24406_s6 }
   0x8   :  { %24476 = sst [smem:[#allocation17_spill]] %s24407_s7 }
   0x9   :  { %24477 = sst [smem:[#allocation18_spill]] %s24408_s8 }
   0xa   :  { %24478 = sst [smem:[#allocation19_spill]] %s24417_s17 }
   0xb   :  { %24479 = sst [smem:[#allocation20_spill]] %s24418_s18 }
   0xc   :  { %24480 = sst [smem:[#allocation21_spill]] %s24419_s19 }
   0xd   :  { %24481 = sst [smem:[#allocation22_spill]] %s24420_s20 }
   0xe   :  { %24482 = sst [smem:[#allocation23_spill]] %s24421_s21 }
   0xf   :  { %24483 = sst [smem:[#allocation24_spill]] %s24422_s22 }
  0x10   :  { %24484 = sst [smem:[#allocation25_spill]] %s24423_s23 }
  0x11   :  { %24485 = sst [smem:[#allocation26_spill]] %s24424_s24 }
  0x12 LB: > { %24486 = sst [smem:[#allocation2_spill]] %s19115_s5  ;;  %s19260_s26 = sadd.s32 4294967295, %s19115_s5   ;;  %s19115_s5 = sphi %s19254_s5, %s34_s5  }
  0x13   : > { %p16225_p0 = scmp.ge.s32.totalorder %s19115_s5, 1  ;;  %p662_p1 = scmp.lt.s32.totalorder %s19115_s5, 3 }
  0x15   : > { %p663_p2 = pnand %p16225_p0, %p662_p1 }
  0x16   : > { %p728_p3 = scmp.lt.s32.totalorder (!%p663_p2), %s19260_s26, 1  ;;  %s24487_s29 = sld [smem:[#allocation10_spill]] (!%p663_p2) }
  0x17   : > { %666 = sbr.rel (%p663_p2) target bundleno = 10294 (0x2836), region = 116  ;;  %s24488_s24 = sld [smem:[#allocation26_spill]] (!%p663_p2) }
  0x18   : > { %p16230_p4 = scmp.ne.s32.totalorder (!%p663_p2), %s19260_s26, 0 }
  0x1e   : > { %s729_s27 = scalar_select %p728_p3, %s19260_s26, 1 }
  0x1f   : > { %742 = sbr.rel (%p16230_p4) target bundleno = 5555 (0x15b3), region = 120 }
  0x20   : > { %s17159_s28 = sshll.u32 %s729_s27, 5 }
  0x21   : > { %s19269_s0 = scalar_lea.vmem %s24487_s29, %s17159_s28  ;;  %s19274_s3 = scalar_lea.vmem %s24488_s24, %s17159_s28 }
  0x26   : > { %v743_v0 = vld [vmem:[%s19269_s0] sm:$0xff]  ;;  %v745_v1 = vld [vmem:[%s19269_s0 + $0x10] sm:$0xff]  ;;  %v744_v2 = vld [vmem:[%s19269_s0 + $0x8] sm:$0xff]  ;;  %s24489_s4 = sld [smem:[#allocation15_spill]]  ;;  %v24433_v39 = vmov 0   ;;  %s24490_s25 = sld [smem:[#allocation13_spill]] }
  0x27   : > { %765 = vadd.xlane.f32.xlu0 %v743_v0  ;;  %769 = vadd.xlane.f32.xlu1 %v745_v1  ;;  %v746_v3 = vld [vmem:[%s19269_s0 + $0x18] sm:$0xff]  ;;  %s24491_s27 = sld [smem:[#allocation14_spill]]  ;;  %s24494_s2 = sld [smem:[#allocation16_spill]]  ;;  %vm2903_vm0 = vcmask 261120  }
  0x28   : > { %1041 = vmatprep.mubr.bf16.mxu0 %v24433_v39  ;;  %s24437_s29 = smov 96   ;;  %s24441_s7 = smov 64  }
  0x29   : > { %s24439_s30 = smov 32   ;;  %s24498_s28 = sld [smem:[#allocation11_spill]] }
  0x2a   : > { %s24500_s6 = smov 32   ;;  %s24501_s1 = sld [smem:[#allocation17_spill]] }
  0x2b   : > { %767 = vadd.xlane.f32.xlu0 %v744_v2  ;;  %771 = vadd.xlane.f32.xlu1 %v746_v3  ;;  %s24506_s22 = smov 96  }
  0x2c   : > { %v18125_v4 = vld [vmem:[%s24489_s4 + $0x4] ss:$12 sps:$4 sm:$0xff]   ;;  %v18127_v5 = vld [vmem:[%s24489_s4] ss:$12 sps:$4 sm:$0xff]   ;;  %v18128_v6 = vld [vmem:[%s24489_s4 + $0x1c] ss:$12 sps:$4 sm:$0xff]  }
  0x2d   : > { %v18130_v7 = vld [vmem:[%s24489_s4 + $0x8] ss:$12 sps:$4 sm:$0xff]   ;;  %1009 = vmatprep.subr.bf16.mxu0 %v18125_v4  ;;  %v18131_v24 = vld [vmem:[%s24489_s4 + $0x18] ss:$12 sps:$4 sm:$0xff]   ;;  %v18134_v26 = vld [vmem:[%s24489_s4 + $0x20] ss:$12 sps:$4 sm:$0xff]  }
  0x2e   : > { %1010 = vmatpush1.bf16.msra.mxu0 %v18127_v5  ;;  %17561 = vmatprep.subr.bf16.mxu1 %v18130_v7  ;;  %v18132_v25 = vld [vmem:[%s24489_s4 + $0x34] ss:$12 sps:$4 sm:$0xff]   ;;  %v18135_v27 = vld [vmem:[%s24489_s4 + $0x30] ss:$12 sps:$4 sm:$0xff]   ;;  %v18136_v28 = vld [vmem:[%s24489_s4 + $0x4c] ss:$12 sps:$4 sm:$0xff]  }
  0x2f   : > { %1011 = vmatprep.subr.bf16.mxu0 %v18128_v6  ;;  %17562 = vmatpush3.bf16.msra.mxu1 %v18130_v7  ;;  %v18138_v29 = vld [vmem:[%s24489_s4 + $0x38] ss:$12 sps:$4 sm:$0xff]   ;;  %v18139_v30 = vld [vmem:[%s24489_s4 + $0x48] ss:$12 sps:$4 sm:$0xff]   ;;  %v18142_v32 = vld [vmem:[%s24489_s4 + $0x50] ss:$12 sps:$4 sm:$0xff]  }
  0x30   : > { %17563 = vmatprep.subr.bf16.mxu1 %v18134_v26  ;;  %v18140_v31 = vld [vmem:[%s24489_s4 + $0x64] ss:$12 sps:$4 sm:$0xff]   ;;  %v18143_v33 = vld [vmem:[%s24489_s4 + $0x60] ss:$12 sps:$4 sm:$0xff]   ;;  %v18144_v34 = vld [vmem:[%s24489_s4 + $0x7c] ss:$12 sps:$4 sm:$0xff]  }
  0x31   : > { %v18146_v35 = vld [vmem:[%s24489_s4 + $0x68] ss:$12 sps:$4 sm:$0xff]   ;;  %v18147_v36 = vld [vmem:[%s24489_s4 + $0x78] ss:$12 sps:$4 sm:$0xff]   ;;  %v18150_v38 = vld [vmem:[%s24489_s4 + $0x80] ss:$12 sps:$4 sm:$0xff]  }
  0x32   : > { %1012 = vmatpush1.bf16.msra.mxu0 %v18131_v24  ;;  %v18148_v37 = vld [vmem:[%s24489_s4 + $0x94] ss:$12 sps:$4 sm:$0xff]   ;;  %v18151_v40 = vld [vmem:[%s24489_s4 + $0x90] ss:$12 sps:$4 sm:$0xff]   ;;  %v18152_v41 = vld [vmem:[%s24489_s4 + $0xac] ss:$12 sps:$4 sm:$0xff]  }
  0x33   : > { %1013 = vmatprep.subr.bf16.mxu0 %v18132_v25  ;;  %17564 = vmatpush3.bf16.msra.mxu1 %v18134_v26  ;;  %v18154_v42 = vld [vmem:[%s24489_s4 + $0x98] ss:$12 sps:$4 sm:$0xff]   ;;  %v18155_v43 = vld [vmem:[%s24489_s4 + $0xa8] ss:$12 sps:$4 sm:$0xff]   ;;  %v18156_v44 = vld [vmem:[%s24489_s4 + $0xb0] ss:$12 sps:$4 sm:$0xff]  }
  0x34   : > { %17565 = vmatprep.subr.bf16.mxu1 %v18138_v29  ;;  %v16231_v59 = vld [vmem:[%s24490_s25] ss:$0 sm:$0xff] }
  0x36   : > { %1014 = vmatpush1.bf16.msra.mxu0 %v18135_v27 }
  0x37   : > { %1015 = vmatprep.subr.bf16.mxu0 %v18136_v28  ;;  %17566 = vmatpush3.bf16.msra.mxu1 %v18138_v29 }
  0x38   : > { %17567 = vmatprep.subr.bf16.mxu1 %v18142_v32 }
  0x3a   : > { %1016 = vmatpush1.bf16.msra.mxu0 %v18139_v30 }
  0x3b   : > { %1017 = vmatprep.subr.bf16.mxu0 %v18140_v31  ;;  %17568 = vmatpush3.bf16.msra.mxu1 %v18142_v32 }
  0x3c   : > { %17569 = vmatprep.subr.bf16.mxu1 %v18146_v35 }
  0x3e   : > { %1018 = vmatpush1.bf16.msra.mxu0 %v18143_v33 }
  0x3f   : > { %1019 = vmatprep.subr.bf16.mxu0 %v18144_v34  ;;  %17570 = vmatpush3.bf16.msra.mxu1 %v18146_v35 }
  0x40   : > { %17571 = vmatprep.subr.bf16.mxu1 %v18150_v38 }
  0x42   : > { %1020 = vmatpush1.bf16.msra.mxu0 %v18147_v36 }
  0x43   : > { %1021 = vmatprep.subr.bf16.mxu0 %v18148_v37  ;;  %17572 = vmatpush3.bf16.msra.mxu1 %v18150_v38 }
  0x44   : > { %17573 = vmatprep.subr.bf16.mxu1 %v18154_v42 }
  0x46   : > { %1022 = vmatpush1.bf16.msra.mxu0 %v18151_v40 }
  0x47   : > { %1023 = vmatprep.subr.bf16.mxu0 %v18152_v41  ;;  %17574 = vmatpush3.bf16.msra.mxu1 %v18154_v42 }
  0x48   : > { %17575 = vmatprep.subr.bf16.mxu1 %v18156_v44 }
  0x4a   : > { %1024 = vmatpush1.bf16.msra.mxu0 %v18155_v43 }
  0x4b   : > { %17576 = vmatpush3.bf16.msra.mxu1 %v18156_v44 }
  0xb4   : > { %v766_v8 = vpop.xlane.xlu0 %765  ;;  %v770_v9 = vpop.xlane.xlu1 %769 }
  0xb5   : > { %v774_v10 = vmul.f32 0.0078125, %v766_v8  ;;  %v776_v11 = vmul.f32 0.0078125, %v770_v9 }
  0xb7   : > { %v19293_v12 = vsub.f32 %v743_v0, %v774_v10  ;;  %v19295_v13 = vsub.f32 %v745_v1, %v776_v11  ;;  %v16232_v0 = vld [vmem:[%s24491_s27] ss:$0 sm:$0xff] }
  0xb8   : > { %v768_v14 = vpop.xlane.xlu0 %767  ;;  %v772_v15 = vpop.xlane.xlu1 %771 }
  0xb9   : > { %v775_v16 = vmul.f32 0.0078125, %v768_v14  ;;  %v782_v17 = vmul.f32 %v19293_v12, %v19293_v12  ;;  %v777_v18 = vmul.f32 0.0078125, %v772_v15  ;;  %v784_v19 = vmul.f32 %v19295_v13, %v19295_v13 }
  0xba   : > { %v866_v14 = vlaneseq }
  0xbb   : > { %786 = vadd.xlane.f32.xlu0 %v782_v17  ;;  %v19301_v20 = vsub.f32 %v744_v2, %v775_v16  ;;  %v19303_v21 = vsub.f32 %v746_v3, %v777_v18  ;;  %v864_v16 = vld [vmem:[%s24494_s2] sm:$0x7] }
  0xbd   : > { %v783_v22 = vmul.f32 %v19301_v20, %v19301_v20  ;;  %v785_v23 = vmul.f32 %v19303_v21, %v19303_v21 }
  0xbf   : > { %790 = vadd.xlane.f32.xlu0 %v784_v19  ;;  %788 = vadd.xlane.f32.xlu1 %v783_v22 }
  0xc3   : > { %792 = vadd.xlane.f32.xlu1 %v785_v23 }
 0x148   : > { %v787_v45 = vpop.xlane.xlu0 %786 }
 0x149   : > { %v794_v46 = vmul.f32 0.0078125, %v787_v45 }
 0x14b   : > { %v798_v47 = vadd.f32 1e-05, %v794_v46 }
 0x14c   : > { %v789_v48 = vpop.xlane.xlu1 %788  ;;  %v791_v49 = vpop.xlane.xlu0 %790 }
 0x14d   : > { %18365 = vrsqrt.f32 %v798_v47  ;;  %v795_v50 = vmul.f32 0.0078125, %v789_v48  ;;  %v796_v51 = vmul.f32 0.0078125, %v791_v49  ;;  %v19121_v48 = vmov 1983009808  }
 0x14e   : > { %v1250_v49 = vunpack.c.l.s4 %v19121_v48 }
 0x14f   : > { %v799_v52 = vadd.f32 1e-05, %v795_v50  ;;  %v800_v53 = vadd.f32 1e-05, %v796_v51  ;;  %v19122_v51 = vmov 1934713408  }
 0x150   : > { %v793_v54 = vpop.xlane.xlu1 %792 }
 0x151   : > { %18367 = vrsqrt.f32 %v799_v52  ;;  %v797_v55 = vmul.f32 0.0078125, %v793_v54  ;;  %v1314_v52 = vunpack.c.l.s4 %v19122_v51  ;;  %v1251_v54 = vunpack.c.0.s8 %v1250_v49 }
 0x152   : > { %18369 = vrsqrt.f32 %v800_v53 }
 0x153   : > { %v801_v56 = vadd.f32 1e-05, %v797_v55 }
 0x155   : > { %18371 = vrsqrt.f32 %v801_v56  ;;  %v1315_v56 = vunpack.c.0.s8 %v1314_v52 }
 0x157   : > { %v18366_v57 = vpop.eup %18365 }
 0x158   : > { %v806_v58 = vmul.f32 %v18366_v57, %v19293_v12 }
 0x15a   : > { %v816_v63 = vmul.f32 %v16231_v59, %v806_v58 }
 0x15b   : > { %v18368_v60 = vpop.eup %18367 }
 0x15c   : > { %v18370_v61 = vpop.eup %18369  ;;  %v807_v62 = vmul.f32 %v18368_v60, %v19301_v20  ;;  %v826_v4 = vadd.f32 %v16232_v0, %v816_v63 }
 0x15d   : > { %v808_v1 = vmul.f32 %v18370_v61, %v19295_v13  ;;  %v19381_v13 = vshrl.u32 %v866_v14, 7 }
 0x15e   : > { %v817_v2 = vmul.f32 %v16231_v59, %v807_v62 }
 0x15f   : > { %v18372_v3 = vpop.eup %18371  ;;  %v818_v7 = vmul.f32 %v16231_v59, %v808_v1  ;;  %24492 = vst [vmem:[#allocation3_spill] sm:$0xff] %v19381_v13  ;;  %v19384_v15 = vsub.s32 0, %v19381_v13  ;;  %v19390_v17 = vsub.s32 1, %v19381_v13  ;;  %v19445_v40 = vsub.s32 2, %v19381_v13 }
 0x160   : > { %v827_v5 = vadd.f32 %v16232_v0, %v817_v2  ;;  %v809_v6 = vmul.f32 %v18372_v3, %v19303_v21  ;;  %v19491_v60 = vsub.s32 %v1251_v54, %v19381_v13 }
 0x161   : > { %v828_v10 = vadd.f32 %v16232_v0, %v818_v7  ;;  %24493 = vst [vmem:[#allocation4_spill] sm:$0xff] %v19384_v15  ;;  %24495 = vst [vmem:[#allocation5_spill] sm:$0xff] %v19390_v17  ;;  %v869_v18 = vrot.slane %v864_v16, %v19384_v15  ;;  %v873_v19 = vrot.slane %v864_v16, %v19390_v17 }
 0x162   : > { %v862_v8 = vpack.c.bf16 %v827_v5, %v826_v4  ;;  %v819_v9 = vmul.f32 %v16231_v59, %v809_v6  ;;  %24496 = vst [vmem:[#allocation6_spill] sm:$0xff] %v19445_v40  ;;  %v877_v41 = vrot.slane %v864_v16, %v19445_v40 }
 0x164   : > { %1042 = vmatmul.mubr.bf16.vlgmr.msra.gmra.mrb[0].mxu0 %v862_v8  ;;  %17577 = vmatprep.mubr.bf16.mxu1 %v862_v8  ;;  %v829_v11 = vadd.f32 %v16232_v0, %v819_v9  ;;  %v19494_v0 = vsub.s32 %v1315_v56, %v19381_v13 }
 0x165   : > { %1051 = vmatprep.mubr.bf16.mxu0 %v24433_v39 }
 0x166   : > { %v863_v12 = vpack.c.bf16 %v829_v11, %v828_v10 }
 0x168   : > { %17578 = vmatmul.mubr.bf16.vlgmr.msra.gmra.mrb[0].mxu1 %v863_v12 }
 0x16c   : > { %1052 = vmatmul.mubr.bf16.gmra.mrb[4].mxu0 %v863_v12 }
 0x237   : > { %v1043_v20 = vpop.f32.mrb[0].mxu0 }
 0x238   : > { %v19394_v21 = vadd.f32 %v1043_v20, %v869_v18  ;;  %v1045_v22 = vpop.f32.mrb[1].mxu0 }
 0x239   : > { %v19396_v23 = vadd.f32 %v1045_v22, %v873_v19  ;;  %v1047_v24 = vpop.f32.mrb[2].mxu0 }
 0x23a   : > { %v1049_v25 = vpop.f32.mrb[3].mxu0  ;;  %1131 = vrot.lane.b32.xlu0 %v19394_v21, %s24437_s29  ;;  %v19402_v28 = vadd.f32 %v1047_v24, %v869_v18 }
 0x23b   : > { %1183 = vrot.lane.b32.xlu1 %v19396_v23, %s24441_s7  ;;  %v17579_v26 = vpop.f32.mrb[0].mxu1  ;;  %v19416_v35 = vadd.f32 %v1049_v25, %v873_v19 }
 0x23c   : > { %v1096_v27 = vpop.f32.mrb[1].mxu1  ;;  %v19468_v44 = vadd.f32 %v17579_v26, %v877_v41 }
 0x23d   : > { %v17580_v29 = vpop.f32.mrb[2].mxu1  ;;  %v19458_v43 = vadd.f32 %v1096_v27, %v877_v41 }
 0x23e   : > { %1143 = vrot.lane.b32.xlu0 %v19394_v21, %s24441_s7  ;;  %v1099_v30 = vpop.f32.mrb[3].mxu1  ;;  %v19482_v46 = vadd.f32 %v17580_v29, %v877_v41 }
 0x23f   : > { %1133 = vrot.lane.b32.xlu1 %v19402_v28, %s24437_s29  ;;  %v1053_v31 = vpop.f32.mrb[4].mxu0  ;;  %v19470_v45 = vadd.f32 %v1099_v30, %v877_v41 }
 0x240   : > { %v1055_v32 = vpop.f32.mrb[5].mxu0  ;;  %v19438_v38 = vadd.f32 %v1053_v31, %v869_v18 }
 0x241   : > { %v1057_v33 = vpop.f32.mrb[6].mxu0  ;;  %v19422_v36 = vadd.f32 %v1055_v32, %v873_v19 }
 0x242   : > { %1155 = vrot.lane.b32.xlu0 %v19394_v21, %s24439_s30  ;;  %v1059_v34 = vpop.f32.mrb[7].mxu0  ;;  %v19452_v42 = vadd.f32 %v1057_v33, %v869_v18 }
 0x243   : > { %1145 = vrot.lane.b32.xlu1 %v19402_v28, %s24441_s7  ;;  %v19432_v37 = vadd.f32 %v1059_v34, %v873_v19 }
 0x246   : > { %1171 = vrot.lane.b32.xlu0 %v19396_v23, %s24437_s29 }
 0x247   : > { %1157 = vrot.lane.b32.xlu1 %v19402_v28, %s24439_s30 }
 0x24a   : > { %1195 = vrot.lane.b32.xlu0 %v19396_v23, %s24439_s30 }
 0x24b   : > { %1173 = vrot.lane.b32.xlu1 %v19416_v35, %s24437_s29 }
 0x24e   : > { %1175 = vrot.lane.b32.xlu0 %v19422_v36, %s24437_s29 }
 0x24f   : > { %1185 = vrot.lane.b32.xlu1 %v19416_v35, %s24441_s7 }
 0x252   : > { %1187 = vrot.lane.b32.xlu0 %v19422_v36, %s24441_s7 }
 0x253   : > { %1197 = vrot.lane.b32.xlu1 %v19416_v35, %s24439_s30 }
 0x256   : > { %1199 = vrot.lane.b32.xlu0 %v19422_v36, %s24439_s30 }
 0x257   : > { %1177 = vrot.lane.b32.xlu1 %v19432_v37, %s24437_s29 }
 0x25a   : > { %1135 = vrot.lane.b32.xlu0 %v19438_v38, %s24437_s29 }
 0x25b   : > { %1189 = vrot.lane.b32.xlu1 %v19432_v37, %s24441_s7 }
 0x25e   : > { %1147 = vrot.lane.b32.xlu0 %v19438_v38, %s24441_s7 }
 0x25f   : > { %1201 = vrot.lane.b32.xlu1 %v19432_v37, %s24439_s30 }
 0x262   : > { %1159 = vrot.lane.b32.xlu0 %v19438_v38, %s24439_s30 }
 0x263   : > { %1137 = vrot.lane.b32.xlu1 %v19452_v42, %s24437_s29 }
 0x266   : > { %1211 = vrot.lane.b32.xlu0 %v19458_v43, %s24437_s29 }
 0x267   : > { %1149 = vrot.lane.b32.xlu1 %v19452_v42, %s24441_s7 }
 0x26a   : > { %1235 = vrot.lane.b32.xlu0 %v19458_v43, %s24439_s30 }
 0x26b   : > { %1161 = vrot.lane.b32.xlu1 %v19452_v42, %s24439_s30 }
 0x26e   : > { %1215 = vrot.lane.b32.xlu0 %v19468_v44, %s24437_s29 }
 0x26f   : > { %1213 = vrot.lane.b32.xlu1 %v19470_v45, %s24437_s29 }
 0x273   : > { %1223 = vrot.lane.b32.xlu1 %v19458_v43, %s24441_s7 }
 0x277   : > { %1225 = vrot.lane.b32.xlu1 %v19470_v45, %s24441_s7  ;;  %s24499_s7 = smov 64  }
 0x27b   : > { %1237 = vrot.lane.b32.xlu1 %v19470_v45, %s24439_s30  ;;  %s24503_s30 = sld [smem:[#allocation18_spill]] }
 0x27f   : > { %1217 = vrot.lane.b32.xlu1 %v19482_v46, %s24437_s29 }
 0x2ac   : > { %v1132_v47 = vpop.permute.xlu0 %1131 }
 0x2ad   : > { %v19486_v50 = vpop.permute.xlu1 %1183 }
 0x2ae   : > { %v1279_v14 = vcombine.low %v19396_v23, %v19486_v50  ;;  %v1280_v16 = vcombine.high %v19396_v23, %v19486_v50 }
 0x2b0   : > { %v1144_v53 = vpop.permute.xlu0 %1143 }
 0x2b1   : > { %v1134_v55 = vpop.permute.xlu1 %1133  ;;  %v1247_v57 = vcombine.low %v19394_v21, %v1144_v53  ;;  %v1248_v58 = vcombine.high %v19394_v21, %v1144_v53 }
 0x2b3   : > { %v1255_v1 = vrot.slane %v1247_v57, %v19491_v60  ;;  %v1262_v2 = vrot.slane %v1248_v58, %v19491_v60 }
 0x2b4   : > { %v1156_v59 = vpop.permute.xlu0 %1155 }
 0x2b5   : > { %v1263_v61 = vcombine.low %v1132_v47, %v1156_v59  ;;  %v1264_v62 = vcombine.high %v1132_v47, %v1156_v59  ;;  %v1146_v63 = vpop.permute.xlu1 %1145 }
 0x2b6   : > { %v1451_v5 = vcombine.low %v19402_v28, %v1146_v63  ;;  %v1452_v6 = vcombine.high %v19402_v28, %v1146_v63  ;;  %v1294_v63 = vrot.slane %v1280_v16, %v19491_v60 }
 0x2b7   : > { %v1271_v3 = vrot.slane %v1263_v61, %v19491_v60  ;;  %v1278_v4 = vrot.slane %v1264_v62, %v19491_v60  ;;  %v1287_v62 = vrot.slane %v1279_v14, %v19491_v60 }
 0x2b8   : > { %v1172_v7 = vpop.permute.xlu0 %1171  ;;  %v1459_v25 = vrot.slane %v1451_v5, %v19491_v60  ;;  %v1466_v26 = vrot.slane %v1452_v6, %v19491_v60 }
 0x2b9   : > { %v1311_v8 = vcombine.low %v1255_v1, %v1271_v3  ;;  %v1312_v9 = vcombine.high %v1255_v1, %v1271_v3  ;;  %v1327_v10 = vcombine.low %v1262_v2, %v1278_v4  ;;  %v1328_v11 = vcombine.high %v1262_v2, %v1278_v4  ;;  %v1158_v12 = vpop.permute.xlu1 %1157 }
 0x2ba   : > { %v1467_v18 = vcombine.low %v1134_v55, %v1158_v12  ;;  %v1468_v19 = vcombine.high %v1134_v55, %v1158_v12 }
 0x2bb   : > { %v1319_v20 = vrot.slane %v1311_v8, %v19494_v0  ;;  %v1326_v21 = vrot.slane %v1312_v9, %v19494_v0  ;;  %v1335_v22 = vrot.slane %v1327_v10, %v19494_v0  ;;  %v1342_v24 = vrot.slane %v1328_v11, %v19494_v0 }
 0x2bc   : > { %v1475_v27 = vrot.slane %v1467_v18, %v19491_v60  ;;  %v1482_v28 = vrot.slane %v1468_v19, %v19491_v60  ;;  %v1196_v29 = vpop.permute.xlu0 %1195 }
 0x2bd   : > { %v16257_v23 = vcombine.low %v1319_v20, %v1326_v21  ;;  %v16259_v30 = vcombine.high %v1319_v20, %v1326_v21  ;;  %v16261_v31 = vcombine.low %v1335_v22, %v1342_v24  ;;  %v16263_v32 = vcombine.high %v1335_v22, %v1342_v24  ;;  %v1174_v33 = vpop.permute.xlu1 %1173 }
 0x2be   : > { %v1515_v34 = vcombine.low %v1459_v25, %v1475_v27  ;;  %v1516_v41 = vcombine.high %v1459_v25, %v1475_v27  ;;  %v1531_v47 = vcombine.low %v1466_v26, %v1482_v28  ;;  %v1532_v48 = vcombine.high %v1466_v26, %v1482_v28 }
 0x2bf   : > { %v19515_v49 = vrot.slane %v16257_v23, %v19491_v60  ;;  %v19518_v50 = vrot.slane %v16259_v30, %v19491_v60  ;;  %v19521_v51 = vrot.slane %v16261_v31, %v19491_v60  ;;  %v19524_v52 = vrot.slane %v16263_v32, %v19491_v60 }
 0x2c0   : > { %v1523_v53 = vrot.slane %v1515_v34, %v19494_v0  ;;  %v1530_v54 = vrot.slane %v1516_v41, %v19494_v0  ;;  %v1539_v55 = vrot.slane %v1531_v47, %v19494_v0  ;;  %v1546_v56 = vrot.slane %v1532_v48, %v19494_v0  ;;  %v1176_v57 = vpop.permute.xlu0 %1175 }
 0x2c1   : > { %v1295_v58 = vcombine.low %v1172_v7, %v1196_v29  ;;  %v1296_v59 = vcombine.high %v1172_v7, %v1196_v29  ;;  %v1186_v61 = vpop.permute.xlu1 %1185  ;;  %v2127_v5 = vcombine.low %v19515_v49, %v19518_v50  ;;  %v2159_v6 = vcombine.low %v19521_v51, %v19524_v52 }
 0x2c2   : > { %v16265_v1 = vcombine.low %v1523_v53, %v1530_v54  ;;  %v16267_v2 = vcombine.high %v1523_v53, %v1530_v54  ;;  %v16269_v8 = vcombine.low %v1539_v55, %v1546_v56  ;;  %v16271_v9 = vcombine.high %v1539_v55, %v1546_v56 }
 0x2c3   : > { %v1303_v3 = vrot.slane %v1295_v58, %v19491_v60  ;;  %v1310_v4 = vrot.slane %v1296_v59, %v19491_v60  ;;  %v1483_v7 = vcombine.low %v19416_v35, %v1186_v61  ;;  %v1484_v10 = vcombine.high %v19416_v35, %v1186_v61 }
 0x2c4   : > { %v1188_v11 = vpop.permute.xlu0 %1187  ;;  %v19541_v20 = vrot.slane %v16265_v1, %v19491_v60  ;;  %v19544_v21 = vrot.slane %v16267_v2, %v19491_v60  ;;  %v19553_v28 = vrot.slane %v16269_v8, %v19491_v60  ;;  %v19556_v29 = vrot.slane %v16271_v9, %v19491_v60 }
 0x2c5   : > { %v1343_v12 = vcombine.low %v1287_v62, %v1303_v3  ;;  %v1344_v14 = vcombine.high %v1287_v62, %v1303_v3  ;;  %v1359_v16 = vcombine.low %v1294_v63, %v1310_v4  ;;  %v1360_v18 = vcombine.high %v1294_v63, %v1310_v4  ;;  %v1198_v19 = vpop.permute.xlu1 %1197 }
 0x2c6   : > { %v1687_v22 = vcombine.low %v19422_v36, %v1188_v11  ;;  %v1688_v24 = vcombine.high %v19422_v36, %v1188_v11  ;;  %v1499_v23 = vcombine.low %v1174_v33, %v1198_v19  ;;  %v1500_v30 = vcombine.high %v1174_v33, %v1198_v19 }
 0x2c7   : > { %v1351_v25 = vrot.slane %v1343_v12, %v19494_v0  ;;  %v1358_v35 = vrot.slane %v1344_v14, %v19494_v0  ;;  %v1367_v26 = vrot.slane %v1359_v16, %v19494_v0  ;;  %v1374_v27 = vrot.slane %v1360_v18, %v19494_v0 }
 0x2c8   : > { %v1200_v31 = vpop.permute.xlu0 %1199  ;;  %v1491_v32 = vrot.slane %v1483_v7, %v19491_v60  ;;  %v1498_v36 = vrot.slane %v1484_v10, %v19491_v60  ;;  %v1695_v34 = vrot.slane %v1687_v22, %v19491_v60  ;;  %v1702_v41 = vrot.slane %v1688_v24, %v19491_v60 }
 0x2c9   : > { %v19562_v47 = vpop.permute.xlu1 %1177  ;;  %v1507_v48 = vrot.slane %v1499_v23, %v19491_v60  ;;  %v1514_v53 = vrot.slane %v1500_v30, %v19491_v60  ;;  %v1703_v54 = vcombine.low %v1176_v57, %v1200_v31  ;;  %v1704_v55 = vcombine.high %v1176_v57, %v1200_v31 }
 0x2ca   : > { %v16258_v56 = vcombine.low %v1351_v25, %v1358_v35  ;;  %v16260_v58 = vcombine.high %v1351_v25, %v1358_v35  ;;  %v16262_v33 = vcombine.low %v1367_v26, %v1374_v27  ;;  %v16264_v59 = vcombine.high %v1367_v26, %v1374_v27 }
 0x2cb   : > { %v1547_v61 = vcombine.low %v1491_v32, %v1507_v48  ;;  %v1548_v62 = vcombine.high %v1491_v32, %v1507_v48  ;;  %v1563_v63 = vcombine.low %v1498_v36, %v1514_v53  ;;  %v1564_v1 = vcombine.high %v1498_v36, %v1514_v53 }
 0x2cc   : > { %v19566_v2 = vpop.permute.xlu0 %1135  ;;  %v1711_v3 = vrot.slane %v1703_v54, %v19491_v60  ;;  %v1718_v4 = vrot.slane %v1704_v55, %v19491_v60  ;;  %v19571_v9 = vrot.slane %v2127_v5, %v19494_v0  ;;  %v19574_v57 = vrot.slane %v2159_v6, %v19494_v0 }
 0x2cd   : > { %v1190_v8 = vpop.permute.xlu1 %1189  ;;  %v1555_v7 = vrot.slane %v1547_v61, %v19494_v0  ;;  %v1562_v10 = vrot.slane %v1548_v62, %v19494_v0  ;;  %v1571_v11 = vrot.slane %v1563_v63, %v19494_v0  ;;  %v1578_v12 = vrot.slane %v1564_v1, %v19494_v0 }
 0x2ce   : > { %v1751_v14 = vcombine.low %v1695_v34, %v1711_v3  ;;  %v1752_v16 = vcombine.high %v1695_v34, %v1711_v3  ;;  %v1767_v18 = vcombine.low %v1702_v41, %v1718_v4  ;;  %v1768_v19 = vcombine.high %v1702_v41, %v1718_v4 }
 0x2cf   : > { %v16266_v22 = vcombine.low %v1555_v7, %v1562_v10  ;;  %v16268_v24 = vcombine.high %v1555_v7, %v1562_v10  ;;  %v16270_v25 = vcombine.low %v1571_v11, %v1578_v12  ;;  %v16272_v5 = vcombine.high %v1571_v11, %v1578_v12 }
 0x2d0   : > { %v1759_v35 = vrot.slane %v1751_v14, %v19494_v0  ;;  %v1766_v6 = vrot.slane %v1752_v16, %v19494_v0  ;;  %v19583_v26 = vrot.slane %v1767_v18, %v19494_v0  ;;  %v19586_v27 = vrot.slane %v1768_v19, %v19494_v0  ;;  %v1148_v34 = vpop.permute.xlu0 %1147 }
 0x2d1   : > { %v1202_v23 = vpop.permute.xlu1 %1201  ;;  %v19589_v30 = vrot.slane %v16258_v56, %v19491_v60  ;;  %v19592_v31 = vrot.slane %v16260_v58, %v19491_v60  ;;  %v19595_v32 = vrot.slane %v16262_v33, %v19491_v60  ;;  %v19598_v36 = vrot.slane %v16264_v59, %v19491_v60 }
 0x2d2   : > { %v19601_v41 = vrot.slane %v16266_v22, %v19491_v60  ;;  %v19604_v48 = vrot.slane %v16268_v24, %v19491_v60  ;;  %v16274_v53 = vcombine.low %v1759_v35, %v1766_v6  ;;  %v16276_v54 = vcombine.high %v1759_v35, %v1766_v6 }
 0x2d3   : > { %v19607_v55 = vrot.slane %v16270_v25, %v19491_v60  ;;  %v19610_v56 = vrot.slane %v16272_v5, %v19491_v60  ;;  %v1891_v58 = vcombine.low %v19432_v37, %v1190_v8  ;;  %v2263_v33 = vcombine.low %v19541_v20, %v19544_v21 }
 0x2d4   : > { %v16278_v59 = vcombine.low %v19583_v26, %v19586_v27  ;;  %v16280_v61 = vcombine.high %v19583_v26, %v19586_v27  ;;  %v1892_v62 = vcombine.high %v19432_v37, %v1190_v8  ;;  %v2191_v63 = vcombine.low %v19571_v9, %v19574_v57  ;;  %v1160_v22 = vpop.permute.xlu0 %1159 }
 0x2d5   : > { %v19622_v1 = vpop.permute.xlu1 %1137  ;;  %v19625_v3 = vrot.slane %v16274_v53, %v19491_v60  ;;  %v19628_v4 = vrot.slane %v16276_v54, %v19491_v60  ;;  %v19631_v7 = vrot.slane %v2263_v33, %v19494_v0  ;;  %v2295_v10 = vcombine.low %v19553_v28, %v19556_v29 }
 0x2d6   : > { %v2128_v37 = vcombine.high %v19515_v49, %v19518_v50  ;;  %v2160_v8 = vcombine.high %v19521_v51, %v19524_v52  ;;  %v2264_v11 = vcombine.high %v19541_v20, %v19544_v21  ;;  %v2296_v12 = vcombine.high %v19553_v28, %v19556_v29 }
 0x2d7   : > { %v1899_v14 = vrot.slane %v1891_v58, %v19491_v60  ;;  %v19645_v16 = vrot.slane %v2295_v10, %v19494_v0  ;;  %v1655_v18 = vcombine.low %v19438_v38, %v1148_v34  ;;  %v1907_v19 = vcombine.low %v19562_v47, %v1202_v23 }
 0x2d8   : > { %v19650_v49 = vrot.slane %v2128_v37, %v19494_v0  ;;  %v19653_v50 = vrot.slane %v2160_v8, %v19494_v0  ;;  %v19656_v51 = vrot.slane %v2264_v11, %v19494_v0  ;;  %v19659_v52 = vrot.slane %v2296_v12, %v19494_v0 }
 0x2d9   : > { %v1150_v20 = vpop.permute.xlu1 %1149  ;;  %v1906_v21 = vrot.slane %v1892_v62, %v19491_v60  ;;  %v2327_v28 = vcombine.low %v19631_v7, %v19645_v16  ;;  %v1656_v29 = vcombine.high %v19438_v38, %v1148_v34  ;;  %v1908_v24 = vcombine.high %v19562_v47, %v1202_v23 }
 0x2da   : > { %v2193_v25 = vcombine.low %v19650_v49, %v19653_v50  ;;  %v2329_v5 = vcombine.low %v19656_v51, %v19659_v52  ;;  %v1915_v35 = vrot.slane %v1907_v19, %v19491_v60  ;;  %v1671_v6 = vcombine.low %v19566_v2, %v1160_v22 }
 0x2db   : > { %v2879_v53 = vpack.c.bf16 %v2327_v28, %v2191_v63  ;;  %v1663_v54 = vrot.slane %v1655_v18, %v19491_v60  ;;  %v1922_v58 = vrot.slane %v1908_v24, %v19491_v60  ;;  %v1672_v33 = vcombine.high %v19566_v2, %v1160_v22 }
 0x2dc   : > { %v2883_v38 = vpack.c.bf16 %v2329_v5, %v2193_v25  ;;  %v1955_v34 = vcombine.low %v1899_v14, %v1915_v35  ;;  %v1956_v47 = vcombine.high %v1899_v14, %v1915_v35  ;;  %v1679_v23 = vrot.slane %v1671_v6, %v19491_v60 }
 0x2dd   : > { %17585 = vmatprep.mubr.msk.bf16.mxu1 %vm2903_vm0, %v2879_v53  ;;  %v1670_v62 = vrot.slane %v1656_v29, %v19491_v60  ;;  %v1971_v10 = vcombine.low %v1906_v21, %v1922_v58  ;;  %v1972_v37 = vcombine.high %v1906_v21, %v1922_v58  ;;  %v1686_v8 = vrot.slane %v1672_v33, %v19491_v60  ;;  %v19682_v18 = vpop.permute.xlu1 %1161 }
 0x2de   : > { %17601 = vmatprep.mubr.msk.bf16.mxu0 %vm2903_vm0, %v2883_v38  ;;  %v1963_v63 = vrot.slane %v1955_v34, %v19494_v0  ;;  %v1970_v11 = vrot.slane %v1956_v47, %v19494_v0  ;;  %v1719_v2 = vcombine.low %v1663_v54, %v1679_v23  ;;  %v1720_v12 = vcombine.high %v1663_v54, %v1679_v23  ;;  %v1212_v54 = vpop.permute.xlu0 %1211 }
 0x2df   : > { %v1979_v14 = vrot.slane %v1971_v10, %v19494_v0  ;;  %v1986_v19 = vrot.slane %v1972_v37, %v19494_v0  ;;  %v1735_v22 = vcombine.low %v1670_v62, %v1686_v8  ;;  %v1736_v28 = vcombine.high %v1670_v62, %v1686_v8 }
 0x2e0   : > { %v16282_v29 = vcombine.low %v1963_v63, %v1970_v11  ;;  %v16284_v21 = vcombine.high %v1963_v63, %v1970_v11  ;;  %v1727_v24 = vrot.slane %v1719_v2, %v19494_v0  ;;  %v1734_v25 = vrot.slane %v1720_v12, %v19494_v0 }
 0x2e1   : > { %v16286_v5 = vcombine.low %v1979_v14, %v1986_v19  ;;  %v16288_v35 = vcombine.high %v1979_v14, %v1986_v19  ;;  %v1743_v6 = vrot.slane %v1735_v22, %v19494_v0  ;;  %v1750_v53 = vrot.slane %v1736_v28, %v19494_v0 }
 0x2e2   : > { %v16273_v58 = vcombine.low %v1727_v24, %v1734_v25  ;;  %v16275_v33 = vcombine.high %v1727_v24, %v1734_v25  ;;  %v1859_v38 = vcombine.low %v19452_v42, %v1150_v20  ;;  %v1860_v34 = vcombine.high %v19452_v42, %v1150_v20  ;;  %v19716_v20 = vpop.permute.xlu1 %1213 }
 0x2e3   : > { %v19696_v47 = vrot.slane %v16278_v59, %v19491_v60  ;;  %v19702_v23 = vrot.slane %v16280_v61, %v19491_v60  ;;  %v16277_v62 = vcombine.low %v1743_v6, %v1750_v53  ;;  %v16279_v10 = vcombine.high %v1743_v6, %v1750_v53 }
 0x2e4   : > { %v19705_v37 = vrot.slane %v16282_v29, %v19491_v60  ;;  %v19708_v8 = vrot.slane %v16284_v21, %v19491_v60  ;;  %v19711_v42 = vrot.slane %v16273_v58, %v19491_v60  ;;  %v19714_v59 = vrot.slane %v16275_v33, %v19491_v60  ;;  %v1236_v21 = vpop.permute.xlu0 %1235 }
 0x2e5   : > { %v19719_v26 = vrot.slane %v16286_v5, %v19491_v60  ;;  %v19722_v27 = vrot.slane %v16288_v35, %v19491_v60  ;;  %v2143_v61 = vcombine.low %v19589_v30, %v19592_v31  ;;  %v2175_v63 = vcombine.low %v19595_v32, %v19598_v36 }
 0x2e6   : > { %v1867_v11 = vrot.slane %v1859_v38, %v19491_v60  ;;  %v1874_v2 = vrot.slane %v1860_v34, %v19491_v60  ;;  %v2279_v12 = vcombine.low %v19601_v41, %v19604_v48  ;;  %v2311_v14 = vcombine.low %v19607_v55, %v19610_v56 }
 0x2e7   : > { %v19735_v19 = vrot.slane %v16277_v62, %v19491_v60  ;;  %v19738_v22 = vrot.slane %v16279_v10, %v19491_v60  ;;  %v19741_v28 = vrot.slane %v2143_v61, %v19494_v0  ;;  %v19744_v29 = vrot.slane %v2175_v63, %v19494_v0  ;;  %v1224_v62 = vpop.permute.xlu1 %1223 }
 0x2e8   : > { %v19749_v25 = vrot.slane %v2279_v12, %v19494_v0  ;;  %v19752_v5 = vrot.slane %v2311_v14, %v19494_v0  ;;  %v2144_v35 = vcombine.high %v19589_v30, %v19592_v31  ;;  %v2400_v6 = vcombine.high %v19711_v42, %v19714_v59 }
 0x2e9   : > { %v2195_v53 = vcombine.low %v19741_v28, %v19744_v29  ;;  %v2176_v58 = vcombine.high %v19595_v32, %v19598_v36  ;;  %v2280_v33 = vcombine.high %v19601_v41, %v19604_v48  ;;  %v2312_v30 = vcombine.high %v19607_v55, %v19610_v56 }
 0x2ea   : > { %v2331_v38 = vcombine.low %v19749_v25, %v19752_v5  ;;  %v19767_v34 = vrot.slane %v2144_v35, %v19494_v0  ;;  %v1399_v31 = vcombine.low %v1212_v54, %v1236_v21  ;;  %v1400_v32 = vcombine.high %v1212_v54, %v1236_v21 }
 0x2eb   : > { %v19772_v10 = vrot.slane %v2176_v58, %v19494_v0  ;;  %v19775_v61 = vrot.slane %v2280_v33, %v19494_v0  ;;  %v1875_v36 = vcombine.low %v19622_v1, %v19682_v18  ;;  %v2432_v41 = vcombine.high %v19735_v19, %v19738_v22 }
 0x2ec   : > { %v2887_v48 = vpack.c.bf16 %v2331_v38, %v2195_v53  ;;  %v19782_v63 = vrot.slane %v2312_v30, %v19494_v0  ;;  %v1876_v55 = vcombine.high %v19622_v1, %v19682_v18  ;;  %v1407_v12 = vrot.slane %v1399_v31, %v19491_v60 }
 0x2ed   : > { %v2197_v56 = vcombine.low %v19767_v34, %v19772_v10  ;;  %v1883_v54 = vrot.slane %v1875_v36, %v19491_v60  ;;  %v1383_v14 = vcombine.low %v19458_v43, %v1224_v62  ;;  %v1384_v1 = vcombine.high %v19458_v43, %v1224_v62 }
 0x2ee   : > { %18073 = vmatprep.subr.msk.bf16.mxu1 %vm2903_vm0, %v2887_v48  ;;  %v2333_v21 = vcombine.low %v19775_v61, %v19782_v63  ;;  %v2911_v35 = vsel %vm2903_vm0, %v2887_v48, 0  ;;  %v1890_v53 = vrot.slane %v1876_v55, %v19491_v60  ;;  %v1414_v18 = vrot.slane %v1400_v32, %v19491_v60 }
 0x2ef   : > { %17582 = vmatpush3.bf16.xpose.msra.mxu1 %v2911_v35  ;;  %v1923_v58 = vcombine.low %v1867_v11, %v1883_v54  ;;  %v1924_v33 = vcombine.high %v1867_v11, %v1883_v54  ;;  %v1391_v38 = vrot.slane %v1383_v14, %v19491_v60  ;;  %v1398_v39 = vrot.slane %v1384_v1, %v19491_v60 }
 0x2f0   : > { %v2891_v30 = vpack.c.bf16 %v2333_v21, %v2197_v56  ;;  %v1939_v31 = vcombine.low %v1874_v2, %v1890_v53  ;;  %v1940_v36 = vcombine.high %v1874_v2, %v1890_v53  ;;  %v2431_v2 = vcombine.low %v19735_v19, %v19738_v22  ;;  %v1226_v22 = vpop.permute.xlu1 %1225 }
 0x2f1   : > { %v1931_v24 = vrot.slane %v1923_v58, %v19494_v0  ;;  %v1938_v48 = vrot.slane %v1924_v33, %v19494_v0  ;;  %v1415_v17 = vcombine.low %v1391_v38, %v1407_v12  ;;  %v1416_v55 = vcombine.high %v1391_v38, %v1407_v12 }
 0x2f2   : > { %18077 = vmatprep.subr.msk.bf16.mxu0 %vm2903_vm0, %v2891_v30  ;;  %v3033_v43 = vsel %vm2903_vm0, %v2891_v30, 0  ;;  %v1947_v62 = vrot.slane %v1939_v31, %v19494_v0  ;;  %v1954_v11 = vrot.slane %v1940_v36, %v19494_v0  ;;  %v1431_v32 = vcombine.low %v1398_v39, %v1414_v18 }
 0x2f3   : > { %17598 = vmatpush3.bf16.xpose.msra.mxu0 %v3033_v43  ;;  %v16281_v56 = vcombine.low %v1931_v24, %v1938_v48  ;;  %v16283_v54 = vcombine.high %v1931_v24, %v1938_v48  ;;  %v2415_v14 = vcombine.low %v19625_v3, %v19628_v4  ;;  %v19811_v12 = vrot.slane %v2400_v6, %v19494_v0 }
 0x2f4   : > { %v16285_v21 = vcombine.low %v1947_v62, %v1954_v11  ;;  %v16287_v35 = vcombine.high %v1947_v62, %v1954_v11  ;;  %v1432_v53 = vcombine.high %v1398_v39, %v1414_v18  ;;  %v19814_v1 = vrot.slane %v2432_v41, %v19494_v0 }
 0x2f5   : > { %v2479_v58 = vrot.slane %v16281_v56, %v19491_v60  ;;  %v2495_v33 = vrot.slane %v16283_v54, %v19491_v60  ;;  %v19819_v19 = vrot.slane %v1415_v17, %v19494_v0  ;;  %v19824_v6 = vrot.slane %v1416_v55, %v19494_v0 }
 0x2f6   : > { %v2511_v24 = vrot.slane %v16285_v21, %v19491_v60  ;;  %v2527_v38 = vrot.slane %v16287_v35, %v19491_v60  ;;  %v19827_v39 = vrot.slane %v1431_v32, %v19494_v0  ;;  %v19830_v18 = vrot.slane %v2415_v14, %v19494_v0 }
 0x2f7   : > { %v2536_v41 = vcombine.high %v2479_v58, %v2495_v33  ;;  %v2447_v30 = vcombine.low %v19696_v47, %v19702_v23  ;;  %v2551_v17 = vcombine.low %v19705_v37, %v19708_v8  ;;  %v2535_v31 = vcombine.low %v2479_v58, %v2495_v33 }
 0x2f8   : > { %v2567_v36 = vcombine.low %v2511_v24, %v2527_v38  ;;  %v2568_v48 = vcombine.high %v2511_v24, %v2527_v38  ;;  %v19837_v43 = vrot.slane %v1432_v53, %v19494_v0  ;;  %v2583_v32 = vcombine.low %v19719_v26, %v19722_v27  ;;  %v1238_v24 = vpop.permute.xlu1 %1237 }
 0x2f9   : > { %v19840_v55 = vrot.slane %v2536_v41, %v19494_v0  ;;  %v19843_v62 = vrot.slane %v2447_v30, %v19494_v0  ;;  %v19846_v11 = vrot.slane %v2551_v17, %v19494_v0  ;;  %v2416_v54 = vcombine.high %v19625_v3, %v19628_v4 }
 0x2fa   : > { %v19851_v56 = vrot.slane %v2568_v48, %v19494_v0  ;;  %v2448_v14 = vcombine.high %v19696_v47, %v19702_v23  ;;  %v2552_v21 = vcombine.high %v19705_v37, %v19708_v8  ;;  %v19862_v53 = vrot.slane %v2583_v32, %v19494_v0 }
 0x2fb   : > { %v2467_v35 = vcombine.low %v19830_v18, %v19843_v62  ;;  %v2584_v58 = vcombine.high %v19719_v26, %v19722_v27  ;;  %v2196_v33 = vcombine.high %v19741_v28, %v19744_v29  ;;  %v19869_v3 = vrot.slane %v2416_v54, %v19494_v0 }
 0x2fc   : > { %v19872_v4 = vrot.slane %v2448_v14, %v19494_v0  ;;  %v19875_v47 = vrot.slane %v2552_v21, %v19494_v0  ;;  %v2332_v23 = vcombine.high %v19749_v25, %v19752_v5  ;;  %v2603_v37 = vcombine.low %v19846_v11, %v19862_v53 }
 0x2fd   : > { %v19882_v8 = vrot.slane %v2584_v58, %v19494_v0  ;;  %v1587_v26 = vcombine.low %v19470_v45, %v1226_v22  ;;  %v1588_v27 = vcombine.high %v19470_v45, %v1226_v22  ;;  %v1603_v38 = vcombine.low %v19716_v20, %v1238_v24 }
 0x2fe   : > { %v2469_v28 = vcombine.low %v19869_v3, %v19872_v4  ;;  %v2889_v29 = vpack.c.bf16 %v2332_v23, %v2196_v33  ;;  %v1604_v41 = vcombine.high %v19716_v20, %v1238_v24  ;;  %v2888_v30 = vpack.c.bf16 %v2603_v37, %v2467_v35 }
 0x2ff   : > { %v2605_v25 = vcombine.low %v19875_v47, %v19882_v8  ;;  %v1595_v5 = vrot.slane %v1587_v26, %v19491_v60  ;;  %v1602_v17 = vrot.slane %v1588_v27, %v19491_v60  ;;  %v1611_v48 = vrot.slane %v1603_v38, %v19491_v60 }
 0x300   : > { %v1618_v45 = vrot.slane %v1604_v41, %v19491_v60  ;;  %v24497_v22 = vcombine.low %v19711_v42, %v19714_v59  ;;  %v19903_v20 = vrot.slane %v2431_v2, %v19494_v0  ;;  %18074 = vmatprep.subr.msk.bf16.mxu1 %vm2903_vm0, %v2888_v30  ;;  %v2914_v14 = vsel %vm2903_vm0, %v2888_v30, 0 }
 0x301   : > { %v2892_v54 = vpack.c.bf16 %v2605_v25, %v2469_v28  ;;  %v19908_v21 = vrot.slane %v2535_v31, %v19494_v0  ;;  %v19911_v35 = vrot.slane %v2567_v36, %v19494_v0  ;;  %17584 = vmatpush3.bf16.xpose.msra.mxu1 %v2914_v14  ;;  %v1619_v58 = vcombine.low %v1595_v5, %v1611_v48 }
 0x302   : > { %v19900_v32 = vrot.slane %v24497_v22, %v19494_v0  ;;  %v1620_v33 = vcombine.high %v1595_v5, %v1611_v48  ;;  %v1635_v42 = vcombine.low %v1602_v17, %v1618_v45  ;;  %v1636_v59 = vcombine.high %v1602_v17, %v1618_v45  ;;  %18075 = vmatprep.subr.msk.bf16.mxu1 %vm2903_vm0, %v2889_v29 }
 0x303   : > { %18078 = vmatprep.subr.msk.bf16.mxu0 %vm2903_vm0, %v2892_v54  ;;  %v3036_v2 = vsel %vm2903_vm0, %v2892_v54, 0  ;;  %v2599_v31 = vcombine.low %v19908_v21, %v19911_v35  ;;  %v1627_v36 = vrot.slane %v1619_v58, %v19494_v0  ;;  %v2465_v28 = vcombine.low %v19811_v12, %v19814_v1 }
 0x304   : > { %v2463_v24 = vcombine.low %v19900_v32, %v19903_v20  ;;  %17600 = vmatpush3.bf16.xpose.msra.mxu0 %v3036_v2  ;;  %v1634_v23 = vrot.slane %v1620_v33, %v19494_v0  ;;  %v1643_v37 = vrot.slane %v1635_v42, %v19494_v0  ;;  %v1650_v26 = vrot.slane %v1636_v59, %v19494_v0 }
 0x305   : > { %v2601_v38 = vcombine.low %v19840_v55, %v19851_v56  ;;  %v2607_v41 = vcombine.low %v19819_v19, %v19824_v6  ;;  %v16289_v30 = vcombine.high %v19819_v19, %v19824_v6  ;;  %v2623_v25 = vcombine.low %v19827_v39, %v19837_v43 }
 0x306   : > { %v2880_v27 = vpack.c.bf16 %v2599_v31, %v2463_v24  ;;  %v16290_v5 = vcombine.high %v19827_v39, %v19837_v43  ;;  %v2468_v48 = vcombine.high %v19830_v18, %v19843_v62  ;;  %v2604_v45 = vcombine.high %v19846_v11, %v19862_v53 }
 0x307   : > { %v2884_v17 = vpack.c.bf16 %v2601_v38, %v2465_v28  ;;  %v2328_v22 = vcombine.high %v19631_v7, %v19645_v16  ;;  %v2675_v54 = vcombine.low %v1627_v36, %v1634_v23  ;;  %v16291_v14 = vcombine.high %v1627_v36, %v1634_v23 }
 0x308   : > { %v2192_v19 = vcombine.high %v19571_v9, %v19574_v57  ;;  %v2691_v6 = vcombine.low %v1643_v37, %v1650_v26  ;;  %v16292_v58 = vcombine.high %v1643_v37, %v1650_v26  ;;  %17586 = vmatmul.mubr.msk.bf16.vlgmr.msra.gmra.mrb[4].mxu1 %vm2903_vm0, %v2880_v27  ;;  %v2972_v39 = vsel %vm2903_vm0, %v2889_v29, 0 }
 0x309   : > { %v2890_v43 = vpack.c.bf16 %v2604_v45, %v2468_v48  ;;  %17590 = vmatpush3.bf16.xpose.msra.mxu1 %v2972_v39  ;;  %v2614_v62 = vrot.slane %v2607_v41, %v19491_v60  ;;  %v2622_v11 = vrot.slane %v16289_v30, %v19491_v60  ;;  %v2630_v7 = vrot.slane %v2623_v25, %v19491_v60 }
 0x30a   : > { %v2881_v18 = vpack.c.bf16 %v2328_v22, %v2192_v19  ;;  %v2638_v9 = vrot.slane %v16290_v5, %v19491_v60  ;;  %v2682_v16 = vrot.slane %v2675_v54, %v19491_v60  ;;  %v2690_v53 = vrot.slane %v16291_v14, %v19491_v60 }
 0x30b   : > { %17602 = vmatmul.mubr.msk.bf16.vlgmr.msra.gmra.mrb[8].mxu0 %vm2903_vm0, %v2884_v17  ;;  %18076 = vmatprep.subr.msk.bf16.mxu1 %vm2903_vm0, %v2890_v43  ;;  %v2639_v57 = vcombine.low %v2614_v62, %v2622_v11  ;;  %v2334_v29 = vcombine.high %v19775_v61, %v19782_v63  ;;  %v2698_v42 = vrot.slane %v2691_v6, %v19491_v60  ;;  %v2975_v61 = vsel %vm2903_vm0, %v2890_v43, 0 }
 0x30c   : > { %17593 = vmatprep.mubr.msk.bf16.mxu1 %vm2903_vm0, %v2881_v18  ;;  %v2655_v33 = vcombine.low %v2630_v7, %v2638_v9  ;;  %v2706_v59 = vrot.slane %v16292_v58, %v19491_v60  ;;  %v2198_v2 = vcombine.high %v19767_v34, %v19772_v10  ;;  %v2707_v24 = vcombine.low %v2682_v16, %v2690_v53 }
 0x30d   : > { %v2647_v31 = vrot.slane %v2639_v57, %v19494_v0  ;;  %v2640_v37 = vcombine.high %v2614_v62, %v2622_v11  ;;  %v2656_v27 = vcombine.high %v2630_v7, %v2638_v9  ;;  %v2708_v28 = vcombine.high %v2682_v16, %v2690_v53  ;;  %v749_v11 = vld [vmem:[%s24498_s28 + $0x10] sm:$0xff] }
 0x30e   : > { %v2663_v36 = vrot.slane %v2655_v33, %v19494_v0  ;;  %v2723_v23 = vcombine.low %v2698_v42, %v2706_v59  ;;  %v2715_v26 = vrot.slane %v2707_v24, %v19494_v0  ;;  %v2893_v63 = vpack.c.bf16 %v2334_v29, %v2198_v2  ;;  %v757_v9 = vld [vmem:[%s24498_s28 + $0x50] sm:$0xff]  ;;  %v748_v2 = vld [vmem:[%s24498_s28 + $0x8] sm:$0xff] }
 0x30f   : > { %v2600_v34 = vcombine.high %v19908_v21, %v19911_v35  ;;  %v2654_v10 = vrot.slane %v2640_v37, %v19494_v0  ;;  %v2670_v41 = vrot.slane %v2656_v27, %v19494_v0  ;;  %v2722_v5 = vrot.slane %v2708_v28, %v19494_v0  ;;  %v755_v27 = vld [vmem:[%s24498_s28 + $0x40] sm:$0xff]  ;;  %v756_v28 = vld [vmem:[%s24498_s28 + $0x48] sm:$0xff] }
 0x310   : > { %v2731_v38 = vrot.slane %v2723_v23, %v19494_v0  ;;  %v2671_v30 = vcombine.low %v2647_v31, %v2663_v36  ;;  %v2724_v17 = vcombine.high %v2698_v42, %v2706_v59  ;;  %v2330_v48 = vcombine.high %v19656_v51, %v19659_v52  ;;  %v747_v42 = vld [vmem:[%s24498_s28] sm:$0xff] }
 0x311   : > { %17592 = vmatpush3.bf16.xpose.msra.mxu1 %v2975_v61  ;;  %v2673_v45 = vcombine.low %v2654_v10, %v2670_v41  ;;  %v2674_v22 = vcombine.high %v2654_v10, %v2670_v41  ;;  %v2464_v54 = vcombine.high %v19900_v32, %v19903_v20  ;;  %v2606_v35 = vcombine.high %v19875_v47, %v19882_v8  ;;  %v750_v10 = vld [vmem:[%s24498_s28 + $0x18] sm:$0xff] }
 0x312   : > { %18079 = vmatprep.subr.msk.bf16.mxu1 %vm2903_vm0, %v2893_v63  ;;  %v2739_v25 = vcombine.low %v2715_v26, %v2731_v38  ;;  %v2738_v14 = vrot.slane %v2724_v17, %v19494_v0  ;;  %v2194_v19 = vcombine.high %v19650_v49, %v19653_v50  ;;  %v2470_v58 = vcombine.high %v19869_v3, %v19872_v4 }
 0x313   : > { %v2882_v6 = vpack.c.bf16 %v2600_v34, %v2464_v54  ;;  %v3094_v32 = vsel %vm2903_vm0, %v2893_v63, 0  ;;  %v2740_v49 = vcombine.high %v2715_v26, %v2731_v38  ;;  %v2672_v50 = vcombine.high %v2647_v31, %v2663_v36  ;;  %v752_v54 = vld [vmem:[%s24498_s28 + $0x28] sm:$0xff] }
 0x314   : > { %v2895_v21 = vpack.c.bf16 %v2739_v25, %v2671_v30  ;;  %v2741_v51 = vcombine.low %v2722_v5, %v2738_v14  ;;  %v2742_v52 = vcombine.high %v2722_v5, %v2738_v14  ;;  %v2885_v39 = vpack.c.bf16 %v2330_v48, %v2194_v19  ;;  %v753_v5 = vld [vmem:[%s24498_s28 + $0x30] sm:$0xff]  ;;  %v754_v48 = vld [vmem:[%s24498_s28 + $0x38] sm:$0xff] }
 0x315   : > { %v2894_v20 = vpack.c.bf16 %v2606_v35, %v2470_v58  ;;  %v2897_v4 = vpack.c.bf16 %v2740_v49, %v2672_v50  ;;  %v2602_v43 = vcombine.high %v19840_v55, %v19851_v56  ;;  %v2466_v18 = vcombine.high %v19811_v12, %v19814_v1  ;;  %v758_v12 = vld [vmem:[%s24498_s28 + $0x58] sm:$0xff] }
 0x316   : > { %17613 = vmatprep.subr.bf16.mxu0 %v2895_v21  ;;  %v19985_v47 = vpack.c.bf16 %v2741_v51, %v2673_v45  ;;  %v19987_v8 = vpack.c.bf16 %v2742_v52, %v2674_v22  ;;  %v762_v50 = vld [vmem:[%s24498_s28 + $0x78] sm:$0xff] }
 0x317   : > { %17614 = vmatpush3.bf16.msra.mxu0 %v2895_v21  ;;  %v3097_v3 = vsel %vm2903_vm0, %v2894_v20, 0  ;;  %v2886_v62 = vpack.c.bf16 %v2602_v43, %v2466_v18  ;;  %v760_v43 = vld [vmem:[%s24498_s28 + $0x68] sm:$0xff] }
 0x318   : > { %17594 = vmatmul.mubr.msk.bf16.vlgmr.msra.gmra.mrb[8].mxu1 %vm2903_vm0, %v2882_v6  ;;  %v751_v6 = vld [vmem:[%s24498_s28 + $0x20] sm:$0xff] }
 0x319   : > { %17606 = vmatpush3.bf16.xpose.msra.mxu1 %v3094_v32  ;;  %17609 = vmatprep.mubr.msk.bf16.mxu1 %vm2903_vm0, %v2885_v39 }
 0x31a   : > { %18080 = vmatprep.subr.msk.bf16.mxu1 %vm2903_vm0, %v2894_v20 }
 0x321   : > { %17608 = vmatpush3.bf16.xpose.msra.mxu1 %v3097_v3 }
 0x322   : > { %17621 = vmatprep.subr.bf16.mxu1 %v2897_v4 }
 0x328   : > { %17610 = vmatmul.mubr.msk.bf16.vlgmr.msra.gmra.mrb[12].mxu1 %vm2903_vm0, %v2886_v62 }
 0x329   : > { %17622 = vmatpush3.bf16.msra.mxu1 %v2897_v4 }
 0x3db   : > { %v17587_v7 = vpop.f32.mrb[4].mxu1 }
 0x3dc   : > { %v20003_v57 = vadd.f32 %v17587_v7, %v749_v11  ;;  %v2950_v16 = vpop.f32.mrb[5].mxu1 }
 0x3dd   : > { %v17588_v56 = vpop.f32.mrb[6].mxu1  ;;  %v20020_v36 = vadd.f32 %v2950_v16, %v747_v42  ;;  %v761_v16 = vld [vmem:[%s24498_s28 + $0x70] sm:$0xff] }
 0x3de   : > { %v17603_v55 = vpop.f32.mrb[8].mxu0  ;;  %v2953_v29 = vpop.f32.mrb[7].mxu1  ;;  %v3154_v33 = vsel %vm2903_vm0, %v20003_v57, -inf  ;;  %v20045_v41 = vadd.f32 %v17588_v56, %v750_v10  ;;  %v759_v56 = vld [vmem:[%s24498_s28 + $0x60] sm:$0xff] }
 0x3df   : > { %v20008_v1 = vadd.f32 %v17603_v55, %v757_v9  ;;  %v3072_v53 = vpop.f32.mrb[9].mxu0  ;;  %3155 = vmax.xlane.f32.xlu0 %v3154_v33  ;;  %v20022_v23 = vadd.f32 %v2953_v29, %v748_v2  ;;  %v3148_v34 = vsel %vm2903_vm0, %v20020_v36, -inf  ;;  %v20113_v33 = vpop.permute.xlu0 %1215 }
 0x3e0   : > { %v17604_v59 = vpop.f32.mrb[10].mxu0  ;;  %v20034_v61 = vadd.f32 %v3072_v53, %v755_v27  ;;  %v3157_v19 = vsel %vm2903_vm0, %v20045_v41, -inf  ;;  %v20116_v2 = vpop.permute.xlu1 %1217 }
 0x3e1   : > { %v20018_v24 = vadd.f32 %v17604_v59, %v758_v12  ;;  %v3075_v31 = vpop.f32.mrb[11].mxu0  ;;  %v3178_v26 = vsel %vm2903_vm0, %v20008_v1, -inf  ;;  %v3151_v38 = vsel %vm2903_vm0, %v20022_v23, -inf }
 0x3e2   : > { %v20036_v63 = vadd.f32 %v3075_v31, %v756_v28  ;;  %v3172_v25 = vsel %vm2903_vm0, %v20034_v61, -inf }
 0x3e3   : > { %v3181_v37 = vsel %vm2903_vm0, %v20018_v24, -inf  ;;  %3179 = vmax.xlane.f32.xlu0 %v3178_v26 }
 0x3e4   : > { %3182 = vmax.xlane.f32.xlu1 %v3181_v37  ;;  %v3175_v30 = vsel %vm2903_vm0, %v20036_v63, -inf }
 0x3e7   : > { %3149 = vmax.xlane.f32.xlu0 %v3148_v34 }
 0x3e8   : > { %3152 = vmax.xlane.f32.xlu1 %v3151_v38 }
 0x3eb   : > { %v17595_v17 = vpop.f32.mrb[8].mxu1  ;;  %3173 = vmax.xlane.f32.xlu0 %v3172_v25 }
 0x3ec   : > { %3176 = vmax.xlane.f32.xlu1 %v3175_v30  ;;  %v3011_v45 = vpop.f32.mrb[9].mxu1  ;;  %v20060_v21 = vadd.f32 %v17595_v17, %v753_v5 }
 0x3ed   : > { %v17596_v22 = vpop.f32.mrb[10].mxu1  ;;  %v20073_v52 = vadd.f32 %v3011_v45, %v751_v6 }
 0x3ee   : > { %v20062_v35 = vadd.f32 %v17596_v22, %v754_v48  ;;  %v3014_v14 = vpop.f32.mrb[11].mxu1  ;;  %v3166_v39 = vsel %vm2903_vm0, %v20060_v21, -inf }
 0x3ef   : > { %3158 = vmax.xlane.f32.xlu0 %v3157_v19  ;;  %v20069_v58 = vadd.f32 %v3014_v14, %v752_v54  ;;  %v3160_v20 = vsel %vm2903_vm0, %v20073_v52, -inf }
 0x3f0   : > { %v3169_v51 = vsel %vm2903_vm0, %v20062_v35, -inf }
 0x3f1   : > { %3170 = vmax.xlane.f32.xlu1 %v3169_v51  ;;  %v3163_v32 = vsel %vm2903_vm0, %v20069_v58, -inf }
 0x3f3   : > { %3167 = vmax.xlane.f32.xlu0 %v3166_v39 }
 0x3f5   : > { %3164 = vmax.xlane.f32.xlu1 %v3163_v32 }
 0x3f7   : > { %3161 = vmax.xlane.f32.xlu0 %v3160_v20 }
 0x3fb   : > { %v17611_v49 = vpop.f32.mrb[12].mxu1 }
 0x3fc   : > { %v3133_v3 = vpop.f32.mrb[13].mxu1  ;;  %v20102_v55 = vadd.f32 %v17611_v49, %v761_v16 }
 0x3fd   : > { %v17612_v4 = vpop.f32.mrb[14].mxu1  ;;  %v20107_v12 = vadd.f32 %v3133_v3, %v759_v56 }
 0x3fe   : > { %v20087_v18 = vadd.f32 %v17612_v4, %v762_v50  ;;  %v3136_v62 = vpop.f32.mrb[15].mxu1  ;;  %v3190_v53 = vsel %vm2903_vm0, %v20102_v55, -inf }
 0x3ff   : > { %v20089_v11 = vadd.f32 %v3136_v62, %v760_v43  ;;  %v3184_v29 = vsel %vm2903_vm0, %v20107_v12, -inf }
 0x400   : > { %v3193_v7 = vsel %vm2903_vm0, %v20087_v18, -inf }
 0x401   : > { %3194 = vmax.xlane.f32.xlu1 %v3193_v7  ;;  %v3187_v9 = vsel %vm2903_vm0, %v20089_v11, -inf }
 0x405   : > { %3188 = vmax.xlane.f32.xlu1 %v3187_v9 }
 0x40d   : > { %1227 = vrot.lane.b32.xlu0 %v19468_v44, %s24499_s7 }
 0x416   : > { %1229 = vrot.lane.b32.xlu1 %v19482_v46, %s24499_s7 }
 0x42c   : > { %3191 = vmax.xlane.f32.xlu0 %v3190_v53 }
 0x430   : > { %3185 = vmax.xlane.f32.xlu0 %v3184_v29 }
 0x46c   : > { %v3156_v42 = vpop.xlane.xlu0 %3155 }
 0x46d   : > { %v3198_v59 = vsub.f32 %v20003_v57, %v3156_v42 }
 0x46f   : > { %v3216_v31 = vmul.f32 1.442695, %v3198_v59 }
 0x470   : > { %v3180_v37 = vpop.xlane.xlu0 %3179 }
 0x471   : > { %18373 = vpow2.f32 %v3216_v31  ;;  %v3183_v26 = vpop.xlane.xlu1 %3182 }
 0x472   : > { %v3207_v29 = vsub.f32 %v20018_v24, %v3183_v26 }
 0x474   : > { %v3150_v27 = vpop.xlane.xlu0 %3149 }
 0x475   : > { %v3196_v28 = vsub.f32 %v20020_v36, %v3150_v27  ;;  %v3153_v34 = vpop.xlane.xlu1 %3152 }
 0x476   : > { %v3197_v25 = vsub.f32 %v20022_v23, %v3153_v34 }
 0x477   : > { %v3212_v38 = vmul.f32 1.442695, %v3196_v28 }
 0x478   : > { %v3174_v10 = vpop.xlane.xlu0 %3173  ;;  %v3214_v48 = vmul.f32 1.442695, %v3197_v25 }
 0x479   : > { %18375 = vpow2.f32 %v3212_v38  ;;  %v3177_v51 = vpop.xlane.xlu1 %3176  ;;  %v3204_v62 = vsub.f32 %v20034_v61, %v3174_v10 }
 0x47a   : > { %v3205_v16 = vsub.f32 %v20036_v63, %v3177_v51 }
 0x47b   : > { %v20119_v30 = vpop.eup %18373  ;;  %v3228_v53 = vmul.f32 1.442695, %v3204_v62 }
 0x47c   : > { %v3159_v5 = vpop.xlane.xlu0 %3158  ;;  %v3250_v57 = vsel %vm2903_vm0, %v20119_v30, 0.0  ;;  %v3230_v42 = vmul.f32 1.442695, %v3205_v16 }
 0x47d   : > { %v3199_v17 = vsub.f32 %v20045_v41, %v3159_v5  ;;  %3251 = vadd.xlane.f32.xlu0 %v3250_v57 }
 0x47e   : > { %v3171_v32 = vpop.xlane.xlu1 %3170 }
 0x47f   : > { %v3218_v45 = vmul.f32 1.442695, %v3199_v17  ;;  %v3203_v50 = vsub.f32 %v20062_v35, %v3171_v32 }
 0x480   : > { %v3168_v19 = vpop.xlane.xlu0 %3167 }
 0x481   : > { %18377 = vpow2.f32 %v3218_v45  ;;  %v3202_v20 = vsub.f32 %v20060_v21, %v3168_v19  ;;  %v3226_v7 = vmul.f32 1.442695, %v3203_v50 }
 0x482   : > { %18379 = vpow2.f32 %v3214_v48  ;;  %v3165_v4 = vpop.xlane.xlu1 %3164 }
 0x483   : > { %v20125_v36 = vpop.eup %18375  ;;  %v3224_v3 = vmul.f32 1.442695, %v3202_v20  ;;  %v3201_v43 = vsub.f32 %v20069_v58, %v3165_v4 }
 0x484   : > { %v3244_v22 = vsel %vm2903_vm0, %v20125_v36, 0.0  ;;  %v3162_v6 = vpop.xlane.xlu0 %3161 }
 0x485   : > { %3245 = vadd.xlane.f32.xlu0 %v3244_v22  ;;  %v3200_v39 = vsub.f32 %v20073_v52, %v3162_v6  ;;  %v3222_v56 = vmul.f32 1.442695, %v3201_v43  ;;  %v3206_v52 = vsub.f32 %v20008_v1, %v3180_v37  ;;  %v3234_v1 = vmul.f32 1.442695, %v3207_v29 }
 0x487   : > { %v3220_v49 = vmul.f32 1.442695, %v3200_v39  ;;  %v3232_v58 = vmul.f32 1.442695, %v3206_v52 }
 0x488   : > { %v20148_v21 = vpop.permute.xlu0 %1227 }
 0x489   : > { %18381 = vpow2.f32 %v3220_v49  ;;  %v1791_v62 = vcombine.low %v19468_v44, %v20148_v21 }
 0x48a   : > { %18383 = vpow2.f32 %v3224_v3 }
 0x48b   : > { %v20129_v54 = vpop.eup %18377  ;;  %18385 = vpow2.f32 %v3226_v7  ;;  %v1792_v7 = vcombine.high %v19468_v44, %v20148_v21 }
 0x48c   : > { %v3253_v23 = vsel %vm2903_vm0, %v20129_v54, 0.0  ;;  %v20133_v14 = vpop.eup %18379  ;;  %18387 = vpow2.f32 %v3222_v56 }
 0x48d   : > { %3254 = vadd.xlane.f32.xlu1 %v3253_v23  ;;  %v3247_v41 = vsel %vm2903_vm0, %v20133_v14, 0.0  ;;  %18389 = vpow2.f32 %v3228_v53  ;;  %v1799_v53 = vrot.slane %v1791_v62, %v19491_v60  ;;  %v1806_v29 = vrot.slane %v1792_v7, %v19491_v60 }
 0x48e   : > { %v3195_v9 = vpop.xlane.xlu1 %3194  ;;  %18391 = vpow2.f32 %v3230_v42 }
 0x48f   : > { %18393 = vpow2.f32 %v3232_v58  ;;  %v3211_v34 = vsub.f32 %v20087_v18, %v3195_v9 }
 0x490   : > { %18395 = vpow2.f32 %v3234_v1 }
 0x491   : > { %3248 = vadd.xlane.f32.xlu1 %v3247_v41 }
 0x492   : > { %v3189_v61 = vpop.xlane.xlu1 %3188 }
 0x493   : > { %v20150_v35 = vpop.eup %18381  ;;  %v3209_v37 = vsub.f32 %v20089_v11, %v3189_v61 }
 0x494   : > { %v3256_v63 = vsel %vm2903_vm0, %v20150_v35, 0.0  ;;  %v20155_v31 = vpop.eup %18383 }
 0x495   : > { %v3262_v28 = vsel %vm2903_vm0, %v20155_v31, 0.0  ;;  %v20162_v38 = vpop.eup %18385  ;;  %v3238_v10 = vmul.f32 1.442695, %v3209_v37 }
 0x496   : > { %v20165_v57 = vpop.eup %18387  ;;  %v3265_v11 = vsel %vm2903_vm0, %v20162_v38, 0.0  ;;  %v1230_v9 = vpop.permute.xlu1 %1229 }
 0x497   : > { %v3259_v17 = vsel %vm2903_vm0, %v20165_v57, 0.0 }
 0x49b   : > { %1239 = vrot.lane.b32.xlu0 %v19468_v44, %s24500_s6 }
 0x4a2   : > { %1241 = vrot.lane.b32.xlu1 %v19482_v46, %s24500_s6 }
 0x4b9   : > { %v3192_v59 = vpop.xlane.xlu0 %3191 }
 0x4ba   : > { %3257 = vadd.xlane.f32.xlu0 %v3256_v63  ;;  %v3210_v27 = vsub.f32 %v20102_v55, %v3192_v59  ;;  %v20169_v55 = vpop.eup %18389 }
 0x4bb   : > { %v20173_v48 = vpop.eup %18391  ;;  %v3268_v18 = vsel %vm2903_vm0, %v20169_v55, 0.0 }
 0x4bc   : > { %v3240_v5 = vmul.f32 1.442695, %v3210_v27  ;;  %v20177_v45 = vpop.eup %18393  ;;  %v3271_v22 = vsel %vm2903_vm0, %v20173_v48, 0.0 }
 0x4bd   : > { %v3186_v24 = vpop.xlane.xlu0 %3185  ;;  %v20181_v23 = vpop.eup %18395  ;;  %v3274_v41 = vsel %vm2903_vm0, %v20177_v45, 0.0 }
 0x4be   : > { %v3208_v26 = vsub.f32 %v20107_v12, %v3186_v24  ;;  %3263 = vadd.xlane.f32.xlu0 %v3262_v28  ;;  %v3242_v12 = vmul.f32 1.442695, %v3211_v34  ;;  %v3277_v6 = vsel %vm2903_vm0, %v20181_v23, 0.0  ;;  %v1996_v28 = vcombine.high %v19482_v46, %v1230_v9 }
 0x4c0   : > { %v3236_v25 = vmul.f32 1.442695, %v3208_v26  ;;  %v1995_v26 = vcombine.low %v19482_v46, %v1230_v9 }
 0x4c2   : > { %18397 = vpow2.f32 %v3236_v25  ;;  %3266 = vadd.xlane.f32.xlu0 %v3265_v11 }
 0x4c3   : > { %18399 = vpow2.f32 %v3238_v10 }
 0x4c4   : > { %18401 = vpow2.f32 %v3240_v5 }
 0x4c5   : > { %18403 = vpow2.f32 %v3242_v12 }
 0x4c6   : > { %3260 = vadd.xlane.f32.xlu1 %v3259_v17  ;;  %3269 = vadd.xlane.f32.xlu0 %v3268_v18  ;;  %v2003_v18 = vrot.slane %v1995_v26, %v19491_v60 }
 0x4ca   : > { %3272 = vadd.xlane.f32.xlu1 %v3271_v22  ;;  %3275 = vadd.xlane.f32.xlu0 %v3274_v41  ;;  %v2010_v22 = vrot.slane %v1996_v28, %v19491_v60 }
 0x4cc   : > { %v20185_v19 = vpop.eup %18397 }
 0x4cd   : > { %v3280_v51 = vsel %vm2903_vm0, %v20185_v19, 0.0  ;;  %v20191_v39 = vpop.eup %18399 }
 0x4ce   : > { %3278 = vadd.xlane.f32.xlu1 %v3277_v6  ;;  %v20193_v32 = vpop.eup %18401  ;;  %3281 = vadd.xlane.f32.xlu0 %v3280_v51  ;;  %v3283_v20 = vsel %vm2903_vm0, %v20191_v39, 0.0 }
 0x4cf   : > { %v20197_v49 = vpop.eup %18403  ;;  %v3286_v50 = vsel %vm2903_vm0, %v20193_v32, 0.0 }
 0x4d0   : > { %v3289_v3 = vsel %vm2903_vm0, %v20197_v49, 0.0 }
 0x4d2   : > { %3284 = vadd.xlane.f32.xlu1 %v3283_v20  ;;  %3287 = vadd.xlane.f32.xlu0 %v3286_v50 }
 0x4d6   : > { %3290 = vadd.xlane.f32.xlu1 %v3289_v3 }
 0x50a   : > { %v3252_v4 = vpop.xlane.xlu0 %3251 }
 0x512   : > { %v3246_v43 = vpop.xlane.xlu0 %3245 }
 0x513   : > { %18405 = vrcp.f32 %v3246_v43 }
 0x516   : > { %v1240_v16 = vpop.permute.xlu0 %1239 }
 0x517   : > { %v1807_v56 = vcombine.low %v20113_v33, %v1240_v16  ;;  %v1808_v52 = vcombine.high %v20113_v33, %v1240_v16 }
 0x519   : > { %v1815_v42 = vrot.slane %v1807_v56, %v19491_v60  ;;  %v1822_v58 = vrot.slane %v1808_v52, %v19491_v60 }
 0x51a   : > { %v3255_v61 = vpop.xlane.xlu1 %3254 }
 0x51b   : > { %v1823_v59 = vcombine.low %v1799_v53, %v1815_v42  ;;  %v1824_v63 = vcombine.high %v1799_v53, %v1815_v42  ;;  %v1839_v1 = vcombine.low %v1806_v29, %v1822_v58  ;;  %v1840_v37 = vcombine.high %v1806_v29, %v1822_v58 }
 0x51d   : > { %v1831_v44 = vrot.slane %v1823_v59, %v19494_v0  ;;  %v1838_v21 = vrot.slane %v1824_v63, %v19494_v0  ;;  %v1847_v33 = vrot.slane %v1839_v1, %v19494_v0  ;;  %v1854_v27 = vrot.slane %v1840_v37, %v19494_v0  ;;  %v18406_v3 = vpop.eup %18405 }
 0x51e   : > { %v3249_v24 = vpop.xlane.xlu1 %3248  ;;  %v3308_v29 = vmul.f32 %v18406_v3, %v20125_v36 }
 0x51f   : > { %18407 = vrcp.f32 %v3249_v24  ;;  %v2743_v34 = vcombine.low %v1831_v44, %v1838_v21  ;;  %v16293_v10 = vcombine.high %v1831_v44, %v1838_v21  ;;  %v2759_v25 = vcombine.low %v1847_v33, %v1854_v27 }
 0x520   : > { %v16294_v5 = vcombine.high %v1847_v33, %v1854_v27  ;;  %18409 = vrcp.f32 %v3255_v61 }
 0x521   : > { %v2750_v46 = vrot.slane %v2743_v34, %v19491_v60  ;;  %v2758_v51 = vrot.slane %v16293_v10, %v19491_v60  ;;  %v2766_v20 = vrot.slane %v2759_v25, %v19491_v60  ;;  %18411 = vrcp.f32 %v3252_v4 }
 0x522   : > { %v1242_v11 = vpop.permute.xlu1 %1241  ;;  %v2774_v50 = vrot.slane %v16294_v5, %v19491_v60 }
 0x523   : > { %v2011_v12 = vcombine.low %v20116_v2, %v1242_v11  ;;  %v2012_v17 = vcombine.high %v20116_v2, %v1242_v11  ;;  %v2775_v58 = vcombine.low %v2750_v46, %v2758_v51  ;;  %v2776_v11 = vcombine.high %v2750_v46, %v2758_v51 }
 0x524   : > { %v2791_v61 = vcombine.low %v2766_v20, %v2774_v50 }
 0x525   : > { %v2019_v41 = vrot.slane %v2011_v12, %v19491_v60  ;;  %v2026_v6 = vrot.slane %v2012_v17, %v19491_v60  ;;  %v2783_v36 = vrot.slane %v2775_v58, %v19494_v0  ;;  %v2792_v12 = vcombine.high %v2766_v20, %v2774_v50 }
 0x527   : > { %v2027_v43 = vcombine.low %v2003_v18, %v2019_v41  ;;  %v2028_v2 = vcombine.high %v2003_v18, %v2019_v41  ;;  %v2043_v62 = vcombine.low %v2010_v22, %v2026_v6  ;;  %v2044_v7 = vcombine.high %v2010_v22, %v2026_v6 }
 0x528   : > { %v2806_v46 = vrot.slane %v2792_v12, %v19494_v0 }
 0x529   : > { %v18408_v9 = vpop.eup %18407  ;;  %v2035_v16 = vrot.slane %v2027_v43, %v19494_v0  ;;  %v2042_v56 = vrot.slane %v2028_v2, %v19494_v0  ;;  %v2051_v52 = vrot.slane %v2043_v62, %v19494_v0  ;;  %v2058_v53 = vrot.slane %v2044_v7, %v19494_v0 }
 0x52a   : > { %v3309_v42 = vmul.f32 %v18408_v9, %v20133_v14  ;;  %v2799_v14 = vrot.slane %v2791_v61, %v19494_v0  ;;  %v18410_v24 = vpop.eup %18409  ;;  %v20252_v9 = vrot.slane %v2776_v11, %v19494_v0 }
 0x52b   : > { %v2811_v59 = vcombine.low %v2035_v16, %v2042_v56  ;;  %v16295_v63 = vcombine.high %v2035_v16, %v2042_v56  ;;  %v2827_v1 = vcombine.low %v2051_v52, %v2058_v53  ;;  %v16296_v37 = vcombine.high %v2051_v52, %v2058_v53  ;;  %v18412_v17 = vpop.eup %18411 }
 0x52c   : > { %v3324_v4 = vpack.c.bf16 %v3309_v42, %v3308_v29  ;;  %v2807_v18 = vcombine.low %v2783_v36, %v2799_v14  ;;  %v2808_v22 = vcombine.high %v2783_v36, %v2799_v14  ;;  %v3311_v2 = vmul.f32 %v18410_v24, %v20129_v54 }
 0x52d   : > { %v2818_v44 = vrot.slane %v2811_v59, %v19491_v60  ;;  %v2826_v21 = vrot.slane %v16295_v63, %v19491_v60  ;;  %v2834_v33 = vrot.slane %v2827_v1, %v19491_v60  ;;  %v2842_v27 = vrot.slane %v16296_v37, %v19491_v60 }
 0x52e   : > { %17617 = vmatprep.mubr.msk.bf16.mxu0 %vm2903_vm0, %v3324_v4  ;;  %v3310_v51 = vmul.f32 %v18412_v17, %v20119_v30  ;;  %v2809_v50 = vcombine.low %v20252_v9, %v2806_v46  ;;  %v18157_v30 = vld [vmem:[%s24501_s1] sm:$0xff]  }
 0x52f   : > { %v2843_v26 = vcombine.low %v2818_v44, %v2826_v21  ;;  %v2859_v28 = vcombine.low %v2834_v33, %v2842_v27  ;;  %v2844_v34 = vcombine.high %v2818_v44, %v2826_v21  ;;  %v2860_v10 = vcombine.high %v2834_v33, %v2842_v27 }
 0x530   : > { %v3325_v54 = vpack.c.bf16 %v3311_v2, %v3310_v51 }
 0x531   : > { %v2851_v25 = vrot.slane %v2843_v26, %v19494_v0  ;;  %v2867_v5 = vrot.slane %v2859_v28, %v19494_v0  ;;  %v20245_v3 = vrot.slane %v2844_v34, %v19494_v0  ;;  %v20248_v43 = vrot.slane %v2860_v10, %v19494_v0 }
 0x533   : > { %v2875_v41 = vcombine.low %v2851_v25, %v2867_v5  ;;  %v2876_v6 = vcombine.high %v2851_v25, %v2867_v5  ;;  %v2877_v20 = vcombine.low %v20245_v3, %v20248_v43  ;;  %v2878_v26 = vcombine.high %v20245_v3, %v20248_v43 }
 0x535   : > { %v2896_v62 = vpack.c.bf16 %v2875_v41, %v2807_v18  ;;  %v2898_v7 = vpack.c.bf16 %v2876_v6, %v2808_v22  ;;  %v2900_v16 = vpack.c.bf16 %v2877_v20, %v2809_v50  ;;  %v18160_v20 = vld [vmem:[%s24501_s1 + $0x18] sm:$0xff]  }
 0x537   : > { %17615 = vmatprep.subr.bf16.mxu0 %v2896_v62  ;;  %17623 = vmatprep.subr.bf16.mxu1 %v2898_v7 }
 0x538   : > { %17616 = vmatpush3.bf16.msra.mxu0 %v2896_v62  ;;  %17624 = vmatpush3.bf16.msra.mxu1 %v2898_v7  ;;  %v24502_v62 = vmov 0  }
 0x539   : > { %17629 = vmatprep.subr.bf16.mxu0 %v19985_v47  ;;  %17637 = vmatprep.subr.bf16.mxu1 %v19987_v8 }
 0x53b   : > { %17618 = vmatmul.mubr.msk.bf16.vlgmr.msra.gmra.mrb[12].mxu0 %vm2903_vm0, %v3325_v54  ;;  %v18161_v54 = vld [vmem:[%s24501_s1 + $0x20] sm:$0xff]  }
 0x53c   : > { %17630 = vmatpush3.bf16.msra.mxu0 %v19985_v47 }
 0x53d   : > { %17631 = vmatprep.subr.bf16.mxu0 %v2900_v16 }
 0x540   : > { %17632 = vmatpush3.bf16.msra.mxu0 %v2900_v16 }
 0x541   : > { %17645 = vmatprep.subr.bf16.mxu0 %v18157_v30 }
 0x547   : > { %v3258_v56 = vpop.xlane.xlu0 %3257 }
 0x54b   : > { %v3264_v52 = vpop.xlane.xlu0 %3263 }
 0x54f   : > { %v3267_v53 = vpop.xlane.xlu0 %3266 }
 0x550   : > { %18413 = vrcp.f32 %v3267_v53 }
 0x551   : > { %18415 = vrcp.f32 %v3258_v56 }
 0x552   : > { %18417 = vrcp.f32 %v3264_v52 }
 0x553   : > { %v3261_v29 = vpop.xlane.xlu1 %3260  ;;  %v3270_v42 = vpop.xlane.xlu0 %3269 }
 0x554   : > { %18419 = vrcp.f32 %v3261_v29  ;;  %v18162_v29 = vld [vmem:[%s24501_s1 + $0x28] sm:$0xff]  }
 0x555   : > { %18421 = vrcp.f32 %v3270_v42 }
 0x557   : > { %v3273_v58 = vpop.xlane.xlu1 %3272  ;;  %v3276_v47 = vpop.xlane.xlu0 %3275 }
 0x558   : > { %18423 = vrcp.f32 %v3273_v58 }
 0x559   : > { %18425 = vrcp.f32 %v3276_v47 }
 0x55a   : > { %v18414_v61 = vpop.eup %18413 }
 0x55b   : > { %v3279_v59 = vpop.xlane.xlu1 %3278  ;;  %v18416_v63 = vpop.eup %18415  ;;  %v3315_v44 = vmul.f32 %v18414_v61, %v20162_v38  ;;  %v2810_v38 = vcombine.high %v20252_v9, %v2806_v46  ;;  %v18163_v61 = vld [vmem:[%s24501_s1 + $0x30] sm:$0xff]  }
 0x55c   : > { %18427 = vrcp.f32 %v3279_v59  ;;  %v3282_v1 = vpop.xlane.xlu0 %3281  ;;  %v18418_v37 = vpop.eup %18417  ;;  %v3312_v33 = vmul.f32 %v18416_v63, %v20150_v35 }
 0x55d   : > { %18429 = vrcp.f32 %v3282_v1  ;;  %v3314_v14 = vmul.f32 %v18418_v37, %v20155_v31  ;;  %v2902_v31 = vpack.c.bf16 %v2878_v26, %v2810_v38 }
 0x55e   : > { %v18420_v4 = vpop.eup %18419 }
 0x55f   : > { %v3285_v21 = vpop.xlane.xlu1 %3284  ;;  %v3313_v27 = vmul.f32 %v18420_v4, %v20165_v57  ;;  %v18422_v36 = vpop.eup %18421  ;;  %v3327_v10 = vpack.c.bf16 %v3315_v44, %v3314_v14 }
 0x560   : > { %18431 = vrcp.f32 %v3285_v21  ;;  %v3288_v24 = vpop.xlane.xlu0 %3287  ;;  %v3316_v35 = vmul.f32 %v18422_v36, %v20169_v55  ;;  %v18164_v21 = vld [vmem:[%s24501_s1 + $0x38] sm:$0xff]  }
 0x561   : > { %v3326_v28 = vpack.c.bf16 %v3313_v27, %v3312_v33  ;;  %18433 = vrcp.f32 %v3288_v24  ;;  %v16329_v24 = vld [vmem:[%s24503_s30] ss:$0 sm:$0xff] }
 0x562   : > { %v18424_v34 = vpop.eup %18423 }
 0x563   : > { %v3291_v25 = vpop.xlane.xlu1 %3290  ;;  %17625 = vmatprep.mubr.msk.bf16.mxu1 %vm2903_vm0, %v3326_v28  ;;  %v3317_v57 = vmul.f32 %v18424_v34, %v20173_v48  ;;  %v18426_v5 = vpop.eup %18425  ;;  %v18661_v28 = vld [vmem:[%s19269_s0] sm:$0xff] }
 0x564   : > { %18435 = vrcp.f32 %v3291_v25  ;;  %17626 = vmatmul.mubr.msk.bf16.vlgmr.msra.gmra.mrb[16].mxu1 %vm2903_vm0, %v3327_v10  ;;  %v3318_v17 = vmul.f32 %v18426_v5, %v20177_v45  ;;  %v18662_v25 = vld [vmem:[%s19269_s0 + $0x10] sm:$0xff]  ;;  %v18663_v5 = vld [vmem:[%s19269_s0 + $0x8] sm:$0xff] }
 0x565   : > { %17638 = vmatpush3.bf16.msra.mxu1 %v19987_v8  ;;  %v3328_v11 = vpack.c.bf16 %v3317_v57, %v3316_v35 }
 0x566   : > { %v18428_v12 = vpop.eup %18427  ;;  %17639 = vmatprep.subr.bf16.mxu1 %v2902_v31 }
 0x567   : > { %v3319_v18 = vmul.f32 %v18428_v12, %v20181_v23  ;;  %17633 = vmatprep.mubr.msk.bf16.mxu0 %vm2903_vm0, %v3328_v11  ;;  %v18430_v22 = vpop.eup %18429  ;;  %v18664_v11 = vld [vmem:[%s19269_s0 + $0x18] sm:$0xff] }
 0x568   : > { %v3320_v41 = vmul.f32 %v18430_v22, %v20185_v19  ;;  %v18158_v19 = vld [vmem:[%s24501_s1 + $0x8] sm:$0xff]  }
 0x569   : > { %17640 = vmatpush3.bf16.msra.mxu1 %v2902_v31  ;;  %v3329_v55 = vpack.c.bf16 %v3319_v18, %v3318_v17 }
 0x56a   : > { %v18432_v48 = vpop.eup %18431 }
 0x56b   : > { %17634 = vmatmul.mubr.msk.bf16.vlgmr.msra.gmra.mrb[16].mxu0 %vm2903_vm0, %v3329_v55  ;;  %v3321_v6 = vmul.f32 %v18432_v48, %v20191_v39  ;;  %v18434_v8 = vpop.eup %18433  ;;  %v18159_v39 = vld [vmem:[%s24501_s1 + $0x10] sm:$0xff]  }
 0x56c   : > { %17646 = vmatpush3.bf16.msra.mxu0 %v18157_v30  ;;  %v3322_v45 = vmul.f32 %v18434_v8, %v20193_v32  ;;  %v18165_v55 = vld [vmem:[%s24411_s11] ss:$16 sps:$4 sm:$0xff]   ;;  %v18167_v48 = vld [vmem:[%s24411_s11 + $0x4] ss:$16 sps:$4 sm:$0xff]  }
 0x56d   : > { %v3330_v3 = vpack.c.bf16 %v3321_v6, %v3320_v41  ;;  %17647 = vmatprep.subr.bf16.mxu0 %v18158_v19  ;;  %v18168_v41 = vld [vmem:[%s24411_s11 + $0x8] ss:$16 sps:$4 sm:$0xff]   ;;  %v18170_v6 = vld [vmem:[%s24411_s11 + $0xc] ss:$16 sps:$4 sm:$0xff]   ;;  %v18173_v8 = vld [vmem:[%s24411_s11 + $0x24] ss:$16 sps:$4 sm:$0xff]   ;;  %4137 = vmatprep.subr.bf16.mxu1 %v18167_v48 }
 0x56e   : > { %v18436_v43 = vpop.eup %18435 }
 0x56f   : > { %v3323_v23 = vmul.f32 %v18436_v43, %v20197_v49  ;;  %17641 = vmatprep.mubr.msk.bf16.mxu1 %vm2903_vm0, %v3330_v3  ;;  %v18176_v3 = vld [vmem:[%s24411_s11 + $0x2c] ss:$16 sps:$4 sm:$0xff]   ;;  %v18171_v43 = vld [vmem:[%s24411_s11 + $0x20] ss:$16 sps:$4 sm:$0xff]  }
 0x570   : > { %17648 = vmatpush3.bf16.msra.mxu0 %v18158_v19 }
 0x571   : > { %v3331_v2 = vpack.c.bf16 %v3323_v23, %v3322_v45  ;;  %17653 = vmatprep.subr.bf16.mxu0 %v18159_v39  ;;  %v18174_v45 = vld [vmem:[%s24411_s11 + $0x28] ss:$16 sps:$4 sm:$0xff]  }
 0x573   : > { %17642 = vmatmul.mubr.msk.bf16.vlgmr.msra.gmra.mrb[20].mxu1 %vm2903_vm0, %v3331_v2 }
 0x574   : > { %4169 = vmatprep.mubr.bf16.mxu1 %v24502_v62  ;;  %4138 = vmatpush1.bf16.msra.mxu1 %v18165_v55 }
 0x575   : > { %4139 = vmatprep.subr.bf16.mxu1 %v18173_v8 }
 0x578   : > { %4140 = vmatpush1.bf16.msra.mxu1 %v18171_v43 }
 0x60e   : > { %v17619_v32 = vpop.f32.mrb[12].mxu0 }
 0x60f   : > { %v3372_v49 = vpop.f32.mrb[13].mxu0 }
 0x610   : > { %v17620_v7 = vpop.f32.mrb[14].mxu0 }
 0x611   : > { %v3553_v9 = vpack.c.bf16 %v17620_v7, %v17619_v32  ;;  %v3375_v46 = vpop.f32.mrb[15].mxu0 }
 0x612   : > { %v3552_v51 = vpack.c.bf16 %v3375_v46, %v3372_v49 }
 0x614   : > { %17649 = vmatprep.mubr.msk.bf16.mxu0 %vm2903_vm0, %v3552_v51 }
 0x615   : > { %17650 = vmatmul.mubr.msk.bf16.vlgmr.msra.gmra.mrb[20].mxu0 %vm2903_vm0, %v3553_v9 }
 0x616   : > { %17654 = vmatpush3.bf16.msra.mxu0 %v18159_v39 }
 0x617   : > { %17655 = vmatprep.subr.bf16.mxu0 %v18160_v20 }
 0x61a   : > { %17656 = vmatpush3.bf16.msra.mxu0 %v18160_v20 }
 0x61b   : > { %17661 = vmatprep.subr.bf16.mxu0 %v18161_v54 }
 0x637   : > { %v17627_v50 = vpop.f32.mrb[16].mxu1 }
 0x638   : > { %v3427_v16 = vpop.f32.mrb[17].mxu1 }
 0x639   : > { %v17628_v30 = vpop.f32.mrb[18].mxu1 }
 0x63a   : > { %v3555_v56 = vpack.c.bf16 %v17628_v30, %v17627_v50  ;;  %v3430_v52 = vpop.f32.mrb[19].mxu1 }
 0x63b   : > { %v3554_v53 = vpack.c.bf16 %v3430_v52, %v3427_v16  ;;  %v18177_v52 = vld [vmem:[%s24411_s11 + $0x40] ss:$16 sps:$4 sm:$0xff]  }
 0x63d   : > { %17657 = vmatprep.mubr.msk.bf16.mxu0 %vm2903_vm0, %v3554_v53  ;;  %v18179_v53 = vld [vmem:[%s24411_s11 + $0x44] ss:$16 sps:$4 sm:$0xff]  }
 0x63e   : > { %v17635_v42 = vpop.f32.mrb[16].mxu0  ;;  %17658 = vmatmul.mubr.msk.bf16.vlgmr.msra.gmra.mrb[20].mxu0 %vm2903_vm0, %v3555_v56  ;;  %4141 = vmatprep.subr.bf16.mxu1 %v18179_v53 }
 0x63f   : > { %17662 = vmatpush3.bf16.msra.mxu0 %v18161_v54  ;;  %v3482_v58 = vpop.f32.mrb[17].mxu0  ;;  %4142 = vmatpush1.bf16.msra.mxu1 %v18177_v52 }
 0x640   : > { %v17636_v47 = vpop.f32.mrb[18].mxu0  ;;  %17663 = vmatprep.subr.bf16.mxu0 %v18162_v29 }
 0x641   : > { %v3557_v59 = vpack.c.bf16 %v17636_v47, %v17635_v42  ;;  %v3485_v63 = vpop.f32.mrb[19].mxu0  ;;  %v18182_v42 = vld [vmem:[%s24411_s11 + $0x4c] ss:$16 sps:$4 sm:$0xff]   ;;  %v18183_v47 = vld [vmem:[%s24411_s11 + $0x60] ss:$16 sps:$4 sm:$0xff]  }
 0x642   : > { %v3556_v1 = vpack.c.bf16 %v3485_v63, %v3482_v58  ;;  %v18185_v58 = vld [vmem:[%s24411_s11 + $0x64] ss:$16 sps:$4 sm:$0xff]  }
 0x643   : > { %17664 = vmatpush3.bf16.msra.mxu0 %v18162_v29  ;;  %v18180_v29 = vld [vmem:[%s24411_s11 + $0x48] ss:$16 sps:$4 sm:$0xff]   ;;  %4143 = vmatprep.subr.bf16.mxu1 %v18185_v58  ;;  %v18191_v63 = vld [vmem:[%s24411_s11 + $0x84] ss:$16 sps:$4 sm:$0xff]  }
 0x644   : > { %17665 = vmatprep.mubr.msk.bf16.mxu0 %vm2903_vm0, %v3556_v1  ;;  %17669 = vmatprep.subr.bf16.mxu0 %v18163_v61  ;;  %v18194_v1 = vld [vmem:[%s24411_s11 + $0x8c] ss:$16 sps:$4 sm:$0xff]   ;;  %v18215_v58 = vld [vmem:[%s24413_s13] sm:$0xff]  }
 0x645   : > { %4144 = vmatpush1.bf16.msra.mxu1 %v18183_v47  ;;  %v18216_v47 = vld [vmem:[%s24413_s13 + $0x80] sm:$0xff]  }
 0x646   : > { %v17643_v37 = vpop.f32.mrb[20].mxu1  ;;  %4145 = vmatprep.subr.bf16.mxu1 %v18191_v63  ;;  %v18219_v63 = vld [vmem:[%s24413_s13 + $0x8] sm:$0xff]  }
 0x647   : > { %v3537_v4 = vpop.f32.mrb[21].mxu1 }
 0x648   : > { %v17644_v44 = vpop.f32.mrb[22].mxu1 }
 0x649   : > { %v3559_v33 = vpack.c.bf16 %v17644_v44, %v17643_v37  ;;  %v3540_v27 = vpop.f32.mrb[23].mxu1  ;;  %v18189_v37 = vld [vmem:[%s24411_s11 + $0x80] ss:$16 sps:$4 sm:$0xff]   ;;  %v18197_v44 = vld [vmem:[%s24411_s11 + $0xa4] ss:$16 sps:$4 sm:$0xff]  }
 0x64a   : > { %v3558_v36 = vpack.c.bf16 %v3540_v27, %v3537_v4  ;;  %17666 = vmatmul.mubr.msk.bf16.vlgmr.msra.gmra.mrb[20].mxu0 %vm2903_vm0, %v3557_v59  ;;  %v18186_v59 = vld [vmem:[%s24411_s11 + $0x68] ss:$16 sps:$4 sm:$0xff]   ;;  %4146 = vmatpush1.bf16.msra.mxu1 %v18189_v37  ;;  %v18221_v37 = vld [vmem:[%s24413_s13 + $0x50] sm:$0xff]  }
 0x64b   : > { %17670 = vmatpush3.bf16.msra.mxu0 %v18163_v61  ;;  %v18188_v61 = vld [vmem:[%s24411_s11 + $0x6c] ss:$16 sps:$4 sm:$0xff]   ;;  %v18192_v4 = vld [vmem:[%s24411_s11 + $0x88] ss:$16 sps:$4 sm:$0xff]   ;;  %4147 = vmatprep.subr.bf16.mxu1 %v18197_v44  ;;  %v18223_v44 = vld [vmem:[%s24413_s13 + $0x10] sm:$0xff]  }
 0x64c   : > { %17673 = vmatprep.mubr.msk.bf16.mxu0 %vm2903_vm0, %v3558_v36  ;;  %17671 = vmatprep.subr.bf16.mxu0 %v18164_v21  ;;  %v18198_v27 = vld [vmem:[%s24411_s11 + $0xa8] ss:$16 sps:$4 sm:$0xff]   ;;  %v18203_v36 = vld [vmem:[%s24411_s11 + $0xc4] ss:$16 sps:$4 sm:$0xff]  }
 0x64f   : > { %17672 = vmatpush3.bf16.msra.mxu0 %v18164_v21  ;;  %v18200_v21 = vld [vmem:[%s24411_s11 + $0xac] ss:$16 sps:$4 sm:$0xff]  }
 0x650   : > { %4190 = vmatprep.subr.bf16.mxu0 %v18170_v6 }
 0x656   : > { %17674 = vmatmul.mubr.msk.bf16.vlgmr.msra.gmra.mrb[20].mxu0 %vm2903_vm0, %v3559_v33  ;;  %v18195_v33 = vld [vmem:[%s24411_s11 + $0xa0] ss:$16 sps:$4 sm:$0xff]  }
 0x657   : > { %4222 = vmatprep.mubr.bf16.mxu0 %v24502_v62  ;;  %4191 = vmatpush1.bf16.msra.mxu0 %v18168_v41 }
 0x658   : > { %4192 = vmatprep.subr.bf16.mxu0 %v18176_v3  ;;  %4148 = vmatpush1.bf16.msra.mxu1 %v18195_v33  ;;  %v18225_v33 = vld [vmem:[%s24413_s13 + $0x58] sm:$0xff]  }
 0x659   : > { %4149 = vmatprep.subr.bf16.mxu1 %v18203_v36  ;;  %v18227_v36 = vld [vmem:[%s24413_s13 + $0x18] sm:$0xff]  }
 0x65b   : > { %4193 = vmatpush1.bf16.msra.mxu0 %v18174_v45  ;;  %v16330_v45 = vld [vmem:[%s24409_s9] ss:$0 sm:$0xff] }
 0x65c   : > { %4194 = vmatprep.subr.bf16.mxu0 %v18182_v42 }
 0x65f   : > { %4195 = vmatpush1.bf16.msra.mxu0 %v18180_v29 }
 0x660   : > { %4196 = vmatprep.subr.bf16.mxu0 %v18188_v61  ;;  %v18217_v61 = vld [vmem:[%s24413_s13 + $0x48] sm:$0xff]  }
 0x663   : > { %4197 = vmatpush1.bf16.msra.mxu0 %v18186_v59  ;;  %v18218_v59 = vld [vmem:[%s24413_s13 + $0xc8] sm:$0xff]  }
 0x664   : > { %4198 = vmatprep.subr.bf16.mxu0 %v18194_v1  ;;  %v18220_v1 = vld [vmem:[%s24413_s13 + $0x88] sm:$0xff]  }
 0x667   : > { %4199 = vmatpush1.bf16.msra.mxu0 %v18192_v4  ;;  %v18222_v4 = vld [vmem:[%s24413_s13 + $0xd0] sm:$0xff]  }
 0x668   : > { %4200 = vmatprep.subr.bf16.mxu0 %v18200_v21  ;;  %v18224_v21 = vld [vmem:[%s24413_s13 + $0x90] sm:$0xff]  }
 0x66b   : > { %4201 = vmatpush1.bf16.msra.mxu0 %v18198_v27  ;;  %v18226_v27 = vld [vmem:[%s24413_s13 + $0xd8] sm:$0xff]  }
 0x729   : > { %v17675_v14 = vpop.f32.mrb[20].mxu0 }
 0x72a   : > { %v3813_v26 = vpop.f32.mrb[21].mxu0  ;;  %v3842_v35 = vadd.f32 %v18662_v25, %v17675_v14  ;;  %v18206_v14 = vld [vmem:[%s24411_s11 + $0xcc] ss:$16 sps:$4 sm:$0xff]  }
 0x72b   : > { %v3840_v34 = vadd.f32 %v18661_v28, %v3813_v26  ;;  %v17676_v10 = vpop.f32.mrb[22].mxu0  ;;  %v18204_v26 = vld [vmem:[%s24411_s11 + $0xc8] ss:$16 sps:$4 sm:$0xff]   ;;  %v18209_v28 = vld [vmem:[%s24411_s11 + $0xe4] ss:$16 sps:$4 sm:$0xff]   ;;  %4202 = vmatprep.subr.bf16.mxu0 %v18206_v14 }
 0x72c   : > { %v3816_v38 = vpop.f32.mrb[23].mxu0  ;;  %v3843_v12 = vadd.f32 %v18664_v11, %v17676_v10  ;;  %v20331_v18 = vadd.f32 %v16329_v24, %v3842_v35  ;;  %v18207_v10 = vld [vmem:[%s24411_s11 + $0xe0] ss:$16 sps:$4 sm:$0xff]   ;;  %4203 = vmatpush1.bf16.msra.mxu0 %v18204_v26  ;;  %v18228_v14 = vld [vmem:[%s24413_s13 + $0x98] sm:$0xff]  }
 0x72d   : > { %v20324_v57 = vadd.f32 %v16329_v24, %v3840_v34  ;;  %v3841_v31 = vadd.f32 %v18663_v5, %v3816_v38  ;;  %v18212_v34 = vld [vmem:[%s24411_s11 + $0xec] ss:$16 sps:$4 sm:$0xff]   ;;  %v18210_v38 = vld [vmem:[%s24411_s11 + $0xe8] ss:$16 sps:$4 sm:$0xff]   ;;  %v18230_v26 = vld [vmem:[%s24413_s13 + $0xe0] sm:$0xff]  }
 0x72e   : > { %v20334_v22 = vadd.f32 %v16329_v24, %v3843_v12  ;;  %4204 = vmatprep.subr.bf16.mxu0 %v18212_v34  ;;  %v18232_v34 = vld [vmem:[%s24413_s13 + $0xa0] sm:$0xff]  }
 0x72f   : > { %v20328_v17 = vadd.f32 %v16329_v24, %v3841_v31  ;;  %3857 = vadd.xlane.f32.xlu0 %v20324_v57  ;;  %v18201_v24 = vld [vmem:[%s24411_s11 + $0xc0] ss:$16 sps:$4 sm:$0xff]  }
 0x730   : > { %4150 = vmatpush1.bf16.msra.mxu1 %v18201_v24  ;;  %4205 = vmatpush1.bf16.msra.mxu0 %v18210_v38  ;;  %v18229_v24 = vld [vmem:[%s24413_s13 + $0x60] sm:$0xff]   ;;  %v18234_v38 = vld [vmem:[%s24413_s13 + $0xe8] sm:$0xff]  }
 0x731   : > { %3859 = vadd.xlane.f32.xlu1 %v20328_v17  ;;  %4151 = vmatprep.subr.bf16.mxu1 %v18209_v28  ;;  %v18231_v28 = vld [vmem:[%s24413_s13 + $0x20] sm:$0xff]  }
 0x733   : > { %3861 = vadd.xlane.f32.xlu0 %v20331_v18 }
 0x734   : > { %4152 = vmatpush1.bf16.msra.mxu1 %v18207_v10  ;;  %v18233_v10 = vld [vmem:[%s24413_s13 + $0x68] sm:$0xff]  }
 0x735   : > { %3863 = vadd.xlane.f32.xlu1 %v20334_v22 }
 0x7bc   : > { %v3858_v23 = vpop.xlane.xlu0 %3857 }
 0x7bd   : > { %v3865_v2 = vmul.f32 0.0078125, %v3858_v23 }
 0x7be   : > { %v3860_v19 = vpop.xlane.xlu1 %3859 }
 0x7bf   : > { %v3866_v39 = vmul.f32 0.0078125, %v3860_v19  ;;  %v20363_v32 = vsub.f32 %v20324_v57, %v3865_v2 }
 0x7c0   : > { %v3862_v49 = vpop.xlane.xlu0 %3861 }
 0x7c1   : > { %v3867_v7 = vmul.f32 0.0078125, %v3862_v49  ;;  %v3873_v9 = vmul.f32 %v20363_v32, %v20363_v32  ;;  %v20368_v46 = vsub.f32 %v20328_v17, %v3866_v39 }
 0x7c2   : > { %v3864_v51 = vpop.xlane.xlu1 %3863 }
 0x7c3   : > { %v20371_v20 = vsub.f32 %v20331_v18, %v3867_v7  ;;  %v3868_v54 = vmul.f32 0.0078125, %v3864_v51  ;;  %3877 = vadd.xlane.f32.xlu0 %v3873_v9  ;;  %v3874_v50 = vmul.f32 %v20368_v46, %v20368_v46  ;;  %v16331_v7 = vld [vmem:[%s24410_s10] ss:$0 sm:$0xff] }
 0x7c5   : > { %v20376_v16 = vsub.f32 %v20334_v22, %v3868_v54  ;;  %3879 = vadd.xlane.f32.xlu1 %v3874_v50  ;;  %v3875_v30 = vmul.f32 %v20371_v20, %v20371_v20 }
 0x7c7   : > { %3881 = vadd.xlane.f32.xlu0 %v3875_v30  ;;  %v3876_v56 = vmul.f32 %v20376_v16, %v20376_v16 }
 0x7c9   : > { %3883 = vadd.xlane.f32.xlu1 %v3876_v56 }
 0x850   : > { %v3878_v25 = vpop.xlane.xlu0 %3877 }
 0x851   : > { %v3885_v35 = vmul.f32 0.0078125, %v3878_v25  ;;  %v18235_v25 = vld [vmem:[%s24413_s13 + $0x28] sm:$0xff]  }
 0x852   : > { %v3880_v5 = vpop.xlane.xlu1 %3879 }
 0x853   : > { %v3889_v31 = vadd.f32 1e-05, %v3885_v35  ;;  %v3886_v11 = vmul.f32 0.0078125, %v3880_v5  ;;  %v18236_v35 = vld [vmem:[%s24413_s13 + $0xa8] sm:$0xff]   ;;  %v18237_v5 = vld [vmem:[%s24413_s13 + $0x70] sm:$0xff]  }
 0x854   : > { %v3882_v12 = vpop.xlane.xlu0 %3881 }
 0x855   : > { %18437 = vrsqrt.f32 %v3889_v31  ;;  %v3890_v55 = vadd.f32 1e-05, %v3886_v11  ;;  %v3887_v48 = vmul.f32 0.0078125, %v3882_v12  ;;  %v18238_v31 = vld [vmem:[%s24413_s13 + $0xf0] sm:$0xff]  }
 0x856   : > { %v3884_v41 = vpop.xlane.xlu1 %3883  ;;  %v18239_v11 = vld [vmem:[%s24413_s13 + $0x30] sm:$0xff]  }
 0x857   : > { %18439 = vrsqrt.f32 %v3890_v55  ;;  %v3891_v6 = vadd.f32 1e-05, %v3887_v48  ;;  %v3888_v8 = vmul.f32 0.0078125, %v3884_v41  ;;  %v18240_v12 = vld [vmem:[%s24413_s13 + $0xb0] sm:$0xff]   ;;  %v18241_v55 = vld [vmem:[%s24413_s13 + $0x78] sm:$0xff]  }
 0x858   : > { %v18242_v48 = vld [vmem:[%s24413_s13 + $0xf8] sm:$0xff]  }
 0x859   : > { %18441 = vrsqrt.f32 %v3891_v6  ;;  %v3892_v3 = vadd.f32 1e-05, %v3888_v8  ;;  %v18243_v41 = vld [vmem:[%s24413_s13 + $0x38] sm:$0xff]   ;;  %v3955_v8 = vld [vmem:[%s24412_s12] sm:$0xf] }
 0x85a   : > { %v18244_v6 = vld [vmem:[%s24413_s13 + $0xb8] sm:$0xff]  }
 0x85b   : > { %18443 = vrsqrt.f32 %v3892_v3  ;;  %v24450_v3 = vsub.s32 3, %v19381_v13 }
 0x85f   : > { %v18438_v43 = vpop.eup %18437 }
 0x860   : > { %v3897_v23 = vmul.f32 %v18438_v43, %v20363_v32  ;;  %v3960_v43 = vrot.slane %v3955_v8, %v19384_v15 }
 0x861   : > { %v18440_v2 = vpop.eup %18439 }
 0x862   : > { %v3898_v19 = vmul.f32 %v18440_v2, %v20368_v46  ;;  %v3907_v39 = vmul.f32 %v16330_v45, %v3897_v23  ;;  %v24504_v23 = vld [vmem:[#allocation5_spill] sm:$0xff] }
 0x863   : > { %v18442_v49 = vpop.eup %18441  ;;  %v20571_v2 = vrot.slane %v3955_v8, %v24504_v23 }
 0x864   : > { %v3908_v9 = vmul.f32 %v16330_v45, %v3898_v19  ;;  %v3917_v54 = vadd.f32 %v16331_v7, %v3907_v39  ;;  %v3899_v30 = vmul.f32 %v18442_v49, %v20371_v20  ;;  %v18213_v20 = vld [vmem:[%s24413_s13 + $0x40] sm:$0xff]   ;;  %v20575_v19 = vrot.slane %v3955_v8, %v24450_v3 }
 0x865   : > { %v18444_v51 = vpop.eup %18443  ;;  %17219 = vmatprep.subr.bf16.mxu1 %v18213_v20 }
 0x866   : > { %v3918_v50 = vadd.f32 %v16331_v7, %v3908_v9  ;;  %v3900_v56 = vmul.f32 %v18444_v51, %v20376_v16  ;;  %v3909_v32 = vmul.f32 %v16330_v45, %v3899_v30  ;;  %v18214_v16 = vld [vmem:[%s24413_s13 + $0xc0] sm:$0xff]  }
 0x867   : > { %17247 = vmatprep.subr.bf16.mxu0 %v18214_v16 }
 0x868   : > { %v3953_v52 = vpack.c.bf16 %v3918_v50, %v3917_v54  ;;  %v3910_v53 = vmul.f32 %v16330_v45, %v3900_v56  ;;  %v3919_v29 = vadd.f32 %v16331_v7, %v3909_v32  ;;  %v20568_v45 = vrot.slane %v3955_v8, %v19445_v40 }
 0x86a   : > { %4170 = vmatmul.mubr.bf16.vlgmr.msra.gmra.mrb[24].mxu1 %v3953_v52  ;;  %4223 = vmatmul.mubr.bf16.vlgmr.msra.gmra.mrb[24].mxu0 %v3953_v52  ;;  %v3920_v46 = vadd.f32 %v16331_v7, %v3910_v53 }
 0x86b   : > { %4179 = vmatprep.mubr.bf16.mxu1 %v24502_v62  ;;  %4232 = vmatprep.mubr.bf16.mxu0 %v24502_v62 }
 0x86c   : > { %v3954_v42 = vpack.c.bf16 %v3920_v46, %v3919_v29  ;;  %17220 = vmatpush3.bf16.msra.mxu1 %v18215_v58  ;;  %17248 = vmatpush3.bf16.msra.mxu0 %v18216_v47 }
 0x86d   : > { %17221 = vmatprep.subr.bf16.mxu1 %v18217_v61  ;;  %17249 = vmatprep.subr.bf16.mxu0 %v18218_v59 }
 0x870   : > { %17222 = vmatpush3.bf16.msra.mxu1 %v18219_v63  ;;  %17250 = vmatpush3.bf16.msra.mxu0 %v18220_v1 }
 0x871   : > { %17223 = vmatprep.subr.bf16.mxu1 %v18221_v37  ;;  %17251 = vmatprep.subr.bf16.mxu0 %v18222_v4 }
 0x872   : > { %4180 = vmatmul.mubr.bf16.gmra.mrb[28].mxu1 %v3954_v42  ;;  %4233 = vmatmul.mubr.bf16.gmra.mrb[28].mxu0 %v3954_v42 }
 0x874   : > { %17224 = vmatpush3.bf16.msra.mxu1 %v18223_v44  ;;  %17252 = vmatpush3.bf16.msra.mxu0 %v18224_v21 }
 0x875   : > { %17225 = vmatprep.subr.bf16.mxu1 %v18225_v33  ;;  %17253 = vmatprep.subr.bf16.mxu0 %v18226_v27 }
 0x878   : > { %17226 = vmatpush3.bf16.msra.mxu1 %v18227_v36  ;;  %17254 = vmatpush3.bf16.msra.mxu0 %v18228_v14 }
 0x879   : > { %17227 = vmatprep.subr.bf16.mxu1 %v18229_v24  ;;  %17255 = vmatprep.subr.bf16.mxu0 %v18230_v26 }
 0x87c   : > { %17228 = vmatpush3.bf16.msra.mxu1 %v18231_v28  ;;  %17256 = vmatpush3.bf16.msra.mxu0 %v18232_v34 }
 0x87d   : > { %17229 = vmatprep.subr.bf16.mxu1 %v18233_v10  ;;  %17257 = vmatprep.subr.bf16.mxu0 %v18234_v38 }
 0x880   : > { %17230 = vmatpush3.bf16.msra.mxu1 %v18235_v25  ;;  %17258 = vmatpush3.bf16.msra.mxu0 %v18236_v35 }
 0x881   : > { %17231 = vmatprep.subr.bf16.mxu1 %v18237_v5  ;;  %17259 = vmatprep.subr.bf16.mxu0 %v18238_v31 }
 0x884   : > { %17232 = vmatpush3.bf16.msra.mxu1 %v18239_v11  ;;  %17260 = vmatpush3.bf16.msra.mxu0 %v18240_v12 }
 0x885   : > { %17233 = vmatprep.subr.bf16.mxu1 %v18241_v55  ;;  %17261 = vmatprep.subr.bf16.mxu0 %v18242_v48 }
 0x888   : > { %17234 = vmatpush3.bf16.msra.mxu1 %v18243_v41  ;;  %17262 = vmatpush3.bf16.msra.mxu0 %v18244_v6 }
 0x93d   : > { %v4171_v39 = vpop.f32.mrb[24].mxu1  ;;  %v4224_v49 = vpop.f32.mrb[24].mxu0 }
 0x93e   : > { %v20577_v7 = vadd.f32 %v4171_v39, %v3960_v43  ;;  %v20580_v9 = vadd.f32 %v4224_v49, %v20568_v45  ;;  %v4173_v51 = vpop.f32.mrb[25].mxu1  ;;  %v4226_v54 = vpop.f32.mrb[25].mxu0 }
 0x93f   : > { %v20583_v50 = vadd.f32 %v4173_v51, %v20571_v2  ;;  %v20586_v30 = vadd.f32 %v4226_v54, %v20575_v19  ;;  %v4175_v56 = vpop.f32.mrb[26].mxu1  ;;  %v4228_v52 = vpop.f32.mrb[26].mxu0 }
 0x940   : > { %v16364_v53 = vmul.f32 -1.702, %v20577_v7  ;;  %v16366_v32 = vmul.f32 -1.702, %v20580_v9  ;;  %v20590_v46 = vadd.f32 %v4175_v56, %v3960_v43  ;;  %v20593_v29 = vadd.f32 %v4228_v52, %v20568_v45  ;;  %v4177_v42 = vpop.f32.mrb[27].mxu1  ;;  %v4230_v20 = vpop.f32.mrb[27].mxu0 }
 0x941   : > { %v16365_v16 = vmul.f32 -1.702, %v20583_v50  ;;  %v16367_v58 = vmul.f32 -1.702, %v20586_v30  ;;  %v20598_v47 = vadd.f32 %v4177_v42, %v20571_v2  ;;  %v20601_v61 = vadd.f32 %v4230_v20, %v20575_v19 }
 0x942   : > { %v4275_v59 = vmul.f32 1.442695, %v16364_v53  ;;  %v4279_v63 = vmul.f32 1.442695, %v16366_v32  ;;  %v16368_v1 = vmul.f32 -1.702, %v20590_v46 }
 0x943   : > { %v4277_v37 = vmul.f32 1.442695, %v16365_v16  ;;  %v4281_v4 = vmul.f32 1.442695, %v16367_v58  ;;  %v16370_v44 = vmul.f32 -1.702, %v20593_v29 }
 0x944   : > { %18445 = vpow2.f32 %v4275_v59  ;;  %v4283_v21 = vmul.f32 1.442695, %v16368_v1  ;;  %v16369_v33 = vmul.f32 -1.702, %v20598_v47  ;;  %v16371_v27 = vmul.f32 -1.702, %v20601_v61 }
 0x945   : > { %18447 = vpow2.f32 %v4279_v63  ;;  %v4287_v36 = vmul.f32 1.442695, %v16370_v44  ;;  %v4181_v14 = vpop.f32.mrb[28].mxu1  ;;  %v4234_v24 = vpop.f32.mrb[28].mxu0 }
 0x946   : > { %18449 = vpow2.f32 %v4277_v37  ;;  %v4285_v26 = vmul.f32 1.442695, %v16369_v33  ;;  %v20607_v28 = vadd.f32 %v4181_v14, %v3960_v43  ;;  %v4183_v34 = vpop.f32.mrb[29].mxu1  ;;  %v4236_v10 = vpop.f32.mrb[29].mxu0  ;;  %v4289_v38 = vmul.f32 1.442695, %v16371_v27 }
 0x947   : > { %18451 = vpow2.f32 %v4281_v4  ;;  %v20610_v25 = vadd.f32 %v4234_v24, %v20568_v45  ;;  %v20613_v35 = vadd.f32 %v4183_v34, %v20571_v2  ;;  %v4185_v5 = vpop.f32.mrb[30].mxu1  ;;  %v4238_v31 = vpop.f32.mrb[30].mxu0  ;;  %v20622_v56 = vadd.f32 %v4236_v10, %v20575_v19 }
 0x948   : > { %18453 = vpow2.f32 %v4283_v21  ;;  %v16372_v11 = vmul.f32 -1.702, %v20607_v28  ;;  %v20616_v12 = vadd.f32 %v4185_v5, %v3960_v43  ;;  %v4187_v55 = vpop.f32.mrb[31].mxu1  ;;  %v4240_v48 = vpop.f32.mrb[31].mxu0  ;;  %v20626_v1 = vadd.f32 %v4238_v31, %v20568_v45 }
 0x949   : > { %18455 = vpow2.f32 %v4287_v36  ;;  %v16374_v41 = vmul.f32 -1.702, %v20610_v25  ;;  %v16373_v6 = vmul.f32 -1.702, %v20613_v35  ;;  %v16375_v58 = vmul.f32 -1.702, %v20622_v56 }
 0x94a   : > { %18457 = vpow2.f32 %v4285_v26  ;;  %v4291_v8 = vmul.f32 1.442695, %v16372_v11  ;;  %v16376_v39 = vmul.f32 -1.702, %v20616_v12  ;;  %v20629_v44 = vadd.f32 %v4187_v55, %v20571_v2 }
 0x94b   : > { %18459 = vpow2.f32 %v4289_v38  ;;  %v4295_v49 = vmul.f32 1.442695, %v16374_v41  ;;  %v4293_v51 = vmul.f32 1.442695, %v16373_v6  ;;  %v20632_v27 = vadd.f32 %v4240_v48, %v20575_v19 }
 0x94c   : > { %18461 = vpow2.f32 %v4291_v8  ;;  %v4299_v54 = vmul.f32 1.442695, %v16376_v39  ;;  %v4297_v24 = vmul.f32 1.442695, %v16375_v58  ;;  %v16378_v34 = vmul.f32 -1.702, %v20626_v1 }
 0x94d   : > { %18463 = vpow2.f32 %v4295_v49  ;;  %v16377_v2 = vmul.f32 -1.702, %v20629_v44  ;;  %v16379_v5 = vmul.f32 -1.702, %v20632_v27 }
 0x94e   : > { %v18446_v43 = vpop.eup %18445  ;;  %18465 = vpow2.f32 %v4293_v51  ;;  %v4303_v11 = vmul.f32 1.442695, %v16378_v34 }
 0x94f   : > { %v18448_v52 = vpop.eup %18447  ;;  %v4307_v53 = vadd.f32 1.0, %v18446_v43  ;;  %18467 = vpow2.f32 %v4299_v54  ;;  %v4301_v41 = vmul.f32 1.442695, %v16377_v2  ;;  %v4305_v8 = vmul.f32 1.442695, %v16379_v5 }
 0x950   : > { %v18450_v32 = vpop.eup %18449  ;;  %v4309_v42 = vadd.f32 1.0, %v18448_v52 }
 0x951   : > { %v18452_v20 = vpop.eup %18451  ;;  %18469 = vrcp.f32 %v4307_v53  ;;  %v4308_v16 = vadd.f32 1.0, %v18450_v32 }
 0x952   : > { %v18454_v59 = vpop.eup %18453  ;;  %18471 = vrcp.f32 %v4309_v42  ;;  %v4310_v63 = vadd.f32 1.0, %v18452_v20 }
 0x953   : > { %v18456_v37 = vpop.eup %18455  ;;  %18473 = vrcp.f32 %v4308_v16  ;;  %v4311_v4 = vadd.f32 1.0, %v18454_v59 }
 0x954   : > { %v18458_v21 = vpop.eup %18457  ;;  %18475 = vrcp.f32 %v4310_v63  ;;  %v4313_v33 = vadd.f32 1.0, %v18456_v37 }
 0x955   : > { %v18460_v36 = vpop.eup %18459  ;;  %18477 = vrcp.f32 %v4311_v4  ;;  %v4312_v14 = vadd.f32 1.0, %v18458_v21 }
 0x956   : > { %v18462_v26 = vpop.eup %18461  ;;  %18479 = vrcp.f32 %v4313_v33  ;;  %v4314_v45 = vadd.f32 1.0, %v18460_v36 }
 0x957   : > { %18481 = vrcp.f32 %v4312_v14  ;;  %v4315_v10 = vadd.f32 1.0, %v18462_v26  ;;  %v18464_v38 = vpop.eup %18463 }
 0x958   : > { %18483 = vrcp.f32 %v4314_v45  ;;  %v18466_v31 = vpop.eup %18465  ;;  %v4317_v21 = vadd.f32 1.0, %v18464_v38 }
 0x959   : > { %18485 = vpow2.f32 %v4297_v24  ;;  %v18468_v19 = vpop.eup %18467  ;;  %v4316_v36 = vadd.f32 1.0, %v18466_v31 }
 0x95a   : > { %18487 = vrcp.f32 %v4315_v10  ;;  %v4319_v48 = vadd.f32 1.0, %v18468_v19 }
 0x95b   : > { %v18470_v55 = vpop.eup %18469 }
 0x95c   : > { %v18472_v6 = vpop.eup %18471  ;;  %18489 = vrcp.f32 %v4319_v48  ;;  %v4355_v43 = vmul.f32 %v18470_v55, %v20577_v7 }
 0x95d   : > { %v18474_v39 = vpop.eup %18473  ;;  %18491 = vpow2.f32 %v4303_v11  ;;  %v4357_v32 = vmul.f32 %v18472_v6, %v20580_v9 }
 0x95e   : > { %v18476_v49 = vpop.eup %18475  ;;  %18493 = vpow2.f32 %v4301_v41  ;;  %v4356_v16 = vmul.f32 %v18474_v39, %v20583_v50 }
 0x95f   : > { %v18478_v51 = vpop.eup %18477  ;;  %18495 = vpow2.f32 %v4305_v8  ;;  %v4358_v37 = vmul.f32 %v18476_v49, %v20586_v30 }
 0x960   : > { %v18480_v54 = vpop.eup %18479  ;;  %v4359_v52 = vmul.f32 %v18478_v51, %v20590_v46  ;;  %18497 = vrcp.f32 %v4317_v21 }
 0x961   : > { %v18482_v53 = vpop.eup %18481  ;;  %v4361_v42 = vmul.f32 %v18480_v54, %v20593_v29  ;;  %18499 = vrcp.f32 %v4316_v36 }
 0x962   : > { %v18484_v20 = vpop.eup %18483  ;;  %v4435_v58 = vpack.c.bf16 %v4359_v52, %v4355_v43  ;;  %v4360_v59 = vmul.f32 %v18482_v53, %v20598_v47 }
 0x963   : > { %v18486_v63 = vpop.eup %18485  ;;  %v4437_v4 = vpack.c.bf16 %v4361_v42, %v4357_v32  ;;  %v4362_v7 = vmul.f32 %v18484_v20, %v20601_v61  ;;  %v16412_v20 = vld [vmem:[%s24414_s14] ss:$0 sm:$0xff] }
 0x964   : > { %v4436_v46 = vpack.c.bf16 %v4360_v59, %v4356_v16  ;;  %v18488_v33 = vpop.eup %18487  ;;  %v4318_v9 = vadd.f32 1.0, %v18486_v63 }
 0x965   : > { %v4438_v14 = vpack.c.bf16 %v4362_v7, %v4358_v37  ;;  %v4363_v24 = vmul.f32 %v18488_v33, %v20607_v28 }
 0x966   : > { %4667 = vmatprep.mubr.bf16.mxu1 %v4436_v46  ;;  %v18490_v29 = vpop.eup %18489  ;;  %18501 = vrcp.f32 %v4318_v9 }
 0x967   : > { %4716 = vmatprep.mubr.bf16.mxu0 %v4438_v14  ;;  %4668 = vmatmul.mubr.bf16.vlgmr.msra.gmra.mrb[32].mxu1 %v4435_v58  ;;  %v18492_v50 = vpop.eup %18491  ;;  %v4367_v47 = vmul.f32 %v18490_v29, %v20616_v12 }
 0x968   : > { %4717 = vmatmul.mubr.bf16.vlgmr.msra.gmra.mrb[32].mxu0 %v4437_v4  ;;  %v18494_v30 = vpop.eup %18493  ;;  %v4321_v61 = vadd.f32 1.0, %v18492_v50 }
 0x969   : > { %v18496_v26 = vpop.eup %18495  ;;  %v4320_v45 = vadd.f32 1.0, %v18494_v30  ;;  %v4439_v34 = vpack.c.bf16 %v4367_v47, %v4363_v24 }
 0x96a   : > { %18503 = vrcp.f32 %v4321_v61  ;;  %v4322_v10 = vadd.f32 1.0, %v18496_v26  ;;  %v18498_v2 = vpop.eup %18497 }
 0x96b   : > { %18505 = vrcp.f32 %v4320_v45  ;;  %v18500_v38 = vpop.eup %18499  ;;  %v4365_v19 = vmul.f32 %v18498_v2, %v20610_v25 }
 0x96c   : > { %18507 = vrcp.f32 %v4322_v10  ;;  %v4364_v55 = vmul.f32 %v18500_v38, %v20613_v35  ;;  %v18247_v10 = vld [vmem:[%s24489_s4 + $0xc4] ss:$12 sps:$4 sm:$0xff]  }
 0x96d   : > { %4997 = vmatprep.subr.bf16.mxu1 %v18247_v10 }
 0x970   : > { %v18502_v5 = vpop.eup %18501 }
 0x971   : > { %v4366_v41 = vmul.f32 %v18502_v5, %v20622_v56 }
 0x974   : > { %v18504_v31 = vpop.eup %18503 }
 0x975   : > { %v18506_v28 = vpop.eup %18505  ;;  %v4369_v12 = vmul.f32 %v18504_v31, %v20626_v1 }
 0x976   : > { %v18508_v11 = vpop.eup %18507  ;;  %v4368_v48 = vmul.f32 %v18506_v28, %v20629_v44 }
 0x977   : > { %v4370_v6 = vmul.f32 %v18508_v11, %v20632_v27  ;;  %v4441_v8 = vpack.c.bf16 %v4369_v12, %v4365_v19 }
 0x978   : > { %v4440_v39 = vpack.c.bf16 %v4368_v48, %v4364_v55 }
 0x979   : > { %v4442_v49 = vpack.c.bf16 %v4370_v6, %v4366_v41 }
 0x97a   : > { %4675 = vmatprep.mubr.bf16.mxu1 %v4440_v39 }
 0x97b   : > { %4724 = vmatprep.mubr.bf16.mxu0 %v4442_v49  ;;  %4676 = vmatmul.mubr.bf16.gmra.mrb[36].mxu1 %v4439_v34  ;;  %v18245_v34 = vld [vmem:[%s24489_s4 + $0xc0] ss:$12 sps:$4 sm:$0xff]  }
 0x97c   : > { %4725 = vmatmul.mubr.bf16.gmra.mrb[36].mxu0 %v4441_v8  ;;  %5029 = vmatprep.mubr.bf16.mxu1 %v24502_v62 }
 0x97d   : > { %4998 = vmatpush1.bf16.msra.mxu1 %v18245_v34  ;;  %v16416_v34 = vld [vmem:[%s24491_s27 + $0x1] ss:$0 sm:$0xff] }
 0xa3a   : > { %v17235_v25 = vpop.f32.mrb[32].mxu1 }
 0xa3b   : > { %v17263_v1 = vpop.f32.mrb[32].mxu0  ;;  %v17236_v51 = vpop.f32.mrb[33].mxu1 }
 0xa3c   : > { %v17237_v54 = vadd.f32 %v17236_v51, %v17235_v25  ;;  %v17264_v35 = vpop.f32.mrb[33].mxu0  ;;  %v17238_v43 = vpop.f32.mrb[34].mxu1  ;;  %v18253_v51 = vld [vmem:[%s24489_s4 + $0xf4] ss:$12 sps:$4 sm:$0xff]  }
 0xa3d   : > { %v17265_v44 = vadd.f32 %v17264_v35, %v17263_v1  ;;  %v17266_v52 = vpop.f32.mrb[34].mxu0  ;;  %v17239_v56 = vpop.f32.mrb[35].mxu1  ;;  %v18251_v1 = vld [vmem:[%s24489_s4 + $0xf0] ss:$12 sps:$4 sm:$0xff]   ;;  %v18257_v35 = vld [vmem:[%s24489_s4 + $0x10c] ss:$12 sps:$4 sm:$0xff]  }
 0xa3e   : > { %v17240_v53 = vadd.f32 %v17239_v56, %v17238_v43  ;;  %v17267_v27 = vpop.f32.mrb[35].mxu0  ;;  %v18258_v43 = vld [vmem:[%s24489_s4 + $0xe0] ss:$12 sps:$4 sm:$0xff]   ;;  %v18261_v56 = vld [vmem:[%s24489_s4 + $0x124] ss:$12 sps:$4 sm:$0xff]  }
 0xa3f   : > { %v4719_v32 = vadd.f32 %v17265_v44, %v17237_v54  ;;  %v17268_v42 = vadd.f32 %v17267_v27, %v17266_v52  ;;  %v18254_v54 = vld [vmem:[%s24489_s4 + $0xc8] ss:$12 sps:$4 sm:$0xff]   ;;  %v18259_v52 = vld [vmem:[%s24489_s4 + $0x120] ss:$12 sps:$4 sm:$0xff]  }
 0xa40   : > { %17677 = vmatprep.subr.bf16.mxu0 %v18254_v54  ;;  %v18255_v44 = vld [vmem:[%s24489_s4 + $0x108] ss:$12 sps:$4 sm:$0xff]  }
 0xa41   : > { %v4733_v16 = vadd.f32 %v4719_v32, %v20324_v57  ;;  %v4722_v58 = vadd.f32 %v17268_v42, %v17240_v53  ;;  %17678 = vmatpush3.bf16.msra.mxu0 %v18254_v54  ;;  %v18262_v53 = vld [vmem:[%s24489_s4 + $0xf8] ss:$12 sps:$4 sm:$0xff]   ;;  %v18265_v27 = vld [vmem:[%s24489_s4 + $0x13c] ss:$12 sps:$4 sm:$0xff]  }
 0xa42   : > { %17679 = vmatprep.subr.bf16.mxu0 %v18258_v43  ;;  %v18266_v32 = vld [vmem:[%s24489_s4 + $0x110] ss:$12 sps:$4 sm:$0xff]   ;;  %v18263_v42 = vld [vmem:[%s24489_s4 + $0x138] ss:$12 sps:$4 sm:$0xff]  }
 0xa43   : > { %v4734_v59 = vadd.f32 %v4722_v58, %v20328_v17  ;;  %v20659_v63 = vadd.f32 %v16412_v20, %v4733_v16  ;;  %v18270_v16 = vld [vmem:[%s24489_s4 + $0x128] ss:$12 sps:$4 sm:$0xff]   ;;  %v18267_v58 = vld [vmem:[%s24489_s4 + $0x150] ss:$12 sps:$4 sm:$0xff]   ;;  %v16449_v54 = vld [vmem:[%s24494_s2 + $0x3] sm:$0x7] }
 0xa45   : > { %4752 = vadd.xlane.f32.xlu0 %v20659_v63  ;;  %v20662_v37 = vadd.f32 %v16412_v20, %v4734_v59  ;;  %17680 = vmatpush3.bf16.msra.mxu0 %v18258_v43  ;;  %v18273_v59 = vld [vmem:[%s24489_s4 + $0x16c] ss:$12 sps:$4 sm:$0xff]   ;;  %v4861_v43 = vrot.slane %v16449_v54, %v24504_v23 }
 0xa46   : > { %17681 = vmatprep.subr.bf16.mxu0 %v18262_v53 }
 0xa47   : > { %4754 = vadd.xlane.f32.xlu1 %v20662_v37 }
 0xa49   : > { %17682 = vmatpush3.bf16.msra.mxu0 %v18262_v53 }
 0xa4a   : > { %17683 = vmatprep.subr.bf16.mxu0 %v18266_v32 }
 0xa4d   : > { %17684 = vmatpush3.bf16.msra.mxu0 %v18266_v32 }
 0xa4e   : > { %v17241_v4 = vpop.f32.mrb[36].mxu1  ;;  %17685 = vmatprep.subr.bf16.mxu0 %v18270_v16 }
 0xa4f   : > { %v17269_v7 = vpop.f32.mrb[36].mxu0  ;;  %v17242_v21 = vpop.f32.mrb[37].mxu1 }
 0xa50   : > { %v17243_v46 = vadd.f32 %v17242_v21, %v17241_v4  ;;  %v17270_v33 = vpop.f32.mrb[37].mxu0  ;;  %v17244_v36 = vpop.f32.mrb[38].mxu1  ;;  %v18274_v4 = vld [vmem:[%s24489_s4 + $0x140] ss:$12 sps:$4 sm:$0xff]   ;;  %v18275_v21 = vld [vmem:[%s24489_s4 + $0x158] ss:$12 sps:$4 sm:$0xff]  }
 0xa51   : > { %v17271_v14 = vadd.f32 %v17270_v33, %v17269_v7  ;;  %v17272_v9 = vpop.f32.mrb[38].mxu0  ;;  %v17245_v57 = vpop.f32.mrb[39].mxu1  ;;  %17686 = vmatpush3.bf16.msra.mxu0 %v18270_v16  ;;  %v18271_v7 = vld [vmem:[%s24489_s4 + $0x168] ss:$12 sps:$4 sm:$0xff]  }
 0xa52   : > { %v17246_v29 = vadd.f32 %v17245_v57, %v17244_v36  ;;  %v17273_v50 = vpop.f32.mrb[39].mxu0  ;;  %17687 = vmatprep.subr.bf16.mxu0 %v18274_v4 }
 0xa53   : > { %v4727_v17 = vadd.f32 %v17271_v14, %v17243_v46  ;;  %v17274_v24 = vadd.f32 %v17273_v50, %v17272_v9  ;;  %v18276_v46 = vld [vmem:[%s24489_s4 + $0x170] ss:$12 sps:$4 sm:$0xff]  }
 0xa55   : > { %v4735_v47 = vadd.f32 %v4727_v17, %v20331_v18  ;;  %v4730_v30 = vadd.f32 %v17274_v24, %v17246_v29  ;;  %v18250_v18 = vld [vmem:[%s24489_s4 + $0xdc] ss:$12 sps:$4 sm:$0xff]   ;;  %17688 = vmatpush3.bf16.msra.mxu0 %v18274_v4  ;;  %v16415_v17 = vld [vmem:[%s24490_s25 + $0x1] ss:$0 sm:$0xff] }
 0xa56   : > { %4999 = vmatprep.subr.bf16.mxu1 %v18250_v18  ;;  %17689 = vmatprep.subr.bf16.mxu0 %v18275_v21 }
 0xa57   : > { %v4736_v61 = vadd.f32 %v4730_v30, %v20334_v22  ;;  %v20667_v26 = vadd.f32 %v16412_v20, %v4735_v47  ;;  %v18248_v22 = vld [vmem:[%s24489_s4 + $0xd8] ss:$12 sps:$4 sm:$0xff]  }
 0xa58   : > { %5000 = vmatpush1.bf16.msra.mxu1 %v18248_v22 }
 0xa59   : > { %4756 = vadd.xlane.f32.xlu0 %v20667_v26  ;;  %v20670_v45 = vadd.f32 %v16412_v20, %v4736_v61  ;;  %5001 = vmatprep.subr.bf16.mxu1 %v18253_v51  ;;  %v18269_v20 = vld [vmem:[%s24489_s4 + $0x154] ss:$12 sps:$4 sm:$0xff]  }
 0xa5a   : > { %17690 = vmatpush3.bf16.msra.mxu0 %v18275_v21 }
 0xa5b   : > { %24505 = vst [vmem:[#allocation7_spill] sm:$0xff] %v20670_v45  ;;  %4758 = vadd.xlane.f32.xlu1 %v20670_v45  ;;  %17691 = vmatprep.subr.bf16.mxu0 %v18276_v46 }
 0xa5c   : > { %5002 = vmatpush1.bf16.msra.mxu1 %v18251_v1 }
 0xa5d   : > { %5003 = vmatprep.subr.bf16.mxu1 %v18257_v35  ;;  %v4857_v35 = vrot.slane %v16449_v54, %v19384_v15 }
 0xa5e   : > { %17692 = vmatpush3.bf16.msra.mxu0 %v18276_v46 }
 0xa60   : > { %5004 = vmatpush1.bf16.msra.mxu1 %v18255_v44 }
 0xa61   : > { %5005 = vmatprep.subr.bf16.mxu1 %v18261_v56 }
 0xa64   : > { %5006 = vmatpush1.bf16.msra.mxu1 %v18259_v52 }
 0xa65   : > { %5007 = vmatprep.subr.bf16.mxu1 %v18265_v27 }
 0xa68   : > { %5008 = vmatpush1.bf16.msra.mxu1 %v18263_v42 }
 0xa69   : > { %5009 = vmatprep.subr.bf16.mxu1 %v18269_v20 }
 0xa6c   : > { %5010 = vmatpush1.bf16.msra.mxu1 %v18267_v58 }
 0xa6d   : > { %5011 = vmatprep.subr.bf16.mxu1 %v18273_v59 }
 0xa70   : > { %5012 = vmatpush1.bf16.msra.mxu1 %v18271_v7 }
 0xad2   : > { %v4753_v2 = vpop.xlane.xlu0 %4752 }
 0xad3   : > { %v4760_v38 = vmul.f32 0.0078125, %v4753_v2 }
 0xad4   : > { %v4755_v5 = vpop.xlane.xlu1 %4754 }
 0xad5   : > { %v20686_v31 = vsub.f32 %v20659_v63, %v4760_v38  ;;  %v4761_v28 = vmul.f32 0.0078125, %v4755_v5 }
 0xad7   : > { %v20689_v19 = vsub.f32 %v20662_v37, %v4761_v28  ;;  %v4768_v12 = vmul.f32 %v20686_v31, %v20686_v31 }
 0xad9   : > { %4772 = vadd.xlane.f32.xlu0 %v4768_v12  ;;  %v4769_v11 = vmul.f32 %v20689_v19, %v20689_v19 }
 0xadb   : > { %4774 = vadd.xlane.f32.xlu1 %v4769_v11 }
 0xae6   : > { %v4757_v55 = vpop.xlane.xlu0 %4756 }
 0xae7   : > { %v4762_v48 = vmul.f32 0.0078125, %v4757_v55 }
 0xae8   : > { %v4759_v41 = vpop.xlane.xlu1 %4758 }
 0xae9   : > { %v20696_v6 = vsub.f32 %v20667_v26, %v4762_v48  ;;  %v4763_v8 = vmul.f32 0.0078125, %v4759_v41 }
 0xaeb   : > { %v20699_v39 = vsub.f32 %v20670_v45, %v4763_v8  ;;  %v4770_v49 = vmul.f32 %v20696_v6, %v20696_v6 }
 0xaed   : > { %4776 = vadd.xlane.f32.xlu0 %v4770_v49  ;;  %v4771_v25 = vmul.f32 %v20699_v39, %v20699_v39 }
 0xaef   : > { %4778 = vadd.xlane.f32.xlu1 %v4771_v25 }
 0xb66   : > { %v4773_v33 = vpop.xlane.xlu0 %4772 }
 0xb67   : > { %v4780_v36 = vmul.f32 0.0078125, %v4773_v33 }
 0xb68   : > { %v4775_v14 = vpop.xlane.xlu1 %4774 }
 0xb69   : > { %v4784_v9 = vadd.f32 1e-05, %v4780_v36  ;;  %v4781_v57 = vmul.f32 0.0078125, %v4775_v14 }
 0xb6b   : > { %18509 = vrsqrt.f32 %v4784_v9  ;;  %v4785_v29 = vadd.f32 1e-05, %v4781_v57  ;;  %v4865_v9 = vrot.slane %v16449_v54, %v19445_v40 }
 0xb6d   : > { %18511 = vrsqrt.f32 %v4785_v29 }
 0xb75   : > { %v18510_v50 = vpop.eup %18509 }
 0xb76   : > { %v4792_v24 = vmul.f32 %v18510_v50, %v20686_v31 }
 0xb77   : > { %v18512_v47 = vpop.eup %18511 }
 0xb78   : > { %v4802_v30 = vmul.f32 %v16415_v17, %v4792_v24  ;;  %v4793_v61 = vmul.f32 %v18512_v47, %v20689_v19 }
 0xb7a   : > { %v4803_v10 = vmul.f32 %v16415_v17, %v4793_v61  ;;  %v4777_v18 = vpop.xlane.xlu0 %4776  ;;  %v4812_v2 = vadd.f32 %v16416_v34, %v4802_v30 }
 0xb7b   : > { %v4782_v22 = vmul.f32 0.0078125, %v4777_v18 }
 0xb7c   : > { %v4813_v38 = vadd.f32 %v16416_v34, %v4803_v10  ;;  %v4779_v5 = vpop.xlane.xlu1 %4778 }
 0xb7d   : > { %v4786_v28 = vadd.f32 1e-05, %v4782_v22  ;;  %v4783_v12 = vmul.f32 0.0078125, %v4779_v5 }
 0xb7e   : > { %v4849_v11 = vpack.c.bf16 %v4813_v38, %v4812_v2 }
 0xb7f   : > { %18513 = vrsqrt.f32 %v4786_v28  ;;  %v4787_v55 = vadd.f32 1e-05, %v4783_v12 }
 0xb80   : > { %5030 = vmatmul.mubr.bf16.vlgmr.msra.gmra.mrb[40].mxu1 %v4849_v11  ;;  %17693 = vmatprep.mubr.bf16.mxu0 %v4849_v11 }
 0xb81   : > { %5039 = vmatprep.mubr.bf16.mxu1 %v24502_v62  ;;  %18515 = vrsqrt.f32 %v4787_v55 }
 0xb89   : > { %v18514_v31 = vpop.eup %18513 }
 0xb8a   : > { %v4794_v19 = vmul.f32 %v18514_v31, %v20696_v6 }
 0xb8b   : > { %v18516_v48 = vpop.eup %18515 }
 0xb8c   : > { %v4795_v41 = vmul.f32 %v18516_v48, %v20699_v39  ;;  %v4804_v8 = vmul.f32 %v16415_v17, %v4794_v19 }
 0xb8e   : > { %v4805_v49 = vmul.f32 %v16415_v17, %v4795_v41  ;;  %v4814_v25 = vadd.f32 %v16416_v34, %v4804_v8 }
 0xb90   : > { %v4815_v1 = vadd.f32 %v16416_v34, %v4805_v49 }
 0xb92   : > { %v4850_v51 = vpack.c.bf16 %v4815_v1, %v4814_v25 }
 0xb94   : > { %5040 = vmatmul.mubr.bf16.gmra.mrb[44].mxu1 %v4850_v51  ;;  %17694 = vmatmul.mubr.bf16.vlgmr.msra.gmra.mrb[40].mxu0 %v4850_v51 }
 0xc53   : > { %v5031_v44 = vpop.f32.mrb[40].mxu1 }
 0xc54   : > { %v20781_v6 = vadd.f32 %v5031_v44, %v4857_v35  ;;  %v5033_v52 = vpop.f32.mrb[41].mxu1 }
 0xc55   : > { %v20783_v39 = vadd.f32 %v5033_v52, %v4861_v43  ;;  %v5035_v56 = vpop.f32.mrb[42].mxu1 }
 0xc56   : > { %v5037_v53 = vpop.f32.mrb[43].mxu1  ;;  %5120 = vrot.lane.b32.xlu0 %v20781_v6, %s24506_s22  ;;  %v20789_v27 = vadd.f32 %v5035_v56, %v4857_v35 }
 0xc57   : > { %5172 = vrot.lane.b32.xlu1 %v20783_v39, %s24499_s7  ;;  %v20803_v32 = vadd.f32 %v5037_v53, %v4861_v43 }
 0xc5a   : > { %5132 = vrot.lane.b32.xlu0 %v20781_v6, %s24499_s7 }
 0xc5b   : > { %5122 = vrot.lane.b32.xlu1 %v20789_v27, %s24506_s22 }
 0xc5e   : > { %5144 = vrot.lane.b32.xlu0 %v20781_v6, %s24500_s6 }
 0xc5f   : > { %5134 = vrot.lane.b32.xlu1 %v20789_v27, %s24499_s7 }
 0xc62   : > { %5160 = vrot.lane.b32.xlu0 %v20783_v39, %s24506_s22 }
 0xc63   : > { %5146 = vrot.lane.b32.xlu1 %v20789_v27, %s24500_s6 }
 0xc66   : > { %5184 = vrot.lane.b32.xlu0 %v20783_v39, %s24500_s6 }
 0xc67   : > { %5162 = vrot.lane.b32.xlu1 %v20803_v32, %s24506_s22  ;;  %v5041_v42 = vpop.f32.mrb[44].mxu1  ;;  %v17695_v20 = vpop.f32.mrb[40].mxu0 }
 0xc68   : > { %v5043_v16 = vpop.f32.mrb[45].mxu1  ;;  %v5084_v58 = vpop.f32.mrb[41].mxu0  ;;  %v20825_v36 = vadd.f32 %v5041_v42, %v4857_v35  ;;  %v20852_v29 = vadd.f32 %v17695_v20, %v4865_v9 }
 0xc69   : > { %v20809_v59 = vadd.f32 %v5043_v16, %v4861_v43  ;;  %v5045_v4 = vpop.f32.mrb[46].mxu1  ;;  %v17696_v7 = vpop.f32.mrb[42].mxu0  ;;  %v20842_v57 = vadd.f32 %v5084_v58, %v4865_v9 }
 0xc6a   : > { %v5047_v21 = vpop.f32.mrb[47].mxu1  ;;  %v5087_v46 = vpop.f32.mrb[43].mxu0  ;;  %v20835_v14 = vadd.f32 %v5045_v4, %v4857_v35  ;;  %v20858_v50 = vadd.f32 %v17696_v7, %v4865_v9 }
 0xc6b   : > { %5174 = vrot.lane.b32.xlu1 %v20803_v32, %s24499_s7  ;;  %5164 = vrot.lane.b32.xlu0 %v20809_v59, %s24506_s22  ;;  %v20819_v33 = vadd.f32 %v5047_v21, %v4861_v43  ;;  %v20862_v17 = vadd.f32 %v5087_v46, %v4865_v9 }
 0xc6f   : > { %5186 = vrot.lane.b32.xlu1 %v20803_v32, %s24500_s6  ;;  %5176 = vrot.lane.b32.xlu0 %v20809_v59, %s24499_s7 }
 0xc73   : > { %5166 = vrot.lane.b32.xlu1 %v20819_v33, %s24506_s22  ;;  %5188 = vrot.lane.b32.xlu0 %v20809_v59, %s24500_s6 }
 0xc77   : > { %5178 = vrot.lane.b32.xlu1 %v20819_v33, %s24499_s7  ;;  %5124 = vrot.lane.b32.xlu0 %v20825_v36, %s24506_s22 }
 0xc7b   : > { %5190 = vrot.lane.b32.xlu1 %v20819_v33, %s24500_s6  ;;  %5136 = vrot.lane.b32.xlu0 %v20825_v36, %s24499_s7 }
 0xc7f   : > { %5126 = vrot.lane.b32.xlu1 %v20835_v14, %s24506_s22  ;;  %5148 = vrot.lane.b32.xlu0 %v20825_v36, %s24500_s6 }
 0xc83   : > { %5138 = vrot.lane.b32.xlu1 %v20835_v14, %s24499_s7  ;;  %5200 = vrot.lane.b32.xlu0 %v20842_v57, %s24506_s22 }
 0xc87   : > { %5150 = vrot.lane.b32.xlu1 %v20835_v14, %s24500_s6  ;;  %5224 = vrot.lane.b32.xlu0 %v20842_v57, %s24500_s6 }
 0xc8b   : > { %5212 = vrot.lane.b32.xlu1 %v20842_v57, %s24499_s7  ;;  %5204 = vrot.lane.b32.xlu0 %v20852_v29, %s24506_s22 }
 0xc8f   : > { %5206 = vrot.lane.b32.xlu1 %v20858_v50, %s24506_s22 }
 0xc93   : > { %5202 = vrot.lane.b32.xlu1 %v20862_v17, %s24506_s22 }
 0xc97   : > { %5214 = vrot.lane.b32.xlu1 %v20862_v17, %s24499_s7 }
 0xc9b   : > { %5226 = vrot.lane.b32.xlu1 %v20862_v17, %s24500_s6 }
 0xcc8   : > { %v5121_v24 = vpop.permute.xlu0 %5120 }
 0xcc9   : > { %v5173_v47 = vpop.permute.xlu1 %5172 }
 0xcca   : > { %v5268_v1 = vcombine.low %v20783_v39, %v5173_v47  ;;  %v5269_v51 = vcombine.high %v20783_v39, %v5173_v47 }
 0xccc   : > { %v5133_v30 = vpop.permute.xlu0 %5132 }
 0xccd   : > { %v5123_v61 = vpop.permute.xlu1 %5122  ;;  %v5236_v34 = vcombine.low %v20781_v6, %v5133_v30  ;;  %v5237_v10 = vcombine.high %v20781_v6, %v5133_v30 }
 0xccf   : > { %v5244_v5 = vrot.slane %v5236_v34, %v19491_v60  ;;  %v5251_v28 = vrot.slane %v5237_v10, %v19491_v60 }
 0xcd0   : > { %v5145_v18 = vpop.permute.xlu0 %5144 }
 0xcd1   : > { %v5252_v22 = vcombine.low %v5121_v24, %v5145_v18  ;;  %v5253_v2 = vcombine.high %v5121_v24, %v5145_v18  ;;  %v5135_v38 = vpop.permute.xlu1 %5134 }
 0xcd2   : > { %v5440_v55 = vcombine.low %v20789_v27, %v5135_v38  ;;  %v5441_v31 = vcombine.high %v20789_v27, %v5135_v38 }
 0xcd3   : > { %v5260_v12 = vrot.slane %v5252_v22, %v19491_v60  ;;  %v5267_v11 = vrot.slane %v5253_v2, %v19491_v60 }
 0xcd4   : > { %v5161_v19 = vpop.permute.xlu0 %5160  ;;  %v5448_v56 = vrot.slane %v5440_v55, %v19491_v60  ;;  %v5455_v53 = vrot.slane %v5441_v31, %v19491_v60 }
 0xcd5   : > { %v5300_v48 = vcombine.low %v5244_v5, %v5260_v12  ;;  %v5301_v41 = vcombine.high %v5244_v5, %v5260_v12  ;;  %v5316_v8 = vcombine.low %v5251_v28, %v5267_v11  ;;  %v5317_v49 = vcombine.high %v5251_v28, %v5267_v11  ;;  %v5147_v25 = vpop.permute.xlu1 %5146 }
 0xcd6   : > { %v5456_v54 = vcombine.low %v5123_v61, %v5147_v25  ;;  %v5457_v35 = vcombine.high %v5123_v61, %v5147_v25  ;;  %v5276_v5 = vrot.slane %v5268_v1, %v19491_v60  ;;  %v5283_v28 = vrot.slane %v5269_v51, %v19491_v60 }
 0xcd7   : > { %v5308_v43 = vrot.slane %v5300_v48, %v19494_v0  ;;  %v5315_v44 = vrot.slane %v5301_v41, %v19494_v0  ;;  %v5324_v6 = vrot.slane %v5316_v8, %v19494_v0  ;;  %v5331_v52 = vrot.slane %v5317_v49, %v19494_v0 }
 0xcd8   : > { %v5464_v27 = vrot.slane %v5456_v54, %v19491_v60  ;;  %v5471_v42 = vrot.slane %v5457_v35, %v19491_v60  ;;  %v5185_v20 = vpop.permute.xlu0 %5184 }
 0xcd9   : > { %v16490_v39 = vcombine.low %v5308_v43, %v5315_v44  ;;  %v16492_v16 = vcombine.high %v5308_v43, %v5315_v44  ;;  %v16494_v58 = vcombine.low %v5324_v6, %v5331_v52  ;;  %v16496_v4 = vcombine.high %v5324_v6, %v5331_v52  ;;  %v5163_v7 = vpop.permute.xlu1 %5162 }
 0xcda   : > { %v5504_v21 = vcombine.low %v5448_v56, %v5464_v27  ;;  %v5505_v46 = vcombine.high %v5448_v56, %v5464_v27  ;;  %v5520_v9 = vcombine.low %v5455_v53, %v5471_v42  ;;  %v5521_v24 = vcombine.high %v5455_v53, %v5471_v42 }
 0xcdb   : > { %v20889_v47 = vrot.slane %v16490_v39, %v19491_v60  ;;  %v20892_v30 = vrot.slane %v16492_v16, %v19491_v60  ;;  %v20895_v61 = vrot.slane %v16494_v58, %v19491_v60  ;;  %v20898_v34 = vrot.slane %v16496_v4, %v19491_v60 }
 0xcdc   : > { %v5512_v10 = vrot.slane %v5504_v21, %v19494_v0  ;;  %v5519_v18 = vrot.slane %v5505_v46, %v19494_v0  ;;  %v5284_v22 = vcombine.low %v5161_v19, %v5185_v20  ;;  %v5285_v2 = vcombine.high %v5161_v19, %v5185_v20 }
 0xcdd   : > { %v5175_v38 = vpop.permute.xlu1 %5174  ;;  %v5528_v12 = vrot.slane %v5520_v9, %v19494_v0  ;;  %v5535_v11 = vrot.slane %v5521_v24, %v19494_v0  ;;  %v5165_v55 = vpop.permute.xlu0 %5164  ;;  %v6116_v41 = vcombine.low %v20889_v47, %v20892_v30  ;;  %v6148_v19 = vcombine.low %v20895_v61, %v20898_v34 }
 0xcde   : > { %v5292_v31 = vrot.slane %v5284_v22, %v19491_v60  ;;  %v5299_v48 = vrot.slane %v5285_v2, %v19491_v60  ;;  %v16498_v8 = vcombine.low %v5512_v10, %v5519_v18  ;;  %v16500_v49 = vcombine.high %v5512_v10, %v5519_v18 }
 0xcdf   : > { %v5472_v25 = vcombine.low %v20803_v32, %v5175_v38  ;;  %v5473_v1 = vcombine.high %v20803_v32, %v5175_v38  ;;  %v16502_v6 = vcombine.low %v5528_v12, %v5535_v11  ;;  %v16504_v52 = vcombine.high %v5528_v12, %v5535_v11 }
 0xce0   : > { %v5332_v51 = vcombine.low %v5276_v5, %v5292_v31  ;;  %v5333_v54 = vcombine.high %v5276_v5, %v5292_v31  ;;  %v5348_v35 = vcombine.low %v5283_v28, %v5299_v48  ;;  %v5349_v43 = vcombine.high %v5283_v28, %v5299_v48 }
 0xce1   : > { %v5187_v44 = vpop.permute.xlu1 %5186  ;;  %v5177_v56 = vpop.permute.xlu0 %5176  ;;  %v20919_v32 = vrot.slane %v16498_v8, %v19491_v60  ;;  %v5480_v58 = vrot.slane %v5472_v25, %v19491_v60  ;;  %v20925_v46 = vrot.slane %v16500_v49, %v19491_v60  ;;  %v20933_v28 = vrot.slane %v16502_v6, %v19491_v60 }
 0xce2   : > { %v5488_v53 = vcombine.low %v5163_v7, %v5187_v44  ;;  %v5489_v27 = vcombine.high %v5163_v7, %v5187_v44  ;;  %v5340_v42 = vrot.slane %v5332_v51, %v19494_v0  ;;  %v5347_v20 = vrot.slane %v5333_v54, %v19494_v0 }
 0xce3   : > { %v5356_v39 = vrot.slane %v5348_v35, %v19494_v0  ;;  %v5363_v16 = vrot.slane %v5349_v43, %v19494_v0  ;;  %v5487_v7 = vrot.slane %v5473_v1, %v19491_v60  ;;  %v5676_v9 = vcombine.low %v20809_v59, %v5177_v56 }
 0xce4   : > { %v5496_v4 = vrot.slane %v5488_v53, %v19491_v60  ;;  %v5503_v21 = vrot.slane %v5489_v27, %v19491_v60  ;;  %v5677_v24 = vcombine.high %v20809_v59, %v5177_v56  ;;  %v16491_v18 = vcombine.low %v5340_v42, %v5347_v20 }
 0xce5   : > { %v20930_v10 = vpop.permute.xlu1 %5166  ;;  %v16493_v22 = vcombine.high %v5340_v42, %v5347_v20  ;;  %v5189_v5 = vpop.permute.xlu0 %5188  ;;  %v20936_v12 = vrot.slane %v16504_v52, %v19491_v60  ;;  %v16495_v11 = vcombine.low %v5356_v39, %v5363_v16  ;;  %v16497_v31 = vcombine.high %v5356_v39, %v5363_v16 }
 0xce6   : > { %v5536_v2 = vcombine.low %v5480_v58, %v5496_v4  ;;  %v5537_v38 = vcombine.high %v5480_v58, %v5496_v4  ;;  %v5552_v59 = vcombine.low %v5487_v7, %v5503_v21  ;;  %v5553_v49 = vcombine.high %v5487_v7, %v5503_v21 }
 0xce7   : > { %v5684_v25 = vrot.slane %v5676_v9, %v19491_v60  ;;  %v5691_v1 = vrot.slane %v5677_v24, %v19491_v60  ;;  %v5692_v51 = vcombine.low %v5165_v55, %v5189_v5  ;;  %v5693_v54 = vcombine.high %v5165_v55, %v5189_v5 }
 0xce8   : > { %v5544_v48 = vrot.slane %v5536_v2, %v19494_v0  ;;  %v5551_v8 = vrot.slane %v5537_v38, %v19494_v0  ;;  %v20943_v43 = vrot.slane %v16491_v18, %v19491_v60  ;;  %v20946_v44 = vrot.slane %v16493_v22, %v19491_v60 }
 0xce9   : > { %v5179_v35 = vpop.permute.xlu1 %5178  ;;  %v5560_v6 = vrot.slane %v5552_v59, %v19494_v0  ;;  %v5567_v52 = vrot.slane %v5553_v49, %v19494_v0  ;;  %v20950_v56 = vpop.permute.xlu0 %5124  ;;  %v5700_v42 = vrot.slane %v5692_v51, %v19491_v60  ;;  %v5707_v20 = vrot.slane %v5693_v54, %v19491_v60 }
 0xcea   : > { %v16499_v53 = vcombine.low %v5544_v48, %v5551_v8  ;;  %v16501_v27 = vcombine.high %v5544_v48, %v5551_v8  ;;  %v20955_v55 = vrot.slane %v16495_v11, %v19491_v60  ;;  %v5880_v58 = vcombine.low %v20819_v33, %v5179_v35 }
 0xceb   : > { %v16503_v39 = vcombine.low %v5560_v6, %v5567_v52  ;;  %v16505_v16 = vcombine.high %v5560_v6, %v5567_v52  ;;  %v5740_v4 = vcombine.low %v5684_v25, %v5700_v42  ;;  %v5741_v21 = vcombine.high %v5684_v25, %v5700_v42 }
 0xcec   : > { %v5756_v7 = vcombine.low %v5691_v1, %v5707_v20  ;;  %v5757_v9 = vcombine.high %v5691_v1, %v5707_v20  ;;  %v20959_v18 = vrot.slane %v16497_v31, %v19491_v60  ;;  %v5881_v22 = vcombine.high %v20819_v33, %v5179_v35 }
 0xced   : > { %v5191_v24 = vpop.permute.xlu1 %5190  ;;  %v20966_v2 = vrot.slane %v6116_v41, %v19494_v0  ;;  %v20972_v38 = vrot.slane %v6148_v19, %v19494_v0  ;;  %v20975_v5 = vrot.slane %v16499_v53, %v19491_v60  ;;  %v20978_v11 = vrot.slane %v16501_v27, %v19491_v60  ;;  %v5137_v48 = vpop.permute.xlu0 %5136 }
 0xcee   : > { %v5748_v33 = vrot.slane %v5740_v4, %v19494_v0  ;;  %v5755_v31 = vrot.slane %v5741_v21, %v19494_v0  ;;  %v20983_v41 = vrot.slane %v16503_v39, %v19491_v60  ;;  %v6252_v8 = vcombine.low %v20919_v32, %v20925_v46 }
 0xcef   : > { %v6284_v19 = vcombine.low %v20933_v28, %v20936_v12  ;;  %v6117_v59 = vcombine.high %v20889_v47, %v20892_v30  ;;  %v20992_v49 = vrot.slane %v16505_v16, %v19491_v60  ;;  %v5764_v25 = vrot.slane %v5756_v7, %v19494_v0 }
 0xcf0   : > { %v5771_v1 = vrot.slane %v5757_v9, %v19494_v0  ;;  %v5888_v51 = vrot.slane %v5880_v58, %v19491_v60  ;;  %v5895_v35 = vrot.slane %v5881_v22, %v19491_v60  ;;  %v21001_v6 = vrot.slane %v6252_v8, %v19494_v0 }
 0xcf1   : > { %v20997_v54 = vpop.permute.xlu1 %5126  ;;  %v21004_v52 = vrot.slane %v6284_v19, %v19494_v0  ;;  %v6149_v47 = vcombine.high %v20895_v61, %v20898_v34  ;;  %v16507_v30 = vcombine.low %v5748_v33, %v5755_v31  ;;  %v16509_v53 = vcombine.high %v5748_v33, %v5755_v31  ;;  %v5149_v7 = vpop.permute.xlu0 %5148 }
 0xcf2   : > { %v6180_v27 = vcombine.low %v20966_v2, %v20972_v38  ;;  %v21011_v42 = vrot.slane %v6117_v59, %v19494_v0  ;;  %v6253_v16 = vcombine.high %v20919_v32, %v20925_v46  ;;  %v6285_v61 = vcombine.high %v20933_v28, %v20936_v12 }
 0xcf3   : > { %v6316_v20 = vcombine.low %v21001_v6, %v21004_v52  ;;  %v21016_v39 = vrot.slane %v6149_v47, %v19494_v0  ;;  %v16511_v34 = vcombine.low %v5764_v25, %v5771_v1  ;;  %v5644_v58 = vcombine.low %v20825_v36, %v5137_v48 }
 0xcf4   : > { %v5896_v4 = vcombine.low %v20930_v10, %v5191_v24  ;;  %v5897_v21 = vcombine.high %v20930_v10, %v5191_v24  ;;  %v21026_v22 = vrot.slane %v6253_v16, %v19494_v0  ;;  %v21029_v33 = vrot.slane %v6285_v61, %v19494_v0 }
 0xcf5   : > { %v6868_v9 = vpack.c.bf16 %v6316_v20, %v6180_v27  ;;  %v5645_v32 = vcombine.high %v20825_v36, %v5137_v48  ;;  %v21032_v46 = vpop.permute.xlu1 %5138  ;;  %v16513_v28 = vcombine.high %v5764_v25, %v5771_v1  ;;  %v6182_v12 = vcombine.low %v21011_v42, %v21016_v39 }
 0xcf6   : > { %v5904_v31 = vrot.slane %v5896_v4, %v19491_v60  ;;  %v5911_v10 = vrot.slane %v5897_v21, %v19491_v60  ;;  %v6318_v24 = vcombine.low %v21026_v22, %v21029_v33  ;;  %v5652_v8 = vrot.slane %v5644_v58, %v19491_v60 }
 0xcf7   : > { %17701 = vmatprep.mubr.msk.bf16.mxu1 %vm2903_vm0, %v6868_v9  ;;  %v5660_v19 = vcombine.low %v20950_v56, %v5149_v7  ;;  %v5661_v36 = vcombine.high %v20950_v56, %v5149_v7  ;;  %v5659_v27 = vrot.slane %v5645_v32, %v19491_v60  ;;  %v21048_v61 = vrot.slane %v16507_v30, %v19491_v60 }
 0xcf8   : > { %v5944_v48 = vcombine.low %v5888_v51, %v5904_v31  ;;  %v5945_v59 = vcombine.high %v5888_v51, %v5904_v31  ;;  %v5960_v25 = vcombine.low %v5895_v35, %v5911_v10  ;;  %v5961_v1 = vcombine.high %v5895_v35, %v5911_v10 }
 0xcf9   : > { %v6872_v47 = vpack.c.bf16 %v6318_v24, %v6182_v12  ;;  %v5668_v20 = vrot.slane %v5660_v19, %v19491_v60  ;;  %v5675_v16 = vrot.slane %v5661_v36, %v19491_v60  ;;  %v21051_v58 = vrot.slane %v16509_v53, %v19491_v60  ;;  %v21056_v9 = vpop.permute.xlu1 %5150  ;;  %v5201_v36 = vpop.permute.xlu0 %5200 }
 0xcfa   : > { %v5952_v4 = vrot.slane %v5944_v48, %v19494_v0  ;;  %v5959_v56 = vrot.slane %v5945_v59, %v19494_v0  ;;  %v21059_v32 = vrot.slane %v16511_v34, %v19491_v60  ;;  %v21062_v30 = vrot.slane %v16513_v28, %v19491_v60 }
 0xcfb   : > { %17717 = vmatprep.mubr.msk.bf16.mxu0 %vm2903_vm0, %v6872_v47  ;;  %v5708_v51 = vcombine.low %v5652_v8, %v5668_v20  ;;  %v5709_v35 = vcombine.high %v5652_v8, %v5668_v20  ;;  %v5724_v21 = vcombine.low %v5659_v27, %v5675_v16  ;;  %v5725_v7 = vcombine.high %v5659_v27, %v5675_v16 }
 0xcfc   : > { %v21065_v53 = vrot.slane %v5960_v25, %v19494_v0  ;;  %v21068_v12 = vrot.slane %v5961_v1, %v19494_v0  ;;  %v16515_v19 = vcombine.low %v5952_v4, %v5959_v56  ;;  %v16517_v34 = vcombine.high %v5952_v4, %v5959_v56 }
 0xcfd   : > { %v5716_v31 = vrot.slane %v5708_v51, %v19494_v0  ;;  %v5723_v10 = vrot.slane %v5709_v35, %v19494_v0  ;;  %v5732_v24 = vrot.slane %v5724_v21, %v19494_v0  ;;  %v5739_v8 = vrot.slane %v5725_v7, %v19494_v0  ;;  %v5213_v35 = vpop.permute.xlu1 %5212 }
 0xcfe   : > { %v5848_v28 = vcombine.low %v20835_v14, %v21032_v46  ;;  %v5849_v48 = vcombine.high %v20835_v14, %v21032_v46  ;;  %v6132_v16 = vcombine.low %v20943_v43, %v20946_v44  ;;  %v6164_v4 = vcombine.low %v20955_v55, %v20959_v18 }
 0xcff   : > { %v16506_v59 = vcombine.low %v5716_v31, %v5723_v10  ;;  %v16508_v25 = vcombine.high %v5716_v31, %v5723_v10  ;;  %v16510_v1 = vcombine.low %v5732_v24, %v5739_v8  ;;  %v16512_v47 = vcombine.high %v5732_v24, %v5739_v8 }
 0xd00   : > { %v21099_v21 = vrot.slane %v6132_v16, %v19494_v0  ;;  %v21102_v7 = vrot.slane %v6164_v4, %v19494_v0  ;;  %v6268_v31 = vcombine.low %v20975_v5, %v20978_v11  ;;  %v6300_v10 = vcombine.low %v20983_v41, %v20992_v49  ;;  %v5225_v4 = vpop.permute.xlu0 %5224 }
 0xd01   : > { %v21087_v56 = vrot.slane %v16506_v59, %v19491_v60  ;;  %v21090_v14 = vrot.slane %v16508_v25, %v19491_v60  ;;  %v21093_v46 = vrot.slane %v16510_v1, %v19491_v60  ;;  %v21096_v51 = vrot.slane %v16512_v47, %v19491_v60  ;;  %v21148_v13 = vpop.permute.xlu1 %5206 }
 0xd02   : > { %v21109_v24 = vrot.slane %v16515_v19, %v19491_v60  ;;  %v21112_v8 = vrot.slane %v16517_v34, %v19491_v60  ;;  %v5856_v25 = vrot.slane %v5848_v28, %v19491_v60  ;;  %v5863_v1 = vrot.slane %v5849_v48, %v19491_v60 }
 0xd03   : > { %v6388_v59 = vcombine.low %v21087_v56, %v21090_v14  ;;  %v21119_v47 = vrot.slane %v6268_v31, %v19494_v0  ;;  %v21122_v16 = vrot.slane %v6300_v10, %v19494_v0  ;;  %v6133_v19 = vcombine.high %v20943_v43, %v20946_v44 }
 0xd04   : > { %v6420_v3 = vcombine.low %v21093_v46, %v21096_v51  ;;  %v6184_v48 = vcombine.low %v21099_v21, %v21102_v7  ;;  %v6165_v43 = vcombine.high %v20955_v55, %v20959_v18  ;;  %v6269_v44 = vcombine.high %v20975_v5, %v20978_v11 }
 0xd05   : > { %v21135_v31 = vrot.slane %v6388_v59, %v19494_v0  ;;  %v6320_v10 = vcombine.low %v21119_v47, %v21122_v16  ;;  %v21144_v34 = vrot.slane %v6133_v19, %v19494_v0  ;;  %v6301_v28 = vcombine.high %v20983_v41, %v20992_v49  ;;  %v21182_v15 = vpop.permute.xlu1 %5202 }
 0xd06   : > { %v5388_v20 = vcombine.low %v5201_v36, %v5225_v4  ;;  %v5389_v27 = vcombine.high %v5201_v36, %v5225_v4  ;;  %v21151_v23 = vrot.slane %v6165_v43, %v19494_v0  ;;  %v21154_v40 = vrot.slane %v6269_v44, %v19494_v0 }
 0xd07   : > { %v6876_v59 = vpack.c.bf16 %v6320_v10, %v6184_v48  ;;  %v5864_v55 = vcombine.low %v20997_v54, %v21056_v9  ;;  %v21159_v18 = vrot.slane %v6420_v3, %v19494_v0  ;;  %v21162_v5 = vrot.slane %v6301_v28, %v19494_v0 }
 0xd08   : > { %v5396_v11 = vrot.slane %v5388_v20, %v19491_v60  ;;  %v5865_v41 = vcombine.high %v20997_v54, %v21056_v9  ;;  %v5403_v36 = vrot.slane %v5389_v27, %v19491_v60  ;;  %v5372_v4 = vcombine.low %v20842_v57, %v5213_v35 }
 0xd09   : > { %18081 = vmatprep.subr.msk.bf16.mxu1 %vm2903_vm0, %v6876_v59  ;;  %v6899_v49 = vsel %vm2903_vm0, %v6876_v59, 0  ;;  %v5872_v19 = vrot.slane %v5864_v55, %v19491_v60  ;;  %v6186_v3 = vcombine.low %v21144_v34, %v21151_v23  ;;  %v6322_v28 = vcombine.low %v21154_v40, %v21162_v5 }
 0xd0a   : > { %17698 = vmatpush3.bf16.xpose.msra.mxu1 %v6899_v49  ;;  %v5879_v20 = vrot.slane %v5865_v41, %v19491_v60  ;;  %v5373_v54 = vcombine.high %v20842_v57, %v5213_v35  ;;  %v5380_v10 = vrot.slane %v5372_v4, %v19491_v60  ;;  %v6404_v27 = vcombine.low %v21048_v61, %v21051_v58 }
 0xd0b   : > { %v5912_v9 = vcombine.low %v5856_v25, %v5872_v19  ;;  %v5913_v48 = vcombine.high %v5856_v25, %v5872_v19  ;;  %v6880_v43 = vpack.c.bf16 %v6322_v28, %v6186_v3 }
 0xd0c   : > { %v5928_v44 = vcombine.low %v5863_v1, %v5879_v20  ;;  %v5929_v59 = vcombine.high %v5863_v1, %v5879_v20  ;;  %v5387_v55 = vrot.slane %v5373_v54, %v19491_v60  ;;  %v5404_v45 = vcombine.low %v5380_v10, %v5396_v11 }
 0xd0d   : > { %v5920_v49 = vrot.slane %v5912_v9, %v19494_v0  ;;  %v5927_v41 = vrot.slane %v5913_v48, %v19494_v0  ;;  %v5405_v57 = vcombine.high %v5380_v10, %v5396_v11  ;;  %18085 = vmatprep.subr.msk.bf16.mxu0 %vm2903_vm0, %v6880_v43  ;;  %v7021_v35 = vsel %vm2903_vm0, %v6880_v43, 0 }
 0xd0e   : > { %v5936_v25 = vrot.slane %v5928_v44, %v19494_v0  ;;  %v5943_v19 = vrot.slane %v5929_v59, %v19494_v0  ;;  %v5420_v4 = vcombine.low %v5387_v55, %v5403_v36  ;;  %17714 = vmatpush3.bf16.xpose.msra.mxu0 %v7021_v35  ;;  %v5412_v28 = vrot.slane %v5404_v45, %v19494_v0 }
 0xd0f   : > { %v16514_v1 = vcombine.low %v5920_v49, %v5927_v41  ;;  %v16516_v3 = vcombine.high %v5920_v49, %v5927_v41  ;;  %v5419_v20 = vrot.slane %v5405_v57, %v19494_v0  ;;  %v5421_v48 = vcombine.high %v5387_v55, %v5403_v36  ;;  %v5215_v36 = vpop.permute.xlu1 %5214 }
 0xd10   : > { %v16518_v54 = vcombine.low %v5936_v25, %v5943_v19  ;;  %v16520_v9 = vcombine.high %v5936_v25, %v5943_v19  ;;  %v6436_v11 = vcombine.low %v21059_v32, %v21062_v30  ;;  %v21197_v44 = vrot.slane %v5420_v4, %v19494_v0 }
 0xd11   : > { %v6468_v10 = vrot.slane %v16514_v1, %v19491_v60  ;;  %v6484_v43 = vrot.slane %v16516_v3, %v19491_v60  ;;  %v6596_v59 = vcombine.low %v5412_v28, %v5419_v20  ;;  %v21202_v41 = vrot.slane %v5421_v48, %v19494_v0 }
 0xd12   : > { %v6500_v49 = vrot.slane %v16518_v54, %v19491_v60  ;;  %v6516_v45 = vrot.slane %v16520_v9, %v19491_v60  ;;  %v16522_v57 = vcombine.high %v5412_v28, %v5419_v20  ;;  %v24507_v55 = vcombine.low %v21065_v53, %v21068_v12 }
 0xd13   : > { %v24508_v25 = vcombine.high %v21065_v53, %v21068_v12  ;;  %v24509_v4 = vcombine.high %v21087_v56, %v21090_v14  ;;  %v6524_v3 = vcombine.low %v6468_v10, %v6484_v43  ;;  %v24510_v28 = vcombine.high %v21093_v46, %v21096_v51 }
 0xd14   : > { %v6507_v35 = vrot.slane %v24507_v55, %v19491_v60  ;;  %v6452_v54 = vcombine.low %v21135_v31, %v21159_v18  ;;  %v6525_v9 = vcombine.high %v6468_v10, %v6484_v43  ;;  %v21227_v53 = vrot.slane %v6404_v27, %v19494_v0 }
 0xd15   : > { %v6523_v19 = vrot.slane %v24508_v25, %v19491_v60  ;;  %v21216_v1 = vrot.slane %v24509_v4, %v19494_v0  ;;  %v21222_v20 = vrot.slane %v24510_v28, %v19494_v0  ;;  %v6556_v12 = vcombine.low %v6500_v49, %v6516_v45 }
 0xd16   : > { %v21230_v48 = vrot.slane %v6596_v59, %v19491_v60  ;;  %v21233_v56 = vrot.slane %v6436_v11, %v19494_v0  ;;  %v6540_v14 = vcombine.low %v21109_v24, %v21112_v8  ;;  %v6557_v46 = vcombine.high %v6500_v49, %v6516_v45 }
 0xd17   : > { %v21238_v51 = vrot.slane %v16522_v57, %v19491_v60  ;;  %v6612_v10 = vcombine.low %v21197_v44, %v21202_v41  ;;  %v16523_v27 = vcombine.high %v21197_v44, %v21202_v41  ;;  %v21245_v43 = vrot.slane %v6524_v3, %v19494_v0  ;;  %v5227_v41 = vpop.permute.xlu1 %5226 }
 0xd18   : > { %v21248_v59 = vrot.slane %v6540_v14, %v19494_v0  ;;  %v6572_v11 = vcombine.low %v6507_v35, %v6523_v19  ;;  %v6405_v55 = vcombine.high %v21048_v61, %v21051_v58  ;;  %v21253_v49 = vrot.slane %v6525_v9, %v19494_v0 }
 0xd19   : > { %v6437_v45 = vcombine.high %v21059_v32, %v21062_v30  ;;  %v6541_v57 = vcombine.high %v21109_v24, %v21112_v8  ;;  %v6573_v44 = vcombine.high %v6507_v35, %v6523_v19  ;;  %v21260_v25 = vrot.slane %v6556_v12, %v19494_v0 }
 0xd1a   : > { %v6456_v4 = vcombine.low %v21227_v53, %v21233_v56  ;;  %v6580_v3 = vrot.slane %v6572_v11, %v19494_v0  ;;  %v21266_v61 = vrot.slane %v6405_v55, %v19494_v0  ;;  %v5576_v24 = vcombine.low %v20862_v17, %v5215_v36 }
 0xd1b   : > { %v21269_v58 = vrot.slane %v6437_v45, %v19494_v0  ;;  %v21272_v32 = vrot.slane %v6541_v57, %v19494_v0  ;;  %v21275_v30 = vrot.slane %v6573_v44, %v19494_v0  ;;  %v6321_v35 = vcombine.high %v21119_v47, %v21122_v16 }
 0xd1c   : > { %v6592_v8 = vcombine.low %v21248_v59, %v6580_v3  ;;  %v5577_v19 = vcombine.high %v20862_v17, %v5215_v36  ;;  %v5592_v28 = vcombine.low %v21182_v15, %v5227_v41  ;;  %v21284_v9 = vrot.slane %v6557_v46, %v19494_v0 }
 0xd1d   : > { %v6458_v12 = vcombine.low %v21266_v61, %v21269_v58  ;;  %v6594_v14 = vcombine.low %v21272_v32, %v21275_v30  ;;  %v5593_v11 = vcombine.high %v21182_v15, %v5227_v41  ;;  %v6185_v45 = vcombine.high %v21099_v21, %v21102_v7 }
 0xd1e   : > { %v6877_v55 = vpack.c.bf16 %v6592_v8, %v6456_v4  ;;  %v5584_v47 = vrot.slane %v5576_v24, %v19491_v60  ;;  %v5600_v17 = vrot.slane %v5592_v28, %v19491_v60  ;;  %v6588_v16 = vcombine.low %v21245_v43, %v21260_v25 }
 0xd1f   : > { %v6881_v36 = vpack.c.bf16 %v6594_v14, %v6458_v12  ;;  %v5591_v46 = vrot.slane %v5577_v19, %v19491_v60  ;;  %v5607_v57 = vrot.slane %v5593_v11, %v19491_v60  ;;  %v6878_v44 = vpack.c.bf16 %v6321_v35, %v6185_v45 }
 0xd20   : > { %18082 = vmatprep.subr.msk.bf16.mxu1 %vm2903_vm0, %v6877_v55  ;;  %v6902_v15 = vsel %vm2903_vm0, %v6877_v55, 0  ;;  %v5608_v41 = vcombine.low %v5584_v47, %v5600_v17  ;;  %v5609_v4 = vcombine.high %v5584_v47, %v5600_v17  ;;  %v6590_v8 = vcombine.low %v21253_v49, %v21284_v9 }
 0xd21   : > { %18086 = vmatprep.subr.msk.bf16.mxu0 %vm2903_vm0, %v6881_v36  ;;  %17700 = vmatpush3.bf16.xpose.msra.mxu1 %v6902_v15  ;;  %v7024_v21 = vsel %vm2903_vm0, %v6881_v36, 0  ;;  %v5624_v7 = vcombine.low %v5591_v46, %v5607_v57  ;;  %v5625_v24 = vcombine.high %v5591_v46, %v5607_v57  ;;  %v6619_v19 = vrot.slane %v6612_v10, %v19491_v60 }
 0xd22   : > { %17716 = vmatpush3.bf16.xpose.msra.mxu0 %v7024_v21  ;;  %18083 = vmatprep.subr.msk.bf16.mxu1 %vm2903_vm0, %v6878_v44  ;;  %v5616_v28 = vrot.slane %v5608_v41, %v19494_v0  ;;  %v5623_v35 = vrot.slane %v5609_v4, %v19494_v0  ;;  %v6869_v11 = vpack.c.bf16 %v6588_v16, %v6452_v54 }
 0xd23   : > { %v5632_v12 = vrot.slane %v5624_v7, %v19494_v0  ;;  %v5639_v14 = vrot.slane %v5625_v24, %v19494_v0  ;;  %v6454_v55 = vcombine.low %v21216_v1, %v21222_v20  ;;  %v6593_v17 = vcombine.high %v21248_v59, %v6580_v3 }
 0xd24   : > { %v6664_v45 = vcombine.low %v5616_v28, %v5623_v35  ;;  %v16524_v47 = vcombine.high %v5616_v28, %v5623_v35  ;;  %v6317_v10 = vcombine.high %v21001_v6, %v21004_v52  ;;  %v6627_v36 = vrot.slane %v16523_v27, %v19491_v60 }
 0xd25   : > { %v6680_v46 = vcombine.low %v5632_v12, %v5639_v14  ;;  %v16525_v57 = vcombine.high %v5632_v12, %v5639_v14  ;;  %v6873_v15 = vpack.c.bf16 %v6590_v8, %v6454_v55  ;;  %v6457_v54 = vcombine.high %v21227_v53, %v21233_v56 }
 0xd26   : > { %v6671_v41 = vrot.slane %v6664_v45, %v19491_v60  ;;  %v6679_v4 = vrot.slane %v16524_v47, %v19491_v60  ;;  %v6181_v16 = vcombine.high %v20966_v2, %v20972_v38  ;;  %v6960_v6 = vsel %vm2903_vm0, %v6878_v44, 0 }
 0xd27   : > { %v6687_v59 = vrot.slane %v6680_v46, %v19491_v60  ;;  %v6695_v3 = vrot.slane %v16525_v57, %v19491_v60  ;;  %v6879_v52 = vpack.c.bf16 %v6593_v17, %v6457_v54  ;;  %v6628_v21 = vcombine.low %v21230_v48, %v21238_v51 }
 0xd28   : > { %17702 = vmatmul.mubr.msk.bf16.vlgmr.msra.gmra.mrb[48].mxu1 %vm2903_vm0, %v6869_v11  ;;  %v6870_v27 = vpack.c.bf16 %v6317_v10, %v6181_v16  ;;  %v6644_v53 = vcombine.low %v6619_v19, %v6627_v36  ;;  %v6696_v2 = vcombine.low %v6671_v41, %v6679_v4  ;;  %v6323_v44 = vcombine.high %v21154_v40, %v21162_v5 }
 0xd29   : > { %17706 = vmatpush3.bf16.xpose.msra.mxu1 %v6960_v6  ;;  %17718 = vmatmul.mubr.msk.bf16.vlgmr.msra.gmra.mrb[44].mxu0 %vm2903_vm0, %v6873_v15  ;;  %v6636_v38 = vrot.slane %v6628_v21, %v19494_v0  ;;  %v6712_v7 = vcombine.low %v6687_v59, %v6695_v3  ;;  %v6629_v8 = vcombine.high %v21230_v48, %v21238_v51  ;;  %v6963_v17 = vsel %vm2903_vm0, %v6879_v52, 0 }
 0xd2a   : > { %18084 = vmatprep.subr.msk.bf16.mxu1 %vm2903_vm0, %v6879_v52  ;;  %17709 = vmatprep.mubr.msk.bf16.mxu1 %vm2903_vm0, %v6870_v27  ;;  %v6652_v56 = vrot.slane %v6644_v53, %v19494_v0  ;;  %v6704_v24 = vrot.slane %v6696_v2, %v19494_v0  ;;  %v6187_v35 = vcombine.high %v21144_v34, %v21151_v23 }
 0xd2b   : > { %v6720_v28 = vrot.slane %v6712_v7, %v19494_v0  ;;  %v6643_v12 = vrot.slane %v6629_v8, %v19494_v0  ;;  %v6645_v14 = vcombine.high %v6619_v19, %v6627_v36  ;;  %v6697_v11 = vcombine.high %v6671_v41, %v6679_v4 }
 0xd2c   : > { %v6660_v55 = vcombine.low %v6636_v38, %v6652_v56  ;;  %v6713_v47 = vcombine.high %v6687_v59, %v6695_v3  ;;  %v6882_v40 = vpack.c.bf16 %v6323_v44, %v6187_v35  ;;  %v6589_v23 = vcombine.high %v21245_v43, %v21260_v25  ;;  %v18665_v3 = vld [vmem:[%s24498_s28 + $0x10] sm:$0xff]  ;;  %v18668_v44 = vld [vmem:[%s24498_s28 + $0x8] sm:$0xff] }
 0xd2d   : > { %v6728_v45 = vcombine.low %v6704_v24, %v6720_v28  ;;  %v6659_v5 = vrot.slane %v6645_v14, %v19494_v0  ;;  %v6711_v10 = vrot.slane %v6697_v11, %v19494_v0  ;;  %v6319_v36 = vcombine.high %v21026_v22, %v21029_v33  ;;  %v18670_v14 = vld [vmem:[%s24498_s28 + $0x48] sm:$0xff] }
 0xd2e   : > { %v6727_v51 = vrot.slane %v6713_v47, %v19494_v0  ;;  %v6453_v15 = vcombine.high %v21135_v31, %v21159_v18  ;;  %v6595_v41 = vcombine.high %v21272_v32, %v21275_v30  ;;  %v6183_v4 = vcombine.high %v21011_v42, %v21016_v39 }
 0xd2f   : > { %v6884_v48 = vpack.c.bf16 %v6728_v45, %v6660_v55  ;;  %v6662_v34 = vcombine.low %v6643_v12, %v6659_v5  ;;  %v6663_v19 = vcombine.high %v6643_v12, %v6659_v5  ;;  %v6459_v22 = vcombine.high %v21266_v61, %v21269_v58  ;;  %v18671_v45 = vld [vmem:[%s24498_s28 + $0x40] sm:$0xff]  ;;  %v18672_v5 = vld [vmem:[%s24498_s28 + $0x18] sm:$0xff] }
 0xd30   : > { %v6730_v46 = vcombine.low %v6711_v10, %v6727_v51  ;;  %v6731_v57 = vcombine.high %v6711_v10, %v6727_v51  ;;  %v6871_v25 = vpack.c.bf16 %v6589_v23, %v6453_v15  ;;  %v6874_v33 = vpack.c.bf16 %v6319_v36, %v6183_v4  ;;  %v18675_v4 = vld [vmem:[%s24498_s28 + $0x28] sm:$0xff] }
 0xd31   : > { %17708 = vmatpush3.bf16.xpose.msra.mxu1 %v6963_v17  ;;  %17729 = vmatprep.subr.bf16.mxu0 %v6884_v48  ;;  %v7082_v31 = vsel %vm2903_vm0, %v6882_v40, 0  ;;  %v6883_v18 = vpack.c.bf16 %v6595_v41, %v6459_v22  ;;  %v6729_v42 = vcombine.high %v6704_v24, %v6720_v28  ;;  %v6661_v39 = vcombine.high %v6636_v38, %v6652_v56  ;;  %v18667_v38 = vld [vmem:[%s24498_s28 + $0x58] sm:$0xff]  ;;  %v18669_v28 = vld [vmem:[%s24498_s28] sm:$0xff] }
 0xd32   : > { %18087 = vmatprep.subr.msk.bf16.mxu1 %vm2903_vm0, %v6882_v40  ;;  %17730 = vmatpush3.bf16.msra.mxu0 %v6884_v48  ;;  %v21358_v54 = vpack.c.bf16 %v6730_v46, %v6662_v34  ;;  %v21360_v43 = vpack.c.bf16 %v6731_v57, %v6663_v19  ;;  %v6591_v61 = vcombine.high %v21253_v49, %v21284_v9  ;;  %v18666_v49 = vld [vmem:[%s24498_s28 + $0x50] sm:$0xff]  ;;  %v18674_v46 = vld [vmem:[%s24498_s28 + $0x38] sm:$0xff] }
 0xd33   : > { %v7085_v32 = vsel %vm2903_vm0, %v6883_v18, 0  ;;  %v6886_v30 = vpack.c.bf16 %v6729_v42, %v6661_v39  ;;  %v6455_v58 = vcombine.high %v21216_v1, %v21222_v20  ;;  %v18673_v19 = vld [vmem:[%s24498_s28 + $0x30] sm:$0xff] }
 0xd35   : > { %v6875_v16 = vpack.c.bf16 %v6591_v61, %v6455_v58  ;;  %v18677_v58 = vld [vmem:[%s24498_s28 + $0x78] sm:$0xff] }
 0xd38   : > { %17710 = vmatmul.mubr.msk.bf16.vlgmr.msra.gmra.mrb[52].mxu1 %vm2903_vm0, %v6871_v25 }
 0xd39   : > { %17722 = vmatpush3.bf16.xpose.msra.mxu1 %v7082_v31  ;;  %17725 = vmatprep.mubr.msk.bf16.mxu1 %vm2903_vm0, %v6874_v33  ;;  %v18676_v33 = vld [vmem:[%s24498_s28 + $0x20] sm:$0xff] }
 0xd3a   : > { %18088 = vmatprep.subr.msk.bf16.mxu1 %vm2903_vm0, %v6883_v18 }
 0xd41   : > { %17724 = vmatpush3.bf16.xpose.msra.mxu1 %v7085_v32 }
 0xd42   : > { %17737 = vmatprep.subr.bf16.mxu1 %v6886_v30 }
 0xd48   : > { %17726 = vmatmul.mubr.msk.bf16.vlgmr.msra.gmra.mrb[56].mxu1 %vm2903_vm0, %v6875_v16 }
 0xd49   : > { %17738 = vmatpush3.bf16.msra.mxu1 %v6886_v30 }
 0xdfb   : > { %v17703_v59 = vpop.f32.mrb[48].mxu1 }
 0xdfc   : > { %v21377_v6 = vadd.f32 %v18665_v3, %v17703_v59  ;;  %v17719_v52 = vpop.f32.mrb[44].mxu0  ;;  %v6938_v27 = vpop.f32.mrb[49].mxu1  ;;  %v18678_v3 = vld [vmem:[%s24498_s28 + $0x68] sm:$0xff] }
 0xdfd   : > { %v7060_v21 = vpop.f32.mrb[45].mxu0  ;;  %v17704_v53 = vpop.f32.mrb[50].mxu1  ;;  %v21382_v1 = vadd.f32 %v18666_v49, %v17719_v52  ;;  %v21401_v35 = vadd.f32 %v18669_v28, %v6938_v27 }
 0xdfe   : > { %v17720_v20 = vpop.f32.mrb[46].mxu0  ;;  %v6941_v9 = vpop.f32.mrb[51].mxu1  ;;  %v7142_v2 = vsel %vm2903_vm0, %v21377_v6, -inf  ;;  %v21415_v47 = vadd.f32 %v18671_v45, %v7060_v21  ;;  %v21424_v10 = vadd.f32 %v18672_v5, %v17704_v53  ;;  %v18679_v53 = vld [vmem:[%s24498_s28 + $0x70] sm:$0xff] }
 0xdff   : > { %v21389_v56 = vadd.f32 %v18667_v38, %v17720_v20  ;;  %v7063_v7 = vpop.f32.mrb[47].mxu0  ;;  %7143 = vmax.xlane.f32.xlu0 %v7142_v2  ;;  %v21394_v24 = vadd.f32 %v18668_v44, %v6941_v9  ;;  %v7166_v12 = vsel %vm2903_vm0, %v21382_v1, -inf  ;;  %v7136_v17 = vsel %vm2903_vm0, %v21401_v35, -inf  ;;  %v18680_v20 = vld [vmem:[%s24498_s28 + $0x60] sm:$0xff] }
 0xe00   : > { %v21408_v11 = vadd.f32 %v18670_v14, %v7063_v7  ;;  %v7160_v48 = vsel %vm2903_vm0, %v21415_v47, -inf  ;;  %v7145_v41 = vsel %vm2903_vm0, %v21424_v10, -inf  ;;  %v21490_v7 = vpop.permute.xlu0 %5204 }
 0xe01   : > { %v7169_v8 = vsel %vm2903_vm0, %v21389_v56, -inf  ;;  %v7139_v55 = vsel %vm2903_vm0, %v21394_v24, -inf }
 0xe02   : > { %7170 = vmax.xlane.f32.xlu1 %v7169_v8  ;;  %v7163_v40 = vsel %vm2903_vm0, %v21408_v11, -inf }
 0xe03   : > { %7167 = vmax.xlane.f32.xlu0 %v7166_v12 }
 0xe06   : > { %7140 = vmax.xlane.f32.xlu1 %v7139_v55 }
 0xe07   : > { %7137 = vmax.xlane.f32.xlu0 %v7136_v17 }
 0xe0a   : > { %7164 = vmax.xlane.f32.xlu1 %v7163_v40 }
 0xe0b   : > { %v17711_v51 = vpop.f32.mrb[52].mxu1  ;;  %7161 = vmax.xlane.f32.xlu0 %v7160_v48 }
 0xe0c   : > { %v6999_v23 = vpop.f32.mrb[53].mxu1  ;;  %v21431_v36 = vadd.f32 %v18673_v19, %v17711_v51 }
 0xe0d   : > { %v17712_v34 = vpop.f32.mrb[54].mxu1  ;;  %v21450_v31 = vadd.f32 %v18676_v33, %v6999_v23 }
 0xe0e   : > { %v21436_v57 = vadd.f32 %v18674_v46, %v17712_v34  ;;  %v7002_v15 = vpop.f32.mrb[55].mxu1  ;;  %v7154_v18 = vsel %vm2903_vm0, %v21431_v36, -inf }
 0xe0f   : > { %7146 = vmax.xlane.f32.xlu0 %v7145_v41  ;;  %v21443_v25 = vadd.f32 %v18675_v4, %v7002_v15  ;;  %v7148_v39 = vsel %vm2903_vm0, %v21450_v31, -inf }
 0xe10   : > { %v7157_v22 = vsel %vm2903_vm0, %v21436_v57, -inf }
 0xe11   : > { %7158 = vmax.xlane.f32.xlu1 %v7157_v22  ;;  %v7151_v42 = vsel %vm2903_vm0, %v21443_v25, -inf }
 0xe13   : > { %7155 = vmax.xlane.f32.xlu0 %v7154_v18 }
 0xe15   : > { %7152 = vmax.xlane.f32.xlu1 %v7151_v42 }
 0xe17   : > { %7149 = vmax.xlane.f32.xlu0 %v7148_v39 }
 0xe1b   : > { %v17727_v32 = vpop.f32.mrb[56].mxu1 }
 0xe1c   : > { %v7121_v30 = vpop.f32.mrb[57].mxu1  ;;  %v21479_v49 = vadd.f32 %v18679_v53, %v17727_v32 }
 0xe1d   : > { %v17728_v61 = vpop.f32.mrb[58].mxu1  ;;  %v21484_v9 = vadd.f32 %v18680_v20, %v7121_v30 }
 0xe1e   : > { %v21461_v16 = vadd.f32 %v18677_v58, %v17728_v61  ;;  %v7124_v59 = vpop.f32.mrb[59].mxu1  ;;  %v7178_v2 = vsel %vm2903_vm0, %v21479_v49, -inf }
 0xe1f   : > { %v21466_v52 = vadd.f32 %v18678_v3, %v7124_v59  ;;  %v7172_v38 = vsel %vm2903_vm0, %v21484_v9, -inf }
 0xe20   : > { %v7181_v27 = vsel %vm2903_vm0, %v21461_v16, -inf }
 0xe21   : > { %7182 = vmax.xlane.f32.xlu1 %v7181_v27  ;;  %v7175_v21 = vsel %vm2903_vm0, %v21466_v52, -inf }
 0xe25   : > { %7176 = vmax.xlane.f32.xlu1 %v7175_v21 }
 0xe2d   : > { %5216 = vrot.lane.b32.xlu0 %v20852_v29, %s24499_s7 }
 0xe36   : > { %5218 = vrot.lane.b32.xlu1 %v20858_v50, %s24499_s7 }
 0xe4c   : > { %7179 = vmax.xlane.f32.xlu0 %v7178_v2 }
 0xe50   : > { %7173 = vmax.xlane.f32.xlu0 %v7172_v38 }
 0xe8c   : > { %v7144_v44 = vpop.xlane.xlu0 %7143 }
 0xe8d   : > { %v7186_v8 = vsub.f32 %v21377_v6, %v7144_v44 }
 0xe8f   : > { %v7204_v28 = vmul.f32 1.442695, %v7186_v8  ;;  %v21493_v14 = vpop.xlane.xlu1 %7170 }
 0xe90   : > { %v7168_v12 = vpop.xlane.xlu0 %7167 }
 0xe91   : > { %18517 = vpow2.f32 %v7204_v28  ;;  %v7194_v20 = vsub.f32 %v21382_v1, %v7168_v12 }
 0xe93   : > { %v7141_v40 = vpop.xlane.xlu1 %7140  ;;  %v7220_v44 = vmul.f32 1.442695, %v7194_v20 }
 0xe94   : > { %v7138_v55 = vpop.xlane.xlu0 %7137  ;;  %v7185_v51 = vsub.f32 %v21394_v24, %v7141_v40 }
 0xe95   : > { %v7184_v45 = vsub.f32 %v21401_v35, %v7138_v55 }
 0xe96   : > { %v7202_v19 = vmul.f32 1.442695, %v7185_v51 }
 0xe97   : > { %v7200_v17 = vmul.f32 1.442695, %v7184_v45  ;;  %v7165_v18 = vpop.xlane.xlu1 %7164 }
 0xe98   : > { %v7162_v5 = vpop.xlane.xlu0 %7161 }
 0xe99   : > { %18519 = vpow2.f32 %v7200_v17  ;;  %v7192_v3 = vsub.f32 %v21415_v47, %v7162_v5  ;;  %v7195_v47 = vsub.f32 %v21389_v56, %v21493_v14 }
 0xe9b   : > { %v21496_v48 = vpop.eup %18517  ;;  %v7216_v2 = vmul.f32 1.442695, %v7192_v3  ;;  %v7222_v55 = vmul.f32 1.442695, %v7195_v47 }
 0xe9c   : > { %v7147_v23 = vpop.xlane.xlu0 %7146  ;;  %v7238_v6 = vsel %vm2903_vm0, %v21496_v48, 0.0 }
 0xe9d   : > { %v7187_v34 = vsub.f32 %v21424_v10, %v7147_v23  ;;  %7239 = vadd.xlane.f32.xlu0 %v7238_v6 }
 0xe9e   : > { %v7159_v39 = vpop.xlane.xlu1 %7158 }
 0xe9f   : > { %v7206_v46 = vmul.f32 1.442695, %v7187_v34  ;;  %v7191_v61 = vsub.f32 %v21436_v57, %v7159_v39 }
 0xea0   : > { %v7156_v22 = vpop.xlane.xlu0 %7155 }
 0xea1   : > { %18521 = vpow2.f32 %v7206_v46  ;;  %v7190_v32 = vsub.f32 %v21431_v36, %v7156_v22  ;;  %v7214_v27 = vmul.f32 1.442695, %v7191_v61 }
 0xea2   : > { %18523 = vpow2.f32 %v7202_v19  ;;  %v7153_v59 = vpop.xlane.xlu1 %7152 }
 0xea3   : > { %v21502_v15 = vpop.eup %18519  ;;  %v7212_v58 = vmul.f32 1.442695, %v7190_v32  ;;  %v7189_v21 = vsub.f32 %v21443_v25, %v7153_v59 }
 0xea4   : > { %v7232_v35 = vsel %vm2903_vm0, %v21502_v15, 0.0  ;;  %v7150_v33 = vpop.xlane.xlu0 %7149 }
 0xea5   : > { %7233 = vadd.xlane.f32.xlu0 %v7232_v35  ;;  %v7188_v42 = vsub.f32 %v21450_v31, %v7150_v33  ;;  %v7193_v31 = vsub.f32 %v21408_v11, %v7165_v18  ;;  %v7210_v36 = vmul.f32 1.442695, %v7189_v21 }
 0xea7   : > { %v7208_v30 = vmul.f32 1.442695, %v7188_v42  ;;  %v7218_v8 = vmul.f32 1.442695, %v7193_v31 }
 0xea8   : > { %v21525_v38 = vpop.permute.xlu0 %5216 }
 0xea9   : > { %18525 = vpow2.f32 %v7208_v30  ;;  %v5780_v21 = vcombine.low %v20852_v29, %v21525_v38 }
 0xeaa   : > { %18527 = vpow2.f32 %v7212_v58 }
 0xeab   : > { %v21506_v41 = vpop.eup %18521  ;;  %18529 = vpow2.f32 %v7214_v27 }
 0xeac   : > { %v7241_v24 = vsel %vm2903_vm0, %v21506_v41, 0.0  ;;  %v21510_v4 = vpop.eup %18523  ;;  %18531 = vpow2.f32 %v7216_v2 }
 0xead   : > { %7242 = vadd.xlane.f32.xlu1 %v7241_v24  ;;  %v7235_v10 = vsel %vm2903_vm0, %v21510_v4, 0.0  ;;  %18533 = vpow2.f32 %v7210_v36 }
 0xeae   : > { %v7183_v53 = vpop.xlane.xlu1 %7182  ;;  %18535 = vpow2.f32 %v7220_v44  ;;  %v5788_v44 = vrot.slane %v5780_v21, %v19491_v60 }
 0xeaf   : > { %18537 = vpow2.f32 %v7218_v8  ;;  %v7199_v51 = vsub.f32 %v21461_v16, %v7183_v53  ;;  %v5781_v53 = vcombine.high %v20852_v29, %v21525_v38 }
 0xeb0   : > { %18539 = vpow2.f32 %v7222_v55 }
 0xeb1   : > { %7236 = vadd.xlane.f32.xlu1 %v7235_v10  ;;  %v7230_v19 = vmul.f32 1.442695, %v7199_v51  ;;  %v5795_v47 = vrot.slane %v5781_v53, %v19491_v60 }
 0xeb2   : > { %v7177_v25 = vpop.xlane.xlu1 %7176 }
 0xeb3   : > { %v21527_v57 = vpop.eup %18525  ;;  %v7197_v11 = vsub.f32 %v21466_v52, %v7177_v25 }
 0xeb4   : > { %v7244_v1 = vsel %vm2903_vm0, %v21527_v57, 0.0  ;;  %v21533_v12 = vpop.eup %18527 }
 0xeb5   : > { %v7250_v56 = vsel %vm2903_vm0, %v21533_v12, 0.0  ;;  %v21539_v14 = vpop.eup %18529  ;;  %v7226_v5 = vmul.f32 1.442695, %v7197_v11 }
 0xeb6   : > { %v21543_v52 = vpop.eup %18531  ;;  %v5219_v20 = vpop.permute.xlu1 %5218 }
 0xeb7   : > { %v21547_v34 = vpop.eup %18533  ;;  %v7256_v16 = vsel %vm2903_vm0, %v21543_v52, 0.0 }
 0xeb8   : > { %v7247_v46 = vsel %vm2903_vm0, %v21547_v34, 0.0 }
 0xebb   : > { %5228 = vrot.lane.b32.xlu0 %v20852_v29, %s24500_s6 }
 0xec2   : > { %5230 = vrot.lane.b32.xlu1 %v20858_v50, %s24500_s6 }
 0xed9   : > { %v7180_v28 = vpop.xlane.xlu0 %7179 }
 0xeda   : > { %7245 = vadd.xlane.f32.xlu0 %v7244_v1  ;;  %v7198_v45 = vsub.f32 %v21479_v49, %v7180_v28  ;;  %v7253_v49 = vsel %vm2903_vm0, %v21539_v14, 0.0 }
 0xedc   : > { %v7228_v23 = vmul.f32 1.442695, %v7198_v45 }
 0xedd   : > { %v7174_v17 = vpop.xlane.xlu0 %7173 }
 0xede   : > { %v7196_v40 = vsub.f32 %v21484_v9, %v7174_v17  ;;  %7251 = vadd.xlane.f32.xlu0 %v7250_v56  ;;  %v21549_v9 = vpop.eup %18535 }
 0xedf   : > { %v21555_v35 = vpop.eup %18537  ;;  %v7262_v10 = vsel %vm2903_vm0, %v21549_v9, 0.0 }
 0xee0   : > { %v7224_v6 = vmul.f32 1.442695, %v7196_v40  ;;  %v7259_v24 = vsel %vm2903_vm0, %v21555_v35, 0.0  ;;  %v21561_v22 = vpop.eup %18539  ;;  %v5984_v40 = vcombine.low %v20858_v50, %v5219_v20 }
 0xee1   : > { %v7265_v42 = vsel %vm2903_vm0, %v21561_v22, 0.0 }
 0xee2   : > { %18541 = vpow2.f32 %v7224_v6  ;;  %7254 = vadd.xlane.f32.xlu0 %v7253_v49 }
 0xee3   : > { %18543 = vpow2.f32 %v7226_v5  ;;  %v5985_v5 = vcombine.high %v20858_v50, %v5219_v20 }
 0xee4   : > { %18545 = vpow2.f32 %v7228_v23 }
 0xee5   : > { %18547 = vpow2.f32 %v7230_v19 }
 0xee6   : > { %7248 = vadd.xlane.f32.xlu1 %v7247_v46  ;;  %7257 = vadd.xlane.f32.xlu0 %v7256_v16 }
 0xeea   : > { %7260 = vadd.xlane.f32.xlu1 %v7259_v24  ;;  %7263 = vadd.xlane.f32.xlu0 %v7262_v10  ;;  %v5992_v24 = vrot.slane %v5984_v40, %v19491_v60  ;;  %v5999_v10 = vrot.slane %v5985_v5, %v19491_v60 }
 0xeec   : > { %v21563_v33 = vpop.eup %18541 }
 0xeed   : > { %v21565_v18 = vpop.eup %18543  ;;  %v7268_v39 = vsel %vm2903_vm0, %v21563_v33, 0.0 }
 0xeee   : > { %v21571_v32 = vpop.eup %18545  ;;  %7266 = vadd.xlane.f32.xlu1 %v7265_v42  ;;  %7269 = vadd.xlane.f32.xlu0 %v7268_v39  ;;  %v7271_v30 = vsel %vm2903_vm0, %v21565_v18, 0.0 }
 0xeef   : > { %v7274_v61 = vsel %vm2903_vm0, %v21571_v32, 0.0  ;;  %v21577_v58 = vpop.eup %18547 }
 0xef0   : > { %v7277_v59 = vsel %vm2903_vm0, %v21577_v58, 0.0 }
 0xef2   : > { %7272 = vadd.xlane.f32.xlu1 %v7271_v30  ;;  %7275 = vadd.xlane.f32.xlu0 %v7274_v61 }
 0xef6   : > { %7278 = vadd.xlane.f32.xlu1 %v7277_v59 }
 0xf2a   : > { %v7240_v3 = vpop.xlane.xlu0 %7239 }
 0xf32   : > { %v7234_v27 = vpop.xlane.xlu0 %7233 }
 0xf33   : > { %18549 = vrcp.f32 %v7234_v27 }
 0xf36   : > { %v5229_v2 = vpop.permute.xlu0 %5228 }
 0xf37   : > { %v5796_v31 = vcombine.low %v21490_v7, %v5229_v2  ;;  %v5797_v36 = vcombine.high %v21490_v7, %v5229_v2 }
 0xf39   : > { %v5804_v8 = vrot.slane %v5796_v31, %v19491_v60  ;;  %v5811_v25 = vrot.slane %v5797_v36, %v19491_v60 }
 0xf3a   : > { %v7243_v28 = vpop.xlane.xlu1 %7242 }
 0xf3b   : > { %v5812_v1 = vcombine.low %v5788_v44, %v5804_v8  ;;  %v5813_v11 = vcombine.high %v5788_v44, %v5804_v8  ;;  %v5828_v55 = vcombine.low %v5795_v47, %v5811_v25  ;;  %v5829_v45 = vcombine.high %v5795_v47, %v5811_v25 }
 0xf3d   : > { %v5820_v29 = vrot.slane %v5812_v1, %v19494_v0  ;;  %v5827_v38 = vrot.slane %v5813_v11, %v19494_v0  ;;  %v5836_v7 = vrot.slane %v5828_v55, %v19494_v0  ;;  %v5843_v17 = vrot.slane %v5829_v45, %v19494_v0  ;;  %v18550_v59 = vpop.eup %18549 }
 0xf3e   : > { %v7237_v56 = vpop.xlane.xlu1 %7236  ;;  %v7296_v8 = vmul.f32 %v18550_v59, %v21502_v15 }
 0xf3f   : > { %18551 = vrcp.f32 %v7237_v56  ;;  %v6732_v51 = vcombine.low %v5820_v29, %v5827_v38  ;;  %v16526_v23 = vcombine.high %v5820_v29, %v5827_v38  ;;  %v6748_v6 = vcombine.low %v5836_v7, %v5843_v17 }
 0xf40   : > { %v16527_v19 = vcombine.high %v5836_v7, %v5843_v17  ;;  %18553 = vrcp.f32 %v7243_v28 }
 0xf41   : > { %v6739_v30 = vrot.slane %v6732_v51, %v19491_v60  ;;  %v6747_v50 = vrot.slane %v16526_v23, %v19491_v60  ;;  %v6755_v61 = vrot.slane %v6748_v6, %v19491_v60  ;;  %18555 = vrcp.f32 %v7240_v3 }
 0xf42   : > { %v5231_v49 = vpop.permute.xlu1 %5230  ;;  %v6763_v27 = vrot.slane %v16527_v19, %v19491_v60 }
 0xf43   : > { %v6000_v46 = vcombine.low %v21148_v13, %v5231_v49  ;;  %v6001_v16 = vcombine.high %v21148_v13, %v5231_v49  ;;  %v6764_v25 = vcombine.low %v6739_v30, %v6747_v50  ;;  %v6765_v49 = vcombine.high %v6739_v30, %v6747_v50 }
 0xf44   : > { %v6780_v45 = vcombine.low %v6755_v61, %v6763_v27 }
 0xf45   : > { %v6008_v42 = vrot.slane %v6000_v46, %v19491_v60  ;;  %v6015_v39 = vrot.slane %v6001_v16, %v19491_v60  ;;  %v6772_v15 = vrot.slane %v6764_v25, %v19494_v0  ;;  %v6781_v46 = vcombine.high %v6755_v61, %v6763_v27 }
 0xf46   : > { %v6788_v40 = vrot.slane %v6780_v45, %v19494_v0 }
 0xf47   : > { %v6016_v21 = vcombine.low %v5992_v24, %v6008_v42  ;;  %v6017_v53 = vcombine.high %v5992_v24, %v6008_v42  ;;  %v6032_v13 = vcombine.low %v5999_v10, %v6015_v39  ;;  %v6033_v20 = vcombine.high %v5999_v10, %v6015_v39 }
 0xf48   : > { %v6796_v24 = vcombine.low %v6772_v15, %v6788_v40  ;;  %v6797_v10 = vcombine.high %v6772_v15, %v6788_v40  ;;  %v6795_v61 = vrot.slane %v6781_v46, %v19494_v0 }
 0xf49   : > { %v6024_v2 = vrot.slane %v6016_v21, %v19494_v0  ;;  %v6031_v31 = vrot.slane %v6017_v53, %v19494_v0  ;;  %v6040_v36 = vrot.slane %v6032_v13, %v19494_v0  ;;  %v18552_v44 = vpop.eup %18551  ;;  %v6047_v47 = vrot.slane %v6033_v20, %v19494_v0 }
 0xf4a   : > { %v7297_v55 = vmul.f32 %v18552_v44, %v21510_v4  ;;  %v18554_v16 = vpop.eup %18553  ;;  %v21629_v53 = vrot.slane %v6765_v49, %v19494_v0 }
 0xf4b   : > { %v6800_v1 = vcombine.low %v6024_v2, %v6031_v31  ;;  %v16528_v11 = vcombine.high %v6024_v2, %v6031_v31  ;;  %v6816_v29 = vcombine.low %v6040_v36, %v6047_v47  ;;  %v16529_v28 = vcombine.high %v6040_v36, %v6047_v47 }
 0xf4c   : > { %v7312_v17 = vpack.c.bf16 %v7297_v55, %v7296_v8  ;;  %v7299_v30 = vmul.f32 %v18554_v16, %v21506_v41  ;;  %v6798_v41 = vcombine.low %v21629_v53, %v6795_v61 }
 0xf4d   : > { %v6807_v38 = vrot.slane %v6800_v1, %v19491_v60  ;;  %v6815_v7 = vrot.slane %v16528_v11, %v19491_v60  ;;  %v6823_v56 = vrot.slane %v6816_v29, %v19491_v60  ;;  %v6831_v3 = vrot.slane %v16529_v28, %v19491_v60  ;;  %v18556_v60 = vpop.eup %18555 }
 0xf4e   : > { %17733 = vmatprep.mubr.msk.bf16.mxu0 %vm2903_vm0, %v7312_v17  ;;  %v7298_v27 = vmul.f32 %v18556_v60, %v21496_v48 }
 0xf4f   : > { %v6832_v5 = vcombine.low %v6807_v38, %v6815_v7  ;;  %v6848_v4 = vcombine.low %v6823_v56, %v6831_v3  ;;  %v6833_v51 = vcombine.high %v6807_v38, %v6815_v7  ;;  %v6849_v23 = vcombine.high %v6823_v56, %v6831_v3 }
 0xf50   : > { %v7313_v2 = vpack.c.bf16 %v7299_v30, %v7298_v27  ;;  %v18281_v27 = vld [vmem:[%s24501_s1 + $0x60] sm:$0xff]  }
 0xf51   : > { %v6840_v6 = vrot.slane %v6832_v5, %v19494_v0  ;;  %v6856_v19 = vrot.slane %v6848_v4, %v19494_v0  ;;  %v21623_v59 = vrot.slane %v6833_v51, %v19494_v0  ;;  %v21626_v21 = vrot.slane %v6849_v23, %v19494_v0  ;;  %v18277_v0 = vld [vmem:[%s24501_s1 + $0x40] sm:$0xff]  }
 0xf53   : > { %v6864_v42 = vcombine.low %v6840_v6, %v6856_v19  ;;  %v6865_v39 = vcombine.high %v6840_v6, %v6856_v19  ;;  %v6866_v20 = vcombine.low %v21623_v59, %v21626_v21  ;;  %v6867_v5 = vcombine.high %v21623_v59, %v21626_v21 }
 0xf55   : > { %v6885_v50 = vpack.c.bf16 %v6864_v42, %v6796_v24  ;;  %v6887_v13 = vpack.c.bf16 %v6865_v39, %v6797_v10  ;;  %v6889_v31 = vpack.c.bf16 %v6866_v20, %v6798_v41 }
 0xf57   : > { %17731 = vmatprep.subr.bf16.mxu0 %v6885_v50  ;;  %17739 = vmatprep.subr.bf16.mxu1 %v6887_v13 }
 0xf58   : > { %17732 = vmatpush3.bf16.msra.mxu0 %v6885_v50  ;;  %17740 = vmatpush3.bf16.msra.mxu1 %v6887_v13 }
 0xf59   : > { %17745 = vmatprep.subr.bf16.mxu0 %v21358_v54  ;;  %17753 = vmatprep.subr.bf16.mxu1 %v21360_v43 }
 0xf5b   : > { %17734 = vmatmul.mubr.msk.bf16.vlgmr.msra.gmra.mrb[48].mxu0 %vm2903_vm0, %v7313_v2 }
 0xf5c   : > { %17746 = vmatpush3.bf16.msra.mxu0 %v21358_v54 }
 0xf5d   : > { %17747 = vmatprep.subr.bf16.mxu0 %v6889_v31 }
 0xf60   : > { %17748 = vmatpush3.bf16.msra.mxu0 %v6889_v31 }
 0xf61   : > { %17761 = vmatprep.subr.bf16.mxu0 %v18277_v0 }
 0xf67   : > { %v7246_v48 = vpop.xlane.xlu0 %7245 }
 0xf6b   : > { %v7252_v36 = vpop.xlane.xlu0 %7251 }
 0xf6f   : > { %v7255_v44 = vpop.xlane.xlu0 %7254 }
 0xf70   : > { %18557 = vrcp.f32 %v7255_v44 }
 0xf71   : > { %18559 = vrcp.f32 %v7246_v48 }
 0xf72   : > { %18561 = vrcp.f32 %v7252_v36  ;;  %v18282_v36 = vld [vmem:[%s24501_s1 + $0x68] sm:$0xff]  }
 0xf73   : > { %v7249_v47 = vpop.xlane.xlu1 %7248  ;;  %v7258_v8 = vpop.xlane.xlu0 %7257 }
 0xf74   : > { %18563 = vrcp.f32 %v7249_v47 }
 0xf75   : > { %18565 = vrcp.f32 %v7258_v8 }
 0xf77   : > { %v7261_v25 = vpop.xlane.xlu1 %7260  ;;  %v7264_v1 = vpop.xlane.xlu0 %7263 }
 0xf78   : > { %18567 = vrcp.f32 %v7261_v25  ;;  %v18283_v25 = vld [vmem:[%s24501_s1 + $0x70] sm:$0xff]  }
 0xf79   : > { %18569 = vrcp.f32 %v7264_v1 }
 0xf7a   : > { %v18558_v54 = vpop.eup %18557 }
 0xf7b   : > { %v7267_v11 = vpop.xlane.xlu1 %7266  ;;  %v7270_v55 = vpop.xlane.xlu0 %7269  ;;  %v7303_v38 = vmul.f32 %v18558_v54, %v21539_v14  ;;  %v6799_v14 = vcombine.high %v21629_v53, %v6795_v61  ;;  %v18280_v61 = vld [vmem:[%s24501_s1 + $0x58] sm:$0xff]  }
 0xf7c   : > { %v18560_v45 = vpop.eup %18559  ;;  %18571 = vrcp.f32 %v7267_v11 }
 0xf7d   : > { %v18562_v29 = vpop.eup %18561  ;;  %18573 = vrcp.f32 %v7270_v55  ;;  %v7300_v56 = vmul.f32 %v18560_v45, %v21527_v57 }
 0xf7e   : > { %v18564_v28 = vpop.eup %18563  ;;  %v7302_v40 = vmul.f32 %v18562_v29, %v21533_v12  ;;  %v6891_v12 = vpack.c.bf16 %v6867_v5, %v6799_v14 }
 0xf7f   : > { %v7273_v7 = vpop.xlane.xlu1 %7272  ;;  %v7276_v17 = vpop.xlane.xlu0 %7275  ;;  %v7301_v3 = vmul.f32 %v18564_v28, %v21547_v34  ;;  %v18284_v28 = vld [vmem:[%s24501_s1 + $0x78] sm:$0xff]  }
 0xf80   : > { %v18566_v15 = vpop.eup %18565  ;;  %18575 = vrcp.f32 %v7273_v7  ;;  %v7315_v23 = vpack.c.bf16 %v7303_v38, %v7302_v40 }
 0xf81   : > { %v7314_v4 = vpack.c.bf16 %v7301_v3, %v7300_v56  ;;  %18577 = vrcp.f32 %v7276_v17  ;;  %v7304_v57 = vmul.f32 %v18566_v15, %v21543_v52  ;;  %v16563_v3 = vld [vmem:[%s24503_s30 + $0x1] ss:$0 sm:$0xff] }
 0xf82   : > { %v18568_v51 = vpop.eup %18567 }
 0xf83   : > { %v7279_v6 = vpop.xlane.xlu1 %7278  ;;  %17741 = vmatprep.mubr.msk.bf16.mxu1 %vm2903_vm0, %v7314_v4  ;;  %v7305_v34 = vmul.f32 %v18568_v51, %v21555_v35  ;;  %v18570_v49 = vpop.eup %18569 }
 0xf84   : > { %18579 = vrcp.f32 %v7279_v6  ;;  %17742 = vmatmul.mubr.msk.bf16.vlgmr.msra.gmra.mrb[60].mxu1 %vm2903_vm0, %v7315_v23  ;;  %v7306_v16 = vmul.f32 %v18570_v49, %v21549_v9  ;;  %v24511_v6 = vld [vmem:[#allocation7_spill] sm:$0xff] }
 0xf85   : > { %17754 = vmatpush3.bf16.msra.mxu1 %v21360_v43  ;;  %v7316_v19 = vpack.c.bf16 %v7305_v34, %v7304_v57 }
 0xf86   : > { %v18572_v46 = vpop.eup %18571  ;;  %17755 = vmatprep.subr.bf16.mxu1 %v6891_v12 }
 0xf87   : > { %v7307_v24 = vmul.f32 %v18572_v46, %v21561_v22  ;;  %17749 = vmatprep.mubr.msk.bf16.mxu0 %vm2903_vm0, %v7316_v19  ;;  %v18574_v10 = vpop.eup %18573  ;;  %v18290_v19 = vld [vmem:[%s24411_s11 + $0x10c] ss:$16 sps:$4 sm:$0xff]   ;;  %v18293_v46 = vld [vmem:[%s24411_s11 + $0x124] ss:$16 sps:$4 sm:$0xff]  }
 0xf88   : > { %v7308_v60 = vmul.f32 %v18574_v10, %v21563_v33  ;;  %v18278_v33 = vld [vmem:[%s24501_s1 + $0x48] sm:$0xff]  }
 0xf89   : > { %17756 = vmatpush3.bf16.msra.mxu1 %v6891_v12  ;;  %v7317_v52 = vpack.c.bf16 %v7307_v24, %v7306_v16  ;;  %v18296_v16 = vld [vmem:[%s24411_s11 + $0x12c] ss:$16 sps:$4 sm:$0xff]   ;;  %v18291_v24 = vld [vmem:[%s24411_s11 + $0x120] ss:$16 sps:$4 sm:$0xff]   ;;  %v18294_v10 = vld [vmem:[%s24411_s11 + $0x128] ss:$16 sps:$4 sm:$0xff]  }
 0xf8a   : > { %v18576_v35 = vpop.eup %18575 }
 0xf8b   : > { %17750 = vmatmul.mubr.msk.bf16.vlgmr.msra.gmra.mrb[52].mxu0 %vm2903_vm0, %v7317_v52  ;;  %v7309_v42 = vmul.f32 %v18576_v35, %v21565_v18  ;;  %v18578_v43 = vpop.eup %18577  ;;  %v18279_v18 = vld [vmem:[%s24501_s1 + $0x50] sm:$0xff]  }
 0xf8c   : > { %17762 = vmatpush3.bf16.msra.mxu0 %v18277_v0  ;;  %v7310_v9 = vmul.f32 %v18578_v43, %v21571_v32 }
 0xf8d   : > { %v7318_v39 = vpack.c.bf16 %v7309_v42, %v7308_v60  ;;  %17763 = vmatprep.subr.bf16.mxu0 %v18278_v33 }
 0xf8e   : > { %v18580_v59 = vpop.eup %18579 }
 0xf8f   : > { %v7311_v22 = vmul.f32 %v18580_v59, %v21577_v58  ;;  %17757 = vmatprep.mubr.msk.bf16.mxu1 %vm2903_vm0, %v7318_v39 }
 0xf90   : > { %17764 = vmatpush3.bf16.msra.mxu0 %v18278_v33 }
 0xf91   : > { %v7319_v21 = vpack.c.bf16 %v7311_v22, %v7310_v9  ;;  %17769 = vmatprep.subr.bf16.mxu0 %v18279_v18 }
 0xf93   : > { %17758 = vmatmul.mubr.msk.bf16.vlgmr.msra.gmra.mrb[64].mxu1 %vm2903_vm0, %v7319_v21 }
 0xf94   : > { %8162 = vmatprep.mubr.bf16.mxu1 %v24502_v62 }
0x102e   : > { %v17735_v32 = vpop.f32.mrb[48].mxu0 }
0x102f   : > { %v7360_v58 = vpop.f32.mrb[49].mxu0 }
0x1030   : > { %v17736_v53 = vpop.f32.mrb[50].mxu0 }
0x1031   : > { %v7541_v30 = vpack.c.bf16 %v17736_v53, %v17735_v32  ;;  %v7363_v50 = vpop.f32.mrb[51].mxu0 }
0x1032   : > { %v7540_v13 = vpack.c.bf16 %v7363_v50, %v7360_v58  ;;  %v18297_v50 = vld [vmem:[%s24411_s11 + $0x140] ss:$16 sps:$4 sm:$0xff]  }
0x1034   : > { %17765 = vmatprep.mubr.msk.bf16.mxu0 %vm2903_vm0, %v7540_v13  ;;  %v18299_v13 = vld [vmem:[%s24411_s11 + $0x144] ss:$16 sps:$4 sm:$0xff]  }
0x1035   : > { %17766 = vmatmul.mubr.msk.bf16.vlgmr.msra.gmra.mrb[56].mxu0 %vm2903_vm0, %v7541_v30 }
0x1036   : > { %17770 = vmatpush3.bf16.msra.mxu0 %v18279_v18 }
0x1037   : > { %17771 = vmatprep.subr.bf16.mxu0 %v18280_v61 }
0x103a   : > { %17772 = vmatpush3.bf16.msra.mxu0 %v18280_v61  ;;  %v18300_v61 = vld [vmem:[%s24411_s11 + $0x148] ss:$16 sps:$4 sm:$0xff]  }
0x103b   : > { %17777 = vmatprep.subr.bf16.mxu0 %v18281_v27 }
0x1057   : > { %v17743_v20 = vpop.f32.mrb[60].mxu1 }
0x1058   : > { %v7415_v2 = vpop.f32.mrb[61].mxu1 }
0x1059   : > { %v17744_v41 = vpop.f32.mrb[62].mxu1 }
0x105a   : > { %v7543_v31 = vpack.c.bf16 %v17744_v41, %v17743_v20  ;;  %v7418_v0 = vpop.f32.mrb[63].mxu1  ;;  %v18305_v20 = vld [vmem:[%s24411_s11 + $0x164] ss:$16 sps:$4 sm:$0xff]   ;;  %v18308_v41 = vld [vmem:[%s24411_s11 + $0x16c] ss:$16 sps:$4 sm:$0xff]  }
0x105b   : > { %v7542_v48 = vpack.c.bf16 %v7418_v0, %v7415_v2  ;;  %v18303_v2 = vld [vmem:[%s24411_s11 + $0x160] ss:$16 sps:$4 sm:$0xff]   ;;  %v18311_v0 = vld [vmem:[%s24411_s11 + $0x184] ss:$16 sps:$4 sm:$0xff]  }
0x105d   : > { %17773 = vmatprep.mubr.msk.bf16.mxu0 %vm2903_vm0, %v7542_v48  ;;  %v18314_v48 = vld [vmem:[%s24411_s11 + $0x18c] ss:$16 sps:$4 sm:$0xff]  }
0x105e   : > { %v17751_v44 = vpop.f32.mrb[52].mxu0  ;;  %17774 = vmatmul.mubr.msk.bf16.vlgmr.msra.gmra.mrb[56].mxu0 %vm2903_vm0, %v7543_v31  ;;  %v18306_v31 = vld [vmem:[%s24411_s11 + $0x168] ss:$16 sps:$4 sm:$0xff]  }
0x105f   : > { %17778 = vmatpush3.bf16.msra.mxu0 %v18281_v27  ;;  %v7470_v47 = vpop.f32.mrb[53].mxu0  ;;  %v18302_v27 = vld [vmem:[%s24411_s11 + $0x14c] ss:$16 sps:$4 sm:$0xff]  }
0x1060   : > { %v17752_v8 = vpop.f32.mrb[54].mxu0  ;;  %17779 = vmatprep.subr.bf16.mxu0 %v18282_v36 }
0x1061   : > { %v7545_v1 = vpack.c.bf16 %v17752_v8, %v17751_v44  ;;  %v7473_v54 = vpop.f32.mrb[55].mxu0  ;;  %v18312_v44 = vld [vmem:[%s24411_s11 + $0x188] ss:$16 sps:$4 sm:$0xff]   ;;  %v18320_v8 = vld [vmem:[%s24411_s11 + $0x1ac] ss:$16 sps:$4 sm:$0xff]  }
0x1062   : > { %v7544_v11 = vpack.c.bf16 %v7473_v54, %v7470_v47  ;;  %v18317_v47 = vld [vmem:[%s24411_s11 + $0x1a4] ss:$16 sps:$4 sm:$0xff]  }
0x1063   : > { %17780 = vmatpush3.bf16.msra.mxu0 %v18282_v36  ;;  %v18309_v36 = vld [vmem:[%s24411_s11 + $0x180] ss:$16 sps:$4 sm:$0xff]   ;;  %v18323_v54 = vld [vmem:[%s24411_s11 + $0x1c4] ss:$16 sps:$4 sm:$0xff]  }
0x1064   : > { %17781 = vmatprep.mubr.msk.bf16.mxu0 %vm2903_vm0, %v7544_v11  ;;  %17785 = vmatprep.subr.bf16.mxu0 %v18283_v25  ;;  %v18326_v11 = vld [vmem:[%s24411_s11 + $0x1cc] ss:$16 sps:$4 sm:$0xff]  }
0x1066   : > { %v17759_v55 = vpop.f32.mrb[64].mxu1 }
0x1067   : > { %v7525_v45 = vpop.f32.mrb[65].mxu1 }
0x1068   : > { %v17760_v29 = vpop.f32.mrb[66].mxu1 }
0x1069   : > { %v7547_v38 = vpack.c.bf16 %v17760_v29, %v17759_v55  ;;  %v7528_v7 = vpop.f32.mrb[67].mxu1  ;;  %v18321_v55 = vld [vmem:[%s24411_s11 + $0x1c0] ss:$16 sps:$4 sm:$0xff]   ;;  %v18329_v29 = vld [vmem:[%s24411_s11 + $0x1e4] ss:$16 sps:$4 sm:$0xff]  }
0x106a   : > { %v7546_v17 = vpack.c.bf16 %v7528_v7, %v7525_v45  ;;  %17782 = vmatmul.mubr.msk.bf16.vlgmr.msra.gmra.mrb[56].mxu0 %vm2903_vm0, %v7545_v1  ;;  %v18318_v1 = vld [vmem:[%s24411_s11 + $0x1a8] ss:$16 sps:$4 sm:$0xff]  }
0x106b   : > { %17786 = vmatpush3.bf16.msra.mxu0 %v18283_v25  ;;  %v18315_v25 = vld [vmem:[%s24411_s11 + $0x1a0] ss:$16 sps:$4 sm:$0xff]   ;;  %v18324_v45 = vld [vmem:[%s24411_s11 + $0x1c8] ss:$16 sps:$4 sm:$0xff]  }
0x106c   : > { %17789 = vmatprep.mubr.msk.bf16.mxu0 %vm2903_vm0, %v7546_v17  ;;  %17787 = vmatprep.subr.bf16.mxu0 %v18284_v28  ;;  %v18330_v7 = vld [vmem:[%s24411_s11 + $0x1e8] ss:$16 sps:$4 sm:$0xff]  }
0x106f   : > { %17788 = vmatpush3.bf16.msra.mxu0 %v18284_v28  ;;  %v18332_v28 = vld [vmem:[%s24411_s11 + $0x1ec] ss:$16 sps:$4 sm:$0xff]  }
0x1070   : > { %8183 = vmatprep.subr.bf16.mxu0 %v18290_v19 }
0x1076   : > { %17790 = vmatmul.mubr.msk.bf16.vlgmr.msra.gmra.mrb[56].mxu0 %vm2903_vm0, %v7547_v38  ;;  %v18327_v38 = vld [vmem:[%s24411_s11 + $0x1e0] ss:$16 sps:$4 sm:$0xff]  }
0x1077   : > { %8215 = vmatprep.mubr.bf16.mxu0 %v24502_v62 }
0x1149   : > { %v17791_v56 = vpop.f32.mrb[56].mxu0 }
0x114a   : > { %v7801_v15 = vpop.f32.mrb[57].mxu0  ;;  %v7830_v51 = vadd.f32 %v17791_v56, %v20667_v26  ;;  %v18288_v26 = vld [vmem:[%s24411_s11 + $0x108] ss:$16 sps:$4 sm:$0xff]  }
0x114b   : > { %v7828_v40 = vadd.f32 %v7801_v15, %v20659_v63  ;;  %v17792_v5 = vpop.f32.mrb[58].mxu0  ;;  %v18285_v63 = vld [vmem:[%s24411_s11 + $0x100] ss:$16 sps:$4 sm:$0xff]   ;;  %8184 = vmatpush1.bf16.msra.mxu0 %v18288_v26 }
0x114c   : > { %v7804_v4 = vpop.f32.mrb[59].mxu0  ;;  %v7831_v57 = vadd.f32 %v17792_v5, %v24511_v6  ;;  %v21709_v49 = vadd.f32 %v16563_v3, %v7830_v51  ;;  %8185 = vmatprep.subr.bf16.mxu0 %v18296_v16  ;;  %v16566_v26 = vld [vmem:[%s24409_s9 + $0x1] ss:$0 sm:$0xff] }
0x114d   : > { %v21702_v23 = vadd.f32 %v16563_v3, %v7828_v40  ;;  %v7829_v14 = vadd.f32 %v7804_v4, %v20662_v37  ;;  %v18287_v37 = vld [vmem:[%s24411_s11 + $0x104] ss:$16 sps:$4 sm:$0xff]  }
0x114e   : > { %v21712_v12 = vadd.f32 %v16563_v3, %v7831_v57  ;;  %8130 = vmatprep.subr.bf16.mxu1 %v18287_v37 }
0x114f   : > { %v21706_v34 = vadd.f32 %v16563_v3, %v7829_v14  ;;  %7848 = vadd.xlane.f32.xlu0 %v21702_v23  ;;  %8131 = vmatpush1.bf16.msra.mxu1 %v18285_v63 }
0x1150   : > { %8132 = vmatprep.subr.bf16.mxu1 %v18293_v46  ;;  %8186 = vmatpush1.bf16.msra.mxu0 %v18294_v10 }
0x1151   : > { %7850 = vadd.xlane.f32.xlu1 %v21706_v34  ;;  %8187 = vmatprep.subr.bf16.mxu0 %v18302_v27  ;;  %v18340_v27 = vld [vmem:[%s24413_s13 + $0x188] sm:$0xff]  }
0x1153   : > { %7852 = vadd.xlane.f32.xlu0 %v21709_v49  ;;  %8133 = vmatpush1.bf16.msra.mxu1 %v18291_v24 }
0x1154   : > { %8134 = vmatprep.subr.bf16.mxu1 %v18299_v13  ;;  %8188 = vmatpush1.bf16.msra.mxu0 %v18300_v61  ;;  %v18338_v13 = vld [vmem:[%s24413_s13 + $0x1c8] sm:$0xff]  }
0x1155   : > { %7854 = vadd.xlane.f32.xlu1 %v21712_v12  ;;  %8189 = vmatprep.subr.bf16.mxu0 %v18308_v41  ;;  %v18339_v61 = vld [vmem:[%s24413_s13 + $0x108] sm:$0xff]   ;;  %v18343_v41 = vld [vmem:[%s24413_s13 + $0x110] sm:$0xff]  }
0x1157   : > { %8135 = vmatpush1.bf16.msra.mxu1 %v18297_v50  ;;  %v18337_v50 = vld [vmem:[%s24413_s13 + $0x148] sm:$0xff]  }
0x1158   : > { %8136 = vmatprep.subr.bf16.mxu1 %v18305_v20  ;;  %8190 = vmatpush1.bf16.msra.mxu0 %v18306_v31  ;;  %v18341_v20 = vld [vmem:[%s24413_s13 + $0x150] sm:$0xff]  }
0x1159   : > { %8191 = vmatprep.subr.bf16.mxu0 %v18314_v48  ;;  %v18344_v31 = vld [vmem:[%s24413_s13 + $0x190] sm:$0xff]   ;;  %v18346_v48 = vld [vmem:[%s24413_s13 + $0x1d8] sm:$0xff]  }
0x115b   : > { %8137 = vmatpush1.bf16.msra.mxu1 %v18303_v2  ;;  %v18342_v2 = vld [vmem:[%s24413_s13 + $0x1d0] sm:$0xff]  }
0x115c   : > { %8138 = vmatprep.subr.bf16.mxu1 %v18311_v0  ;;  %8192 = vmatpush1.bf16.msra.mxu0 %v18312_v44  ;;  %v18345_v0 = vld [vmem:[%s24413_s13 + $0x158] sm:$0xff]  }
0x115d   : > { %8193 = vmatprep.subr.bf16.mxu0 %v18320_v8  ;;  %v18348_v44 = vld [vmem:[%s24413_s13 + $0x198] sm:$0xff]   ;;  %v18350_v8 = vld [vmem:[%s24413_s13 + $0x1e0] sm:$0xff]  }
0x115f   : > { %8139 = vmatpush1.bf16.msra.mxu1 %v18309_v36  ;;  %v18347_v36 = vld [vmem:[%s24413_s13 + $0x118] sm:$0xff]  }
0x1160   : > { %8140 = vmatprep.subr.bf16.mxu1 %v18317_v47  ;;  %8194 = vmatpush1.bf16.msra.mxu0 %v18318_v1  ;;  %v18349_v47 = vld [vmem:[%s24413_s13 + $0x160] sm:$0xff]  }
0x1161   : > { %8195 = vmatprep.subr.bf16.mxu0 %v18326_v11  ;;  %v18352_v1 = vld [vmem:[%s24413_s13 + $0x1a0] sm:$0xff]   ;;  %v18354_v11 = vld [vmem:[%s24413_s13 + $0x1e8] sm:$0xff]  }
0x1163   : > { %8141 = vmatpush1.bf16.msra.mxu1 %v18315_v25  ;;  %v18351_v25 = vld [vmem:[%s24413_s13 + $0x120] sm:$0xff]  }
0x1164   : > { %8142 = vmatprep.subr.bf16.mxu1 %v18323_v54  ;;  %8196 = vmatpush1.bf16.msra.mxu0 %v18324_v45  ;;  %v18353_v54 = vld [vmem:[%s24413_s13 + $0x168] sm:$0xff]  }
0x1165   : > { %8197 = vmatprep.subr.bf16.mxu0 %v18332_v28  ;;  %v18356_v45 = vld [vmem:[%s24413_s13 + $0x1a8] sm:$0xff]   ;;  %v18358_v28 = vld [vmem:[%s24413_s13 + $0x1f0] sm:$0xff]  }
0x1167   : > { %8143 = vmatpush1.bf16.msra.mxu1 %v18321_v55  ;;  %v18355_v55 = vld [vmem:[%s24413_s13 + $0x128] sm:$0xff]  }
0x1168   : > { %8144 = vmatprep.subr.bf16.mxu1 %v18329_v29  ;;  %8198 = vmatpush1.bf16.msra.mxu0 %v18330_v7  ;;  %v18357_v29 = vld [vmem:[%s24413_s13 + $0x170] sm:$0xff]  }
0x1169   : > { %v18360_v7 = vld [vmem:[%s24413_s13 + $0x1b0] sm:$0xff]  }
0x116b   : > { %8145 = vmatpush1.bf16.msra.mxu1 %v18327_v38  ;;  %v18359_v38 = vld [vmem:[%s24413_s13 + $0x130] sm:$0xff]  }
0x11dc   : > { %v7849_v52 = vpop.xlane.xlu0 %7848 }
0x11dd   : > { %v7856_v35 = vmul.f32 0.0078125, %v7849_v52  ;;  %v16567_v52 = vld [vmem:[%s24410_s10 + $0x1] ss:$0 sm:$0xff] }
0x11de   : > { %v7851_v60 = vpop.xlane.xlu1 %7850 }
0x11df   : > { %v21741_v42 = vsub.f32 %v21702_v23, %v7856_v35  ;;  %v7857_v43 = vmul.f32 0.0078125, %v7851_v60 }
0x11e0   : > { %v7853_v39 = vpop.xlane.xlu0 %7852 }
0x11e1   : > { %v21744_v59 = vsub.f32 %v21706_v34, %v7857_v43  ;;  %v7858_v9 = vmul.f32 0.0078125, %v7853_v39  ;;  %v7864_v22 = vmul.f32 %v21741_v42, %v21741_v42 }
0x11e2   : > { %v7855_v21 = vpop.xlane.xlu1 %7854 }
0x11e3   : > { %v21749_v33 = vsub.f32 %v21709_v49, %v7858_v9  ;;  %v7859_v18 = vmul.f32 0.0078125, %v7855_v21  ;;  %7868 = vadd.xlane.f32.xlu0 %v7864_v22  ;;  %v7865_v32 = vmul.f32 %v21744_v59, %v21744_v59 }
0x11e5   : > { %v21754_v58 = vsub.f32 %v21712_v12, %v7859_v18  ;;  %7870 = vadd.xlane.f32.xlu1 %v7865_v32  ;;  %v7866_v53 = vmul.f32 %v21749_v33, %v21749_v33 }
0x11e7   : > { %7872 = vadd.xlane.f32.xlu0 %v7866_v53  ;;  %v7867_v30 = vmul.f32 %v21754_v58, %v21754_v58 }
0x11e9   : > { %7874 = vadd.xlane.f32.xlu1 %v7867_v30  ;;  %v18335_v30 = vld [vmem:[%s24413_s13 + $0x100] sm:$0xff]  }
0x1270   : > { %v7869_v17 = vpop.xlane.xlu0 %7868 }
0x1271   : > { %v7876_v56 = vmul.f32 0.0078125, %v7869_v17  ;;  %v18361_v17 = vld [vmem:[%s24413_s13 + $0x178] sm:$0xff]  }
0x1272   : > { %v7871_v3 = vpop.xlane.xlu1 %7870 }
0x1273   : > { %v7880_v15 = vadd.f32 1e-05, %v7876_v56  ;;  %v7877_v40 = vmul.f32 0.0078125, %v7871_v3  ;;  %v18362_v56 = vld [vmem:[%s24413_s13 + $0x1f8] sm:$0xff]  }
0x1274   : > { %v7873_v5 = vpop.xlane.xlu0 %7872  ;;  %v18363_v3 = vld [vmem:[%s24413_s13 + $0x138] sm:$0xff]  }
0x1275   : > { %18581 = vrsqrt.f32 %v7880_v15  ;;  %v7881_v4 = vadd.f32 1e-05, %v7877_v40  ;;  %v7878_v51 = vmul.f32 0.0078125, %v7873_v5  ;;  %v18364_v15 = vld [vmem:[%s24413_s13 + $0x1b8] sm:$0xff]   ;;  %v16600_v40 = vld [vmem:[%s24412_s12 + $0x4] sm:$0xf] }
0x1276   : > { %v7875_v14 = vpop.xlane.xlu1 %7874  ;;  %v24512_v5 = vld [vmem:[#allocation4_spill] sm:$0xff] }
0x1277   : > { %18583 = vrsqrt.f32 %v7881_v4  ;;  %v7882_v6 = vadd.f32 1e-05, %v7878_v51  ;;  %v7879_v57 = vmul.f32 0.0078125, %v7875_v14  ;;  %v7953_v4 = vrot.slane %v16600_v40, %v24512_v5  ;;  %v24513_v51 = vld [vmem:[#allocation6_spill] sm:$0xff] }
0x1278   : > { %v21945_v14 = vrot.slane %v16600_v40, %v24513_v51 }
0x1279   : > { %18585 = vrsqrt.f32 %v7882_v6  ;;  %v7883_v63 = vadd.f32 1e-05, %v7879_v57  ;;  %v24514_v6 = vld [vmem:[#allocation5_spill] sm:$0xff] }
0x127a   : > { %v21948_v57 = vrot.slane %v16600_v40, %v24514_v6 }
0x127b   : > { %18587 = vrsqrt.f32 %v7883_v63  ;;  %v24515_v63 = vld [vmem:[#allocation3_spill] sm:$0xff] }
0x127f   : > { %v18582_v37 = vpop.eup %18581 }
0x1280   : > { %v7888_v19 = vmul.f32 %v18582_v37, %v21741_v42  ;;  %v24516_v37 = vsub.s32 3, %v24515_v63 }
0x1281   : > { %v18584_v46 = vpop.eup %18583 }
0x1282   : > { %v7889_v16 = vmul.f32 %v18584_v46, %v21744_v59  ;;  %v7898_v24 = vmul.f32 %v16566_v26, %v7888_v19 }
0x1283   : > { %v18586_v10 = vpop.eup %18585 }
0x1284   : > { %v7899_v35 = vmul.f32 %v16566_v26, %v7889_v16  ;;  %v7908_v43 = vadd.f32 %v16567_v52, %v7898_v24  ;;  %v7890_v9 = vmul.f32 %v18586_v10, %v21749_v33  ;;  %v18333_v33 = vld [vmem:[%s24413_s13 + $0x140] sm:$0xff]  }
0x1285   : > { %v18588_v60 = vpop.eup %18587  ;;  %17333 = vmatprep.subr.bf16.mxu1 %v18333_v33 }
0x1286   : > { %v7909_v39 = vadd.f32 %v16567_v52, %v7899_v35  ;;  %v7891_v22 = vmul.f32 %v18588_v60, %v21754_v58  ;;  %v7900_v42 = vmul.f32 %v16566_v26, %v7890_v9  ;;  %v18334_v58 = vld [vmem:[%s24413_s13 + $0x1c0] sm:$0xff]  }
0x1287   : > { %17361 = vmatprep.subr.bf16.mxu0 %v18334_v58 }
0x1288   : > { %v7945_v21 = vpack.c.bf16 %v7909_v39, %v7908_v43  ;;  %v7901_v18 = vmul.f32 %v16566_v26, %v7891_v22  ;;  %v7910_v32 = vadd.f32 %v16567_v52, %v7900_v42  ;;  %v21952_v26 = vrot.slane %v16600_v40, %v24516_v37 }
0x128a   : > { %8163 = vmatmul.mubr.bf16.vlgmr.msra.gmra.mrb[68].mxu1 %v7945_v21  ;;  %8216 = vmatmul.mubr.bf16.vlgmr.msra.gmra.mrb[60].mxu0 %v7945_v21  ;;  %v7911_v59 = vadd.f32 %v16567_v52, %v7901_v18 }
0x128b   : > { %8172 = vmatprep.mubr.bf16.mxu1 %v24502_v62  ;;  %8225 = vmatprep.mubr.bf16.mxu0 %v24502_v62  ;;  %v18336_v62 = vld [vmem:[%s24413_s13 + $0x180] sm:$0xff]  }
0x128c   : > { %v7946_v53 = vpack.c.bf16 %v7911_v59, %v7910_v32  ;;  %17334 = vmatpush3.bf16.msra.mxu1 %v18335_v30  ;;  %17362 = vmatpush3.bf16.msra.mxu0 %v18336_v62 }
0x128d   : > { %17335 = vmatprep.subr.bf16.mxu1 %v18337_v50  ;;  %17363 = vmatprep.subr.bf16.mxu0 %v18338_v13 }
0x1290   : > { %17336 = vmatpush3.bf16.msra.mxu1 %v18339_v61  ;;  %17364 = vmatpush3.bf16.msra.mxu0 %v18340_v27 }
0x1291   : > { %17337 = vmatprep.subr.bf16.mxu1 %v18341_v20  ;;  %17365 = vmatprep.subr.bf16.mxu0 %v18342_v2 }
0x1292   : > { %8173 = vmatmul.mubr.bf16.gmra.mrb[72].mxu1 %v7946_v53  ;;  %8226 = vmatmul.mubr.bf16.gmra.mrb[64].mxu0 %v7946_v53 }
0x1294   : > { %17338 = vmatpush3.bf16.msra.mxu1 %v18343_v41  ;;  %17366 = vmatpush3.bf16.msra.mxu0 %v18344_v31 }
0x1295   : > { %17339 = vmatprep.subr.bf16.mxu1 %v18345_v0  ;;  %17367 = vmatprep.subr.bf16.mxu0 %v18346_v48 }
0x1298   : > { %17340 = vmatpush3.bf16.msra.mxu1 %v18347_v36  ;;  %17368 = vmatpush3.bf16.msra.mxu0 %v18348_v44 }
0x1299   : > { %17341 = vmatprep.subr.bf16.mxu1 %v18349_v47  ;;  %17369 = vmatprep.subr.bf16.mxu0 %v18350_v8 }
0x129c   : > { %17342 = vmatpush3.bf16.msra.mxu1 %v18351_v25  ;;  %17370 = vmatpush3.bf16.msra.mxu0 %v18352_v1 }
0x129d   : > { %17343 = vmatprep.subr.bf16.mxu1 %v18353_v54  ;;  %17371 = vmatprep.subr.bf16.mxu0 %v18354_v11 }
0x12a0   : > { %17344 = vmatpush3.bf16.msra.mxu1 %v18355_v55  ;;  %17372 = vmatpush3.bf16.msra.mxu0 %v18356_v45 }
0x12a1   : > { %17345 = vmatprep.subr.bf16.mxu1 %v18357_v29  ;;  %17373 = vmatprep.subr.bf16.mxu0 %v18358_v28 }
0x12a4   : > { %17346 = vmatpush3.bf16.msra.mxu1 %v18359_v38  ;;  %17374 = vmatpush3.bf16.msra.mxu0 %v18360_v7 }
0x12a5   : > { %17347 = vmatprep.subr.bf16.mxu1 %v18361_v17  ;;  %17375 = vmatprep.subr.bf16.mxu0 %v18362_v56 }
0x12a8   : > { %17348 = vmatpush3.bf16.msra.mxu1 %v18363_v3  ;;  %17376 = vmatpush3.bf16.msra.mxu0 %v18364_v15 }
0x135d   : > { %v8164_v19 = vpop.f32.mrb[68].mxu1  ;;  %v8217_v46 = vpop.f32.mrb[60].mxu0 }
0x135e   : > { %v21954_v16 = vadd.f32 %v8164_v19, %v7953_v4  ;;  %v21957_v24 = vadd.f32 %v8217_v46, %v21945_v14  ;;  %v8166_v10 = vpop.f32.mrb[69].mxu1  ;;  %v8219_v52 = vpop.f32.mrb[61].mxu0 }
0x135f   : > { %v21960_v35 = vadd.f32 %v8166_v10, %v21948_v57  ;;  %v21963_v60 = vadd.f32 %v8219_v52, %v21952_v26  ;;  %v8168_v43 = vpop.f32.mrb[70].mxu1  ;;  %v8221_v39 = vpop.f32.mrb[62].mxu0 }
0x1360   : > { %v16633_v9 = vmul.f32 -1.702, %v21954_v16  ;;  %v16635_v22 = vmul.f32 -1.702, %v21957_v24  ;;  %v21967_v21 = vadd.f32 %v8168_v43, %v7953_v4  ;;  %v21970_v18 = vadd.f32 %v8221_v39, %v21945_v14  ;;  %v8170_v42 = vpop.f32.mrb[71].mxu1  ;;  %v8223_v59 = vpop.f32.mrb[63].mxu0 }
0x1361   : > { %v16634_v32 = vmul.f32 -1.702, %v21960_v35  ;;  %v16636_v53 = vmul.f32 -1.702, %v21963_v60  ;;  %v21975_v33 = vadd.f32 %v8170_v42, %v21948_v57  ;;  %v21978_v58 = vadd.f32 %v8223_v59, %v21952_v26 }
0x1362   : > { %v8268_v30 = vmul.f32 1.442695, %v16633_v9  ;;  %v8272_v62 = vmul.f32 1.442695, %v16635_v22  ;;  %v16637_v50 = vmul.f32 -1.702, %v21967_v21 }
0x1363   : > { %v8270_v13 = vmul.f32 1.442695, %v16634_v32  ;;  %v8274_v61 = vmul.f32 1.442695, %v16636_v53  ;;  %v16639_v27 = vmul.f32 -1.702, %v21970_v18 }
0x1364   : > { %18589 = vpow2.f32 %v8268_v30  ;;  %v8276_v20 = vmul.f32 1.442695, %v16637_v50  ;;  %v16638_v2 = vmul.f32 -1.702, %v21975_v33  ;;  %v16640_v41 = vmul.f32 -1.702, %v21978_v58 }
0x1365   : > { %18591 = vpow2.f32 %v8272_v62  ;;  %v8280_v31 = vmul.f32 1.442695, %v16639_v27  ;;  %v8174_v0 = vpop.f32.mrb[72].mxu1  ;;  %v8227_v48 = vpop.f32.mrb[64].mxu0 }
0x1366   : > { %18593 = vpow2.f32 %v8270_v13  ;;  %v8278_v36 = vmul.f32 1.442695, %v16638_v2  ;;  %v21984_v44 = vadd.f32 %v8174_v0, %v7953_v4  ;;  %v8176_v47 = vpop.f32.mrb[73].mxu1  ;;  %v8229_v8 = vpop.f32.mrb[65].mxu0  ;;  %v8282_v25 = vmul.f32 1.442695, %v16640_v41 }
0x1367   : > { %18595 = vpow2.f32 %v8274_v61  ;;  %v21987_v1 = vadd.f32 %v8227_v48, %v21945_v14  ;;  %v21990_v54 = vadd.f32 %v8176_v47, %v21948_v57  ;;  %v8178_v11 = vpop.f32.mrb[74].mxu1  ;;  %v8231_v55 = vpop.f32.mrb[66].mxu0  ;;  %v21999_v51 = vadd.f32 %v8229_v8, %v21952_v26 }
0x1368   : > { %18597 = vpow2.f32 %v8276_v20  ;;  %v16641_v45 = vmul.f32 -1.702, %v21984_v44  ;;  %v21993_v29 = vadd.f32 %v8178_v11, %v7953_v4  ;;  %v8180_v28 = vpop.f32.mrb[75].mxu1  ;;  %v8233_v38 = vpop.f32.mrb[67].mxu0  ;;  %v22003_v9 = vadd.f32 %v8231_v55, %v21945_v14 }
0x1369   : > { %18599 = vpow2.f32 %v8280_v31  ;;  %v16643_v7 = vmul.f32 -1.702, %v21987_v1  ;;  %v16642_v17 = vmul.f32 -1.702, %v21990_v54  ;;  %v16644_v52 = vmul.f32 -1.702, %v21999_v51 }
0x136a   : > { %18601 = vpow2.f32 %v8278_v36  ;;  %v8284_v56 = vmul.f32 1.442695, %v16641_v45  ;;  %v16645_v3 = vmul.f32 -1.702, %v21993_v29  ;;  %v22006_v59 = vadd.f32 %v8180_v28, %v21948_v57 }
0x136b   : > { %18603 = vpow2.f32 %v8282_v25  ;;  %v8288_v15 = vmul.f32 1.442695, %v16643_v7  ;;  %v8286_v40 = vmul.f32 1.442695, %v16642_v17  ;;  %v22009_v30 = vadd.f32 %v8233_v38, %v21952_v26 }
0x136c   : > { %18605 = vpow2.f32 %v8284_v56  ;;  %v8292_v5 = vmul.f32 1.442695, %v16645_v3  ;;  %v8290_v13 = vmul.f32 1.442695, %v16644_v52  ;;  %v16647_v27 = vmul.f32 -1.702, %v22003_v9 }
0x136d   : > { %18607 = vpow2.f32 %v8288_v15  ;;  %v16646_v57 = vmul.f32 -1.702, %v22006_v59  ;;  %v16648_v41 = vmul.f32 -1.702, %v22009_v30 }
0x136e   : > { %v18590_v4 = vpop.eup %18589  ;;  %18609 = vpow2.f32 %v8286_v40  ;;  %v8296_v0 = vmul.f32 1.442695, %v16647_v27 }
0x136f   : > { %v18592_v6 = vpop.eup %18591  ;;  %v8300_v63 = vadd.f32 1.0, %v18590_v4  ;;  %18611 = vpow2.f32 %v8292_v5  ;;  %v8294_v47 = vmul.f32 1.442695, %v16646_v57  ;;  %v8298_v25 = vmul.f32 1.442695, %v16648_v41 }
0x1370   : > { %v18594_v37 = vpop.eup %18593  ;;  %v8302_v19 = vadd.f32 1.0, %v18592_v6 }
0x1371   : > { %v18596_v46 = vpop.eup %18595  ;;  %18613 = vrcp.f32 %v8300_v63  ;;  %v8301_v10 = vadd.f32 1.0, %v18594_v37 }
0x1372   : > { %v18598_v43 = vpop.eup %18597  ;;  %18615 = vrcp.f32 %v8302_v19  ;;  %v8303_v39 = vadd.f32 1.0, %v18596_v46 }
0x1373   : > { %v18600_v22 = vpop.eup %18599  ;;  %18617 = vrcp.f32 %v8301_v10  ;;  %v8304_v42 = vadd.f32 1.0, %v18598_v43 }
0x1374   : > { %v18602_v32 = vpop.eup %18601  ;;  %18619 = vrcp.f32 %v8303_v39  ;;  %v8306_v53 = vadd.f32 1.0, %v18600_v22 }
0x1375   : > { %v18604_v62 = vpop.eup %18603  ;;  %18621 = vrcp.f32 %v8304_v42  ;;  %v8305_v50 = vadd.f32 1.0, %v18602_v32 }
0x1376   : > { %v18606_v61 = vpop.eup %18605  ;;  %18623 = vrcp.f32 %v8306_v53  ;;  %v8307_v14 = vadd.f32 1.0, %v18604_v62 }
0x1377   : > { %18625 = vrcp.f32 %v8305_v50  ;;  %v8308_v20 = vadd.f32 1.0, %v18606_v61  ;;  %v18608_v2 = vpop.eup %18607 }
0x1378   : > { %18627 = vrcp.f32 %v8307_v14  ;;  %v18610_v31 = vpop.eup %18609  ;;  %v8310_v19 = vadd.f32 1.0, %v18608_v2 }
0x1379   : > { %18629 = vpow2.f32 %v8290_v13  ;;  %v18612_v26 = vpop.eup %18611  ;;  %v8309_v10 = vadd.f32 1.0, %v18610_v31 }
0x137a   : > { %18631 = vrcp.f32 %v8308_v20  ;;  %v8312_v36 = vadd.f32 1.0, %v18612_v26 }
0x137b   : > { %v18614_v48 = vpop.eup %18613 }
0x137c   : > { %v18616_v8 = vpop.eup %18615  ;;  %18633 = vrcp.f32 %v8312_v36  ;;  %v8348_v38 = vmul.f32 %v18614_v48, %v21954_v16 }
0x137d   : > { %v18618_v11 = vpop.eup %18617  ;;  %18635 = vpow2.f32 %v8296_v0  ;;  %v8350_v56 = vmul.f32 %v18616_v8, %v21957_v24 }
0x137e   : > { %v18620_v55 = vpop.eup %18619  ;;  %18637 = vpow2.f32 %v8294_v47  ;;  %v8349_v40 = vmul.f32 %v18618_v11, %v21960_v35 }
0x137f   : > { %v18622_v45 = vpop.eup %18621  ;;  %18639 = vpow2.f32 %v8298_v25  ;;  %v8351_v63 = vmul.f32 %v18620_v55, %v21963_v60  ;;  %v16746_v55 = vld [vmem:[%s24414_s14 + $0x1] ss:$0 sm:$0xff] }
0x1380   : > { %v18624_v28 = vpop.eup %18623  ;;  %v8352_v7 = vmul.f32 %v18622_v45, %v21967_v21  ;;  %18641 = vrcp.f32 %v8310_v19 }
0x1381   : > { %v18626_v17 = vpop.eup %18625  ;;  %v8354_v3 = vmul.f32 %v18624_v28, %v21970_v18  ;;  %18643 = vrcp.f32 %v8309_v10 }
0x1382   : > { %v18628_v15 = vpop.eup %18627  ;;  %v8429_v5 = vpack.c.bf16 %v8352_v7, %v8348_v38  ;;  %v8353_v4 = vmul.f32 %v18626_v17, %v21975_v33 }
0x1383   : > { %v18630_v6 = vpop.eup %18629  ;;  %v8431_v37 = vpack.c.bf16 %v8354_v3, %v8350_v56  ;;  %v8355_v16 = vmul.f32 %v18628_v15, %v21978_v58 }
0x1384   : > { %v8430_v21 = vpack.c.bf16 %v8353_v4, %v8349_v40  ;;  %v18632_v46 = vpop.eup %18631  ;;  %v8311_v24 = vadd.f32 1.0, %v18630_v6 }
0x1385   : > { %v8432_v52 = vpack.c.bf16 %v8355_v16, %v8351_v63  ;;  %v8356_v43 = vmul.f32 %v18632_v46, %v21984_v44 }
0x1386   : > { %8661 = vmatprep.mubr.bf16.mxu1 %v8430_v21  ;;  %v18634_v18 = vpop.eup %18633  ;;  %18645 = vrcp.f32 %v8311_v24 }
0x1387   : > { %8710 = vmatprep.mubr.bf16.mxu0 %v8432_v52  ;;  %8662 = vmatmul.mubr.bf16.vlgmr.msra.gmra.mrb[76].mxu1 %v8429_v5  ;;  %v18636_v35 = vpop.eup %18635  ;;  %v8360_v33 = vmul.f32 %v18634_v18, %v21993_v29 }
0x1388   : > { %8711 = vmatmul.mubr.bf16.vlgmr.msra.gmra.mrb[68].mxu0 %v8431_v37  ;;  %v18638_v60 = vpop.eup %18637  ;;  %v8314_v58 = vadd.f32 1.0, %v18636_v35 }
0x1389   : > { %v18640_v39 = vpop.eup %18639  ;;  %v8313_v22 = vadd.f32 1.0, %v18638_v60  ;;  %v8433_v42 = vpack.c.bf16 %v8360_v33, %v8356_v43 }
0x138a   : > { %18647 = vrcp.f32 %v8314_v58  ;;  %v8315_v32 = vadd.f32 1.0, %v18640_v39  ;;  %v18642_v53 = vpop.eup %18641 }
0x138b   : > { %18649 = vrcp.f32 %v8313_v22  ;;  %v18644_v62 = vpop.eup %18643  ;;  %v8358_v61 = vmul.f32 %v18642_v53, %v21987_v1 }
0x138c   : > { %18651 = vrcp.f32 %v8315_v32  ;;  %v8357_v27 = vmul.f32 %v18644_v62, %v21990_v54 }
0x1390   : > { %v18646_v50 = vpop.eup %18645 }
0x1391   : > { %v8359_v57 = vmul.f32 %v18646_v50, %v21999_v51 }
0x1394   : > { %v18648_v13 = vpop.eup %18647 }
0x1395   : > { %v18650_v44 = vpop.eup %18649  ;;  %v8362_v29 = vmul.f32 %v18648_v13, %v22003_v9 }
0x1396   : > { %v18652_v14 = vpop.eup %18651  ;;  %v8361_v20 = vmul.f32 %v18650_v44, %v22006_v59 }
0x1397   : > { %v8363_v2 = vmul.f32 %v18652_v14, %v22009_v30  ;;  %v8435_v41 = vpack.c.bf16 %v8362_v29, %v8358_v61 }
0x1398   : > { %v8434_v31 = vpack.c.bf16 %v8361_v20, %v8357_v27 }
0x1399   : > { %v8436_v26 = vpack.c.bf16 %v8363_v2, %v8359_v57  ;;  %v16747_v2 = vld [vmem:[%s24415_s15] ss:$0 sm:$0xff] }
0x139a   : > { %8669 = vmatprep.mubr.bf16.mxu1 %v8434_v31 }
0x139b   : > { %8718 = vmatprep.mubr.bf16.mxu0 %v8436_v26  ;;  %8670 = vmatmul.mubr.bf16.gmra.mrb[80].mxu1 %v8433_v42  ;;  %v16748_v26 = vld [vmem:[%s24416_s16] ss:$0 sm:$0xff] }
0x139c   : > { %8719 = vmatmul.mubr.bf16.gmra.mrb[72].mxu0 %v8435_v41 }
0x145a   : > { %v17349_v0 = vpop.f32.mrb[76].mxu1 }
0x145b   : > { %v17377_v1 = vpop.f32.mrb[68].mxu0  ;;  %v17350_v48 = vpop.f32.mrb[77].mxu1 }
0x145c   : > { %v17351_v9 = vadd.f32 %v17350_v48, %v17349_v0  ;;  %v17378_v36 = vpop.f32.mrb[69].mxu0  ;;  %v17352_v47 = vpop.f32.mrb[78].mxu1 }
0x145d   : > { %v17379_v54 = vadd.f32 %v17378_v36, %v17377_v1  ;;  %v17380_v8 = vpop.f32.mrb[70].mxu0  ;;  %v17353_v59 = vpop.f32.mrb[79].mxu1 }
0x145e   : > { %v17354_v25 = vadd.f32 %v17353_v59, %v17352_v47  ;;  %v17381_v51 = vpop.f32.mrb[71].mxu0 }
0x145f   : > { %v8713_v11 = vadd.f32 %v17379_v54, %v17351_v9  ;;  %v17382_v30 = vadd.f32 %v17381_v51, %v17380_v8 }
0x1461   : > { %v8727_v45 = vadd.f32 %v8713_v11, %v21702_v23  ;;  %v8716_v28 = vadd.f32 %v17382_v30, %v17354_v25 }
0x1463   : > { %v8728_v38 = vadd.f32 %v8716_v28, %v21706_v34  ;;  %v8739_v7 = vadd.f32 %v16746_v55, %v8727_v45 }
0x1465   : > { %8745 = vadd.xlane.f32.xlu0 %v8739_v7  ;;  %v8740_v17 = vadd.f32 %v16746_v55, %v8728_v38 }
0x1467   : > { %8747 = vadd.xlane.f32.xlu1 %v8740_v17 }
0x146e   : > { %v17355_v56 = vpop.f32.mrb[80].mxu1 }
0x146f   : > { %v17383_v3 = vpop.f32.mrb[72].mxu0  ;;  %v17356_v15 = vpop.f32.mrb[81].mxu1 }
0x1470   : > { %v17357_v40 = vadd.f32 %v17356_v15, %v17355_v56  ;;  %v17384_v5 = vpop.f32.mrb[73].mxu0  ;;  %v17358_v4 = vpop.f32.mrb[82].mxu1 }
0x1471   : > { %v17385_v6 = vadd.f32 %v17384_v5, %v17383_v3  ;;  %v17386_v63 = vpop.f32.mrb[74].mxu0  ;;  %v17359_v37 = vpop.f32.mrb[83].mxu1 }
0x1472   : > { %v17360_v16 = vadd.f32 %v17359_v37, %v17358_v4  ;;  %v17387_v19 = vpop.f32.mrb[75].mxu0 }
0x1473   : > { %v8721_v21 = vadd.f32 %v17385_v6, %v17357_v40  ;;  %v17388_v23 = vadd.f32 %v17387_v19, %v17386_v63 }
0x1475   : > { %v8729_v46 = vadd.f32 %v8721_v21, %v21709_v49  ;;  %v8724_v34 = vadd.f32 %v17388_v23, %v17360_v16 }
0x1477   : > { %v8730_v10 = vadd.f32 %v8724_v34, %v21712_v12  ;;  %v8741_v52 = vadd.f32 %v16746_v55, %v8729_v46 }
0x1479   : > { %8749 = vadd.xlane.f32.xlu0 %v8741_v52  ;;  %v8742_v24 = vadd.f32 %v16746_v55, %v8730_v10 }
0x147b   : > { %8751 = vadd.xlane.f32.xlu1 %v8742_v24 }
0x14f2   : > { %v8746_v18 = vpop.xlane.xlu0 %8745 }
0x14f3   : > { %v8753_v35 = vmul.f32 0.0078125, %v8746_v18 }
0x14f4   : > { %v8748_v43 = vpop.xlane.xlu1 %8747 }
0x14f5   : > { %v8757_v33 = vsub.f32 %v8739_v7, %v8753_v35  ;;  %v8754_v60 = vmul.f32 0.0078125, %v8748_v43 }
0x14f7   : > { %v8758_v58 = vsub.f32 %v8740_v17, %v8754_v60  ;;  %v8761_v39 = vmul.f32 %v8757_v33, %v8757_v33 }
0x14f9   : > { %8765 = vadd.xlane.f32.xlu0 %v8761_v39  ;;  %v8762_v22 = vmul.f32 %v8758_v58, %v8758_v58 }
0x14fb   : > { %8767 = vadd.xlane.f32.xlu1 %v8762_v22 }
0x1506   : > { %v8750_v42 = vpop.xlane.xlu0 %8749 }
0x1507   : > { %v8755_v32 = vmul.f32 0.0078125, %v8750_v42 }
0x1508   : > { %v8752_v49 = vpop.xlane.xlu1 %8751 }
0x1509   : > { %v8759_v53 = vsub.f32 %v8741_v52, %v8755_v32  ;;  %v8756_v62 = vmul.f32 0.0078125, %v8752_v49 }
0x150b   : > { %v8760_v12 = vsub.f32 %v8742_v24, %v8756_v62  ;;  %v8763_v50 = vmul.f32 %v8759_v53, %v8759_v53 }
0x150d   : > { %8769 = vadd.xlane.f32.xlu0 %v8763_v50  ;;  %v8764_v13 = vmul.f32 %v8760_v12, %v8760_v12 }
0x150f   : > { %8771 = vadd.xlane.f32.xlu1 %v8764_v13 }
0x1586   : > { %v8766_v44 = vpop.xlane.xlu0 %8765 }
0x1587   : > { %v8773_v61 = vmul.f32 0.0078125, %v8766_v44 }
0x1588   : > { %v8768_v29 = vpop.xlane.xlu1 %8767 }
0x1589   : > { %v8777_v14 = vadd.f32 1e-05, %v8773_v61  ;;  %v8774_v27 = vmul.f32 0.0078125, %v8768_v29 }
0x158b   : > { %18653 = vrsqrt.f32 %v8777_v14  ;;  %v8778_v20 = vadd.f32 1e-05, %v8774_v27 }
0x158d   : > { %18655 = vrsqrt.f32 %v8778_v20 }
0x1595   : > { %v18654_v57 = vpop.eup %18653 }
0x1596   : > { %v8785_v41 = vmul.f32 %v18654_v57, %v8757_v33 }
0x1597   : > { %v18656_v31 = vpop.eup %18655 }
0x1598   : > { %v8795_v0 = vmul.f32 %v16747_v2, %v8785_v41  ;;  %v8786_v1 = vmul.f32 %v18656_v31, %v8758_v58 }
0x159a   : > { %v8805_v48 = vadd.f32 %v16748_v26, %v8795_v0  ;;  %v8796_v9 = vmul.f32 %v16747_v2, %v8786_v1  ;;  %v8770_v36 = vpop.xlane.xlu0 %8769 }
0x159b   : > { %v8775_v54 = vmul.f32 0.0078125, %v8770_v36 }
0x159c   : > { %8809 = vst [vmem:[%s19274_s3] sm:$0xff] %v8805_v48  ;;  %v8806_v47 = vadd.f32 %v16748_v26, %v8796_v9  ;;  %v8772_v8 = vpop.xlane.xlu1 %8771 }
0x159d   : > { %v8779_v59 = vadd.f32 1e-05, %v8775_v54  ;;  %v8776_v25 = vmul.f32 0.0078125, %v8772_v8 }
0x159e   : > { %8810 = vst [vmem:[%s19274_s3 + $0x8] sm:$0xff] %v8806_v47 }
0x159f   : > { %18657 = vrsqrt.f32 %v8779_v59  ;;  %v8780_v51 = vadd.f32 1e-05, %v8776_v25 }
0x15a1   : > { %18659 = vrsqrt.f32 %v8780_v51 }
0x15a9   : > { %v18658_v11 = vpop.eup %18657 }
0x15aa   : > { %v8787_v30 = vmul.f32 %v18658_v11, %v8759_v53 }
0x15ab   : > { %v18660_v55 = vpop.eup %18659 }
0x15ac   : > { %v8797_v45 = vmul.f32 %v16747_v2, %v8787_v30  ;;  %v8788_v28 = vmul.f32 %v18660_v55, %v8760_v12 }
0x15ae   : > { %v8807_v38 = vadd.f32 %v16748_v26, %v8797_v45  ;;  %v8798_v7 = vmul.f32 %v16747_v2, %v8788_v28 }
0x15b0   : > { %8811 = vst [vmem:[%s19274_s3 + $0x10] sm:$0xff] %v8807_v38  ;;  %v8808_v17 = vadd.f32 %v16748_v26, %v8798_v7 }
0x15b2   : > { %8812 = vst [vmem:[%s19274_s3 + $0x18] sm:$0xff] %v8808_v17 }
0x15b3 PF: > { %p16749_p5 = scmp.ne.s32.totalorder %s19260_s26, 1 }
0x15b5   : > { %8816 = sbr.rel (%p16749_p5) target bundleno = 10294 (0x2836), region = 124 }
0x15bc   : > { %v22049_v56 = vld [vmem:[%s19269_s0] sm:$0xff]  ;;  %v22052_v3 = vld [vmem:[%s19269_s0 + $0x8] sm:$0xff]  ;;  %v22055_v15 = vld [vmem:[%s19269_s0 + $0x10] sm:$0xff]  ;;  %s24517_s20 = sld [smem:[#allocation20_spill]]  ;;  %v24456_v22 = vmov 0   ;;  %s24518_s7 = sld [smem:[#allocation19_spill]] }
0x15bd   : > { %v8838_v40 = vmul.f32 %v22049_v56, %v22049_v56  ;;  %v8840_v5 = vmul.f32 %v22055_v15, %v22055_v15  ;;  %v22062_v4 = vld [vmem:[%s19269_s0 + $0x18] sm:$0xff]  ;;  %v8839_v37 = vmul.f32 %v22052_v3, %v22052_v3  ;;  %9071 = vmatprep.mubr.bf16.mxu0 %v24456_v22  ;;  %s24462_s6 = smov 96   ;;  %s24460_s26 = smov 64   ;;  %vm10933_vm1 = vcmask 261120  }
0x15be   : > { %v8841_v16 = vmul.f32 %v22062_v4, %v22062_v4  ;;  %s24458_s22 = smov 32   ;;  %s24526_s19 = sld [smem:[#allocation12_spill]] }
0x15bf   : > { %8842 = vadd.xlane.f32.xlu0 %v8838_v40  ;;  %8846 = vadd.xlane.f32.xlu1 %v8840_v5  ;;  %s24527_s21 = sld [smem:[#allocation21_spill]]  ;;  %s24529_s8 = sld [smem:[#allocation23_spill]] }
0x15c0   : > { %s24530_s2 = sld [smem:[#allocation22_spill]]  ;;  %s24531_s18 = sld [smem:[#allocation24_spill]] }
0x15c1   : > { %s24534_s23 = smov 96   ;;  %s24535_s5 = smov 64  }
0x15c2   : > { %v18681_v6 = vld [vmem:[%s24517_s20 + $0x4] ss:$12 sps:$4 sm:$0xff]   ;;  %v18683_v63 = vld [vmem:[%s24517_s20] ss:$12 sps:$4 sm:$0xff]   ;;  %v18684_v19 = vld [vmem:[%s24517_s20 + $0x1c] ss:$12 sps:$4 sm:$0xff]  }
0x15c3   : > { %v18686_v21 = vld [vmem:[%s24517_s20 + $0x18] ss:$12 sps:$4 sm:$0xff]   ;;  %9039 = vmatprep.subr.bf16.mxu0 %v18681_v6  ;;  %8844 = vadd.xlane.f32.xlu0 %v8839_v37  ;;  %v18687_v23 = vld [vmem:[%s24517_s20 + $0x34] ss:$12 sps:$4 sm:$0xff]   ;;  %v18689_v46 = vld [vmem:[%s24517_s20 + $0x30] ss:$12 sps:$4 sm:$0xff]  }
0x15c4   : > { %9040 = vmatpush1.bf16.msra.mxu0 %v18683_v63  ;;  %8848 = vadd.xlane.f32.xlu1 %v8841_v16  ;;  %v18690_v34 = vld [vmem:[%s24517_s20 + $0x4c] ss:$12 sps:$4 sm:$0xff]   ;;  %v18692_v10 = vld [vmem:[%s24517_s20 + $0x48] ss:$12 sps:$4 sm:$0xff]   ;;  %v18693_v52 = vld [vmem:[%s24517_s20 + $0x64] ss:$12 sps:$4 sm:$0xff]  }
0x15c5   : > { %9041 = vmatprep.subr.bf16.mxu0 %v18684_v19  ;;  %v18695_v24 = vld [vmem:[%s24517_s20 + $0x60] ss:$12 sps:$4 sm:$0xff]   ;;  %v18696_v18 = vld [vmem:[%s24517_s20 + $0x7c] ss:$12 sps:$4 sm:$0xff]   ;;  %v18699_v33 = vld [vmem:[%s24517_s20 + $0x78] ss:$12 sps:$4 sm:$0xff]  }
0x15c6   : > { %v18698_v35 = vld [vmem:[%s24517_s20 + $0x8] ss:$12 sps:$4 sm:$0xff]   ;;  %v18702_v43 = vld [vmem:[%s24517_s20 + $0x20] ss:$12 sps:$4 sm:$0xff]   ;;  %v18706_v58 = vld [vmem:[%s24517_s20 + $0x38] ss:$12 sps:$4 sm:$0xff]  }
0x15c7   : > { %17793 = vmatprep.subr.bf16.mxu1 %v18698_v35  ;;  %v18700_v60 = vld [vmem:[%s24517_s20 + $0x94] ss:$12 sps:$4 sm:$0xff]   ;;  %v18703_v39 = vld [vmem:[%s24517_s20 + $0x90] ss:$12 sps:$4 sm:$0xff]   ;;  %v18704_v42 = vld [vmem:[%s24517_s20 + $0xac] ss:$12 sps:$4 sm:$0xff]  }
0x15c8   : > { %9042 = vmatpush1.bf16.msra.mxu0 %v18686_v21  ;;  %17794 = vmatpush3.bf16.msra.mxu1 %v18698_v35  ;;  %v18707_v32 = vld [vmem:[%s24517_s20 + $0xa8] ss:$12 sps:$4 sm:$0xff]   ;;  %v18708_v49 = vld [vmem:[%s24517_s20 + $0x50] ss:$12 sps:$4 sm:$0xff]   ;;  %v18710_v62 = vld [vmem:[%s24517_s20 + $0x80] ss:$12 sps:$4 sm:$0xff]   ;;  %v9282_v21 = vlaneseq }
0x15c9   : > { %9043 = vmatprep.subr.bf16.mxu0 %v18687_v23  ;;  %17795 = vmatprep.subr.bf16.mxu1 %v18702_v43  ;;  %v18709_v53 = vld [vmem:[%s24517_s20 + $0x68] ss:$12 sps:$4 sm:$0xff]   ;;  %v18711_v12 = vld [vmem:[%s24517_s20 + $0x98] ss:$12 sps:$4 sm:$0xff]   ;;  %v18712_v50 = vld [vmem:[%s24517_s20 + $0xb0] ss:$12 sps:$4 sm:$0xff]  }
0x15ca   : > { %v16750_v47 = vld [vmem:[%s24518_s7] ss:$0 sm:$0xff]  ;;  %v19127_v16 = vmov 1983009808   ;;  %s24536_s29 = smov 32   ;;  %s24540_s24 = sld [smem:[#allocation25_spill]] }
0x15cb   : > { %v9280_v19 = vunpack.c.l.s4 %v19127_v16 }
0x15cc   : > { %9044 = vmatpush1.bf16.msra.mxu0 %v18689_v46  ;;  %17796 = vmatpush3.bf16.msra.mxu1 %v18702_v43  ;;  %v19128_v46 = vmov 1934713408  }
0x15cd   : > { %9045 = vmatprep.subr.bf16.mxu0 %v18690_v34  ;;  %17797 = vmatprep.subr.bf16.mxu1 %v18706_v58  ;;  %v9344_v34 = vunpack.c.l.s4 %v19128_v46 }
0x15cf   : > { %v9345_v35 = vunpack.c.0.s8 %v9344_v34 }
0x15d0   : > { %9046 = vmatpush1.bf16.msra.mxu0 %v18692_v10  ;;  %17798 = vmatpush3.bf16.msra.mxu1 %v18706_v58 }
0x15d1   : > { %9047 = vmatprep.subr.bf16.mxu0 %v18693_v52  ;;  %17799 = vmatprep.subr.bf16.mxu1 %v18708_v49  ;;  %v9281_v52 = vunpack.c.0.s8 %v9280_v19 }
0x15d4   : > { %9048 = vmatpush1.bf16.msra.mxu0 %v18695_v24  ;;  %17800 = vmatpush3.bf16.msra.mxu1 %v18708_v49  ;;  %v9283_v24 = vshrl.u32 %v9282_v21, 7 }
0x15d5   : > { %9049 = vmatprep.subr.bf16.mxu0 %v18696_v18  ;;  %17801 = vmatprep.subr.bf16.mxu1 %v18709_v53 }
0x15d6   : > { %v22239_v58 = vsub.s32 %v9281_v52, %v9283_v24 }
0x15d8   : > { %9050 = vmatpush1.bf16.msra.mxu0 %v18699_v33  ;;  %17802 = vmatpush3.bf16.msra.mxu1 %v18709_v53 }
0x15d9   : > { %9051 = vmatprep.subr.bf16.mxu0 %v18700_v60  ;;  %17803 = vmatprep.subr.bf16.mxu1 %v18710_v62 }
0x15dc   : > { %9052 = vmatpush1.bf16.msra.mxu0 %v18703_v39  ;;  %17804 = vmatpush3.bf16.msra.mxu1 %v18710_v62  ;;  %v22243_v62 = vsub.s32 %v9345_v35, %v9283_v24 }
0x15dd   : > { %9053 = vmatprep.subr.bf16.mxu0 %v18704_v42  ;;  %17805 = vmatprep.subr.bf16.mxu1 %v18711_v12 }
0x15e0   : > { %9054 = vmatpush1.bf16.msra.mxu0 %v18707_v32  ;;  %17806 = vmatpush3.bf16.msra.mxu1 %v18711_v12 }
0x15e1   : > { %17807 = vmatprep.subr.bf16.mxu1 %v18712_v50 }
0x15e4   : > { %17808 = vmatpush3.bf16.msra.mxu1 %v18712_v50 }
0x164c   : > { %v8843_v13 = vpop.xlane.xlu0 %8842  ;;  %v8847_v44 = vpop.xlane.xlu1 %8846 }
0x164d   : > { %v8851_v61 = vmul.f32 0.0078125, %v8843_v13  ;;  %v8853_v29 = vmul.f32 0.0078125, %v8847_v44 }
0x164f   : > { %v8855_v14 = vadd.f32 1e-06, %v8851_v61  ;;  %v8857_v27 = vadd.f32 1e-06, %v8853_v29 }
0x1650   : > { %v8845_v20 = vpop.xlane.xlu0 %8844 }
0x1651   : > { %v8849_v57 = vpop.xlane.xlu1 %8848  ;;  %18889 = vrsqrt.f32 %v8855_v14  ;;  %v8852_v2 = vmul.f32 0.0078125, %v8845_v20 }
0x1652   : > { %v8854_v41 = vmul.f32 0.0078125, %v8849_v57  ;;  %18891 = vrsqrt.f32 %v8857_v27 }
0x1653   : > { %v8856_v31 = vadd.f32 1e-06, %v8852_v2 }
0x1654   : > { %v8858_v26 = vadd.f32 1e-06, %v8854_v41 }
0x1655   : > { %18893 = vrsqrt.f32 %v8856_v31 }
0x1656   : > { %18895 = vrsqrt.f32 %v8858_v26 }
0x165b   : > { %v18890_v0 = vpop.eup %18889 }
0x165c   : > { %v18892_v1 = vpop.eup %18891  ;;  %v8863_v9 = vmul.f32 %v18890_v0, %v22049_v56 }
0x165d   : > { %v8865_v48 = vmul.f32 %v18892_v1, %v22055_v15 }
0x165e   : > { %v8873_v51 = vmul.f32 %v16750_v47, %v8863_v9 }
0x165f   : > { %v18894_v36 = vpop.eup %18893  ;;  %v8875_v25 = vmul.f32 %v16750_v47, %v8865_v48 }
0x1660   : > { %v18896_v54 = vpop.eup %18895  ;;  %v8864_v8 = vmul.f32 %v18894_v36, %v22052_v3 }
0x1661   : > { %v8866_v59 = vmul.f32 %v18896_v54, %v22062_v4 }
0x1662   : > { %v8874_v11 = vmul.f32 %v16750_v47, %v8864_v8 }
0x1663   : > { %v8876_v30 = vmul.f32 %v16750_v47, %v8866_v59 }
0x1664   : > { %v8909_v55 = vpack.c.bf16 %v8874_v11, %v8873_v51 }
0x1665   : > { %v8910_v45 = vpack.c.bf16 %v8876_v30, %v8875_v25 }
0x1666   : > { %9072 = vmatmul.mubr.bf16.vlgmr.msra.gmra.mrb[0].mxu0 %v8909_v55  ;;  %17809 = vmatprep.mubr.bf16.mxu1 %v8909_v55 }
0x1667   : > { %9081 = vmatprep.mubr.bf16.mxu0 %v24456_v22  ;;  %17810 = vmatmul.mubr.bf16.vlgmr.msra.gmra.mrb[0].mxu1 %v8910_v45 }
0x166e   : > { %9082 = vmatmul.mubr.bf16.gmra.mrb[4].mxu0 %v8910_v45 }
0x1739   : > { %v22149_v28 = vpop.f32.mrb[0].mxu0 }
0x173a   : > { %9161 = vrot.lane.b32.xlu0 %v22149_v28, %s24462_s6  ;;  %v22153_v38 = vpop.f32.mrb[1].mxu0  ;;  %v22155_v7 = vpop.f32.mrb[0].mxu1 }
0x173b   : > { %9213 = vrot.lane.b32.xlu1 %v22153_v38, %s24460_s26  ;;  %v22159_v17 = vpop.f32.mrb[2].mxu0  ;;  %v22161_v56 = vpop.f32.mrb[1].mxu1 }
0x173c   : > { %v22163_v3 = vpop.f32.mrb[3].mxu0  ;;  %v22165_v15 = vpop.f32.mrb[2].mxu1 }
0x173d   : > { %v22167_v40 = vpop.f32.mrb[3].mxu1 }
0x173e   : > { %9173 = vrot.lane.b32.xlu0 %v22149_v28, %s24460_s26 }
0x173f   : > { %9163 = vrot.lane.b32.xlu1 %v22159_v17, %s24462_s6 }
0x1741   : > { %v22173_v5 = vpop.f32.mrb[4].mxu0 }
0x1742   : > { %9185 = vrot.lane.b32.xlu0 %v22149_v28, %s24458_s22  ;;  %v22177_v4 = vpop.f32.mrb[5].mxu0 }
0x1743   : > { %9175 = vrot.lane.b32.xlu1 %v22159_v17, %s24460_s26  ;;  %v22181_v6 = vpop.f32.mrb[6].mxu0 }
0x1744   : > { %v22183_v63 = vpop.f32.mrb[7].mxu0 }
0x1746   : > { %9201 = vrot.lane.b32.xlu0 %v22153_v38, %s24462_s6 }
0x1747   : > { %9187 = vrot.lane.b32.xlu1 %v22159_v17, %s24458_s22 }
0x174a   : > { %9225 = vrot.lane.b32.xlu0 %v22153_v38, %s24458_s22 }
0x174b   : > { %9203 = vrot.lane.b32.xlu1 %v22163_v3, %s24462_s6 }
0x174e   : > { %9165 = vrot.lane.b32.xlu0 %v22173_v5, %s24462_s6 }
0x174f   : > { %9215 = vrot.lane.b32.xlu1 %v22163_v3, %s24460_s26 }
0x1752   : > { %9205 = vrot.lane.b32.xlu0 %v22177_v4, %s24462_s6 }
0x1753   : > { %9227 = vrot.lane.b32.xlu1 %v22163_v3, %s24458_s22 }
0x1756   : > { %9217 = vrot.lane.b32.xlu0 %v22177_v4, %s24460_s26 }
0x1757   : > { %9167 = vrot.lane.b32.xlu1 %v22181_v6, %s24462_s6 }
0x175a   : > { %9229 = vrot.lane.b32.xlu0 %v22177_v4, %s24458_s22 }
0x175b   : > { %9207 = vrot.lane.b32.xlu1 %v22183_v63, %s24462_s6 }
0x175e   : > { %9177 = vrot.lane.b32.xlu0 %v22173_v5, %s24460_s26 }
0x175f   : > { %9219 = vrot.lane.b32.xlu1 %v22183_v63, %s24460_s26 }
0x1762   : > { %9189 = vrot.lane.b32.xlu0 %v22173_v5, %s24458_s22 }
0x1763   : > { %9231 = vrot.lane.b32.xlu1 %v22183_v63, %s24458_s22 }
0x1766   : > { %9241 = vrot.lane.b32.xlu0 %v22161_v56, %s24462_s6 }
0x1767   : > { %9179 = vrot.lane.b32.xlu1 %v22181_v6, %s24460_s26 }
0x176a   : > { %9265 = vrot.lane.b32.xlu0 %v22161_v56, %s24458_s22 }
0x176b   : > { %9191 = vrot.lane.b32.xlu1 %v22181_v6, %s24458_s22 }
0x176e   : > { %9245 = vrot.lane.b32.xlu0 %v22155_v7, %s24462_s6 }
0x176f   : > { %9243 = vrot.lane.b32.xlu1 %v22167_v40, %s24462_s6 }
0x1773   : > { %9253 = vrot.lane.b32.xlu1 %v22161_v56, %s24460_s26 }
0x1777   : > { %9255 = vrot.lane.b32.xlu1 %v22167_v40, %s24460_s26 }
0x177b   : > { %9267 = vrot.lane.b32.xlu1 %v22167_v40, %s24458_s22 }
0x177f   : > { %9247 = vrot.lane.b32.xlu1 %v22165_v15, %s24462_s6 }
0x17ac   : > { %v9162_v37 = vpop.permute.xlu0 %9161 }
0x17ad   : > { %v9214_v23 = vpop.permute.xlu1 %9213 }
0x17ae   : > { %v9309_v49 = vcombine.low %v22153_v38, %v9214_v23  ;;  %v9310_v53 = vcombine.high %v22153_v38, %v9214_v23 }
0x17b0   : > { %v9174_v10 = vpop.permute.xlu0 %9173  ;;  %v9317_v31 = vrot.slane %v9309_v49, %v22239_v58  ;;  %v9324_v26 = vrot.slane %v9310_v53, %v22239_v58 }
0x17b1   : > { %v9164_v18 = vpop.permute.xlu1 %9163  ;;  %v9277_v43 = vcombine.low %v22149_v28, %v9174_v10  ;;  %v9278_v33 = vcombine.high %v22149_v28, %v9174_v10 }
0x17b3   : > { %v9285_v12 = vrot.slane %v9277_v43, %v22239_v58  ;;  %v9292_v50 = vrot.slane %v9278_v33, %v22239_v58 }
0x17b4   : > { %v9186_v60 = vpop.permute.xlu0 %9185 }
0x17b5   : > { %v9293_v39 = vcombine.low %v9162_v37, %v9186_v60  ;;  %v9294_v42 = vcombine.high %v9162_v37, %v9186_v60  ;;  %v9176_v32 = vpop.permute.xlu1 %9175 }
0x17b6   : > { %v9481_v61 = vcombine.low %v22159_v17, %v9176_v32  ;;  %v9482_v29 = vcombine.high %v22159_v17, %v9176_v32 }
0x17b7   : > { %v9301_v13 = vrot.slane %v9293_v39, %v22239_v58  ;;  %v9308_v44 = vrot.slane %v9294_v42, %v22239_v58 }
0x17b8   : > { %v9202_v14 = vpop.permute.xlu0 %9201  ;;  %v9489_v54 = vrot.slane %v9481_v61, %v22239_v58  ;;  %v9496_v8 = vrot.slane %v9482_v29, %v22239_v58 }
0x17b9   : > { %v9341_v27 = vcombine.low %v9285_v12, %v9301_v13  ;;  %v9342_v20 = vcombine.high %v9285_v12, %v9301_v13  ;;  %v9357_v57 = vcombine.low %v9292_v50, %v9308_v44  ;;  %v9358_v2 = vcombine.high %v9292_v50, %v9308_v44  ;;  %v9188_v41 = vpop.permute.xlu1 %9187 }
0x17ba   : > { %v9497_v0 = vcombine.low %v9164_v18, %v9188_v41  ;;  %v9498_v1 = vcombine.high %v9164_v18, %v9188_v41 }
0x17bb   : > { %v9349_v48 = vrot.slane %v9341_v27, %v22243_v62  ;;  %v9356_v9 = vrot.slane %v9342_v20, %v22243_v62  ;;  %v9365_v36 = vrot.slane %v9357_v57, %v22243_v62  ;;  %v9372_v47 = vrot.slane %v9358_v2, %v22243_v62 }
0x17bc   : > { %v9505_v59 = vrot.slane %v9497_v0, %v22239_v58  ;;  %v9512_v25 = vrot.slane %v9498_v1, %v22239_v58  ;;  %v9226_v51 = vpop.permute.xlu0 %9225 }
0x17bd   : > { %v16775_v11 = vcombine.low %v9349_v48, %v9356_v9  ;;  %v16777_v30 = vcombine.high %v9349_v48, %v9356_v9  ;;  %v16779_v55 = vcombine.low %v9365_v36, %v9372_v47  ;;  %v16781_v45 = vcombine.high %v9365_v36, %v9372_v47  ;;  %v9204_v28 = vpop.permute.xlu1 %9203 }
0x17be   : > { %v9545_v38 = vcombine.low %v9489_v54, %v9505_v59  ;;  %v9546_v17 = vcombine.high %v9489_v54, %v9505_v59  ;;  %v9561_v37 = vcombine.low %v9496_v8, %v9512_v25  ;;  %v9562_v16 = vcombine.high %v9496_v8, %v9512_v25 }
0x17bf   : > { %v22262_v19 = vrot.slane %v16775_v11, %v22239_v58  ;;  %v22265_v21 = vrot.slane %v16777_v30, %v22239_v58  ;;  %v22268_v23 = vrot.slane %v16779_v55, %v22239_v58  ;;  %v22271_v46 = vrot.slane %v16781_v45, %v22239_v58 }
0x17c0   : > { %v9553_v34 = vrot.slane %v9545_v38, %v22243_v62  ;;  %v9560_v10 = vrot.slane %v9546_v17, %v22243_v62  ;;  %v9569_v52 = vrot.slane %v9561_v37, %v22243_v62  ;;  %v9576_v24 = vrot.slane %v9562_v16, %v22243_v62  ;;  %v22277_v18 = vpop.permute.xlu0 %9165 }
0x17c1   : > { %v9325_v35 = vcombine.low %v9202_v14, %v9226_v51  ;;  %v9326_v43 = vcombine.high %v9202_v14, %v9226_v51  ;;  %v9216_v33 = vpop.permute.xlu1 %9215  ;;  %v10157_v60 = vcombine.low %v22262_v19, %v22265_v21  ;;  %v10189_v39 = vcombine.low %v22268_v23, %v22271_v46 }
0x17c2   : > { %v16783_v42 = vcombine.low %v9553_v34, %v9560_v10  ;;  %v16785_v32 = vcombine.high %v9553_v34, %v9560_v10  ;;  %v16787_v49 = vcombine.low %v9569_v52, %v9576_v24  ;;  %v16789_v53 = vcombine.high %v9569_v52, %v9576_v24 }
0x17c3   : > { %v9333_v12 = vrot.slane %v9325_v35, %v22239_v58  ;;  %v9340_v50 = vrot.slane %v9326_v43, %v22239_v58  ;;  %v9513_v13 = vcombine.low %v22163_v3, %v9216_v33  ;;  %v9514_v44 = vcombine.high %v22163_v3, %v9216_v33 }
0x17c4   : > { %v22288_v61 = vrot.slane %v16783_v42, %v22239_v58  ;;  %v22291_v29 = vrot.slane %v16785_v32, %v22239_v58  ;;  %v22294_v14 = vrot.slane %v16787_v49, %v22239_v58  ;;  %v22297_v27 = vrot.slane %v16789_v53, %v22239_v58  ;;  %v9206_v20 = vpop.permute.xlu0 %9205 }
0x17c5   : > { %v9373_v57 = vcombine.low %v9317_v31, %v9333_v12  ;;  %v9374_v2 = vcombine.high %v9317_v31, %v9333_v12  ;;  %v9389_v41 = vcombine.low %v9324_v26, %v9340_v50  ;;  %v9390_v0 = vcombine.high %v9324_v26, %v9340_v50  ;;  %v9228_v1 = vpop.permute.xlu1 %9227 }
0x17c6   : > { %v9521_v3 = vrot.slane %v9513_v13, %v22239_v58  ;;  %v9528_v48 = vrot.slane %v9514_v44, %v22239_v58  ;;  %v9529_v9 = vcombine.low %v9204_v28, %v9228_v1  ;;  %v9530_v36 = vcombine.high %v9204_v28, %v9228_v1 }
0x17c7   : > { %v9381_v47 = vrot.slane %v9373_v57, %v22243_v62  ;;  %v9388_v54 = vrot.slane %v9374_v2, %v22243_v62  ;;  %v9397_v8 = vrot.slane %v9389_v41, %v22243_v62  ;;  %v9404_v59 = vrot.slane %v9390_v0, %v22243_v62 }
0x17c8   : > { %v9537_v25 = vrot.slane %v9529_v9, %v22239_v58  ;;  %v9544_v31 = vrot.slane %v9530_v36, %v22239_v58  ;;  %v9218_v26 = vpop.permute.xlu0 %9217  ;;  %v22308_v51 = vrot.slane %v10157_v60, %v22243_v62  ;;  %v22311_v11 = vrot.slane %v10189_v39, %v22243_v62 }
0x17c9   : > { %v16776_v30 = vcombine.low %v9381_v47, %v9388_v54  ;;  %v16778_v55 = vcombine.high %v9381_v47, %v9388_v54  ;;  %v16780_v45 = vcombine.low %v9397_v8, %v9404_v59  ;;  %v16782_v28 = vcombine.high %v9397_v8, %v9404_v59  ;;  %v22313_v38 = vpop.permute.xlu1 %9167 }
0x17ca   : > { %v9577_v17 = vcombine.low %v9521_v3, %v9537_v25  ;;  %v9578_v37 = vcombine.high %v9521_v3, %v9537_v25  ;;  %v9593_v16 = vcombine.low %v9528_v48, %v9544_v31  ;;  %v9594_v34 = vcombine.high %v9528_v48, %v9544_v31 }
0x17cb   : > { %v22316_v10 = vrot.slane %v16776_v30, %v22239_v58  ;;  %v22319_v52 = vrot.slane %v16778_v55, %v22239_v58  ;;  %v22322_v24 = vrot.slane %v16780_v45, %v22239_v58  ;;  %v22325_v35 = vrot.slane %v16782_v28, %v22239_v58 }
0x17cc   : > { %v9585_v43 = vrot.slane %v9577_v17, %v22243_v62  ;;  %v9592_v33 = vrot.slane %v9578_v37, %v22243_v62  ;;  %v9601_v60 = vrot.slane %v9593_v16, %v22243_v62  ;;  %v9608_v39 = vrot.slane %v9594_v34, %v22243_v62  ;;  %v9230_v42 = vpop.permute.xlu0 %9229 }
0x17cd   : > { %v9717_v32 = vcombine.low %v22177_v4, %v9218_v26  ;;  %v9718_v49 = vcombine.high %v22177_v4, %v9218_v26  ;;  %v9733_v53 = vcombine.low %v9206_v20, %v9230_v42  ;;  %v9734_v12 = vcombine.high %v9206_v20, %v9230_v42  ;;  %v22333_v50 = vpop.permute.xlu1 %9207 }
0x17ce   : > { %v16784_v13 = vcombine.low %v9585_v43, %v9592_v33  ;;  %v16786_v44 = vcombine.high %v9585_v43, %v9592_v33  ;;  %v16788_v57 = vcombine.low %v9601_v60, %v9608_v39  ;;  %v16790_v2 = vcombine.high %v9601_v60, %v9608_v39 }
0x17cf   : > { %v9725_v41 = vrot.slane %v9717_v32, %v22239_v58  ;;  %v9732_v0 = vrot.slane %v9718_v49, %v22239_v58  ;;  %v9741_v1 = vrot.slane %v9733_v53, %v22239_v58  ;;  %v9748_v3 = vrot.slane %v9734_v12, %v22239_v58 }
0x17d0   : > { %v22340_v48 = vrot.slane %v16784_v13, %v22239_v58  ;;  %v22343_v4 = vrot.slane %v16786_v44, %v22239_v58  ;;  %v22346_v20 = vrot.slane %v16788_v57, %v22239_v58  ;;  %v22349_v9 = vrot.slane %v16790_v2, %v22239_v58  ;;  %v9178_v36 = vpop.permute.xlu0 %9177 }
0x17d1   : > { %v9781_v47 = vcombine.low %v9725_v41, %v9741_v1  ;;  %v9782_v54 = vcombine.high %v9725_v41, %v9741_v1  ;;  %v9797_v8 = vcombine.low %v9732_v0, %v9748_v3  ;;  %v9798_v59 = vcombine.high %v9732_v0, %v9748_v3  ;;  %v9220_v25 = vpop.permute.xlu1 %9219 }
0x17d2   : > { %v10221_v31 = vcombine.low %v22308_v51, %v22311_v11  ;;  %v10293_v26 = vcombine.low %v22288_v61, %v22291_v29  ;;  %v10325_v30 = vcombine.low %v22294_v14, %v22297_v27  ;;  %v10222_v55 = vcombine.high %v22308_v51, %v22311_v11 }
0x17d3   : > { %v9789_v45 = vrot.slane %v9781_v47, %v22243_v62  ;;  %v9796_v28 = vrot.slane %v9782_v54, %v22243_v62  ;;  %v9805_v17 = vrot.slane %v9797_v8, %v22243_v62  ;;  %v9812_v37 = vrot.slane %v9798_v59, %v22243_v62 }
0x17d4   : > { %v10301_v16 = vrot.slane %v10293_v26, %v22243_v62  ;;  %v10333_v34 = vrot.slane %v10325_v30, %v22243_v62  ;;  %v9685_v43 = vcombine.low %v22173_v5, %v9178_v36  ;;  %v9686_v33 = vcombine.high %v22173_v5, %v9178_v36  ;;  %v9190_v13 = vpop.permute.xlu0 %9189 }
0x17d5   : > { %v16792_v60 = vcombine.low %v9789_v45, %v9796_v28  ;;  %v16794_v39 = vcombine.high %v9789_v45, %v9796_v28  ;;  %v16796_v42 = vcombine.low %v9805_v17, %v9812_v37  ;;  %v16798_v51 = vcombine.high %v9805_v17, %v9812_v37  ;;  %v9232_v11 = vpop.permute.xlu1 %9231 }
0x17d6   : > { %v10357_v32 = vcombine.low %v10301_v16, %v10333_v34  ;;  %v10358_v49 = vcombine.high %v10301_v16, %v10333_v34  ;;  %v9693_v53 = vrot.slane %v9685_v43, %v22239_v58  ;;  %v9700_v12 = vrot.slane %v9686_v33, %v22239_v58 }
0x17d7   : > { %v22370_v44 = vrot.slane %v16792_v60, %v22239_v58  ;;  %v22373_v57 = vrot.slane %v16794_v39, %v22239_v58  ;;  %v22376_v5 = vrot.slane %v16796_v42, %v22239_v58  ;;  %v22379_v2 = vrot.slane %v16798_v51, %v22239_v58 }
0x17d8   : > { %v10909_v41 = vpack.c.bf16 %v10357_v32, %v10221_v31  ;;  %v10911_v0 = vpack.c.bf16 %v10358_v49, %v10222_v55  ;;  %v9921_v1 = vcombine.low %v22183_v63, %v9220_v25  ;;  %v9922_v3 = vcombine.high %v22183_v63, %v9220_v25 }
0x17d9   : > { %v9701_v36 = vcombine.low %v22277_v18, %v9190_v13  ;;  %v9702_v47 = vcombine.high %v22277_v18, %v9190_v13  ;;  %v9937_v54 = vcombine.low %v22333_v50, %v9232_v11  ;;  %v9938_v8 = vcombine.high %v22333_v50, %v9232_v11  ;;  %v9180_v59 = vpop.permute.xlu1 %9179  ;;  %v9242_v11 = vpop.permute.xlu0 %9241 }
0x17da   : > { %17817 = vmatprep.mubr.msk.bf16.mxu0 %vm10933_vm1, %v10909_v41  ;;  %17825 = vmatprep.mubr.msk.bf16.mxu1 %vm10933_vm1, %v10911_v0  ;;  %v9929_v31 = vrot.slane %v9921_v1, %v22239_v58  ;;  %v9936_v26 = vrot.slane %v9922_v3, %v22239_v58  ;;  %v9889_v30 = vcombine.low %v22181_v6, %v9180_v59 }
0x17db   : > { %v9709_v63 = vrot.slane %v9701_v36, %v22239_v58  ;;  %v9716_v25 = vrot.slane %v9702_v47, %v22239_v58  ;;  %v9945_v18 = vrot.slane %v9937_v54, %v22239_v58  ;;  %v9952_v55 = vrot.slane %v9938_v8, %v22239_v58 }
0x17dc   : > { %v9890_v50 = vcombine.high %v22181_v6, %v9180_v59  ;;  %v22398_v45 = vrot.slane %v9889_v30, %v22239_v58  ;;  %v10173_v28 = vcombine.low %v22316_v10, %v22319_v52  ;;  %v10205_v17 = vcombine.low %v22322_v24, %v22325_v35 }
0x17dd   : > { %v9749_v37 = vcombine.low %v9693_v53, %v9709_v63  ;;  %v9750_v16 = vcombine.high %v9693_v53, %v9709_v63  ;;  %v9765_v34 = vcombine.low %v9700_v12, %v9716_v25  ;;  %v9766_v43 = vcombine.high %v9700_v12, %v9716_v25  ;;  %v9192_v33 = vpop.permute.xlu1 %9191 }
0x17de   : > { %v9985_v60 = vcombine.low %v9929_v31, %v9945_v18  ;;  %v9986_v39 = vcombine.high %v9929_v31, %v9945_v18  ;;  %v10001_v42 = vcombine.low %v9936_v26, %v9952_v55  ;;  %v10002_v51 = vcombine.high %v9936_v26, %v9952_v55 }
0x17df   : > { %v9757_v6 = vrot.slane %v9749_v37, %v22243_v62  ;;  %v9764_v32 = vrot.slane %v9750_v16, %v22243_v62  ;;  %v9773_v49 = vrot.slane %v9765_v34, %v22243_v62  ;;  %v9780_v13 = vrot.slane %v9766_v43, %v22243_v62  ;;  %v9266_v43 = vpop.permute.xlu0 %9265 }
0x17e0   : > { %v9993_v41 = vrot.slane %v9985_v60, %v22243_v62  ;;  %v10000_v53 = vrot.slane %v9986_v39, %v22243_v62  ;;  %v10009_v12 = vrot.slane %v10001_v42, %v22243_v62  ;;  %v10016_v0 = vrot.slane %v10002_v51, %v22243_v62 }
0x17e1   : > { %v16791_v1 = vcombine.low %v9757_v6, %v9764_v32  ;;  %v16793_v3 = vcombine.high %v9757_v6, %v9764_v32  ;;  %v16795_v36 = vcombine.low %v9773_v49, %v9780_v13  ;;  %v16797_v47 = vcombine.high %v9773_v49, %v9780_v13  ;;  %v22412_v54 = vpop.permute.xlu1 %9243 }
0x17e2   : > { %v16800_v8 = vcombine.low %v9993_v41, %v10000_v53  ;;  %v16802_v59 = vcombine.high %v9993_v41, %v10000_v53  ;;  %v16804_v31 = vcombine.low %v10009_v12, %v10016_v0  ;;  %v16806_v26 = vcombine.high %v10009_v12, %v10016_v0 }
0x17e3   : > { %v22415_v30 = vrot.slane %v16791_v1, %v22239_v58  ;;  %v22418_v63 = vrot.slane %v16793_v3, %v22239_v58  ;;  %v22421_v25 = vrot.slane %v16795_v36, %v22239_v58  ;;  %v22424_v18 = vrot.slane %v16797_v47, %v22239_v58 }
0x17e4   : > { %v22427_v55 = vrot.slane %v16800_v8, %v22239_v58  ;;  %v22430_v37 = vrot.slane %v16802_v59, %v22239_v58  ;;  %v22433_v16 = vrot.slane %v16804_v31, %v22239_v58  ;;  %v22436_v34 = vrot.slane %v16806_v26, %v22239_v58 }
0x17e5   : > { %v10429_v60 = vcombine.low %v22415_v30, %v22418_v63  ;;  %v10430_v39 = vcombine.high %v22415_v30, %v22418_v63  ;;  %v10461_v42 = vcombine.low %v22421_v25, %v22424_v18  ;;  %v9254_v6 = vpop.permute.xlu1 %9253  ;;  %v9904_v32 = vrot.slane %v9890_v50, %v22239_v58 }
0x17e6   : > { %v10181_v49 = vrot.slane %v10173_v28, %v22243_v62  ;;  %v10213_v13 = vrot.slane %v10205_v17, %v22243_v62  ;;  %v10309_v41 = vcombine.low %v22340_v48, %v22343_v4  ;;  %v10341_v0 = vcombine.low %v22346_v20, %v22349_v9 }
0x17e7   : > { %v22452_v53 = vrot.slane %v10429_v60, %v22243_v62  ;;  %v22455_v12 = vrot.slane %v10461_v42, %v22243_v62  ;;  %v9429_v1 = vcombine.low %v9242_v11, %v9266_v43  ;;  %v9430_v28 = vcombine.high %v9242_v11, %v9266_v43 }
0x17e8   : > { %v10225_v3 = vcombine.low %v10181_v49, %v10213_v13  ;;  %v10317_v50 = vrot.slane %v10309_v41, %v22243_v62  ;;  %v10226_v36 = vcombine.high %v10181_v49, %v10213_v13  ;;  %v10349_v17 = vrot.slane %v10341_v0, %v22243_v62 }
0x17e9   : > { %v9437_v47 = vrot.slane %v9429_v1, %v22239_v58  ;;  %v9905_v8 = vcombine.low %v22313_v38, %v9192_v33  ;;  %v9906_v59 = vcombine.high %v22313_v38, %v9192_v33  ;;  %v9256_v31 = vpop.permute.xlu1 %9255  ;;  %v9444_v26 = vrot.slane %v9430_v28, %v22239_v58 }
0x17ea   : > { %v9413_v60 = vcombine.low %v22161_v56, %v9254_v6  ;;  %v9414_v42 = vcombine.high %v22161_v56, %v9254_v6  ;;  %v9617_v22 = vcombine.low %v22167_v40, %v9256_v31  ;;  %v10361_v41 = vcombine.low %v10317_v50, %v10349_v17 }
0x17eb   : > { %v10362_v49 = vcombine.high %v10317_v50, %v10349_v17  ;;  %v9913_v11 = vrot.slane %v9905_v8, %v22239_v58  ;;  %v9920_v43 = vrot.slane %v9906_v59, %v22239_v58  ;;  %v9618_v38 = vcombine.high %v22167_v40, %v9256_v31 }
0x17ec   : > { %v9421_v13 = vrot.slane %v9413_v60, %v22239_v58  ;;  %v9428_v0 = vrot.slane %v9414_v42, %v22239_v58  ;;  %v22474_v33 = vrot.slane %v9617_v22, %v22239_v58  ;;  %v10917_v1 = vpack.c.bf16 %v10361_v41, %v10225_v3 }
0x17ed   : > { %v10919_v28 = vpack.c.bf16 %v10362_v49, %v10226_v36  ;;  %v9953_v56 = vcombine.low %v22398_v45, %v9913_v11  ;;  %v9954_v6 = vcombine.high %v22398_v45, %v9913_v11  ;;  %v9969_v50 = vcombine.low %v9904_v32, %v9920_v43 }
0x17ee   : > { %v9970_v17 = vcombine.high %v9904_v32, %v9920_v43  ;;  %v9445_v8 = vcombine.low %v9421_v13, %v9437_v47  ;;  %v9446_v51 = vcombine.high %v9421_v13, %v9437_v47  ;;  %18089 = vmatprep.subr.msk.bf16.mxu0 %vm10933_vm1, %v10917_v1  ;;  %v10941_v59 = vsel %vm10933_vm1, %v10917_v1, 0 }
0x17ef   : > { %18091 = vmatprep.subr.msk.bf16.mxu1 %vm10933_vm1, %v10919_v28  ;;  %v11002_v40 = vsel %vm10933_vm1, %v10919_v28, 0  ;;  %v9961_v22 = vrot.slane %v9953_v56, %v22243_v62  ;;  %v9968_v3 = vrot.slane %v9954_v6, %v22243_v62  ;;  %17814 = vmatpush3.bf16.xpose.msra.mxu0 %v10941_v59  ;;  %v9977_v45 = vrot.slane %v9969_v50, %v22243_v62 }
0x17f0   : > { %17822 = vmatpush3.bf16.xpose.msra.mxu1 %v11002_v40  ;;  %v9984_v32 = vrot.slane %v9970_v17, %v22243_v62  ;;  %v22487_v36 = vrot.slane %v9445_v8, %v22243_v62  ;;  %v22490_v60 = vrot.slane %v9446_v51, %v22243_v62  ;;  %v9461_v42 = vcombine.low %v9428_v0, %v9444_v26 }
0x17f1   : > { %v16799_v47 = vcombine.low %v9961_v22, %v9968_v3  ;;  %v16801_v31 = vcombine.high %v9961_v22, %v9968_v3  ;;  %v9462_v11 = vcombine.high %v9428_v0, %v9444_v26  ;;  %v22493_v43 = vrot.slane %v9618_v38, %v22239_v58 }
0x17f2   : > { %v16803_v41 = vcombine.low %v9977_v45, %v9984_v32  ;;  %v16805_v49 = vcombine.high %v9977_v45, %v9984_v32  ;;  %v22502_v28 = vrot.slane %v9461_v42, %v22243_v62  ;;  %v10445_v17 = vcombine.low %v22370_v44, %v22373_v57 }
0x17f3   : > { %v22496_v13 = vrot.slane %v16799_v47, %v22239_v58  ;;  %v22499_v1 = vrot.slane %v16801_v31, %v22239_v58  ;;  %v22513_v0 = vrot.slane %v9462_v11, %v22243_v62  ;;  %v10477_v8 = vcombine.low %v22376_v5, %v22379_v2 }
0x17f4   : > { %v22507_v56 = vrot.slane %v16803_v41, %v22239_v58  ;;  %v22510_v26 = vrot.slane %v16805_v49, %v22239_v58  ;;  %v10453_v32 = vrot.slane %v10445_v17, %v22243_v62  ;;  %v10581_v31 = vcombine.low %v22427_v55, %v22430_v37 }
0x17f5   : > { %v10565_v6 = vcombine.low %v22496_v13, %v22499_v1  ;;  %v10485_v47 = vrot.slane %v10477_v8, %v22243_v62  ;;  %v10613_v41 = vcombine.low %v22433_v16, %v22436_v34  ;;  %v10174_v49 = vcombine.high %v22316_v10, %v22319_v52 }
0x17f6   : > { %v10597_v59 = vcombine.low %v22507_v56, %v22510_v26  ;;  %v10206_v11 = vcombine.high %v22322_v24, %v22325_v35  ;;  %v10589_v17 = vrot.slane %v10581_v31, %v22243_v62  ;;  %v10310_v8 = vcombine.high %v22340_v48, %v22343_v4 }
0x17f7   : > { %v22534_v45 = vrot.slane %v10565_v6, %v22243_v62  ;;  %v9268_v6 = vpop.permute.xlu1 %9267  ;;  %v10497_v3 = vcombine.low %v10453_v32, %v10485_v47  ;;  %v10498_v22 = vcombine.high %v10453_v32, %v10485_v47  ;;  %v10621_v38 = vrot.slane %v10613_v41, %v22243_v62 }
0x17f8   : > { %v10605_v42 = vrot.slane %v10597_v59, %v22243_v62  ;;  %v10188_v59 = vrot.slane %v10174_v49, %v22243_v62  ;;  %v10220_v51 = vrot.slane %v10206_v11, %v22243_v62  ;;  %v10342_v10 = vcombine.high %v22346_v20, %v22349_v9 }
0x17f9   : > { %v10324_v52 = vrot.slane %v10310_v8, %v22243_v62  ;;  %v9633_v24 = vcombine.low %v22412_v54, %v9268_v6  ;;  %v9634_v35 = vcombine.high %v22412_v54, %v9268_v6  ;;  %v10493_v32 = vcombine.low %v22452_v53, %v22455_v12 }
0x17fa   : > { %v10633_v47 = vcombine.low %v10589_v17, %v10621_v38  ;;  %v10634_v48 = vcombine.high %v10589_v17, %v10621_v38  ;;  %v10227_v4 = vcombine.low %v10188_v59, %v10220_v51  ;;  %v10356_v31 = vrot.slane %v10342_v10, %v22243_v62 }
0x17fb   : > { %v10228_v41 = vcombine.high %v10188_v59, %v10220_v51  ;;  %v9641_v49 = vrot.slane %v9633_v24, %v22239_v58  ;;  %v9648_v11 = vrot.slane %v9634_v35, %v22239_v58  ;;  %v10629_v20 = vcombine.low %v22534_v45, %v10605_v42 }
0x17fc   : > { %v10918_v9 = vpack.c.bf16 %v10633_v47, %v10497_v3  ;;  %v10920_v8 = vpack.c.bf16 %v10634_v48, %v10498_v22  ;;  %v10363_v40 = vcombine.low %v10324_v52, %v10356_v31  ;;  %v10364_v50 = vcombine.high %v10324_v52, %v10356_v31 }
0x17fd   : > { %v9649_v54 = vcombine.low %v22474_v33, %v9641_v49  ;;  %v9650_v6 = vcombine.high %v22474_v33, %v9641_v49  ;;  %v9665_v38 = vcombine.low %v22493_v43, %v9648_v11  ;;  %v9666_v17 = vcombine.high %v22493_v43, %v9648_v11 }
0x17fe   : > { %18090 = vmatprep.subr.msk.bf16.mxu0 %vm10933_vm1, %v10918_v9  ;;  %18092 = vmatprep.subr.msk.bf16.mxu1 %vm10933_vm1, %v10920_v8  ;;  %v10944_v51 = vsel %vm10933_vm1, %v10918_v9, 0  ;;  %v11005_v59 = vsel %vm10933_vm1, %v10920_v8, 0  ;;  %v10921_v3 = vpack.c.bf16 %v10363_v40, %v10227_v4  ;;  %v10923_v22 = vpack.c.bf16 %v10364_v50, %v10228_v41 }
0x17ff   : > { %17816 = vmatpush3.bf16.xpose.msra.mxu0 %v10944_v51  ;;  %17824 = vmatpush3.bf16.xpose.msra.mxu1 %v11005_v59  ;;  %v22573_v10 = vrot.slane %v9649_v54, %v22243_v62  ;;  %v22576_v33 = vrot.slane %v9650_v6, %v22243_v62  ;;  %v22579_v43 = vrot.slane %v9665_v38, %v22243_v62 }
0x1800   : > { %18093 = vmatprep.subr.msk.bf16.mxu0 %vm10933_vm1, %v10921_v3  ;;  %18095 = vmatprep.subr.msk.bf16.mxu1 %vm10933_vm1, %v10923_v22  ;;  %v22584_v52 = vrot.slane %v9666_v17, %v22243_v62  ;;  %v10910_v40 = vpack.c.bf16 %v10629_v20, %v10493_v32  ;;  %v10494_v50 = vcombine.high %v22452_v53, %v22455_v12  ;;  %v11063_v47 = vsel %vm10933_vm1, %v10921_v3, 0 }
0x1801   : > { %v10705_v24 = vcombine.low %v22573_v10, %v22576_v33  ;;  %v10630_v35 = vcombine.high %v22534_v45, %v10605_v42  ;;  %v10158_v48 = vcombine.high %v22262_v19, %v22265_v21  ;;  %v16809_v4 = vcombine.high %v22573_v10, %v22576_v33 }
0x1802   : > { %v10721_v31 = vcombine.low %v22579_v43, %v22584_v52  ;;  %v10190_v32 = vcombine.high %v22268_v23, %v22271_v46  ;;  %v10294_v53 = vcombine.high %v22288_v61, %v22291_v29  ;;  %v16810_v12 = vcombine.high %v22579_v43, %v22584_v52 }
0x1803   : > { %v10912_v45 = vpack.c.bf16 %v10630_v35, %v10494_v50  ;;  %v10172_v42 = vrot.slane %v10158_v48, %v22243_v62  ;;  %v10326_v19 = vcombine.high %v22294_v14, %v22297_v27  ;;  %v10446_v49 = vcombine.high %v22370_v44, %v22373_v57 }
0x1804   : > { %v10204_v21 = vrot.slane %v10190_v32, %v22243_v62  ;;  %v10308_v41 = vrot.slane %v10294_v53, %v22243_v62  ;;  %v10478_v23 = vcombine.high %v22376_v5, %v22379_v2  ;;  %v10582_v61 = vcombine.high %v22427_v55, %v22430_v37 }
0x1805   : > { %v10340_v46 = vrot.slane %v10326_v19, %v22243_v62  ;;  %v10614_v29 = vcombine.high %v22433_v16, %v22436_v34  ;;  %v10444_v14 = vrot.slane %v10430_v39, %v22243_v62  ;;  %v11124_v44 = vsel %vm10933_vm1, %v10923_v22, 0 }
0x1806   : > { %17818 = vmatmul.mubr.msk.bf16.vlgmr.msra.gmra.mrb[8].mxu0 %vm10933_vm1, %v10910_v40  ;;  %17826 = vmatmul.mubr.msk.bf16.vlgmr.msra.gmra.mrb[4].mxu1 %vm10933_vm1, %v10912_v45  ;;  %v10223_v27 = vcombine.low %v10172_v42, %v10204_v21  ;;  %v10224_v57 = vcombine.high %v10172_v42, %v10204_v21  ;;  %v10460_v5 = vrot.slane %v10446_v49, %v22243_v62 }
0x1807   : > { %17830 = vmatpush3.bf16.xpose.msra.mxu0 %v11063_v47  ;;  %v10359_v2 = vcombine.low %v10308_v41, %v10340_v46  ;;  %17838 = vmatpush3.bf16.xpose.msra.mxu1 %v11124_v44  ;;  %v10360_v55 = vcombine.high %v10308_v41, %v10340_v46  ;;  %v10492_v37 = vrot.slane %v10478_v23, %v22243_v62 }
0x1808   : > { %v10596_v16 = vrot.slane %v10582_v61, %v22243_v62  ;;  %v10628_v30 = vrot.slane %v10614_v29, %v22243_v62  ;;  %v24519_v63 = vcombine.high %v22421_v25, %v22424_v18  ;;  %v24520_v39 = vcombine.high %v22496_v13, %v22499_v1 }
0x1809   : > { %v10913_v20 = vpack.c.bf16 %v10359_v2, %v10223_v27  ;;  %v10915_v9 = vpack.c.bf16 %v10360_v55, %v10224_v57  ;;  %v10499_v8 = vcombine.low %v10460_v5, %v10492_v37  ;;  %v10500_v54 = vcombine.high %v10460_v5, %v10492_v37 }
0x180a   : > { %v10476_v34 = vrot.slane %v24519_v63, %v22243_v62  ;;  %v10580_v11 = vrot.slane %v24520_v39, %v22243_v62  ;;  %v10635_v6 = vcombine.low %v10596_v16, %v10628_v30  ;;  %v10636_v38 = vcombine.high %v10596_v16, %v10628_v30  ;;  %v8823_v39 = vld [vmem:[%s24526_s19 + $0x10] sm:$0xff] }
0x180b   : > { %v24521_v51 = vcombine.high %v22507_v56, %v22510_v26  ;;  %17833 = vmatprep.mubr.msk.bf16.mxu0 %vm10933_vm1, %v10913_v20  ;;  %17841 = vmatprep.mubr.msk.bf16.mxu1 %vm10933_vm1, %v10915_v9  ;;  %v24522_v18 = vcombine.low %v22487_v36, %v22490_v60  ;;  %v24523_v1 = vcombine.high %v22487_v36, %v22490_v60  ;;  %v8827_v20 = vld [vmem:[%s24526_s19 + $0x30] sm:$0xff] }
0x180c   : > { %v10495_v17 = vcombine.low %v10444_v14, %v10476_v34  ;;  %v10496_v25 = vcombine.high %v10444_v14, %v10476_v34  ;;  %v10922_v22 = vpack.c.bf16 %v10635_v6, %v10499_v8  ;;  %v10924_v10 = vpack.c.bf16 %v10636_v38, %v10500_v54  ;;  %v8828_v8 = vld [vmem:[%s24526_s19 + $0x38] sm:$0xff] }
0x180d   : > { %v10612_v59 = vrot.slane %v24521_v51, %v22243_v62  ;;  %v10644_v13 = vrot.slane %v24522_v18, %v22239_v58  ;;  %v10652_v3 = vrot.slane %v24523_v1, %v22239_v58  ;;  %v24524_v26 = vcombine.low %v22502_v28, %v22513_v0 }
0x180e   : > { %v24525_v52 = vcombine.high %v22502_v28, %v22513_v0  ;;  %v10712_v35 = vrot.slane %v10705_v24, %v22239_v58  ;;  %18094 = vmatprep.subr.msk.bf16.mxu0 %vm10933_vm1, %v10922_v22  ;;  %18096 = vmatprep.subr.msk.bf16.mxu1 %vm10933_vm1, %v10924_v10  ;;  %v11066_v36 = vsel %vm10933_vm1, %v10922_v22, 0  ;;  %v11127_v60 = vsel %vm10933_vm1, %v10924_v10, 0  ;;  %v8821_v22 = vld [vmem:[%s24526_s19] sm:$0xff] }
0x180f   : > { %v10631_v33 = vcombine.low %v10580_v11, %v10612_v59  ;;  %v10632_v56 = vcombine.high %v10580_v11, %v10612_v59  ;;  %v10660_v43 = vrot.slane %v24524_v26, %v22239_v58  ;;  %v10669_v50 = vcombine.low %v10644_v13, %v10652_v3  ;;  %17832 = vmatpush3.bf16.xpose.msra.mxu0 %v11066_v36  ;;  %v8822_v59 = vld [vmem:[%s24526_s19 + $0x8] sm:$0xff] }
0x1810   : > { %v10668_v40 = vrot.slane %v24525_v52, %v22239_v58  ;;  %17840 = vmatpush3.bf16.xpose.msra.mxu1 %v11127_v60  ;;  %v10720_v53 = vrot.slane %v16809_v4, %v22239_v58  ;;  %v10728_v28 = vrot.slane %v10721_v31, %v22239_v58  ;;  %v10736_v0 = vrot.slane %v16810_v12, %v22239_v58  ;;  %v8825_v52 = vld [vmem:[%s24526_s19 + $0x20] sm:$0xff]  ;;  %v8824_v60 = vld [vmem:[%s24526_s19 + $0x18] sm:$0xff] }
0x1811   : > { %v10914_v47 = vpack.c.bf16 %v10631_v33, %v10495_v17  ;;  %v10916_v48 = vpack.c.bf16 %v10632_v56, %v10496_v25  ;;  %v10670_v24 = vcombine.high %v10644_v13, %v10652_v3  ;;  %v10677_v42 = vrot.slane %v10669_v50, %v22243_v62  ;;  %v8826_v56 = vld [vmem:[%s24526_s19 + $0x28] sm:$0xff] }
0x1812   : > { %v10685_v32 = vcombine.low %v10660_v43, %v10668_v40  ;;  %v10686_v45 = vcombine.high %v10660_v43, %v10668_v40  ;;  %v10737_v21 = vcombine.low %v10712_v35, %v10720_v53  ;;  %v10738_v41 = vcombine.high %v10712_v35, %v10720_v53  ;;  %v8831_v53 = vld [vmem:[%s24526_s19 + $0x50] sm:$0xff] }
0x1813   : > { %v10753_v49 = vcombine.low %v10728_v28, %v10736_v0  ;;  %v10684_v23 = vrot.slane %v10670_v24, %v22243_v62  ;;  %v10754_v61 = vcombine.high %v10728_v28, %v10736_v0  ;;  %v8832_v24 = vld [vmem:[%s24526_s19 + $0x58] sm:$0xff] }
0x1814   : > { %v10693_v19 = vrot.slane %v10685_v32, %v22243_v62  ;;  %v10700_v46 = vrot.slane %v10686_v45, %v22243_v62  ;;  %v10745_v4 = vrot.slane %v10737_v21, %v22243_v62  ;;  %v10752_v31 = vrot.slane %v10738_v41, %v22243_v62  ;;  %v8836_v21 = vld [vmem:[%s24526_s19 + $0x78] sm:$0xff] }
0x1815   : > { %v10761_v12 = vrot.slane %v10753_v49, %v22243_v62  ;;  %v10768_v14 = vrot.slane %v10754_v61, %v22243_v62 }
0x1816   : > { %v10703_v29 = vcombine.low %v10684_v23, %v10700_v46  ;;  %v10704_v27 = vcombine.high %v10684_v23, %v10700_v46  ;;  %v10701_v44 = vcombine.low %v10677_v42, %v10693_v19  ;;  %v10702_v57 = vcombine.high %v10677_v42, %v10693_v19  ;;  %17834 = vmatmul.mubr.msk.bf16.vlgmr.msra.gmra.mrb[12].mxu0 %vm10933_vm1, %v10914_v47 }
0x1817   : > { %17842 = vmatmul.mubr.msk.bf16.vlgmr.msra.gmra.mrb[8].mxu1 %vm10933_vm1, %v10916_v48  ;;  %v10769_v5 = vcombine.low %v10745_v4, %v10761_v12  ;;  %v10770_v2 = vcombine.high %v10745_v4, %v10761_v12  ;;  %v10771_v55 = vcombine.low %v10752_v31, %v10768_v14  ;;  %v10772_v37 = vcombine.high %v10752_v31, %v10768_v14  ;;  %v8835_v31 = vld [vmem:[%s24526_s19 + $0x70] sm:$0xff]  ;;  %v8830_v14 = vld [vmem:[%s24526_s19 + $0x48] sm:$0xff] }
0x1819   : > { %v10925_v16 = vpack.c.bf16 %v10769_v5, %v10701_v44  ;;  %v10927_v30 = vpack.c.bf16 %v10770_v2, %v10702_v57  ;;  %v22677_v63 = vpack.c.bf16 %v10771_v55, %v10703_v29  ;;  %v22679_v34 = vpack.c.bf16 %v10772_v37, %v10704_v27  ;;  %v8829_v57 = vld [vmem:[%s24526_s19 + $0x40] sm:$0xff]  ;;  %v8834_v55 = vld [vmem:[%s24526_s19 + $0x68] sm:$0xff] }
0x181b   : > { %17845 = vmatprep.subr.bf16.mxu0 %v10925_v16  ;;  %17853 = vmatprep.subr.bf16.mxu1 %v10927_v30 }
0x181c   : > { %17846 = vmatpush3.bf16.msra.mxu0 %v10925_v16  ;;  %17854 = vmatpush3.bf16.msra.mxu1 %v10927_v30 }
0x18d9   : > { %v17819_v11 = vpop.f32.mrb[8].mxu0  ;;  %v17827_v9 = vpop.f32.mrb[4].mxu1 }
0x18da   : > { %v22690_v54 = vadd.f32 %v17819_v11, %v8823_v39  ;;  %v10980_v6 = vpop.f32.mrb[9].mxu0  ;;  %v11041_v38 = vpop.f32.mrb[5].mxu1  ;;  %v22695_v25 = vadd.f32 %v17827_v9, %v8827_v20  ;;  %v8833_v9 = vld [vmem:[%s24526_s19 + $0x60] sm:$0xff] }
0x18db   : > { %v17820_v17 = vpop.f32.mrb[10].mxu0  ;;  %v17828_v51 = vpop.f32.mrb[6].mxu1  ;;  %v22711_v26 = vadd.f32 %v10980_v6, %v8821_v22  ;;  %v22722_v35 = vadd.f32 %v11041_v38, %v8825_v52 }
0x18dc   : > { %v22697_v18 = vadd.f32 %v17828_v51, %v8828_v8  ;;  %v10983_v13 = vpop.f32.mrb[11].mxu0  ;;  %v11044_v1 = vpop.f32.mrb[7].mxu1  ;;  %v11184_v3 = vsel %vm10933_vm1, %v22690_v54, -inf  ;;  %v11196_v43 = vsel %vm10933_vm1, %v22695_v25, -inf  ;;  %v22731_v48 = vadd.f32 %v17820_v17, %v8824_v60 }
0x18dd   : > { %11185 = vmax.xlane.f32.xlu0 %v11184_v3  ;;  %v22704_v10 = vadd.f32 %v10983_v13, %v8822_v59  ;;  %v22718_v40 = vadd.f32 %v11044_v1, %v8826_v56  ;;  %v11178_v36 = vsel %vm10933_vm1, %v22711_v26, -inf  ;;  %v11190_v32 = vsel %vm10933_vm1, %v22722_v35, -inf  ;;  %v22797_v38 = vpop.permute.xlu0 %9245  ;;  %v22800_v59 = vpop.permute.xlu1 %9247 }
0x18de   : > { %v11199_v33 = vsel %vm10933_vm1, %v22697_v18, -inf  ;;  %v11187_v4 = vsel %vm10933_vm1, %v22731_v48, -inf }
0x18df   : > { %11200 = vmax.xlane.f32.xlu1 %v11199_v33  ;;  %v11181_v50 = vsel %vm10933_vm1, %v22704_v10, -inf  ;;  %v11193_v47 = vsel %vm10933_vm1, %v22718_v40, -inf }
0x18e1   : > { %11197 = vmax.xlane.f32.xlu0 %v11196_v43 }
0x18e3   : > { %11182 = vmax.xlane.f32.xlu1 %v11181_v50 }
0x18e5   : > { %11179 = vmax.xlane.f32.xlu0 %v11178_v36 }
0x18e7   : > { %11194 = vmax.xlane.f32.xlu1 %v11193_v47 }
0x18e9   : > { %v17835_v28 = vpop.f32.mrb[12].mxu0  ;;  %11191 = vmax.xlane.f32.xlu0 %v11190_v32 }
0x18ea   : > { %v17843_v0 = vpop.f32.mrb[8].mxu1  ;;  %v11102_v45 = vpop.f32.mrb[13].mxu0  ;;  %v22744_v49 = vadd.f32 %v17835_v28, %v8831_v53 }
0x18eb   : > { %v11163_v42 = vpop.f32.mrb[9].mxu1  ;;  %v17836_v19 = vpop.f32.mrb[14].mxu0  ;;  %v22760_v27 = vadd.f32 %v17843_v0, %v8835_v31  ;;  %v22774_v37 = vadd.f32 %v11102_v45, %v8829_v57 }
0x18ec   : > { %v17844_v41 = vpop.f32.mrb[10].mxu1  ;;  %v22746_v23 = vadd.f32 %v17836_v19, %v8832_v24  ;;  %v11105_v46 = vpop.f32.mrb[15].mxu0  ;;  %v11208_v44 = vsel %vm10933_vm1, %v22744_v49, -inf  ;;  %v22793_v8 = vadd.f32 %v11163_v42, %v8833_v9 }
0x18ed   : > { %v11166_v61 = vpop.f32.mrb[11].mxu1  ;;  %11188 = vmax.xlane.f32.xlu0 %v11187_v4  ;;  %v22753_v12 = vadd.f32 %v17844_v41, %v8836_v21  ;;  %v22767_v5 = vadd.f32 %v11105_v46, %v8830_v14  ;;  %v11220_v16 = vsel %vm10933_vm1, %v22760_v27, -inf  ;;  %v11202_v11 = vsel %vm10933_vm1, %v22774_v37, -inf }
0x18ee   : > { %v11211_v29 = vsel %vm10933_vm1, %v22746_v23, -inf  ;;  %v22778_v30 = vadd.f32 %v11166_v61, %v8834_v55  ;;  %v11214_v6 = vsel %vm10933_vm1, %v22793_v8, -inf }
0x18ef   : > { %11212 = vmax.xlane.f32.xlu1 %v11211_v29  ;;  %v11223_v2 = vsel %vm10933_vm1, %v22753_v12, -inf  ;;  %v11205_v39 = vsel %vm10933_vm1, %v22767_v5, -inf }
0x18f0   : > { %v11217_v20 = vsel %vm10933_vm1, %v22778_v30, -inf }
0x18f1   : > { %11209 = vmax.xlane.f32.xlu0 %v11208_v44 }
0x18f3   : > { %11224 = vmax.xlane.f32.xlu1 %v11223_v2 }
0x18f5   : > { %11221 = vmax.xlane.f32.xlu0 %v11220_v16 }
0x18f7   : > { %11206 = vmax.xlane.f32.xlu1 %v11205_v39 }
0x18f9   : > { %11203 = vmax.xlane.f32.xlu0 %v11202_v11 }
0x18fb   : > { %11218 = vmax.xlane.f32.xlu1 %v11217_v20 }
0x190c   : > { %9259 = vrot.lane.b32.xlu1 %v22165_v15, %s24460_s26 }
0x190f   : > { %9257 = vrot.lane.b32.xlu0 %v22155_v7, %s24460_s26 }
0x192e   : > { %11215 = vmax.xlane.f32.xlu0 %v11214_v6 }
0x196a   : > { %v11186_v17 = vpop.xlane.xlu0 %11185 }
0x196b   : > { %v11228_v51 = vsub.f32 %v22690_v54, %v11186_v17 }
0x196c   : > { %v11201_v3 = vpop.xlane.xlu1 %11200 }
0x196d   : > { %v11246_v13 = vmul.f32 1.442695, %v11228_v51  ;;  %v11233_v31 = vsub.f32 %v22697_v18, %v11201_v3 }
0x196e   : > { %v11198_v1 = vpop.xlane.xlu0 %11197 }
0x196f   : > { %18897 = vpow2.f32 %v11246_v13  ;;  %v11232_v46 = vsub.f32 %v22695_v25, %v11198_v1  ;;  %v11256_v57 = vmul.f32 1.442695, %v11233_v31 }
0x1970   : > { %v11183_v43 = vpop.xlane.xlu1 %11182 }
0x1971   : > { %v11227_v36 = vsub.f32 %v22704_v10, %v11183_v43  ;;  %v11254_v29 = vmul.f32 1.442695, %v11232_v46 }
0x1972   : > { %v11180_v22 = vpop.xlane.xlu0 %11179 }
0x1973   : > { %v11226_v33 = vsub.f32 %v22711_v26, %v11180_v22  ;;  %v11244_v32 = vmul.f32 1.442695, %v11227_v36 }
0x1974   : > { %v11195_v45 = vpop.xlane.xlu1 %11194 }
0x1975   : > { %v11242_v56 = vmul.f32 1.442695, %v11226_v33  ;;  %v11231_v44 = vsub.f32 %v22718_v40, %v11195_v45 }
0x1976   : > { %v11192_v52 = vpop.xlane.xlu0 %11191 }
0x1977   : > { %18899 = vpow2.f32 %v11242_v56  ;;  %v11230_v19 = vsub.f32 %v22722_v35, %v11192_v52  ;;  %v11252_v16 = vmul.f32 1.442695, %v11231_v44 }
0x1979   : > { %v22803_v50 = vpop.eup %18897  ;;  %v11250_v61 = vmul.f32 1.442695, %v11230_v19 }
0x197a   : > { %v11189_v60 = vpop.xlane.xlu0 %11188  ;;  %v11280_v54 = vsel %vm10933_vm1, %v22803_v50, 0.0 }
0x197b   : > { %v11229_v47 = vsub.f32 %v22731_v48, %v11189_v60  ;;  %11281 = vadd.xlane.f32.xlu0 %v11280_v54 }
0x197c   : > { %v11213_v21 = vpop.xlane.xlu1 %11212 }
0x197d   : > { %v11248_v53 = vmul.f32 1.442695, %v11229_v47  ;;  %v11237_v20 = vsub.f32 %v22746_v23, %v11213_v21 }
0x197e   : > { %v11210_v42 = vpop.xlane.xlu0 %11209 }
0x197f   : > { %18901 = vpow2.f32 %v11248_v53  ;;  %v11236_v35 = vsub.f32 %v22744_v49, %v11210_v42 }
0x1980   : > { %18903 = vpow2.f32 %v11244_v32  ;;  %v11225_v4 = vpop.xlane.xlu1 %11224 }
0x1981   : > { %v22809_v28 = vpop.eup %18899  ;;  %18905 = vpow2.f32 %v11250_v61  ;;  %v11262_v18 = vmul.f32 1.442695, %v11236_v35  ;;  %v11241_v33 = vsub.f32 %v22753_v12, %v11225_v4 }
0x1982   : > { %v11274_v26 = vsel %vm10933_vm1, %v22809_v28, 0.0  ;;  %v11222_v41 = vpop.xlane.xlu0 %11221  ;;  %18907 = vpow2.f32 %v11254_v29 }
0x1983   : > { %11275 = vadd.xlane.f32.xlu0 %v11274_v26  ;;  %18909 = vpow2.f32 %v11256_v57  ;;  %v11240_v49 = vsub.f32 %v22760_v27, %v11222_v41  ;;  %v11272_v36 = vmul.f32 1.442695, %v11241_v33 }
0x1984   : > { %v11207_v55 = vpop.xlane.xlu1 %11206  ;;  %18911 = vpow2.f32 %v11252_v16 }
0x1985   : > { %v11235_v25 = vsub.f32 %v22767_v5, %v11207_v55  ;;  %v11264_v5 = vmul.f32 1.442695, %v11237_v20  ;;  %v11270_v22 = vmul.f32 1.442695, %v11240_v49 }
0x1986   : > { %v11204_v14 = vpop.xlane.xlu0 %11203 }
0x1987   : > { %v11234_v2 = vsub.f32 %v22774_v37, %v11204_v14  ;;  %v11260_v9 = vmul.f32 1.442695, %v11235_v25 }
0x1988   : > { %v11219_v40 = vpop.xlane.xlu1 %11218 }
0x1989   : > { %v22813_v0 = vpop.eup %18901  ;;  %v11258_v39 = vmul.f32 1.442695, %v11234_v2  ;;  %v11239_v51 = vsub.f32 %v22778_v30, %v11219_v40 }
0x198a   : > { %v11283_v10 = vsel %vm10933_vm1, %v22813_v0, 0.0  ;;  %v22817_v24 = vpop.eup %18903  ;;  %v22835_v6 = vpop.permute.xlu0 %9257 }
0x198b   : > { %11284 = vadd.xlane.f32.xlu1 %v11283_v10  ;;  %v11277_v48 = vsel %vm10933_vm1, %v22817_v24, 0.0  ;;  %v22832_v11 = vpop.eup %18905  ;;  %18913 = vpow2.f32 %v11258_v39  ;;  %v11268_v56 = vmul.f32 1.442695, %v11239_v51  ;;  %v9821_v31 = vcombine.low %v22155_v7, %v22835_v6 }
0x198c   : > { %v11286_v37 = vsel %vm10933_vm1, %v22832_v11, 0.0  ;;  %v22839_v17 = vpop.eup %18907  ;;  %18915 = vpow2.f32 %v11262_v18  ;;  %v9822_v29 = vcombine.high %v22155_v7, %v22835_v6  ;;  %v9260_v14 = vpop.permute.xlu1 %9259 }
0x198d   : > { %18917 = vpow2.f32 %v11260_v9  ;;  %v11292_v23 = vsel %vm10933_vm1, %v22839_v17, 0.0  ;;  %v22845_v1 = vpop.eup %18909  ;;  %v9829_v55 = vrot.slane %v9821_v31, %v22239_v58  ;;  %v10026_v51 = vcombine.high %v22165_v15, %v9260_v14 }
0x198e   : > { %18919 = vpow2.f32 %v11264_v5  ;;  %v22849_v27 = vpop.eup %18911  ;;  %v11295_v30 = vsel %vm10933_vm1, %v22845_v1, 0.0  ;;  %v9836_v16 = vrot.slane %v9822_v29, %v22239_v58  ;;  %v10025_v5 = vcombine.low %v22165_v15, %v9260_v14 }
0x198f   : > { %11278 = vadd.xlane.f32.xlu1 %v11277_v48  ;;  %v11289_v12 = vsel %vm10933_vm1, %v22849_v27, 0.0 }
0x1995   : > { %v22853_v52 = vpop.eup %18913 }
0x1996   : > { %v11298_v60 = vsel %vm10933_vm1, %v22853_v52, 0.0 }
0x1999   : > { %9269 = vrot.lane.b32.xlu0 %v22155_v7, %s24458_s22 }
0x19a0   : > { %9271 = vrot.lane.b32.xlu1 %v22165_v15, %s24458_s22 }
0x19b8   : > { %11287 = vadd.xlane.f32.xlu0 %v11286_v37 }
0x19bb   : > { %v11216_v13 = vpop.xlane.xlu0 %11215 }
0x19bc   : > { %v11238_v3 = vsub.f32 %v22793_v8, %v11216_v13  ;;  %11293 = vadd.xlane.f32.xlu0 %v11292_v23  ;;  %v22855_v8 = vpop.eup %18915 }
0x19bd   : > { %v22861_v54 = vpop.eup %18917  ;;  %v11304_v47 = vsel %vm10933_vm1, %v22855_v8, 0.0 }
0x19be   : > { %v11266_v43 = vmul.f32 1.442695, %v11238_v3  ;;  %v11301_v32 = vsel %vm10933_vm1, %v22861_v54, 0.0  ;;  %v22867_v53 = vpop.eup %18919 }
0x19bf   : > { %v11307_v45 = vsel %vm10933_vm1, %v22867_v53, 0.0 }
0x19c0   : > { %18921 = vpow2.f32 %v11266_v43  ;;  %11296 = vadd.xlane.f32.xlu0 %v11295_v30  ;;  %v10033_v30 = vrot.slane %v10025_v5, %v22239_v58 }
0x19c1   : > { %18923 = vpow2.f32 %v11270_v22 }
0x19c2   : > { %18925 = vpow2.f32 %v11268_v56 }
0x19c3   : > { %18927 = vpow2.f32 %v11272_v36  ;;  %v10040_v36 = vrot.slane %v10026_v51, %v22239_v58 }
0x19c4   : > { %11299 = vadd.xlane.f32.xlu0 %v11298_v60  ;;  %11290 = vadd.xlane.f32.xlu1 %v11289_v12 }
0x19c8   : > { %11305 = vadd.xlane.f32.xlu0 %v11304_v47  ;;  %11302 = vadd.xlane.f32.xlu1 %v11301_v32 }
0x19ca   : > { %v22869_v26 = vpop.eup %18921 }
0x19cb   : > { %v22871_v10 = vpop.eup %18923  ;;  %v11310_v48 = vsel %vm10933_vm1, %v22869_v26, 0.0 }
0x19cc   : > { %v22877_v42 = vpop.eup %18925  ;;  %11311 = vadd.xlane.f32.xlu0 %v11310_v48  ;;  %11308 = vadd.xlane.f32.xlu1 %v11307_v45  ;;  %v11316_v19 = vsel %vm10933_vm1, %v22871_v10, 0.0 }
0x19cd   : > { %v11313_v21 = vsel %vm10933_vm1, %v22877_v42, 0.0  ;;  %v22883_v41 = vpop.eup %18927 }
0x19ce   : > { %v11319_v46 = vsel %vm10933_vm1, %v22883_v41, 0.0 }
0x19d0   : > { %11317 = vadd.xlane.f32.xlu0 %v11316_v19  ;;  %11314 = vadd.xlane.f32.xlu1 %v11313_v21 }
0x19d4   : > { %11320 = vadd.xlane.f32.xlu1 %v11319_v46 }
0x1a08   : > { %v11282_v61 = vpop.xlane.xlu0 %11281 }
0x1a10   : > { %v11276_v4 = vpop.xlane.xlu0 %11275 }
0x1a11   : > { %18929 = vrcp.f32 %v11276_v4 }
0x1a14   : > { %v9270_v44 = vpop.permute.xlu0 %9269 }
0x1a15   : > { %v9837_v57 = vcombine.low %v22797_v38, %v9270_v44  ;;  %v9838_v2 = vcombine.high %v22797_v38, %v9270_v44 }
0x1a17   : > { %v9845_v35 = vrot.slane %v9837_v57, %v22239_v58  ;;  %v9852_v25 = vrot.slane %v9838_v2, %v22239_v58 }
0x1a18   : > { %v11285_v39 = vpop.xlane.xlu1 %11284 }
0x1a19   : > { %v9853_v18 = vcombine.low %v9829_v55, %v9845_v35  ;;  %v9854_v20 = vcombine.high %v9829_v55, %v9845_v35  ;;  %v9869_v9 = vcombine.low %v9836_v16, %v9852_v25  ;;  %v9870_v40 = vcombine.high %v9836_v16, %v9852_v25 }
0x1a1b   : > { %v9861_v7 = vrot.slane %v9853_v18, %v22243_v62  ;;  %v9868_v6 = vrot.slane %v9854_v20, %v22243_v62  ;;  %v9877_v38 = vrot.slane %v9869_v9, %v22243_v62  ;;  %v9884_v37 = vrot.slane %v9870_v40, %v22243_v62  ;;  %v18930_v47 = vpop.eup %18929 }
0x1a1c   : > { %v11279_v49 = vpop.xlane.xlu1 %11278  ;;  %v11338_v14 = vmul.f32 %v18930_v47, %v22809_v28 }
0x1a1d   : > { %18931 = vrcp.f32 %v11279_v49  ;;  %v10773_v13 = vcombine.low %v9861_v7, %v9868_v6  ;;  %v16811_v23 = vcombine.high %v9861_v7, %v9868_v6  ;;  %v10789_v3 = vcombine.low %v9877_v38, %v9884_v37 }
0x1a1e   : > { %v16812_v22 = vcombine.high %v9877_v38, %v9884_v37  ;;  %18933 = vrcp.f32 %v11282_v61 }
0x1a1f   : > { %v10780_v15 = vrot.slane %v10773_v13, %v22239_v58  ;;  %v10788_v32 = vrot.slane %v16811_v23, %v22239_v58  ;;  %v10796_v48 = vrot.slane %v10789_v3, %v22239_v58  ;;  %18935 = vrcp.f32 %v11285_v39 }
0x1a20   : > { %v9272_v33 = vpop.permute.xlu1 %9271  ;;  %v10804_v45 = vrot.slane %v16812_v22, %v22239_v58 }
0x1a21   : > { %v10041_v56 = vcombine.low %v22800_v59, %v9272_v33  ;;  %v10042_v43 = vcombine.high %v22800_v59, %v9272_v33  ;;  %v10805_v2 = vcombine.low %v10780_v15, %v10788_v32  ;;  %v10806_v16 = vcombine.high %v10780_v15, %v10788_v32 }
0x1a22   : > { %v10821_v55 = vcombine.low %v10796_v48, %v10804_v45  ;;  %v10822_v39 = vcombine.high %v10796_v48, %v10804_v45 }
0x1a23   : > { %v10049_v60 = vrot.slane %v10041_v56, %v22239_v58  ;;  %v10056_v12 = vrot.slane %v10042_v43, %v22239_v58  ;;  %v10813_v38 = vrot.slane %v10805_v2, %v22243_v62 }
0x1a24   : > { %v10829_v37 = vrot.slane %v10821_v55, %v22243_v62  ;;  %v10836_v5 = vrot.slane %v10822_v39, %v22243_v62 }
0x1a25   : > { %v10057_v19 = vcombine.low %v10033_v30, %v10049_v60  ;;  %v10058_v59 = vcombine.high %v10033_v30, %v10049_v60  ;;  %v10073_v21 = vcombine.low %v10040_v36, %v10056_v12  ;;  %v10074_v46 = vcombine.high %v10040_v36, %v10056_v12 }
0x1a26   : > { %v10837_v36 = vcombine.low %v10813_v38, %v10829_v37  ;;  %v10838_v60 = vcombine.high %v10813_v38, %v10829_v37 }
0x1a27   : > { %v10065_v4 = vrot.slane %v10057_v19, %v22243_v62  ;;  %v10072_v31 = vrot.slane %v10058_v59, %v22243_v62  ;;  %v10081_v29 = vrot.slane %v10073_v21, %v22243_v62  ;;  %v18932_v44 = vpop.eup %18931  ;;  %v10088_v57 = vrot.slane %v10074_v46, %v22243_v62 }
0x1a28   : > { %v11339_v25 = vmul.f32 %v18932_v44, %v22817_v24  ;;  %v10820_v24 = vrot.slane %v10806_v16, %v22243_v62  ;;  %v18934_v3 = vpop.eup %18933 }
0x1a29   : > { %v10841_v61 = vcombine.low %v10065_v4, %v10072_v31  ;;  %v16813_v35 = vcombine.high %v10065_v4, %v10072_v31  ;;  %v10857_v18 = vcombine.low %v10081_v29, %v10088_v57  ;;  %v16814_v20 = vcombine.high %v10081_v29, %v10088_v57  ;;  %v18936_v56 = vpop.eup %18935 }
0x1a2a   : > { %v11354_v7 = vpack.c.bf16 %v11339_v25, %v11338_v14  ;;  %v10839_v12 = vcombine.low %v10820_v24, %v10836_v5  ;;  %v10840_v47 = vcombine.high %v10820_v24, %v10836_v5  ;;  %v11341_v19 = vmul.f32 %v18936_v56, %v22813_v0  ;;  %v18713_v0 = vld [vmem:[%s24527_s21] sm:$0xff]  }
0x1a2b   : > { %v10848_v9 = vrot.slane %v10841_v61, %v22239_v58  ;;  %v10856_v40 = vrot.slane %v16813_v35, %v22239_v58  ;;  %v10864_v28 = vrot.slane %v10857_v18, %v22239_v58  ;;  %v10872_v6 = vrot.slane %v16814_v20, %v22239_v58 }
0x1a2c   : > { %17849 = vmatprep.mubr.msk.bf16.mxu0 %vm10933_vm1, %v11354_v7  ;;  %v11340_v31 = vmul.f32 %v18934_v3, %v22803_v50 }
0x1a2d   : > { %v10873_v49 = vcombine.low %v10848_v9, %v10856_v40  ;;  %v10874_v51 = vcombine.high %v10848_v9, %v10856_v40  ;;  %v10889_v13 = vcombine.low %v10864_v28, %v10872_v6  ;;  %v10890_v23 = vcombine.high %v10864_v28, %v10872_v6 }
0x1a2e   : > { %v11355_v29 = vpack.c.bf16 %v11341_v19, %v11340_v31  ;;  %v18718_v31 = vld [vmem:[%s24527_s21 + $0x28] sm:$0xff]  }
0x1a2f   : > { %v10881_v22 = vrot.slane %v10873_v49, %v22243_v62  ;;  %v10888_v33 = vrot.slane %v10874_v51, %v22243_v62  ;;  %v10897_v43 = vrot.slane %v10889_v13, %v22243_v62  ;;  %v10904_v30 = vrot.slane %v10890_v23, %v22243_v62 }
0x1a31   : > { %v10905_v15 = vcombine.low %v10881_v22, %v10897_v43  ;;  %v10906_v32 = vcombine.high %v10881_v22, %v10897_v43  ;;  %v10907_v48 = vcombine.low %v10888_v33, %v10904_v30  ;;  %v10908_v45 = vcombine.high %v10888_v33, %v10904_v30 }
0x1a33   : > { %v10926_v59 = vpack.c.bf16 %v10905_v15, %v10837_v36  ;;  %v10928_v21 = vpack.c.bf16 %v10906_v32, %v10838_v60  ;;  %v10930_v46 = vpack.c.bf16 %v10907_v48, %v10839_v12  ;;  %v22933_v4 = vpack.c.bf16 %v10908_v45, %v10840_v47  ;;  %v18716_v32 = vld [vmem:[%s24527_s21 + $0x18] sm:$0xff]   ;;  %v18717_v48 = vld [vmem:[%s24527_s21 + $0x20] sm:$0xff]  }
0x1a34   : > { %v24528_v36 = vmov 0  }
0x1a35   : > { %17847 = vmatprep.subr.bf16.mxu0 %v10926_v59  ;;  %17855 = vmatprep.subr.bf16.mxu1 %v10928_v21 }
0x1a36   : > { %17848 = vmatpush3.bf16.msra.mxu0 %v10926_v59  ;;  %17856 = vmatpush3.bf16.msra.mxu1 %v10928_v21 }
0x1a37   : > { %17861 = vmatprep.subr.bf16.mxu0 %v22677_v63  ;;  %17869 = vmatprep.subr.bf16.mxu1 %v22679_v34 }
0x1a39   : > { %17850 = vmatmul.mubr.msk.bf16.vlgmr.msra.gmra.mrb[16].mxu0 %vm10933_vm1, %v11355_v29 }
0x1a3a   : > { %17862 = vmatpush3.bf16.msra.mxu0 %v22677_v63 }
0x1a3b   : > { %17863 = vmatprep.subr.bf16.mxu0 %v10930_v46 }
0x1a3e   : > { %17864 = vmatpush3.bf16.msra.mxu0 %v10930_v46 }
0x1a3f   : > { %17877 = vmatprep.subr.bf16.mxu0 %v18713_v0 }
0x1a45   : > { %v11288_v50 = vpop.xlane.xlu0 %11287 }
0x1a49   : > { %v11294_v14 = vpop.xlane.xlu0 %11293 }
0x1a4d   : > { %v11297_v44 = vpop.xlane.xlu0 %11296 }
0x1a4e   : > { %18937 = vrcp.f32 %v11297_v44 }
0x1a4f   : > { %18939 = vrcp.f32 %v11288_v50 }
0x1a50   : > { %18941 = vrcp.f32 %v11294_v14  ;;  %v18719_v14 = vld [vmem:[%s24527_s21 + $0x30] sm:$0xff]  }
0x1a51   : > { %v11300_v57 = vpop.xlane.xlu0 %11299  ;;  %v11291_v2 = vpop.xlane.xlu1 %11290 }
0x1a52   : > { %18943 = vrcp.f32 %v11291_v2 }
0x1a53   : > { %18945 = vrcp.f32 %v11300_v57 }
0x1a55   : > { %v11306_v55 = vpop.xlane.xlu0 %11305  ;;  %v11303_v16 = vpop.xlane.xlu1 %11302 }
0x1a56   : > { %18947 = vrcp.f32 %v11303_v16 }
0x1a57   : > { %18949 = vrcp.f32 %v11306_v55 }
0x1a58   : > { %v18938_v35 = vpop.eup %18937 }
0x1a59   : > { %v11312_v63 = vpop.xlane.xlu0 %11311  ;;  %v11309_v61 = vpop.xlane.xlu1 %11308  ;;  %v11345_v20 = vmul.f32 %v18938_v35, %v22845_v1 }
0x1a5a   : > { %v18940_v25 = vpop.eup %18939  ;;  %18951 = vrcp.f32 %v11309_v61 }
0x1a5b   : > { %v18942_v39 = vpop.eup %18941  ;;  %18953 = vrcp.f32 %v11312_v63  ;;  %v11342_v7 = vmul.f32 %v18940_v25, %v22832_v11  ;;  %v18720_v25 = vld [vmem:[%s24527_s21 + $0x38] sm:$0xff]  }
0x1a5c   : > { %v18944_v18 = vpop.eup %18943  ;;  %v11344_v38 = vmul.f32 %v18942_v39, %v22839_v17 }
0x1a5d   : > { %v11318_v9 = vpop.xlane.xlu0 %11317  ;;  %v11315_v40 = vpop.xlane.xlu1 %11314  ;;  %v11343_v28 = vmul.f32 %v18944_v18, %v22849_v27  ;;  %v18721_v18 = vld [vmem:[%s24529_s8] ss:$16 sps:$4 sm:$0xff]  }
0x1a5e   : > { %v18946_v6 = vpop.eup %18945  ;;  %18955 = vrcp.f32 %v11315_v40  ;;  %v11357_v5 = vpack.c.bf16 %v11345_v20, %v11344_v38  ;;  %v18723_v20 = vld [vmem:[%s24529_s8 + $0x4] ss:$16 sps:$4 sm:$0xff]   ;;  %v18726_v40 = vld [vmem:[%s24529_s8 + $0xc] ss:$16 sps:$4 sm:$0xff]   ;;  %v18730_v38 = vld [vmem:[%s24529_s8 + $0x28] ss:$16 sps:$4 sm:$0xff]  }
0x1a5f   : > { %18957 = vrcp.f32 %v11318_v9  ;;  %v11356_v37 = vpack.c.bf16 %v11343_v28, %v11342_v7  ;;  %v11346_v1 = vmul.f32 %v18946_v6, %v22853_v52  ;;  %v18724_v9 = vld [vmem:[%s24529_s8 + $0x8] ss:$16 sps:$4 sm:$0xff]   ;;  %v18729_v7 = vld [vmem:[%s24529_s8 + $0x24] ss:$16 sps:$4 sm:$0xff]   ;;  %v18732_v28 = vld [vmem:[%s24529_s8 + $0x2c] ss:$16 sps:$4 sm:$0xff]  }
0x1a60   : > { %v18948_v49 = vpop.eup %18947  ;;  %v18727_v6 = vld [vmem:[%s24529_s8 + $0x20] ss:$16 sps:$4 sm:$0xff]  }
0x1a61   : > { %v11321_v24 = vpop.xlane.xlu1 %11320  ;;  %17857 = vmatprep.mubr.msk.bf16.mxu1 %vm10933_vm1, %v11356_v37  ;;  %v11347_v51 = vmul.f32 %v18948_v49, %v22861_v54  ;;  %v18950_v13 = vpop.eup %18949  ;;  %v18735_v37 = vld [vmem:[%s24529_s8 + $0x44] ss:$16 sps:$4 sm:$0xff]   ;;  %v18738_v49 = vld [vmem:[%s24529_s8 + $0x4c] ss:$16 sps:$4 sm:$0xff]  }
0x1a62   : > { %18959 = vrcp.f32 %v11321_v24  ;;  %17858 = vmatmul.mubr.msk.bf16.vlgmr.msra.gmra.mrb[12].mxu1 %vm10933_vm1, %v11357_v5  ;;  %v11348_v27 = vmul.f32 %v18950_v13, %v22855_v8  ;;  %v18733_v24 = vld [vmem:[%s24529_s8 + $0x40] ss:$16 sps:$4 sm:$0xff]   ;;  %v18736_v5 = vld [vmem:[%s24529_s8 + $0x48] ss:$16 sps:$4 sm:$0xff]  }
0x1a63   : > { %17870 = vmatpush3.bf16.msra.mxu1 %v22679_v34  ;;  %v11358_v11 = vpack.c.bf16 %v11347_v51, %v11346_v1  ;;  %v19089_v13 = vld [vmem:[%s19269_s0] sm:$0xff] }
0x1a64   : > { %v18952_v17 = vpop.eup %18951  ;;  %17871 = vmatprep.subr.bf16.mxu1 %v22933_v4 }
0x1a65   : > { %v11349_v23 = vmul.f32 %v18952_v17, %v22867_v53  ;;  %17865 = vmatprep.mubr.msk.bf16.mxu0 %vm10933_vm1, %v11358_v11  ;;  %v18954_v3 = vpop.eup %18953 }
0x1a66   : > { %v11350_v34 = vmul.f32 %v18954_v3, %v22869_v26  ;;  %v18714_v26 = vld [vmem:[%s24527_s21 + $0x8] sm:$0xff]  }
0x1a67   : > { %17872 = vmatpush3.bf16.msra.mxu1 %v22933_v4  ;;  %v11359_v52 = vpack.c.bf16 %v11349_v23, %v11348_v27  ;;  %v19090_v23 = vld [vmem:[%s19269_s0 + $0x10] sm:$0xff] }
0x1a68   : > { %v18956_v54 = vpop.eup %18955  ;;  %12107 = vmatprep.subr.bf16.mxu1 %v18723_v20 }
0x1a69   : > { %v18958_v22 = vpop.eup %18957  ;;  %17866 = vmatmul.mubr.msk.bf16.vlgmr.msra.gmra.mrb[20].mxu0 %vm10933_vm1, %v11359_v52  ;;  %v11351_v33 = vmul.f32 %v18956_v54, %v22877_v42  ;;  %v18715_v42 = vld [vmem:[%s24527_s21 + $0x10] sm:$0xff]   ;;  %v19091_v52 = vld [vmem:[%s19269_s0 + $0x8] sm:$0xff] }
0x1a6a   : > { %17878 = vmatpush3.bf16.msra.mxu0 %v18713_v0  ;;  %v11352_v8 = vmul.f32 %v18958_v22, %v22871_v10 }
0x1a6b   : > { %v11360_v43 = vpack.c.bf16 %v11351_v33, %v11350_v34  ;;  %17879 = vmatprep.subr.bf16.mxu0 %v18714_v26  ;;  %v19092_v34 = vld [vmem:[%s19269_s0 + $0x18] sm:$0xff] }
0x1a6c   : > { %v18960_v56 = vpop.eup %18959 }
0x1a6d   : > { %v11353_v53 = vmul.f32 %v18960_v56, %v22883_v41  ;;  %17873 = vmatprep.mubr.msk.bf16.mxu1 %vm10933_vm1, %v11360_v43 }
0x1a6e   : > { %17880 = vmatpush3.bf16.msra.mxu0 %v18714_v26  ;;  %v18742_v26 = vld [vmem:[%s24529_s8 + $0x68] ss:$16 sps:$4 sm:$0xff]  }
0x1a6f   : > { %v11361_v30 = vpack.c.bf16 %v11353_v53, %v11352_v8  ;;  %17885 = vmatprep.subr.bf16.mxu0 %v18715_v42  ;;  %v18739_v53 = vld [vmem:[%s24529_s8 + $0x60] ss:$16 sps:$4 sm:$0xff]  }
0x1a71   : > { %17874 = vmatmul.mubr.msk.bf16.vlgmr.msra.gmra.mrb[16].mxu1 %vm10933_vm1, %v11361_v30  ;;  %v18741_v30 = vld [vmem:[%s24529_s8 + $0x64] ss:$16 sps:$4 sm:$0xff]  }
0x1a72   : > { %12139 = vmatprep.mubr.bf16.mxu1 %v24528_v36  ;;  %12108 = vmatpush1.bf16.msra.mxu1 %v18721_v18 }
0x1a73   : > { %12109 = vmatprep.subr.bf16.mxu1 %v18729_v7 }
0x1a76   : > { %12110 = vmatpush1.bf16.msra.mxu1 %v18727_v6 }
0x1a77   : > { %12111 = vmatprep.subr.bf16.mxu1 %v18735_v37 }
0x1a7a   : > { %12112 = vmatpush1.bf16.msra.mxu1 %v18733_v24 }
0x1a7b   : > { %12113 = vmatprep.subr.bf16.mxu1 %v18741_v30  ;;  %v18780_v30 = vld [vmem:[%s24531_s18 + $0x28] sm:$0xff]  }
0x1a7e   : > { %12114 = vmatpush1.bf16.msra.mxu1 %v18739_v53  ;;  %v18779_v53 = vld [vmem:[%s24531_s18 + $0x68] sm:$0xff]  }
0x1b0c   : > { %v17851_v10 = vpop.f32.mrb[16].mxu0 }
0x1b0d   : > { %v11402_v41 = vpop.f32.mrb[17].mxu0 }
0x1b0e   : > { %v17852_v60 = vpop.f32.mrb[18].mxu0 }
0x1b0f   : > { %v11583_v12 = vpack.c.bf16 %v17852_v60, %v17851_v10  ;;  %v11405_v47 = vpop.f32.mrb[19].mxu0  ;;  %v18745_v10 = vld [vmem:[%s24529_s8 + $0x80] ss:$16 sps:$4 sm:$0xff]   ;;  %v18748_v60 = vld [vmem:[%s24529_s8 + $0x88] ss:$16 sps:$4 sm:$0xff]  }
0x1b10   : > { %v11582_v15 = vpack.c.bf16 %v11405_v47, %v11402_v41  ;;  %v18747_v41 = vld [vmem:[%s24529_s8 + $0x84] ss:$16 sps:$4 sm:$0xff]  }
0x1b11   : > { %v18753_v47 = vld [vmem:[%s24529_s8 + $0xa4] ss:$16 sps:$4 sm:$0xff]   ;;  %12115 = vmatprep.subr.bf16.mxu1 %v18747_v41  ;;  %v18784_v41 = vld [vmem:[%s24531_s18 + $0x38] sm:$0xff]  }
0x1b12   : > { %17881 = vmatprep.mubr.msk.bf16.mxu0 %vm10933_vm1, %v11582_v15  ;;  %v18756_v15 = vld [vmem:[%s24529_s8 + $0xac] ss:$16 sps:$4 sm:$0xff]   ;;  %12116 = vmatpush1.bf16.msra.mxu1 %v18745_v10 }
0x1b13   : > { %17882 = vmatmul.mubr.msk.bf16.vlgmr.msra.gmra.mrb[24].mxu0 %vm10933_vm1, %v11583_v12  ;;  %v18750_v12 = vld [vmem:[%s24529_s8 + $0x8c] ss:$16 sps:$4 sm:$0xff]   ;;  %12117 = vmatprep.subr.bf16.mxu1 %v18753_v47 }
0x1b14   : > { %17886 = vmatpush3.bf16.msra.mxu0 %v18715_v42  ;;  %v18744_v42 = vld [vmem:[%s24529_s8 + $0x6c] ss:$16 sps:$4 sm:$0xff]  }
0x1b15   : > { %17887 = vmatprep.subr.bf16.mxu0 %v18716_v32  ;;  %v18783_v10 = vld [vmem:[%s24531_s18 + $0x78] sm:$0xff]  }
0x1b18   : > { %17888 = vmatpush3.bf16.msra.mxu0 %v18716_v32  ;;  %v18751_v32 = vld [vmem:[%s24529_s8 + $0xa0] ss:$16 sps:$4 sm:$0xff]  }
0x1b19   : > { %17893 = vmatprep.subr.bf16.mxu0 %v18717_v48  ;;  %12118 = vmatpush1.bf16.msra.mxu1 %v18751_v32 }
0x1b35   : > { %v17859_v45 = vpop.f32.mrb[12].mxu1 }
0x1b36   : > { %v11457_v19 = vpop.f32.mrb[13].mxu1 }
0x1b37   : > { %v17860_v59 = vpop.f32.mrb[14].mxu1 }
0x1b38   : > { %v11585_v21 = vpack.c.bf16 %v17860_v59, %v17859_v45  ;;  %v11460_v46 = vpop.f32.mrb[15].mxu1  ;;  %v18759_v45 = vld [vmem:[%s24529_s8 + $0xc4] ss:$16 sps:$4 sm:$0xff]   ;;  %v18757_v59 = vld [vmem:[%s24529_s8 + $0xc0] ss:$16 sps:$4 sm:$0xff]  }
0x1b39   : > { %v11584_v4 = vpack.c.bf16 %v11460_v46, %v11457_v19  ;;  %v18762_v19 = vld [vmem:[%s24529_s8 + $0xcc] ss:$16 sps:$4 sm:$0xff]   ;;  %12119 = vmatprep.subr.bf16.mxu1 %v18759_v45  ;;  %v18765_v46 = vld [vmem:[%s24529_s8 + $0xe4] ss:$16 sps:$4 sm:$0xff]  }
0x1b3a   : > { %12120 = vmatpush1.bf16.msra.mxu1 %v18757_v59 }
0x1b3b   : > { %17889 = vmatprep.mubr.msk.bf16.mxu0 %vm10933_vm1, %v11584_v4  ;;  %v18768_v4 = vld [vmem:[%s24529_s8 + $0xec] ss:$16 sps:$4 sm:$0xff]   ;;  %12121 = vmatprep.subr.bf16.mxu1 %v18765_v46 }
0x1b3c   : > { %v17867_v29 = vpop.f32.mrb[20].mxu0  ;;  %17890 = vmatmul.mubr.msk.bf16.vlgmr.msra.gmra.mrb[24].mxu0 %vm10933_vm1, %v11585_v21  ;;  %v18760_v21 = vld [vmem:[%s24529_s8 + $0xc8] ss:$16 sps:$4 sm:$0xff]  }
0x1b3d   : > { %v11512_v0 = vpop.f32.mrb[21].mxu0  ;;  %17894 = vmatpush3.bf16.msra.mxu0 %v18717_v48  ;;  %v18754_v48 = vld [vmem:[%s24529_s8 + $0xa8] ss:$16 sps:$4 sm:$0xff]  }
0x1b3e   : > { %v17868_v50 = vpop.f32.mrb[22].mxu0  ;;  %17895 = vmatprep.subr.bf16.mxu0 %v18718_v31 }
0x1b3f   : > { %v11587_v44 = vpack.c.bf16 %v17868_v50, %v17867_v29  ;;  %v11515_v57 = vpop.f32.mrb[23].mxu0  ;;  %v18766_v29 = vld [vmem:[%s24529_s8 + $0xe8] ss:$16 sps:$4 sm:$0xff]  }
0x1b40   : > { %v11586_v2 = vpack.c.bf16 %v11515_v57, %v11512_v0 }
0x1b41   : > { %17896 = vmatpush3.bf16.msra.mxu0 %v18718_v31  ;;  %v18763_v31 = vld [vmem:[%s24529_s8 + $0xe0] ss:$16 sps:$4 sm:$0xff]  }
0x1b42   : > { %17897 = vmatprep.mubr.msk.bf16.mxu0 %vm10933_vm1, %v11586_v2  ;;  %17901 = vmatprep.subr.bf16.mxu0 %v18719_v14 }
0x1b43   : > { %12122 = vmatpush1.bf16.msra.mxu1 %v18763_v31 }
0x1b44   : > { %v17875_v55 = vpop.f32.mrb[16].mxu1 }
0x1b45   : > { %v11567_v16 = vpop.f32.mrb[17].mxu1 }
0x1b46   : > { %v17876_v63 = vpop.f32.mrb[18].mxu1 }
0x1b47   : > { %v11589_v61 = vpack.c.bf16 %v17876_v63, %v17875_v55  ;;  %v11570_v35 = vpop.f32.mrb[19].mxu1 }
0x1b48   : > { %v11588_v39 = vpack.c.bf16 %v11570_v35, %v11567_v16  ;;  %17898 = vmatmul.mubr.msk.bf16.vlgmr.msra.gmra.mrb[24].mxu0 %vm10933_vm1, %v11587_v44 }
0x1b49   : > { %17902 = vmatpush3.bf16.msra.mxu0 %v18719_v14 }
0x1b4a   : > { %17905 = vmatprep.mubr.msk.bf16.mxu0 %vm10933_vm1, %v11588_v39  ;;  %17903 = vmatprep.subr.bf16.mxu0 %v18720_v25 }
0x1b4d   : > { %17904 = vmatpush3.bf16.msra.mxu0 %v18720_v25 }
0x1b4e   : > { %12160 = vmatprep.subr.bf16.mxu0 %v18726_v40 }
0x1b54   : > { %17906 = vmatmul.mubr.msk.bf16.vlgmr.msra.gmra.mrb[24].mxu0 %vm10933_vm1, %v11589_v61 }
0x1b55   : > { %12192 = vmatprep.mubr.bf16.mxu0 %v24528_v36  ;;  %12161 = vmatpush1.bf16.msra.mxu0 %v18724_v9  ;;  %v16847_v9 = vld [vmem:[%s24530_s2] ss:$0 sm:$0xff] }
0x1b56   : > { %12162 = vmatprep.subr.bf16.mxu0 %v18732_v28 }
0x1b59   : > { %12163 = vmatpush1.bf16.msra.mxu0 %v18730_v38 }
0x1b5a   : > { %12164 = vmatprep.subr.bf16.mxu0 %v18738_v49 }
0x1b5d   : > { %12165 = vmatpush1.bf16.msra.mxu0 %v18736_v5 }
0x1b5e   : > { %12166 = vmatprep.subr.bf16.mxu0 %v18744_v42  ;;  %v18782_v42 = vld [vmem:[%s24531_s18 + $0x30] sm:$0xff]  }
0x1b61   : > { %12167 = vmatpush1.bf16.msra.mxu0 %v18742_v26  ;;  %v18781_v26 = vld [vmem:[%s24531_s18 + $0x70] sm:$0xff]  }
0x1b62   : > { %12168 = vmatprep.subr.bf16.mxu0 %v18750_v12 }
0x1b65   : > { %12169 = vmatpush1.bf16.msra.mxu0 %v18748_v60 }
0x1b66   : > { %12170 = vmatprep.subr.bf16.mxu0 %v18756_v15 }
0x1b69   : > { %12171 = vmatpush1.bf16.msra.mxu0 %v18754_v48 }
0x1b6a   : > { %12172 = vmatprep.subr.bf16.mxu0 %v18762_v19 }
0x1b6d   : > { %12173 = vmatpush1.bf16.msra.mxu0 %v18760_v21 }
0x1b6e   : > { %12174 = vmatprep.subr.bf16.mxu0 %v18768_v4 }
0x1b71   : > { %12175 = vmatpush1.bf16.msra.mxu0 %v18766_v29 }
0x1c27   : > { %v17907_v1 = vpop.f32.mrb[24].mxu0 }
0x1c28   : > { %v11843_v51 = vpop.f32.mrb[25].mxu0  ;;  %v23035_v3 = vadd.f32 %v19090_v23, %v17907_v1  ;;  %v18772_v23 = vld [vmem:[%s24531_s18 + $0x8] sm:$0xff]  }
0x1c29   : > { %v23032_v11 = vadd.f32 %v19089_v13, %v11843_v51  ;;  %v17908_v17 = vpop.f32.mrb[26].mxu0  ;;  %v18769_v13 = vld [vmem:[%s24531_s18 + $0x40] sm:$0xff]  }
0x1c2a   : > { %v11846_v27 = vpop.f32.mrb[27].mxu0  ;;  %v23043_v33 = vadd.f32 %v19092_v34, %v17908_v17  ;;  %v11877_v43 = vmul.f32 %v23035_v3, %v23035_v3  ;;  %v18770_v17 = vld [vmem:[%s24531_s18] sm:$0xff]   ;;  %17447 = vmatprep.subr.bf16.mxu1 %v18769_v13  ;;  %v18775_v34 = vld [vmem:[%s24531_s18 + $0x58] sm:$0xff]  }
0x1c2b   : > { %v23038_v54 = vadd.f32 %v19091_v52, %v11846_v27  ;;  %v11875_v22 = vmul.f32 %v23032_v11, %v23032_v11  ;;  %v18771_v27 = vld [vmem:[%s24531_s18 + $0x48] sm:$0xff]   ;;  %v18773_v52 = vld [vmem:[%s24531_s18 + $0x50] sm:$0xff]  }
0x1c2c   : > { %v11878_v8 = vmul.f32 %v23043_v33, %v23043_v33 }
0x1c2d   : > { %11879 = vadd.xlane.f32.xlu0 %v11875_v22  ;;  %v11876_v56 = vmul.f32 %v23038_v54, %v23038_v54  ;;  %v18774_v22 = vld [vmem:[%s24531_s18 + $0x10] sm:$0xff]  }
0x1c2f   : > { %11881 = vadd.xlane.f32.xlu1 %v11876_v56  ;;  %v18776_v56 = vld [vmem:[%s24531_s18 + $0x18] sm:$0xff]  }
0x1c31   : > { %11883 = vadd.xlane.f32.xlu0 %v11877_v43  ;;  %v18777_v43 = vld [vmem:[%s24531_s18 + $0x60] sm:$0xff]  }
0x1c33   : > { %11885 = vadd.xlane.f32.xlu1 %v11878_v8  ;;  %v18778_v8 = vld [vmem:[%s24531_s18 + $0x20] sm:$0xff]  }
0x1cba   : > { %v11880_v0 = vpop.xlane.xlu0 %11879 }
0x1cbb   : > { %v11887_v50 = vmul.f32 0.0078125, %v11880_v0 }
0x1cbc   : > { %v11882_v14 = vpop.xlane.xlu1 %11881 }
0x1cbd   : > { %v11891_v44 = vadd.f32 1e-06, %v11887_v50  ;;  %v11888_v57 = vmul.f32 0.0078125, %v11882_v14 }
0x1cbe   : > { %v11884_v2 = vpop.xlane.xlu0 %11883 }
0x1cbf   : > { %18961 = vrsqrt.f32 %v11891_v44  ;;  %v11892_v55 = vadd.f32 1e-06, %v11888_v57  ;;  %v11889_v16 = vmul.f32 0.0078125, %v11884_v2 }
0x1cc0   : > { %v11886_v63 = vpop.xlane.xlu1 %11885 }
0x1cc1   : > { %18963 = vrsqrt.f32 %v11892_v55  ;;  %v11893_v61 = vadd.f32 1e-06, %v11889_v16  ;;  %v11890_v35 = vmul.f32 0.0078125, %v11886_v63 }
0x1cc3   : > { %v11894_v25 = vadd.f32 1e-06, %v11890_v35  ;;  %18965 = vrsqrt.f32 %v11893_v61 }
0x1cc5   : > { %18967 = vrsqrt.f32 %v11894_v25 }
0x1cc9   : > { %v18962_v39 = vpop.eup %18961 }
0x1cca   : > { %v11899_v18 = vmul.f32 %v18962_v39, %v23032_v11 }
0x1ccb   : > { %v18964_v20 = vpop.eup %18963 }
0x1ccc   : > { %v11900_v40 = vmul.f32 %v18964_v20, %v23038_v54  ;;  %v11909_v28 = vmul.f32 %v16847_v9, %v11899_v18 }
0x1ccd   : > { %v18966_v7 = vpop.eup %18965 }
0x1cce   : > { %v11910_v6 = vmul.f32 %v16847_v9, %v11900_v40  ;;  %v11901_v24 = vmul.f32 %v18966_v7, %v23035_v3 }
0x1ccf   : > { %v18968_v38 = vpop.eup %18967 }
0x1cd0   : > { %v11945_v37 = vpack.c.bf16 %v11910_v6, %v11909_v28  ;;  %v11902_v49 = vmul.f32 %v18968_v38, %v23043_v33  ;;  %v11911_v1 = vmul.f32 %v16847_v9, %v11901_v24 }
0x1cd2   : > { %12140 = vmatmul.mubr.bf16.vlgmr.msra.gmra.mrb[20].mxu1 %v11945_v37  ;;  %12193 = vmatmul.mubr.bf16.vlgmr.msra.gmra.mrb[28].mxu0 %v11945_v37  ;;  %v11912_v5 = vmul.f32 %v16847_v9, %v11902_v49 }
0x1cd3   : > { %12149 = vmatprep.mubr.bf16.mxu1 %v24528_v36  ;;  %12202 = vmatprep.mubr.bf16.mxu0 %v24528_v36 }
0x1cd4   : > { %v11946_v51 = vpack.c.bf16 %v11912_v5, %v11911_v1  ;;  %17448 = vmatpush3.bf16.msra.mxu1 %v18770_v17 }
0x1cd5   : > { %17449 = vmatprep.subr.bf16.mxu1 %v18771_v27 }
0x1cd8   : > { %17450 = vmatpush3.bf16.msra.mxu1 %v18772_v23 }
0x1cd9   : > { %17451 = vmatprep.subr.bf16.mxu1 %v18773_v52 }
0x1cda   : > { %12150 = vmatmul.mubr.bf16.gmra.mrb[24].mxu1 %v11946_v51  ;;  %12203 = vmatmul.mubr.bf16.gmra.mrb[32].mxu0 %v11946_v51 }
0x1cdb   : > { %12713 = vmatprep.mubr.bf16.mxu0 %v24528_v36 }
0x1cdc   : > { %17452 = vmatpush3.bf16.msra.mxu1 %v18774_v22 }
0x1cdd   : > { %17453 = vmatprep.subr.bf16.mxu1 %v18775_v34 }
0x1ce0   : > { %17454 = vmatpush3.bf16.msra.mxu1 %v18776_v56 }
0x1ce1   : > { %17455 = vmatprep.subr.bf16.mxu1 %v18777_v43 }
0x1ce4   : > { %17456 = vmatpush3.bf16.msra.mxu1 %v18778_v8 }
0x1ce5   : > { %17457 = vmatprep.subr.bf16.mxu1 %v18779_v53 }
0x1ce8   : > { %17458 = vmatpush3.bf16.msra.mxu1 %v18780_v30 }
0x1ce9   : > { %17459 = vmatprep.subr.bf16.mxu1 %v18781_v26 }
0x1cec   : > { %17460 = vmatpush3.bf16.msra.mxu1 %v18782_v42 }
0x1ced   : > { %17461 = vmatprep.subr.bf16.mxu1 %v18783_v10 }
0x1cf0   : > { %17462 = vmatpush3.bf16.msra.mxu1 %v18784_v41 }
0x1da5   : > { %v23169_v60 = vpop.f32.mrb[20].mxu1  ;;  %v23171_v12 = vpop.f32.mrb[28].mxu0 }
0x1da6   : > { %v12213_v47 = vmul.f32 %v23169_v60, %v23169_v60  ;;  %v23175_v15 = vpop.f32.mrb[21].mxu1  ;;  %v23177_v32 = vpop.f32.mrb[29].mxu0 }
0x1da7   : > { %v12214_v48 = vmul.f32 %v23175_v15, %v23175_v15  ;;  %v23181_v45 = vpop.f32.mrb[22].mxu1  ;;  %v23183_v19 = vpop.f32.mrb[30].mxu0 }
0x1da8   : > { %v12221_v59 = vmul.f32 %v12213_v47, %v23169_v60  ;;  %v12215_v21 = vmul.f32 %v23181_v45, %v23181_v45  ;;  %v23188_v46 = vpop.f32.mrb[23].mxu1  ;;  %v23190_v4 = vpop.f32.mrb[31].mxu0 }
0x1da9   : > { %v12222_v31 = vmul.f32 %v12214_v48, %v23175_v15  ;;  %v12216_v29 = vmul.f32 %v23188_v46, %v23188_v46 }
0x1daa   : > { %v12229_v0 = vmul.f32 0.044715, %v12221_v59  ;;  %v12223_v50 = vmul.f32 %v12215_v21, %v23181_v45 }
0x1dab   : > { %v12230_v14 = vmul.f32 0.044715, %v12222_v31  ;;  %v12224_v44 = vmul.f32 %v12216_v29, %v23188_v46 }
0x1dac   : > { %v12237_v57 = vadd.f32 %v12229_v0, %v23169_v60  ;;  %v12231_v2 = vmul.f32 0.044715, %v12223_v50 }
0x1dad   : > { %v12238_v55 = vadd.f32 %v12230_v14, %v23175_v15  ;;  %v12232_v16 = vmul.f32 0.044715, %v12224_v44  ;;  %v23199_v63 = vpop.f32.mrb[24].mxu1  ;;  %v23201_v61 = vpop.f32.mrb[32].mxu0 }
0x1dae   : > { %v12245_v35 = vmul.f32 0.7978846, %v12237_v57  ;;  %v12239_v25 = vadd.f32 %v12231_v2, %v23181_v45  ;;  %v12217_v39 = vmul.f32 %v23199_v63, %v23199_v63  ;;  %v23206_v18 = vpop.f32.mrb[25].mxu1  ;;  %v23208_v20 = vpop.f32.mrb[33].mxu0 }
0x1daf   : > { %v12246_v9 = vmul.f32 0.7978846, %v12238_v55  ;;  %v12240_v40 = vadd.f32 %v12232_v16, %v23188_v46  ;;  %v12218_v7 = vmul.f32 %v23206_v18, %v23206_v18  ;;  %v23213_v28 = vpop.f32.mrb[26].mxu1  ;;  %v23215_v6 = vpop.f32.mrb[34].mxu0 }
0x1db0   : > { %18969 = vtanh.f32 %v12245_v35  ;;  %v12247_v38 = vmul.f32 0.7978846, %v12239_v25  ;;  %v12225_v37 = vmul.f32 %v12217_v39, %v23199_v63  ;;  %v12219_v49 = vmul.f32 %v23213_v28, %v23213_v28  ;;  %v23220_v24 = vpop.f32.mrb[27].mxu1  ;;  %v23222_v5 = vpop.f32.mrb[35].mxu0 }
0x1db1   : > { %18971 = vtanh.f32 %v12246_v9  ;;  %v12248_v1 = vmul.f32 0.7978846, %v12240_v40  ;;  %v12226_v51 = vmul.f32 %v12218_v7, %v23206_v18  ;;  %v12220_v13 = vmul.f32 %v23220_v24, %v23220_v24 }
0x1db2   : > { %18973 = vtanh.f32 %v12247_v38  ;;  %v12233_v17 = vmul.f32 0.044715, %v12225_v37  ;;  %v12227_v27 = vmul.f32 %v12219_v49, %v23213_v28 }
0x1db3   : > { %18975 = vtanh.f32 %v12248_v1  ;;  %v12234_v23 = vmul.f32 0.044715, %v12226_v51  ;;  %v12228_v52 = vmul.f32 %v12220_v13, %v23220_v24 }
0x1db4   : > { %v12241_v22 = vadd.f32 %v12233_v17, %v23199_v63  ;;  %v12235_v34 = vmul.f32 0.044715, %v12227_v27 }
0x1db5   : > { %v12242_v56 = vadd.f32 %v12234_v23, %v23206_v18  ;;  %v12236_v43 = vmul.f32 0.044715, %v12228_v52 }
0x1db6   : > { %v12249_v8 = vmul.f32 0.7978846, %v12241_v22  ;;  %v12243_v53 = vadd.f32 %v12235_v34, %v23213_v28 }
0x1db7   : > { %v12250_v30 = vmul.f32 0.7978846, %v12242_v56  ;;  %v12244_v26 = vadd.f32 %v12236_v43, %v23220_v24 }
0x1db8   : > { %18977 = vtanh.f32 %v12249_v8  ;;  %v12251_v42 = vmul.f32 0.7978846, %v12243_v53 }
0x1db9   : > { %18979 = vtanh.f32 %v12250_v30  ;;  %v12252_v10 = vmul.f32 0.7978846, %v12244_v26 }
0x1dba   : > { %v18970_v41 = vpop.eup %18969  ;;  %18981 = vtanh.f32 %v12251_v42 }
0x1dbb   : > { %v18972_v47 = vpop.eup %18971  ;;  %v12261_v48 = vadd.f32 1.0, %v18970_v41  ;;  %18983 = vtanh.f32 %v12252_v10 }
0x1dbc   : > { %v18974_v59 = vpop.eup %18973  ;;  %v12262_v21 = vadd.f32 1.0, %v18972_v47 }
0x1dbd   : > { %v18976_v31 = vpop.eup %18975  ;;  %v12269_v29 = vmul.f32 0.5, %v12261_v48  ;;  %v12263_v0 = vadd.f32 1.0, %v18974_v59 }
0x1dbe   : > { %v12270_v50 = vmul.f32 0.5, %v12262_v21  ;;  %v12264_v14 = vadd.f32 1.0, %v18976_v31 }
0x1dbf   : > { %v12277_v44 = vmul.f32 %v12269_v29, %v23169_v60  ;;  %v12271_v57 = vmul.f32 0.5, %v12263_v0 }
0x1dc0   : > { %v12278_v2 = vmul.f32 %v12270_v50, %v23175_v15  ;;  %v12272_v55 = vmul.f32 0.5, %v12264_v14 }
0x1dc1   : > { %v12285_v16 = vmul.f32 %v12277_v44, %v23171_v12  ;;  %v12279_v35 = vmul.f32 %v12271_v57, %v23181_v45 }
0x1dc2   : > { %v18978_v25 = vpop.eup %18977  ;;  %v12286_v39 = vmul.f32 %v12278_v2, %v23177_v32  ;;  %v12280_v9 = vmul.f32 %v12272_v55, %v23188_v46  ;;  %v18795_v2 = vld [vmem:[%s24517_s20 + $0x108] ss:$12 sps:$4 sm:$0xff]   ;;  %v18801_v55 = vld [vmem:[%s24517_s20 + $0x124] ss:$12 sps:$4 sm:$0xff]  }
0x1dc3   : > { %v18980_v40 = vpop.eup %18979  ;;  %v12287_v7 = vmul.f32 %v12279_v35, %v23183_v19  ;;  %v12265_v38 = vadd.f32 1.0, %v18978_v25  ;;  %v18799_v35 = vld [vmem:[%s24517_s20 + $0x120] ss:$12 sps:$4 sm:$0xff]   ;;  %v18805_v25 = vld [vmem:[%s24517_s20 + $0x13c] ss:$12 sps:$4 sm:$0xff]  }
0x1dc4   : > { %v18982_v37 = vpop.eup %18981  ;;  %v12288_v60 = vmul.f32 %v12280_v9, %v23190_v4  ;;  %v12266_v49 = vadd.f32 1.0, %v18980_v40  ;;  %v18803_v9 = vld [vmem:[%s24517_s20 + $0x138] ss:$12 sps:$4 sm:$0xff]   ;;  %v18809_v40 = vld [vmem:[%s24517_s20 + $0x154] ss:$12 sps:$4 sm:$0xff]  }
0x1dc5   : > { %v18984_v1 = vpop.eup %18983  ;;  %v12325_v15 = vpack.c.bf16 %v12287_v7, %v12285_v16  ;;  %v12273_v51 = vmul.f32 0.5, %v12265_v38  ;;  %v12267_v13 = vadd.f32 1.0, %v18982_v37  ;;  %v18802_v16 = vld [vmem:[%s24517_s20 + $0xf8] ss:$12 sps:$4 sm:$0xff]   ;;  %v18810_v7 = vld [vmem:[%s24517_s20 + $0x128] ss:$12 sps:$4 sm:$0xff]  }
0x1dc6   : > { %v12326_v12 = vpack.c.bf16 %v12288_v60, %v12286_v39  ;;  %v12274_v17 = vmul.f32 0.5, %v12266_v49  ;;  %v12268_v45 = vadd.f32 1.0, %v18984_v1  ;;  %v18806_v39 = vld [vmem:[%s24517_s20 + $0x110] ss:$12 sps:$4 sm:$0xff]   ;;  %v18813_v37 = vld [vmem:[%s24517_s20 + $0x16c] ss:$12 sps:$4 sm:$0xff]  }
0x1dc7   : > { %v12281_v27 = vmul.f32 %v12273_v51, %v23199_v63  ;;  %v12275_v32 = vmul.f32 0.5, %v12267_v13  ;;  %v18807_v38 = vld [vmem:[%s24517_s20 + $0x150] ss:$12 sps:$4 sm:$0xff]   ;;  %v18814_v60 = vld [vmem:[%s24517_s20 + $0x140] ss:$12 sps:$4 sm:$0xff]  }
0x1dc8   : > { %v12282_v46 = vmul.f32 %v12274_v17, %v23206_v18  ;;  %v12276_v23 = vmul.f32 0.5, %v12268_v45  ;;  %12457 = vmatprep.mubr.bf16.mxu1 %v12326_v12  ;;  %v18785_v18 = vld [vmem:[%s24517_s20 + $0xc0] ss:$12 sps:$4 sm:$0xff]   ;;  %v18811_v49 = vld [vmem:[%s24517_s20 + $0x168] ss:$12 sps:$4 sm:$0xff]  }
0x1dc9   : > { %v12289_v19 = vmul.f32 %v12281_v27, %v23201_v61  ;;  %v12283_v52 = vmul.f32 %v12275_v32, %v23213_v28  ;;  %12458 = vmatmul.mubr.bf16.vlgmr.msra.gmra.mrb[28].mxu1 %v12325_v15  ;;  %v18787_v61 = vld [vmem:[%s24517_s20 + $0xc4] ss:$12 sps:$4 sm:$0xff]   ;;  %v18794_v28 = vld [vmem:[%s24517_s20 + $0xc8] ss:$12 sps:$4 sm:$0xff]  }
0x1dca   : > { %v12290_v4 = vmul.f32 %v12282_v46, %v23208_v20  ;;  %v12284_v22 = vmul.f32 %v12276_v23, %v23220_v24  ;;  %v18790_v20 = vld [vmem:[%s24517_s20 + $0xdc] ss:$12 sps:$4 sm:$0xff]   ;;  %12681 = vmatprep.subr.bf16.mxu0 %v18787_v61  ;;  %v18793_v24 = vld [vmem:[%s24517_s20 + $0xf4] ss:$12 sps:$4 sm:$0xff]   ;;  %17909 = vmatprep.subr.bf16.mxu1 %v18794_v28  ;;  %v18815_v1 = vld [vmem:[%s24517_s20 + $0x158] ss:$12 sps:$4 sm:$0xff]  }
0x1dcb   : > { %v12291_v34 = vmul.f32 %v12283_v52, %v23215_v6  ;;  %12682 = vmatpush1.bf16.msra.mxu0 %v18785_v18  ;;  %v18788_v6 = vld [vmem:[%s24517_s20 + $0xd8] ss:$12 sps:$4 sm:$0xff]   ;;  %17910 = vmatpush3.bf16.msra.mxu1 %v18794_v28  ;;  %v18816_v15 = vld [vmem:[%s24517_s20 + $0x170] ss:$12 sps:$4 sm:$0xff]  }
0x1dcc   : > { %v12292_v56 = vmul.f32 %v12284_v22, %v23222_v5  ;;  %12683 = vmatprep.subr.bf16.mxu0 %v18790_v20  ;;  %v18791_v5 = vld [vmem:[%s24517_s20 + $0xf0] ss:$12 sps:$4 sm:$0xff]  }
0x1dcd   : > { %v12327_v43 = vpack.c.bf16 %v12291_v34, %v12289_v19 }
0x1dce   : > { %v12328_v63 = vpack.c.bf16 %v12292_v56, %v12290_v4 }
0x1dcf   : > { %12684 = vmatpush1.bf16.msra.mxu0 %v18788_v6 }
0x1dd0   : > { %12465 = vmatprep.mubr.bf16.mxu1 %v12328_v63  ;;  %12685 = vmatprep.subr.bf16.mxu0 %v18793_v24 }
0x1dd1   : > { %12466 = vmatmul.mubr.bf16.gmra.mrb[32].mxu1 %v12327_v43  ;;  %v16897_v43 = vld [vmem:[%s24518_s7 + $0x1] ss:$0 sm:$0xff] }
0x1dd3   : > { %12686 = vmatpush1.bf16.msra.mxu0 %v18791_v5 }
0x1e9c   : > { %v17463_v8 = vpop.f32.mrb[28].mxu1 }
0x1e9d   : > { %v17464_v53 = vpop.f32.mrb[29].mxu1 }
0x1e9e   : > { %v17465_v30 = vadd.f32 %v17464_v53, %v17463_v8  ;;  %v17466_v26 = vpop.f32.mrb[30].mxu1 }
0x1e9f   : > { %v17467_v42 = vpop.f32.mrb[31].mxu1 }
0x1ea0   : > { %v23271_v10 = vadd.f32 %v17465_v30, %v23032_v11  ;;  %v17468_v41 = vadd.f32 %v17467_v42, %v17466_v26 }
0x1ea2   : > { %v23274_v47 = vadd.f32 %v17468_v41, %v23038_v54  ;;  %v12480_v48 = vmul.f32 %v23271_v10, %v23271_v10 }
0x1ea4   : > { %24532 = vst [vmem:[#allocation8_spill] sm:$0xff] %v23274_v47  ;;  %12484 = vadd.xlane.f32.xlu0 %v12480_v48  ;;  %v17469_v59 = vpop.f32.mrb[32].mxu1  ;;  %v12481_v21 = vmul.f32 %v23274_v47, %v23274_v47 }
0x1ea5   : > { %v17470_v31 = vpop.f32.mrb[33].mxu1 }
0x1ea6   : > { %v17471_v29 = vadd.f32 %v17470_v31, %v17469_v59  ;;  %12486 = vadd.xlane.f32.xlu1 %v12481_v21  ;;  %v17472_v0 = vpop.f32.mrb[34].mxu1 }
0x1ea7   : > { %v17473_v50 = vpop.f32.mrb[35].mxu1 }
0x1ea8   : > { %v23281_v11 = vadd.f32 %v17471_v29, %v23035_v3  ;;  %v17474_v14 = vadd.f32 %v17473_v50, %v17472_v0  ;;  %v18797_v3 = vld [vmem:[%s24517_s20 + $0x10c] ss:$12 sps:$4 sm:$0xff]  }
0x1ea9   : > { %12687 = vmatprep.subr.bf16.mxu0 %v18797_v3 }
0x1eaa   : > { %v23284_v54 = vadd.f32 %v17474_v14, %v23043_v33  ;;  %v12482_v44 = vmul.f32 %v23281_v11, %v23281_v11  ;;  %v18798_v33 = vld [vmem:[%s24517_s20 + $0xe0] ss:$12 sps:$4 sm:$0xff]   ;;  %12688 = vmatpush1.bf16.msra.mxu0 %v18795_v2 }
0x1eab   : > { %17911 = vmatprep.subr.bf16.mxu1 %v18798_v33  ;;  %12689 = vmatprep.subr.bf16.mxu0 %v18801_v55 }
0x1eac   : > { %24533 = vst [vmem:[#allocation9_spill] sm:$0xff] %v23284_v54  ;;  %12488 = vadd.xlane.f32.xlu0 %v12482_v44  ;;  %v12483_v57 = vmul.f32 %v23284_v54, %v23284_v54  ;;  %17912 = vmatpush3.bf16.msra.mxu1 %v18798_v33 }
0x1ead   : > { %17913 = vmatprep.subr.bf16.mxu1 %v18802_v16 }
0x1eae   : > { %12490 = vadd.xlane.f32.xlu1 %v12483_v57  ;;  %12690 = vmatpush1.bf16.msra.mxu0 %v18799_v35 }
0x1eaf   : > { %12691 = vmatprep.subr.bf16.mxu0 %v18805_v25 }
0x1eb0   : > { %17914 = vmatpush3.bf16.msra.mxu1 %v18802_v16 }
0x1eb1   : > { %17915 = vmatprep.subr.bf16.mxu1 %v18806_v39 }
0x1eb2   : > { %12692 = vmatpush1.bf16.msra.mxu0 %v18803_v9 }
0x1eb3   : > { %12693 = vmatprep.subr.bf16.mxu0 %v18809_v40 }
0x1eb4   : > { %17916 = vmatpush3.bf16.msra.mxu1 %v18806_v39 }
0x1eb5   : > { %17917 = vmatprep.subr.bf16.mxu1 %v18810_v7 }
0x1eb6   : > { %12694 = vmatpush1.bf16.msra.mxu0 %v18807_v38 }
0x1eb7   : > { %12695 = vmatprep.subr.bf16.mxu0 %v18813_v37 }
0x1eb8   : > { %17918 = vmatpush3.bf16.msra.mxu1 %v18810_v7 }
0x1eb9   : > { %17919 = vmatprep.subr.bf16.mxu1 %v18814_v60 }
0x1eba   : > { %12696 = vmatpush1.bf16.msra.mxu0 %v18811_v49 }
0x1ebc   : > { %17920 = vmatpush3.bf16.msra.mxu1 %v18814_v60 }
0x1ebd   : > { %17921 = vmatprep.subr.bf16.mxu1 %v18815_v1 }
0x1ec0   : > { %17922 = vmatpush3.bf16.msra.mxu1 %v18815_v1 }
0x1ec1   : > { %17923 = vmatprep.subr.bf16.mxu1 %v18816_v15 }
0x1ec4   : > { %17924 = vmatpush3.bf16.msra.mxu1 %v18816_v15 }
0x1f31   : > { %v12485_v51 = vpop.xlane.xlu0 %12484 }
0x1f32   : > { %v12492_v13 = vmul.f32 0.0078125, %v12485_v51 }
0x1f33   : > { %v12487_v12 = vpop.xlane.xlu1 %12486 }
0x1f34   : > { %v12496_v17 = vadd.f32 1e-06, %v12492_v13  ;;  %v12493_v45 = vmul.f32 0.0078125, %v12487_v12 }
0x1f36   : > { %18985 = vrsqrt.f32 %v12496_v17  ;;  %v12497_v27 = vadd.f32 1e-06, %v12493_v45 }
0x1f38   : > { %18987 = vrsqrt.f32 %v12497_v27 }
0x1f39   : > { %v12489_v32 = vpop.xlane.xlu0 %12488 }
0x1f3a   : > { %v12494_v46 = vmul.f32 0.0078125, %v12489_v32 }
0x1f3b   : > { %v12491_v23 = vpop.xlane.xlu1 %12490 }
0x1f3c   : > { %v12498_v19 = vadd.f32 1e-06, %v12494_v46  ;;  %v12495_v52 = vmul.f32 0.0078125, %v12491_v23 }
0x1f3e   : > { %18989 = vrsqrt.f32 %v12498_v19  ;;  %v12499_v4 = vadd.f32 1e-06, %v12495_v52 }
0x1f40   : > { %v18986_v22 = vpop.eup %18985  ;;  %18991 = vrsqrt.f32 %v12499_v4 }
0x1f41   : > { %v12504_v34 = vmul.f32 %v18986_v22, %v23271_v10 }
0x1f42   : > { %v18988_v56 = vpop.eup %18987 }
0x1f43   : > { %v12505_v63 = vmul.f32 %v18988_v56, %v23274_v47  ;;  %v12514_v18 = vmul.f32 %v16897_v43, %v12504_v34 }
0x1f45   : > { %v12515_v61 = vmul.f32 %v16897_v43, %v12505_v63 }
0x1f47   : > { %v12551_v20 = vpack.c.bf16 %v12515_v61, %v12514_v18 }
0x1f48   : > { %v18990_v28 = vpop.eup %18989 }
0x1f49   : > { %12714 = vmatmul.mubr.bf16.vlgmr.msra.gmra.mrb[36].mxu0 %v12551_v20  ;;  %17925 = vmatprep.mubr.bf16.mxu1 %v12551_v20  ;;  %v12506_v6 = vmul.f32 %v18990_v28, %v23281_v11 }
0x1f4a   : > { %v18992_v24 = vpop.eup %18991  ;;  %12723 = vmatprep.mubr.bf16.mxu0 %v24528_v36 }
0x1f4b   : > { %v12507_v5 = vmul.f32 %v18992_v24, %v23284_v54  ;;  %v12516_v8 = vmul.f32 %v16897_v43, %v12506_v6 }
0x1f4d   : > { %v12517_v53 = vmul.f32 %v16897_v43, %v12507_v5 }
0x1f4f   : > { %v12552_v30 = vpack.c.bf16 %v12517_v53, %v12516_v8 }
0x1f51   : > { %12724 = vmatmul.mubr.bf16.gmra.mrb[40].mxu0 %v12552_v30  ;;  %17926 = vmatmul.mubr.bf16.vlgmr.msra.gmra.mrb[36].mxu1 %v12552_v30 }
0x201c   : > { %v12715_v26 = vpop.f32.mrb[36].mxu0 }
0x201d   : > { %v23349_v42 = vpop.f32.mrb[37].mxu0  ;;  %12804 = vrot.lane.b32.xlu0 %v12715_v26, %s24534_s23 }
0x201e   : > { %v23352_v41 = vpop.f32.mrb[38].mxu0  ;;  %12856 = vrot.lane.b32.xlu1 %v23349_v42, %s24535_s5 }
0x201f   : > { %v23356_v48 = vpop.f32.mrb[39].mxu0 }
0x2021   : > { %12816 = vrot.lane.b32.xlu0 %v12715_v26, %s24535_s5 }
0x2022   : > { %12806 = vrot.lane.b32.xlu1 %v23352_v41, %s24534_s23 }
0x2024   : > { %v23361_v59 = vpop.f32.mrb[40].mxu0  ;;  %v23363_v21 = vpop.f32.mrb[36].mxu1 }
0x2025   : > { %12828 = vrot.lane.b32.xlu0 %v12715_v26, %s24536_s29  ;;  %v23366_v31 = vpop.f32.mrb[41].mxu0  ;;  %v23368_v29 = vpop.f32.mrb[37].mxu1 }
0x2026   : > { %12818 = vrot.lane.b32.xlu1 %v23352_v41, %s24535_s5  ;;  %v23372_v0 = vpop.f32.mrb[42].mxu0  ;;  %v23374_v50 = vpop.f32.mrb[38].mxu1 }
0x2027   : > { %v23376_v14 = vpop.f32.mrb[43].mxu0  ;;  %v23378_v44 = vpop.f32.mrb[39].mxu1 }
0x2029   : > { %12844 = vrot.lane.b32.xlu0 %v23349_v42, %s24534_s23 }
0x202a   : > { %12830 = vrot.lane.b32.xlu1 %v23352_v41, %s24536_s29 }
0x202d   : > { %12868 = vrot.lane.b32.xlu0 %v23349_v42, %s24536_s29 }
0x202e   : > { %12846 = vrot.lane.b32.xlu1 %v23356_v48, %s24534_s23 }
0x2031   : > { %12808 = vrot.lane.b32.xlu0 %v23361_v59, %s24534_s23 }
0x2032   : > { %12858 = vrot.lane.b32.xlu1 %v23356_v48, %s24535_s5 }
0x2035   : > { %12848 = vrot.lane.b32.xlu0 %v23366_v31, %s24534_s23 }
0x2036   : > { %12870 = vrot.lane.b32.xlu1 %v23356_v48, %s24536_s29 }
0x2039   : > { %12860 = vrot.lane.b32.xlu0 %v23366_v31, %s24535_s5 }
0x203a   : > { %12810 = vrot.lane.b32.xlu1 %v23372_v0, %s24534_s23 }
0x203d   : > { %12872 = vrot.lane.b32.xlu0 %v23366_v31, %s24536_s29 }
0x203e   : > { %12850 = vrot.lane.b32.xlu1 %v23376_v14, %s24534_s23 }
0x2041   : > { %12820 = vrot.lane.b32.xlu0 %v23361_v59, %s24535_s5 }
0x2042   : > { %12862 = vrot.lane.b32.xlu1 %v23376_v14, %s24535_s5 }
0x2045   : > { %12832 = vrot.lane.b32.xlu0 %v23361_v59, %s24536_s29 }
0x2046   : > { %12874 = vrot.lane.b32.xlu1 %v23376_v14, %s24536_s29 }
0x2049   : > { %12884 = vrot.lane.b32.xlu0 %v23368_v29, %s24534_s23 }
0x204a   : > { %12822 = vrot.lane.b32.xlu1 %v23372_v0, %s24535_s5 }
0x204d   : > { %12908 = vrot.lane.b32.xlu0 %v23368_v29, %s24536_s29 }
0x204e   : > { %12834 = vrot.lane.b32.xlu1 %v23372_v0, %s24536_s29 }
0x2051   : > { %12888 = vrot.lane.b32.xlu0 %v23363_v21, %s24534_s23 }
0x2052   : > { %12896 = vrot.lane.b32.xlu1 %v23368_v29, %s24535_s5 }
0x2056   : > { %12890 = vrot.lane.b32.xlu1 %v23374_v50, %s24534_s23 }
0x205a   : > { %12886 = vrot.lane.b32.xlu1 %v23378_v44, %s24534_s23 }
0x205e   : > { %12898 = vrot.lane.b32.xlu1 %v23378_v44, %s24535_s5 }
0x2062   : > { %12910 = vrot.lane.b32.xlu1 %v23378_v44, %s24536_s29 }
0x208f   : > { %v12805_v57 = vpop.permute.xlu0 %12804 }
0x2090   : > { %v12857_v2 = vpop.permute.xlu1 %12856 }
0x2091   : > { %v12952_v40 = vcombine.low %v23349_v42, %v12857_v2  ;;  %v12953_v7 = vcombine.high %v23349_v42, %v12857_v2 }
0x2093   : > { %v12817_v3 = vpop.permute.xlu0 %12816  ;;  %v12960_v32 = vrot.slane %v12952_v40, %v22239_v58  ;;  %v12967_v46 = vrot.slane %v12953_v7, %v22239_v58 }
0x2094   : > { %v12807_v33 = vpop.permute.xlu1 %12806  ;;  %v12920_v55 = vcombine.low %v12715_v26, %v12817_v3  ;;  %v12921_v16 = vcombine.high %v12715_v26, %v12817_v3 }
0x2096   : > { %v12928_v38 = vrot.slane %v12920_v55, %v22239_v58  ;;  %v12935_v37 = vrot.slane %v12921_v16, %v22239_v58 }
0x2097   : > { %v12829_v35 = vpop.permute.xlu0 %12828 }
0x2098   : > { %v12936_v25 = vcombine.low %v12805_v57, %v12829_v35  ;;  %v12937_v39 = vcombine.high %v12805_v57, %v12829_v35  ;;  %v12819_v9 = vpop.permute.xlu1 %12818 }
0x2099   : > { %v13124_v1 = vcombine.low %v23352_v41, %v12819_v9  ;;  %v13125_v15 = vcombine.high %v23352_v41, %v12819_v9 }
0x209a   : > { %v12944_v60 = vrot.slane %v12936_v25, %v22239_v58  ;;  %v12951_v49 = vrot.slane %v12937_v39, %v22239_v58 }
0x209b   : > { %v12845_v51 = vpop.permute.xlu0 %12844  ;;  %v13132_v56 = vrot.slane %v13124_v1, %v22239_v58  ;;  %v13139_v43 = vrot.slane %v13125_v15, %v22239_v58 }
0x209c   : > { %v12984_v13 = vcombine.low %v12928_v38, %v12944_v60  ;;  %v12985_v12 = vcombine.high %v12928_v38, %v12944_v60  ;;  %v13000_v17 = vcombine.low %v12935_v37, %v12951_v49  ;;  %v13001_v45 = vcombine.high %v12935_v37, %v12951_v49  ;;  %v12831_v27 = vpop.permute.xlu1 %12830 }
0x209d   : > { %v13140_v23 = vcombine.low %v12807_v33, %v12831_v27  ;;  %v13141_v19 = vcombine.high %v12807_v33, %v12831_v27 }
0x209e   : > { %v12992_v52 = vrot.slane %v12984_v13, %v22243_v62  ;;  %v12999_v4 = vrot.slane %v12985_v12, %v22243_v62  ;;  %v13008_v22 = vrot.slane %v13000_v17, %v22243_v62  ;;  %v13015_v34 = vrot.slane %v13001_v45, %v22243_v62 }
0x209f   : > { %v13148_v63 = vrot.slane %v13140_v23, %v22239_v58  ;;  %v13155_v18 = vrot.slane %v13141_v19, %v22239_v58  ;;  %v12869_v61 = vpop.permute.xlu0 %12868 }
0x20a0   : > { %v16970_v20 = vcombine.low %v12992_v52, %v12999_v4  ;;  %v16972_v28 = vcombine.high %v12992_v52, %v12999_v4  ;;  %v16974_v6 = vcombine.low %v13008_v22, %v13015_v34  ;;  %v16976_v24 = vcombine.high %v13008_v22, %v13015_v34  ;;  %v12847_v5 = vpop.permute.xlu1 %12846 }
0x20a1   : > { %v13188_v8 = vcombine.low %v13132_v56, %v13148_v63  ;;  %v13189_v53 = vcombine.high %v13132_v56, %v13148_v63  ;;  %v13204_v30 = vcombine.low %v13139_v43, %v13155_v18  ;;  %v13205_v26 = vcombine.high %v13139_v43, %v13155_v18 }
0x20a2   : > { %v23451_v42 = vrot.slane %v16970_v20, %v22239_v58  ;;  %v23454_v41 = vrot.slane %v16972_v28, %v22239_v58  ;;  %v23457_v57 = vrot.slane %v16974_v6, %v22239_v58  ;;  %v23460_v2 = vrot.slane %v16976_v24, %v22239_v58 }
0x20a3   : > { %v13196_v3 = vrot.slane %v13188_v8, %v22243_v62  ;;  %v13203_v33 = vrot.slane %v13189_v53, %v22243_v62  ;;  %v13212_v55 = vrot.slane %v13204_v30, %v22243_v62  ;;  %v13219_v16 = vrot.slane %v13205_v26, %v22243_v62  ;;  %v23466_v35 = vpop.permute.xlu0 %12808 }
0x20a4   : > { %v12968_v25 = vcombine.low %v12845_v51, %v12869_v61  ;;  %v12969_v39 = vcombine.high %v12845_v51, %v12869_v61  ;;  %v12859_v9 = vpop.permute.xlu1 %12858  ;;  %v13800_v40 = vcombine.low %v23451_v42, %v23454_v41  ;;  %v13832_v7 = vcombine.low %v23457_v57, %v23460_v2 }
0x20a5   : > { %v16978_v38 = vcombine.low %v13196_v3, %v13203_v33  ;;  %v16980_v37 = vcombine.high %v13196_v3, %v13203_v33  ;;  %v16982_v60 = vcombine.low %v13212_v55, %v13219_v16  ;;  %v16984_v49 = vcombine.high %v13212_v55, %v13219_v16 }
0x20a6   : > { %v12976_v1 = vrot.slane %v12968_v25, %v22239_v58  ;;  %v12983_v15 = vrot.slane %v12969_v39, %v22239_v58  ;;  %v13156_v13 = vcombine.low %v23356_v48, %v12859_v9  ;;  %v13157_v12 = vcombine.high %v23356_v48, %v12859_v9 }
0x20a7   : > { %v23477_v51 = vrot.slane %v16978_v38, %v22239_v58  ;;  %v23480_v17 = vrot.slane %v16980_v37, %v22239_v58  ;;  %v23483_v45 = vrot.slane %v16982_v60, %v22239_v58  ;;  %v23486_v27 = vrot.slane %v16984_v49, %v22239_v58  ;;  %v12849_v23 = vpop.permute.xlu0 %12848 }
0x20a8   : > { %v13016_v19 = vcombine.low %v12960_v32, %v12976_v1  ;;  %v13017_v52 = vcombine.high %v12960_v32, %v12976_v1  ;;  %v13032_v4 = vcombine.low %v12967_v46, %v12983_v15  ;;  %v13033_v22 = vcombine.high %v12967_v46, %v12983_v15  ;;  %v12871_v34 = vpop.permute.xlu1 %12870 }
0x20a9   : > { %v13164_v48 = vrot.slane %v13156_v13, %v22239_v58  ;;  %v13171_v56 = vrot.slane %v13157_v12, %v22239_v58  ;;  %v13172_v43 = vcombine.low %v12847_v5, %v12871_v34  ;;  %v13173_v63 = vcombine.high %v12847_v5, %v12871_v34 }
0x20aa   : > { %v13024_v18 = vrot.slane %v13016_v19, %v22243_v62  ;;  %v13031_v61 = vrot.slane %v13017_v52, %v22243_v62  ;;  %v13040_v20 = vrot.slane %v13032_v4, %v22243_v62  ;;  %v13047_v28 = vrot.slane %v13033_v22, %v22243_v62 }
0x20ab   : > { %v13180_v6 = vrot.slane %v13172_v43, %v22239_v58  ;;  %v13187_v32 = vrot.slane %v13173_v63, %v22239_v58  ;;  %v12861_v46 = vpop.permute.xlu0 %12860  ;;  %v23497_v24 = vrot.slane %v13800_v40, %v22243_v62  ;;  %v23500_v8 = vrot.slane %v13832_v7, %v22243_v62 }
0x20ac   : > { %v16971_v5 = vcombine.low %v13024_v18, %v13031_v61  ;;  %v16973_v53 = vcombine.high %v13024_v18, %v13031_v61  ;;  %v16975_v30 = vcombine.low %v13040_v20, %v13047_v28  ;;  %v16977_v26 = vcombine.high %v13040_v20, %v13047_v28  ;;  %v23502_v3 = vpop.permute.xlu1 %12810 }
0x20ad   : > { %v13220_v33 = vcombine.low %v13164_v48, %v13180_v6  ;;  %v13221_v55 = vcombine.high %v13164_v48, %v13180_v6  ;;  %v13236_v16 = vcombine.low %v13171_v56, %v13187_v32  ;;  %v13237_v25 = vcombine.high %v13171_v56, %v13187_v32 }
0x20ae   : > { %v23505_v39 = vrot.slane %v16971_v5, %v22239_v58  ;;  %v23508_v9 = vrot.slane %v16973_v53, %v22239_v58  ;;  %v23511_v40 = vrot.slane %v16975_v30, %v22239_v58  ;;  %v23514_v7 = vrot.slane %v16977_v26, %v22239_v58 }
0x20af   : > { %v13228_v38 = vrot.slane %v13220_v33, %v22243_v62  ;;  %v13235_v37 = vrot.slane %v13221_v55, %v22243_v62  ;;  %v13244_v60 = vrot.slane %v13236_v16, %v22243_v62  ;;  %v13251_v49 = vrot.slane %v13237_v25, %v22243_v62  ;;  %v12873_v1 = vpop.permute.xlu0 %12872 }
0x20b0   : > { %v13360_v15 = vcombine.low %v23366_v31, %v12861_v46  ;;  %v13361_v13 = vcombine.high %v23366_v31, %v12861_v46  ;;  %v13376_v12 = vcombine.low %v12849_v23, %v12873_v1  ;;  %v13377_v19 = vcombine.high %v12849_v23, %v12873_v1  ;;  %v23522_v52 = vpop.permute.xlu1 %12850 }
0x20b1   : > { %v16979_v4 = vcombine.low %v13228_v38, %v13235_v37  ;;  %v16981_v22 = vcombine.high %v13228_v38, %v13235_v37  ;;  %v16983_v34 = vcombine.low %v13244_v60, %v13251_v49  ;;  %v16985_v48 = vcombine.high %v13244_v60, %v13251_v49 }
0x20b2   : > { %v13368_v56 = vrot.slane %v13360_v15, %v22239_v58  ;;  %v13375_v43 = vrot.slane %v13361_v13, %v22239_v58  ;;  %v13384_v63 = vrot.slane %v13376_v12, %v22239_v58  ;;  %v13391_v18 = vrot.slane %v13377_v19, %v22239_v58 }
0x20b3   : > { %v23529_v61 = vrot.slane %v16979_v4, %v22239_v58  ;;  %v23532_v31 = vrot.slane %v16981_v22, %v22239_v58  ;;  %v23535_v23 = vrot.slane %v16983_v34, %v22239_v58  ;;  %v23538_v20 = vrot.slane %v16985_v48, %v22239_v58  ;;  %v12821_v28 = vpop.permute.xlu0 %12820 }
0x20b4   : > { %v13424_v6 = vcombine.low %v13368_v56, %v13384_v63  ;;  %v13425_v32 = vcombine.high %v13368_v56, %v13384_v63  ;;  %v13440_v46 = vcombine.low %v13375_v43, %v13391_v18  ;;  %v13441_v5 = vcombine.high %v13375_v43, %v13391_v18  ;;  %v12863_v53 = vpop.permute.xlu1 %12862 }
0x20b5   : > { %v13864_v30 = vcombine.low %v23497_v24, %v23500_v8  ;;  %v13936_v26 = vcombine.low %v23477_v51, %v23480_v17  ;;  %v13968_v33 = vcombine.low %v23483_v45, %v23486_v27  ;;  %v13865_v55 = vcombine.high %v23497_v24, %v23500_v8 }
0x20b6   : > { %v13432_v16 = vrot.slane %v13424_v6, %v22243_v62  ;;  %v13439_v25 = vrot.slane %v13425_v32, %v22243_v62  ;;  %v13448_v38 = vrot.slane %v13440_v46, %v22243_v62  ;;  %v13455_v37 = vrot.slane %v13441_v5, %v22243_v62 }
0x20b7   : > { %v13944_v60 = vrot.slane %v13936_v26, %v22243_v62  ;;  %v13976_v49 = vrot.slane %v13968_v33, %v22243_v62  ;;  %v13328_v1 = vcombine.low %v23361_v59, %v12821_v28  ;;  %v13329_v15 = vcombine.high %v23361_v59, %v12821_v28  ;;  %v12833_v56 = vpop.permute.xlu0 %12832 }
0x20b8   : > { %v16987_v13 = vcombine.low %v13432_v16, %v13439_v25  ;;  %v16989_v12 = vcombine.high %v13432_v16, %v13439_v25  ;;  %v16991_v19 = vcombine.low %v13448_v38, %v13455_v37  ;;  %v16993_v24 = vcombine.high %v13448_v38, %v13455_v37  ;;  %v12875_v8 = vpop.permute.xlu1 %12874 }
0x20b9   : > { %v14000_v4 = vcombine.low %v13944_v60, %v13976_v49  ;;  %v14001_v22 = vcombine.high %v13944_v60, %v13976_v49  ;;  %v13336_v34 = vrot.slane %v13328_v1, %v22239_v58  ;;  %v13343_v48 = vrot.slane %v13329_v15, %v22239_v58 }
0x20ba   : > { %v23559_v43 = vrot.slane %v16987_v13, %v22239_v58  ;;  %v23562_v63 = vrot.slane %v16989_v12, %v22239_v58  ;;  %v23565_v59 = vrot.slane %v16991_v19, %v22239_v58  ;;  %v23568_v18 = vrot.slane %v16993_v24, %v22239_v58 }
0x20bb   : > { %v14552_v28 = vpack.c.bf16 %v14000_v4, %v13864_v30  ;;  %v14554_v6 = vpack.c.bf16 %v14001_v22, %v13865_v55  ;;  %v13564_v32 = vcombine.low %v23376_v14, %v12863_v53  ;;  %v13565_v46 = vcombine.high %v23376_v14, %v12863_v53 }
0x20bc   : > { %v13344_v5 = vcombine.low %v23466_v35, %v12833_v56  ;;  %v13345_v26 = vcombine.high %v23466_v35, %v12833_v56  ;;  %v13580_v33 = vcombine.low %v23522_v52, %v12875_v8  ;;  %v13581_v16 = vcombine.high %v23522_v52, %v12875_v8  ;;  %v12823_v25 = vpop.permute.xlu1 %12822 }
0x20bd   : > { %17933 = vmatprep.mubr.msk.bf16.mxu0 %vm10933_vm1, %v14552_v28  ;;  %17941 = vmatprep.mubr.msk.bf16.mxu1 %vm10933_vm1, %v14554_v6  ;;  %v13572_v30 = vrot.slane %v13564_v32, %v22239_v58  ;;  %v13579_v55 = vrot.slane %v13565_v46, %v22239_v58  ;;  %v13532_v38 = vcombine.low %v23372_v0, %v12823_v25 }
0x20be   : > { %v13352_v14 = vrot.slane %v13344_v5, %v22239_v58  ;;  %v13359_v53 = vrot.slane %v13345_v26, %v22239_v58  ;;  %v13588_v35 = vrot.slane %v13580_v33, %v22239_v58  ;;  %v13595_v37 = vrot.slane %v13581_v16, %v22239_v58  ;;  %v12885_v26 = vpop.permute.xlu0 %12884 }
0x20bf   : > { %v13533_v52 = vcombine.high %v23372_v0, %v12823_v25  ;;  %v23587_v60 = vrot.slane %v13532_v38, %v22239_v58  ;;  %v13816_v49 = vcombine.low %v23505_v39, %v23508_v9  ;;  %v13848_v1 = vcombine.low %v23511_v40, %v23514_v7 }
0x20c0   : > { %v13392_v15 = vcombine.low %v13336_v34, %v13352_v14  ;;  %v13393_v13 = vcombine.high %v13336_v34, %v13352_v14  ;;  %v13408_v12 = vcombine.low %v13343_v48, %v13359_v53  ;;  %v13409_v19 = vcombine.high %v13343_v48, %v13359_v53  ;;  %v12835_v32 = vpop.permute.xlu1 %12834 }
0x20c1   : > { %v13628_v24 = vcombine.low %v13572_v30, %v13588_v35  ;;  %v13629_v8 = vcombine.high %v13572_v30, %v13588_v35  ;;  %v13644_v4 = vcombine.low %v13579_v55, %v13595_v37  ;;  %v13645_v22 = vcombine.high %v13579_v55, %v13595_v37 }
0x20c2   : > { %v13400_v56 = vrot.slane %v13392_v15, %v22243_v62  ;;  %v13407_v0 = vrot.slane %v13393_v13, %v22243_v62  ;;  %v13416_v28 = vrot.slane %v13408_v12, %v22243_v62  ;;  %v13423_v6 = vrot.slane %v13409_v19, %v22243_v62 }
0x20c3   : > { %v13636_v46 = vrot.slane %v13628_v24, %v22243_v62  ;;  %v13643_v5 = vrot.slane %v13629_v8, %v22243_v62  ;;  %v13652_v34 = vrot.slane %v13644_v4, %v22243_v62  ;;  %v13659_v48 = vrot.slane %v13645_v22, %v22243_v62 }
0x20c4   : > { %v16986_v33 = vcombine.low %v13400_v56, %v13407_v0  ;;  %v16988_v16 = vcombine.high %v13400_v56, %v13407_v0  ;;  %v16990_v25 = vcombine.low %v13416_v28, %v13423_v6  ;;  %v16992_v30 = vcombine.high %v13416_v28, %v13423_v6  ;;  %v12897_v28 = vpop.permute.xlu1 %12896 }
0x20c5   : > { %v16995_v55 = vcombine.low %v13636_v46, %v13643_v5  ;;  %v16997_v38 = vcombine.high %v13636_v46, %v13643_v5  ;;  %v16999_v14 = vcombine.low %v13652_v34, %v13659_v48  ;;  %v17001_v53 = vcombine.high %v13652_v34, %v13659_v48  ;;  %v12909_v48 = vpop.permute.xlu0 %12908 }
0x20c6   : > { %v14016_v35 = vrot.slane %v16986_v33, %v22239_v58  ;;  %v14032_v37 = vrot.slane %v16988_v16, %v22239_v58  ;;  %v14048_v15 = vrot.slane %v16990_v25, %v22239_v58  ;;  %v14064_v13 = vrot.slane %v16992_v30, %v22239_v58 }
0x20c7   : > { %v23606_v12 = vrot.slane %v16995_v55, %v22239_v58  ;;  %v23609_v19 = vrot.slane %v16997_v38, %v22239_v58  ;;  %v23612_v24 = vrot.slane %v16999_v14, %v22239_v58  ;;  %v23615_v8 = vrot.slane %v17001_v53, %v22239_v58 }
0x20c8   : > { %v14072_v4 = vcombine.low %v14016_v35, %v14032_v37  ;;  %v14073_v22 = vcombine.high %v14016_v35, %v14032_v37  ;;  %v14104_v56 = vcombine.low %v14048_v15, %v14064_v13  ;;  %v14105_v0 = vcombine.high %v14048_v15, %v14064_v13 }
0x20c9   : > { %v13547_v6 = vrot.slane %v13533_v52, %v22239_v58  ;;  %v13824_v46 = vrot.slane %v13816_v49, %v22243_v62  ;;  %v13856_v5 = vrot.slane %v13848_v1, %v22243_v62  ;;  %v13952_v34 = vcombine.low %v23529_v61, %v23532_v31 }
0x20ca   : > { %v23623_v33 = vrot.slane %v14072_v4, %v22243_v62  ;;  %v23626_v16 = vrot.slane %v14073_v22, %v22243_v62  ;;  %v23629_v25 = vrot.slane %v14104_v56, %v22243_v62  ;;  %v23632_v30 = vrot.slane %v14105_v0, %v22243_v62 }
0x20cb   : > { %v13868_v52 = vcombine.low %v13824_v46, %v13856_v5  ;;  %v13960_v49 = vrot.slane %v13952_v34, %v22243_v62  ;;  %v13984_v1 = vcombine.low %v23535_v23, %v23538_v20  ;;  %v13869_v55 = vcombine.high %v13824_v46, %v13856_v5  ;;  %v23647_v46 = vpop.permute.xlu1 %12890 }
0x20cc   : > { %v13072_v14 = vcombine.low %v12885_v26, %v12909_v48  ;;  %v13073_v53 = vcombine.high %v12885_v26, %v12909_v48  ;;  %v13548_v35 = vcombine.low %v23502_v3, %v12835_v32  ;;  %v13549_v15 = vcombine.high %v23502_v3, %v12835_v32 }
0x20cd   : > { %v13992_v37 = vrot.slane %v13984_v1, %v22243_v62  ;;  %v13056_v13 = vcombine.low %v23368_v29, %v12897_v28  ;;  %v13057_v4 = vcombine.high %v23368_v29, %v12897_v28  ;;  %v14088_v26 = vcombine.low %v23559_v43, %v23562_v63 }
0x20ce   : > { %v13080_v22 = vrot.slane %v13072_v14, %v22239_v58  ;;  %v13087_v56 = vrot.slane %v13073_v53, %v22239_v58  ;;  %v13556_v0 = vrot.slane %v13548_v35, %v22239_v58  ;;  %v13563_v48 = vrot.slane %v13549_v15, %v22239_v58 }
0x20cf   : > { %v14004_v5 = vcombine.low %v13960_v49, %v13992_v37  ;;  %v14005_v34 = vcombine.high %v13960_v49, %v13992_v37  ;;  %v13064_v3 = vrot.slane %v13056_v13, %v22239_v58  ;;  %v13071_v28 = vrot.slane %v13057_v4, %v22239_v58 }
0x20d0   : > { %v13596_v32 = vcombine.low %v23587_v60, %v13556_v0  ;;  %v13597_v29 = vcombine.high %v23587_v60, %v13556_v0  ;;  %v23657_v1 = vrot.slane %v14088_v26, %v22243_v62  ;;  %v13612_v35 = vcombine.low %v13547_v6, %v13563_v48  ;;  %v23668_v26 = vpop.permute.xlu1 %12886 }
0x20d1   : > { %v14560_v14 = vpack.c.bf16 %v14004_v5, %v13868_v52  ;;  %v14562_v53 = vpack.c.bf16 %v14005_v34, %v13869_v55  ;;  %v13613_v38 = vcombine.high %v13547_v6, %v13563_v48  ;;  %v13088_v37 = vcombine.low %v13064_v3, %v13080_v22 }
0x20d2   : > { %v13604_v54 = vrot.slane %v13596_v32, %v22243_v62  ;;  %v13611_v49 = vrot.slane %v13597_v29, %v22243_v62  ;;  %v13089_v15 = vcombine.high %v13064_v3, %v13080_v22  ;;  %v13620_v4 = vrot.slane %v13612_v35, %v22243_v62 }
0x20d3   : > { %18097 = vmatprep.subr.msk.bf16.mxu0 %vm10933_vm1, %v14560_v14  ;;  %18099 = vmatprep.subr.msk.bf16.mxu1 %vm10933_vm1, %v14562_v53  ;;  %v14583_v60 = vsel %vm10933_vm1, %v14560_v14, 0  ;;  %v14644_v13 = vsel %vm10933_vm1, %v14562_v53, 0  ;;  %v13627_v52 = vrot.slane %v13613_v38, %v22243_v62  ;;  %v13096_v0 = vrot.slane %v13088_v37, %v22243_v62 }
0x20d4   : > { %17930 = vmatpush3.bf16.xpose.msra.mxu0 %v14583_v60  ;;  %17938 = vmatpush3.bf16.xpose.msra.mxu1 %v14644_v13  ;;  %v16994_v6 = vcombine.low %v13604_v54, %v13611_v49  ;;  %v16996_v55 = vcombine.high %v13604_v54, %v13611_v49  ;;  %v13103_v34 = vrot.slane %v13089_v15, %v22243_v62 }
0x20d5   : > { %v16998_v22 = vcombine.low %v13620_v4, %v13627_v52  ;;  %v17000_v5 = vcombine.high %v13620_v4, %v13627_v52  ;;  %v13104_v48 = vcombine.low %v13071_v28, %v13087_v56  ;;  %v13105_v29 = vcombine.high %v13071_v28, %v13087_v56 }
0x20d6   : > { %v14152_v3 = vrot.slane %v16994_v6, %v22239_v58  ;;  %v14168_v32 = vrot.slane %v16996_v55, %v22239_v58  ;;  %v14120_v38 = vcombine.low %v23565_v59, %v23568_v18  ;;  %v14280_v35 = vcombine.low %v13096_v0, %v13103_v34 }
0x20d7   : > { %v14184_v14 = vrot.slane %v16998_v22, %v22239_v58  ;;  %v14200_v54 = vrot.slane %v17000_v5, %v22239_v58  ;;  %v13112_v53 = vrot.slane %v13104_v48, %v22243_v62  ;;  %v13119_v15 = vrot.slane %v13105_v29, %v22243_v62  ;;  %v12899_v5 = vpop.permute.xlu1 %12898 }
0x20d8   : > { %v14208_v49 = vcombine.low %v14152_v3, %v14168_v32  ;;  %v14209_v37 = vcombine.high %v14152_v3, %v14168_v32  ;;  %v17002_v60 = vcombine.high %v13096_v0, %v13103_v34  ;;  %v23680_v52 = vrot.slane %v14280_v35, %v22239_v58 }
0x20d9   : > { %v14240_v13 = vcombine.low %v14184_v14, %v14200_v54  ;;  %v14241_v4 = vcombine.high %v14184_v14, %v14200_v54  ;;  %v14128_v56 = vrot.slane %v14120_v38, %v22243_v62  ;;  %v14296_v22 = vcombine.low %v13112_v53, %v13119_v15 }
0x20da   : > { %v23684_v28 = vrot.slane %v14208_v49, %v22243_v62  ;;  %v23687_v6 = vrot.slane %v14209_v37, %v22243_v62  ;;  %v23690_v55 = vrot.slane %v17002_v60, %v22239_v58  ;;  %v17003_v48 = vcombine.high %v13112_v53, %v13119_v15 }
0x20db   : > { %v14248_v0 = vrot.slane %v14240_v13, %v22243_v62  ;;  %v23694_v34 = vrot.slane %v14241_v4, %v22243_v62  ;;  %v14140_v3 = vcombine.low %v23657_v1, %v14128_v56  ;;  %v23698_v32 = vrot.slane %v14296_v22, %v22239_v58 }
0x20dc   : > { %v14224_v29 = vcombine.low %v23606_v12, %v23609_v19  ;;  %v14256_v38 = vcombine.low %v23612_v24, %v23615_v8  ;;  %v14141_v14 = vcombine.high %v23657_v1, %v14128_v56  ;;  %v23707_v35 = vrot.slane %v17003_v48, %v22239_v58  ;;  %v12911_v48 = vpop.permute.xlu1 %12910 }
0x20dd   : > { %v14272_v54 = vcombine.low %v23684_v28, %v14248_v0  ;;  %v13817_v53 = vcombine.high %v23505_v39, %v23508_v9  ;;  %v13849_v49 = vcombine.high %v23511_v40, %v23514_v7  ;;  %v13953_v60 = vcombine.high %v23529_v61, %v23532_v31 }
0x20de   : > { %v14232_v37 = vrot.slane %v14224_v29, %v22243_v62  ;;  %v14264_v15 = vrot.slane %v14256_v38, %v22243_v62  ;;  %v13985_v1 = vcombine.high %v23535_v23, %v23538_v20  ;;  %v13260_v56 = vcombine.low %v23378_v44, %v12899_v5 }
0x20df   : > { %v13831_v13 = vrot.slane %v13817_v53, %v22243_v62  ;;  %v13863_v4 = vrot.slane %v13849_v49, %v22243_v62  ;;  %v13261_v39 = vcombine.high %v23378_v44, %v12899_v5  ;;  %v13967_v7 = vrot.slane %v13953_v60, %v22243_v62 }
0x20e0   : > { %v14276_v9 = vcombine.low %v14232_v37, %v14264_v15  ;;  %v14277_v40 = vcombine.high %v14232_v37, %v14264_v15  ;;  %v13999_v22 = vrot.slane %v13985_v1, %v22243_v62  ;;  %v13268_v31 = vrot.slane %v13260_v56, %v22239_v58 }
0x20e1   : > { %v13870_v29 = vcombine.low %v13831_v13, %v13863_v4  ;;  %v13871_v61 = vcombine.high %v13831_v13, %v13863_v4  ;;  %v13275_v23 = vrot.slane %v13261_v39, %v22239_v58  ;;  %v13276_v47 = vcombine.low %v23668_v26, %v12911_v48 }
0x20e2   : > { %v14561_v20 = vpack.c.bf16 %v14276_v9, %v14140_v3  ;;  %v14563_v38 = vpack.c.bf16 %v14277_v40, %v14141_v14  ;;  %v14006_v53 = vcombine.low %v13967_v7, %v13999_v22  ;;  %v14007_v49 = vcombine.high %v13967_v7, %v13999_v22 }
0x20e3   : > { %v13277_v44 = vcombine.high %v23668_v26, %v12911_v48  ;;  %v24537_v5 = vcombine.low %v23623_v33, %v23629_v25  ;;  %v14137_v15 = vcombine.high %v23623_v33, %v23629_v25  ;;  %v13284_v26 = vrot.slane %v13276_v47, %v22239_v58 }
0x20e4   : > { %18098 = vmatprep.subr.msk.bf16.mxu0 %vm10933_vm1, %v14561_v20  ;;  %18100 = vmatprep.subr.msk.bf16.mxu1 %vm10933_vm1, %v14563_v38  ;;  %v14586_v3 = vsel %vm10933_vm1, %v14561_v20, 0  ;;  %v14647_v14 = vsel %vm10933_vm1, %v14563_v38, 0  ;;  %v14564_v60 = vpack.c.bf16 %v14006_v53, %v13870_v29  ;;  %v14566_v1 = vpack.c.bf16 %v14007_v49, %v13871_v61 }
0x20e5   : > { %v14553_v37 = vpack.c.bf16 %v14272_v54, %v24537_v5  ;;  %17932 = vmatpush3.bf16.xpose.msra.mxu0 %v14586_v3  ;;  %17940 = vmatpush3.bf16.xpose.msra.mxu1 %v14647_v14  ;;  %v13291_v13 = vrot.slane %v13277_v44, %v22239_v58  ;;  %v14273_v54 = vcombine.high %v23684_v28, %v14248_v0 }
0x20e6   : > { %18101 = vmatprep.subr.msk.bf16.mxu0 %vm10933_vm1, %v14564_v60  ;;  %18103 = vmatprep.subr.msk.bf16.mxu1 %vm10933_vm1, %v14566_v1  ;;  %v13801_v33 = vcombine.high %v23451_v42, %v23454_v41  ;;  %v13833_v25 = vcombine.high %v23457_v57, %v23460_v2  ;;  %v13937_v4 = vcombine.high %v23477_v51, %v23480_v17  ;;  %v14705_v28 = vsel %vm10933_vm1, %v14564_v60, 0 }
0x20e7   : > { %v13292_v56 = vcombine.low %v13268_v31, %v13284_v26  ;;  %v13293_v39 = vcombine.high %v13268_v31, %v13284_v26  ;;  %v13308_v47 = vcombine.low %v13275_v23, %v13291_v13  ;;  %v13309_v9 = vcombine.high %v13275_v23, %v13291_v13 }
0x20e8   : > { %v14555_v40 = vpack.c.bf16 %v14273_v54, %v14137_v15  ;;  %v13815_v0 = vrot.slane %v13801_v33, %v22243_v62  ;;  %v13847_v7 = vrot.slane %v13833_v25, %v22243_v62  ;;  %v13951_v51 = vrot.slane %v13937_v4, %v22243_v62 }
0x20e9   : > { %v13300_v22 = vrot.slane %v13292_v56, %v22243_v62  ;;  %v13307_v42 = vrot.slane %v13293_v39, %v22243_v62  ;;  %v13316_v41 = vrot.slane %v13308_v47, %v22243_v62  ;;  %v13323_v57 = vrot.slane %v13309_v9, %v22243_v62 }
0x20ea   : > { %v13866_v2 = vcombine.low %v13815_v0, %v13847_v7  ;;  %v13969_v17 = vcombine.high %v23483_v45, %v23486_v27  ;;  %v13867_v48 = vcombine.high %v13815_v0, %v13847_v7  ;;  %v14766_v38 = vsel %vm10933_vm1, %v14566_v1, 0 }
0x20eb   : > { %v14348_v29 = vcombine.low %v13300_v22, %v13307_v42  ;;  %v17004_v61 = vcombine.high %v13300_v22, %v13307_v42  ;;  %v14364_v31 = vcombine.low %v13316_v41, %v13323_v57  ;;  %v17005_v23 = vcombine.high %v13316_v41, %v13323_v57 }
0x20ec   : > { %17934 = vmatmul.mubr.msk.bf16.vlgmr.msra.gmra.mrb[44].mxu0 %vm10933_vm1, %v14553_v37  ;;  %17942 = vmatmul.mubr.msk.bf16.vlgmr.msra.gmra.mrb[40].mxu1 %vm10933_vm1, %v14555_v40  ;;  %v13983_v20 = vrot.slane %v13969_v17, %v22243_v62  ;;  %v14089_v53 = vcombine.high %v23559_v43, %v23562_v63  ;;  %v14121_v49 = vcombine.high %v23565_v59, %v23568_v18 }
0x20ed   : > { %v14355_v45 = vrot.slane %v14348_v29, %v22239_v58  ;;  %v14363_v27 = vrot.slane %v17004_v61, %v22239_v58  ;;  %v14371_v44 = vrot.slane %v14364_v31, %v22239_v58  ;;  %v14379_v5 = vrot.slane %v17005_v23, %v22239_v58  ;;  %17946 = vmatpush3.bf16.xpose.msra.mxu0 %v14705_v28 }
0x20ee   : > { %v14002_v37 = vcombine.low %v13951_v51, %v13983_v20  ;;  %17954 = vmatpush3.bf16.xpose.msra.mxu1 %v14766_v38  ;;  %v14003_v15 = vcombine.high %v13951_v51, %v13983_v20  ;;  %v14103_v3 = vrot.slane %v14089_v53, %v22243_v62  ;;  %v14135_v14 = vrot.slane %v14121_v49, %v22243_v62 }
0x20ef   : > { %v14225_v43 = vcombine.high %v23606_v12, %v23609_v19  ;;  %v14257_v63 = vcombine.high %v23612_v24, %v23615_v8  ;;  %v14138_v59 = vcombine.low %v23626_v16, %v23632_v30  ;;  %v14274_v18 = vcombine.low %v23687_v6, %v23694_v34 }
0x20f0   : > { %v14556_v60 = vpack.c.bf16 %v14002_v37, %v13866_v2  ;;  %v14558_v1 = vpack.c.bf16 %v14003_v15, %v13867_v48  ;;  %v14142_v26 = vcombine.low %v14103_v3, %v14135_v14  ;;  %v14143_v13 = vcombine.high %v14103_v3, %v14135_v14 }
0x20f1   : > { %v14239_v54 = vrot.slane %v14225_v43, %v22243_v62  ;;  %v14271_v33 = vrot.slane %v14257_v63, %v22243_v62  ;;  %v14557_v25 = vpack.c.bf16 %v14274_v18, %v14138_v59  ;;  %v14139_v12 = vcombine.high %v23626_v16, %v23632_v30  ;;  %v19094_v43 = vld [vmem:[%s24526_s19 + $0x30] sm:$0xff]  ;;  %v19095_v59 = vld [vmem:[%s24526_s19 + $0x38] sm:$0xff] }
0x20f2   : > { %17949 = vmatprep.mubr.msk.bf16.mxu0 %vm10933_vm1, %v14556_v60  ;;  %17957 = vmatprep.mubr.msk.bf16.mxu1 %vm10933_vm1, %v14558_v1  ;;  %v14275_v19 = vcombine.high %v23687_v6, %v23694_v34  ;;  %v14312_v24 = vcombine.low %v23680_v52, %v23690_v55  ;;  %v14328_v8 = vcombine.low %v23698_v32, %v23707_v35 }
0x20f3   : > { %v14278_v4 = vcombine.low %v14239_v54, %v14271_v33  ;;  %v14279_v56 = vcombine.high %v14239_v54, %v14271_v33  ;;  %v14380_v39 = vcombine.low %v14355_v45, %v14363_v27  ;;  %v14396_v47 = vcombine.low %v14371_v44, %v14379_v5 }
0x20f4   : > { %v14559_v9 = vpack.c.bf16 %v14275_v19, %v14139_v12  ;;  %v14320_v16 = vrot.slane %v14312_v24, %v22243_v62  ;;  %v14336_v30 = vrot.slane %v14328_v8, %v22243_v62  ;;  %v14313_v40 = vcombine.high %v23680_v52, %v23690_v55  ;;  %v19098_v24 = vld [vmem:[%s24526_s19 + $0x28] sm:$0xff] }
0x20f5   : > { %v14565_v28 = vpack.c.bf16 %v14278_v4, %v14142_v26  ;;  %v14567_v6 = vpack.c.bf16 %v14279_v56, %v14143_v13  ;;  %v14388_v34 = vrot.slane %v14380_v39, %v22243_v62  ;;  %v14404_v0 = vrot.slane %v14396_v47, %v22243_v62  ;;  %v19096_v13 = vld [vmem:[%s24526_s19 + $0x8] sm:$0xff]  ;;  %v19099_v56 = vld [vmem:[%s24526_s19 + $0x20] sm:$0xff] }
0x20f6   : > { %v14344_v7 = vcombine.low %v14320_v16, %v14336_v30  ;;  %v14345_v22 = vcombine.high %v14320_v16, %v14336_v30  ;;  %v14327_v42 = vrot.slane %v14313_v40, %v22243_v62  ;;  %v14329_v41 = vcombine.high %v23698_v32, %v23707_v35  ;;  %v19100_v16 = vld [vmem:[%s24526_s19 + $0x18] sm:$0xff] }
0x20f7   : > { %18102 = vmatprep.subr.msk.bf16.mxu0 %vm10933_vm1, %v14565_v28  ;;  %18104 = vmatprep.subr.msk.bf16.mxu1 %vm10933_vm1, %v14567_v6  ;;  %v14708_v57 = vsel %vm10933_vm1, %v14565_v28, 0  ;;  %v14769_v52 = vsel %vm10933_vm1, %v14567_v6, 0  ;;  %v14412_v55 = vcombine.low %v14388_v34, %v14404_v0  ;;  %v14413_v2 = vcombine.high %v14388_v34, %v14404_v0  ;;  %v19101_v0 = vld [vmem:[%s24526_s19 + $0x50] sm:$0xff] }
0x20f8   : > { %17948 = vmatpush3.bf16.xpose.msra.mxu0 %v14708_v57  ;;  %17956 = vmatpush3.bf16.xpose.msra.mxu1 %v14769_v52  ;;  %v14343_v51 = vrot.slane %v14329_v41, %v22243_v62  ;;  %v14381_v17 = vcombine.high %v14355_v45, %v14363_v27  ;;  %v14397_v48 = vcombine.high %v14371_v44, %v14379_v5  ;;  %v19093_v44 = vld [vmem:[%s24526_s19 + $0x10] sm:$0xff]  ;;  %v19102_v52 = vld [vmem:[%s24526_s19 + $0x58] sm:$0xff] }
0x20f9   : > { %v14568_v29 = vpack.c.bf16 %v14412_v55, %v14344_v7  ;;  %v14570_v61 = vpack.c.bf16 %v14413_v2, %v14345_v22 }
0x20fa   : > { %v14346_v31 = vcombine.low %v14327_v42, %v14343_v51  ;;  %v14395_v32 = vrot.slane %v14381_v17, %v22243_v62  ;;  %v14411_v35 = vrot.slane %v14397_v48, %v22243_v62  ;;  %v14347_v23 = vcombine.high %v14327_v42, %v14343_v51  ;;  %v19103_v17 = vld [vmem:[%s24526_s19 + $0x70] sm:$0xff] }
0x20fb   : > { %17961 = vmatprep.subr.bf16.mxu0 %v14568_v29  ;;  %17969 = vmatprep.subr.bf16.mxu1 %v14570_v61 }
0x20fc   : > { %v14414_v20 = vcombine.low %v14395_v32, %v14411_v35  ;;  %v14415_v38 = vcombine.high %v14395_v32, %v14411_v35  ;;  %v19105_v35 = vld [vmem:[%s24526_s19 + $0x40] sm:$0xff] }
0x20fe   : > { %v23809_v53 = vpack.c.bf16 %v14414_v20, %v14346_v31  ;;  %v23811_v49 = vpack.c.bf16 %v14415_v38, %v14347_v23  ;;  %v19106_v38 = vld [vmem:[%s24526_s19 + $0x48] sm:$0xff] }
0x20ff   : > { %17950 = vmatmul.mubr.msk.bf16.vlgmr.msra.gmra.mrb[48].mxu0 %vm10933_vm1, %v14557_v25  ;;  %17958 = vmatmul.mubr.msk.bf16.vlgmr.msra.gmra.mrb[44].mxu1 %vm10933_vm1, %v14559_v9  ;;  %v19097_v25 = vld [vmem:[%s24526_s19] sm:$0xff] }
0x2100   : > { %17962 = vmatpush3.bf16.msra.mxu0 %v14568_v29  ;;  %17970 = vmatpush3.bf16.msra.mxu1 %v14570_v61  ;;  %v19104_v61 = vld [vmem:[%s24526_s19 + $0x78] sm:$0xff] }
0x21bf   : > { %v17935_v45 = vpop.f32.mrb[44].mxu0  ;;  %v17943_v27 = vpop.f32.mrb[40].mxu1 }
0x21c0   : > { %v23818_v5 = vadd.f32 %v19093_v44, %v17935_v45  ;;  %v14622_v37 = vpop.f32.mrb[45].mxu0  ;;  %v14683_v15 = vpop.f32.mrb[41].mxu1  ;;  %v23823_v63 = vadd.f32 %v19094_v43, %v17943_v27  ;;  %v19108_v43 = vld [vmem:[%s24526_s19 + $0x60] sm:$0xff] }
0x21c1   : > { %v17936_v3 = vpop.f32.mrb[46].mxu0  ;;  %v17944_v14 = vpop.f32.mrb[42].mxu1  ;;  %v23842_v12 = vadd.f32 %v19097_v25, %v14622_v37  ;;  %v23856_v39 = vadd.f32 %v19099_v56, %v14683_v15  ;;  %v19107_v37 = vld [vmem:[%s24526_s19 + $0x68] sm:$0xff] }
0x21c2   : > { %v23828_v18 = vadd.f32 %v19095_v59, %v17944_v14  ;;  %v14625_v60 = vpop.f32.mrb[47].mxu0  ;;  %v14686_v1 = vpop.f32.mrb[43].mxu1  ;;  %v14826_v26 = vsel %vm10933_vm1, %v23818_v5, -inf  ;;  %v14838_v19 = vsel %vm10933_vm1, %v23823_v63, -inf  ;;  %v23865_v30 = vadd.f32 %v19100_v16, %v17936_v3 }
0x21c3   : > { %14827 = vmax.xlane.f32.xlu0 %v14826_v26  ;;  %v23835_v54 = vadd.f32 %v19096_v13, %v14625_v60  ;;  %v23849_v8 = vadd.f32 %v19098_v24, %v14686_v1  ;;  %v14820_v47 = vsel %vm10933_vm1, %v23842_v12, -inf  ;;  %v14832_v40 = vsel %vm10933_vm1, %v23856_v39, -inf  ;;  %v23931_v1 = vpop.permute.xlu0 %12888 }
0x21c4   : > { %v14841_v33 = vsel %vm10933_vm1, %v23828_v18, -inf  ;;  %v14829_v34 = vsel %vm10933_vm1, %v23865_v30, -inf }
0x21c5   : > { %14842 = vmax.xlane.f32.xlu1 %v14841_v33  ;;  %v14823_v4 = vsel %vm10933_vm1, %v23835_v54, -inf  ;;  %v14835_v9 = vsel %vm10933_vm1, %v23849_v8, -inf }
0x21c7   : > { %14839 = vmax.xlane.f32.xlu0 %v14838_v19 }
0x21c9   : > { %14824 = vmax.xlane.f32.xlu1 %v14823_v4 }
0x21cb   : > { %14821 = vmax.xlane.f32.xlu0 %v14820_v47 }
0x21cd   : > { %14836 = vmax.xlane.f32.xlu1 %v14835_v9 }
0x21cf   : > { %14833 = vmax.xlane.f32.xlu0 %v14832_v40 }
0x21d2   : > { %v17951_v28 = vpop.f32.mrb[48].mxu0  ;;  %v17959_v6 = vpop.f32.mrb[44].mxu1 }
0x21d3   : > { %v23874_v7 = vadd.f32 %v19101_v0, %v17951_v28  ;;  %v14744_v22 = vpop.f32.mrb[49].mxu0  ;;  %v14805_v42 = vpop.f32.mrb[45].mxu1  ;;  %14830 = vmax.xlane.f32.xlu0 %v14829_v34  ;;  %v23884_v48 = vadd.f32 %v19103_v17, %v17959_v6 }
0x21d4   : > { %v17952_v41 = vpop.f32.mrb[50].mxu0  ;;  %v17960_v57 = vpop.f32.mrb[46].mxu1  ;;  %v23898_v23 = vadd.f32 %v19105_v35, %v14744_v22  ;;  %v23927_v59 = vadd.f32 %v19108_v43, %v14805_v42 }
0x21d5   : > { %v23879_v55 = vadd.f32 %v19102_v52, %v17952_v41  ;;  %v14747_v2 = vpop.f32.mrb[51].mxu0  ;;  %v14808_v51 = vpop.f32.mrb[47].mxu1  ;;  %v14850_v29 = vsel %vm10933_vm1, %v23874_v7, -inf  ;;  %v23891_v31 = vadd.f32 %v19104_v61, %v17960_v57  ;;  %v14862_v20 = vsel %vm10933_vm1, %v23884_v48, -inf }
0x21d6   : > { %v23905_v45 = vadd.f32 %v19106_v38, %v14747_v2  ;;  %v14844_v44 = vsel %vm10933_vm1, %v23898_v23, -inf  ;;  %v23914_v15 = vadd.f32 %v19107_v37, %v14808_v51  ;;  %v14856_v60 = vsel %vm10933_vm1, %v23927_v59, -inf }
0x21d7   : > { %v14853_v32 = vsel %vm10933_vm1, %v23879_v55, -inf  ;;  %14851 = vmax.xlane.f32.xlu0 %v14850_v29  ;;  %v14865_v27 = vsel %vm10933_vm1, %v23891_v31, -inf }
0x21d8   : > { %14854 = vmax.xlane.f32.xlu1 %v14853_v32  ;;  %v14847_v3 = vsel %vm10933_vm1, %v23905_v45, -inf  ;;  %v14859_v14 = vsel %vm10933_vm1, %v23914_v15, -inf }
0x21db   : > { %14863 = vmax.xlane.f32.xlu0 %v14862_v20 }
0x21dc   : > { %14866 = vmax.xlane.f32.xlu1 %v14865_v27 }
0x21df   : > { %14845 = vmax.xlane.f32.xlu0 %v14844_v44 }
0x21e0   : > { %14848 = vmax.xlane.f32.xlu1 %v14847_v3 }
0x21e4   : > { %14860 = vmax.xlane.f32.xlu1 %v14859_v14 }
0x21f5   : > { %12902 = vrot.lane.b32.xlu1 %v23374_v50, %s24535_s5  ;;  %12900 = vrot.lane.b32.xlu0 %v23363_v21, %s24535_s5 }
0x2214   : > { %14857 = vmax.xlane.f32.xlu0 %v14856_v60 }
0x2250   : > { %v14828_v26 = vpop.xlane.xlu0 %14827 }
0x2251   : > { %v14870_v13 = vsub.f32 %v23818_v5, %v14828_v26 }
0x2252   : > { %v14843_v19 = vpop.xlane.xlu1 %14842 }
0x2253   : > { %v14888_v33 = vmul.f32 1.442695, %v14870_v13  ;;  %v14875_v44 = vsub.f32 %v23828_v18, %v14843_v19 }
0x2254   : > { %v14840_v25 = vpop.xlane.xlu0 %14839 }
0x2255   : > { %18993 = vpow2.f32 %v14888_v33  ;;  %v14874_v20 = vsub.f32 %v23823_v63, %v14840_v25  ;;  %v14898_v14 = vmul.f32 1.442695, %v14875_v44 }
0x2256   : > { %v14825_v47 = vpop.xlane.xlu1 %14824 }
0x2257   : > { %v14869_v40 = vsub.f32 %v23835_v54, %v14825_v47  ;;  %v14896_v37 = vmul.f32 1.442695, %v14874_v20 }
0x2258   : > { %v14822_v24 = vpop.xlane.xlu0 %14821 }
0x2259   : > { %v14868_v4 = vsub.f32 %v23842_v12, %v14822_v24  ;;  %v14886_v34 = vmul.f32 1.442695, %v14869_v40 }
0x225a   : > { %v14837_v61 = vpop.xlane.xlu1 %14836 }
0x225b   : > { %v14884_v56 = vmul.f32 1.442695, %v14868_v4  ;;  %v14873_v3 = vsub.f32 %v23849_v8, %v14837_v61 }
0x225c   : > { %v14834_v9 = vpop.xlane.xlu0 %14833 }
0x225d   : > { %18995 = vpow2.f32 %v14884_v56  ;;  %v14872_v32 = vsub.f32 %v23856_v39, %v14834_v9  ;;  %v14894_v26 = vmul.f32 1.442695, %v14873_v3 }
0x225f   : > { %v23935_v16 = vpop.eup %18993  ;;  %v14892_v38 = vmul.f32 1.442695, %v14872_v32 }
0x2260   : > { %v14831_v28 = vpop.xlane.xlu0 %14830  ;;  %v14922_v6 = vsel %vm10933_vm1, %v23935_v16, 0.0 }
0x2261   : > { %v14871_v5 = vsub.f32 %v23865_v30, %v14831_v28  ;;  %14923 = vadd.xlane.f32.xlu0 %v14922_v6 }
0x2263   : > { %v14890_v0 = vmul.f32 1.442695, %v14871_v5 }
0x2264   : > { %v14852_v22 = vpop.xlane.xlu0 %14851 }
0x2265   : > { %18997 = vpow2.f32 %v14890_v0  ;;  %v14855_v35 = vpop.xlane.xlu1 %14854  ;;  %v14878_v13 = vsub.f32 %v23874_v7, %v14852_v22 }
0x2266   : > { %18999 = vpow2.f32 %v14886_v34  ;;  %v14879_v25 = vsub.f32 %v23879_v55, %v14855_v35 }
0x2267   : > { %v23941_v12 = vpop.eup %18995  ;;  %19001 = vpow2.f32 %v14892_v38  ;;  %v14904_v18 = vmul.f32 1.442695, %v14878_v13 }
0x2268   : > { %v14864_v42 = vpop.xlane.xlu0 %14863  ;;  %v14916_v41 = vsel %vm10933_vm1, %v23941_v12, 0.0  ;;  %19003 = vpow2.f32 %v14896_v37 }
0x2269   : > { %14917 = vadd.xlane.f32.xlu0 %v14916_v41  ;;  %v14867_v27 = vpop.xlane.xlu1 %14866  ;;  %19005 = vpow2.f32 %v14898_v14  ;;  %v14882_v7 = vsub.f32 %v23884_v48, %v14864_v42 }
0x226a   : > { %19007 = vpow2.f32 %v14894_v26  ;;  %v14883_v28 = vsub.f32 %v23891_v31, %v14867_v27 }
0x226b   : > { %v14912_v40 = vmul.f32 1.442695, %v14882_v7 }
0x226c   : > { %v14846_v54 = vpop.xlane.xlu0 %14845  ;;  %v14914_v0 = vmul.f32 1.442695, %v14883_v28 }
0x226d   : > { %v14876_v43 = vsub.f32 %v23898_v23, %v14846_v54  ;;  %v14849_v60 = vpop.xlane.xlu1 %14848 }
0x226e   : > { %v14877_v39 = vsub.f32 %v23905_v45, %v14849_v60  ;;  %v14906_v45 = vmul.f32 1.442695, %v14879_v25 }
0x226f   : > { %v23945_v57 = vpop.eup %18997  ;;  %v14900_v63 = vmul.f32 1.442695, %v14876_v43 }
0x2270   : > { %v23947_v52 = vpop.permute.xlu0 %12900  ;;  %v14925_v30 = vsel %vm10933_vm1, %v23945_v57, 0.0  ;;  %v23951_v2 = vpop.eup %18999  ;;  %v14902_v19 = vmul.f32 1.442695, %v14877_v39 }
0x2271   : > { %v13464_v51 = vcombine.low %v23363_v21, %v23947_v52  ;;  %v13465_v17 = vcombine.high %v23363_v21, %v23947_v52  ;;  %14926 = vadd.xlane.f32.xlu1 %v14925_v30  ;;  %v14919_v29 = vsel %vm10933_vm1, %v23951_v2, 0.0  ;;  %v23970_v33 = vpop.eup %19001  ;;  %19009 = vpow2.f32 %v14900_v63  ;;  %v14861_v8 = vpop.xlane.xlu1 %14860 }
0x2272   : > { %v14928_v23 = vsel %vm10933_vm1, %v23970_v33, 0.0  ;;  %v23975_v24 = vpop.eup %19003  ;;  %19011 = vpow2.f32 %v14904_v18  ;;  %v14881_v4 = vsub.f32 %v23914_v15, %v14861_v8 }
0x2273   : > { %19013 = vpow2.f32 %v14902_v19  ;;  %v14934_v55 = vsel %vm10933_vm1, %v23975_v24, 0.0  ;;  %v23981_v47 = vpop.eup %19005  ;;  %v13472_v39 = vrot.slane %v13464_v51, %v22239_v58  ;;  %v13479_v63 = vrot.slane %v13465_v17, %v22239_v58 }
0x2274   : > { %19015 = vpow2.f32 %v14906_v45  ;;  %v14910_v6 = vmul.f32 1.442695, %v14881_v4  ;;  %v23985_v48 = vpop.eup %19007  ;;  %v14937_v15 = vsel %vm10933_vm1, %v23981_v47, 0.0 }
0x2275   : > { %14920 = vadd.xlane.f32.xlu1 %v14919_v29  ;;  %v14931_v22 = vsel %vm10933_vm1, %v23985_v48, 0.0  ;;  %v12903_v43 = vpop.permute.xlu1 %12902 }
0x2276   : > { %v13669_v28 = vcombine.high %v23374_v50, %v12903_v43 }
0x227b   : > { %v23989_v34 = vpop.eup %19009 }
0x227c   : > { %v14940_v31 = vsel %vm10933_vm1, %v23989_v34, 0.0 }
0x227f   : > { %12912 = vrot.lane.b32.xlu0 %v23363_v21, %s24536_s29 }
0x2286   : > { %12914 = vrot.lane.b32.xlu1 %v23374_v50, %s24536_s29 }
0x229e   : > { %14929 = vadd.xlane.f32.xlu0 %v14928_v23 }
0x22a1   : > { %v14858_v56 = vpop.xlane.xlu0 %14857 }
0x22a2   : > { %v14880_v9 = vsub.f32 %v23927_v59, %v14858_v56  ;;  %14935 = vadd.xlane.f32.xlu0 %v14934_v55  ;;  %v23991_v59 = vpop.eup %19011 }
0x22a3   : > { %v23997_v42 = vpop.eup %19013  ;;  %v14946_v54 = vsel %vm10933_vm1, %v23991_v59, 0.0 }
0x22a4   : > { %v14908_v5 = vmul.f32 1.442695, %v14880_v9  ;;  %v14943_v41 = vsel %vm10933_vm1, %v23997_v42, 0.0  ;;  %v24003_v30 = vpop.eup %19015 }
0x22a5   : > { %v14949_v32 = vsel %vm10933_vm1, %v24003_v30, 0.0 }
0x22a6   : > { %19017 = vpow2.f32 %v14908_v5  ;;  %14938 = vadd.xlane.f32.xlu0 %v14937_v15 }
0x22a7   : > { %19019 = vpow2.f32 %v14912_v40  ;;  %v13668_v40 = vcombine.low %v23374_v50, %v12903_v43  ;;  %v13683_v50 = vrot.slane %v13669_v28, %v22239_v58 }
0x22a8   : > { %19021 = vpow2.f32 %v14910_v6 }
0x22a9   : > { %19023 = vpow2.f32 %v14914_v0 }
0x22aa   : > { %14932 = vadd.xlane.f32.xlu1 %v14931_v22  ;;  %14941 = vadd.xlane.f32.xlu0 %v14940_v31 }
0x22ae   : > { %14944 = vadd.xlane.f32.xlu1 %v14943_v41  ;;  %14947 = vadd.xlane.f32.xlu0 %v14946_v54 }
0x22b0   : > { %v24005_v29 = vpop.eup %19017 }
0x22b1   : > { %v24007_v61 = vpop.eup %19019  ;;  %v14952_v35 = vsel %vm10933_vm1, %v24005_v29, 0.0 }
0x22b2   : > { %v24013_v20 = vpop.eup %19021  ;;  %14950 = vadd.xlane.f32.xlu1 %v14949_v32  ;;  %14953 = vadd.xlane.f32.xlu0 %v14952_v35  ;;  %v14958_v27 = vsel %vm10933_vm1, %v24007_v61, 0.0  ;;  %v13676_v35 = vrot.slane %v13668_v40, %v22239_v58 }
0x22b3   : > { %v14955_v38 = vsel %vm10933_vm1, %v24013_v20, 0.0  ;;  %v24019_v44 = vpop.eup %19023 }
0x22b4   : > { %v14961_v37 = vsel %vm10933_vm1, %v24019_v44, 0.0 }
0x22b6   : > { %14956 = vadd.xlane.f32.xlu1 %v14955_v38  ;;  %14959 = vadd.xlane.f32.xlu0 %v14958_v27 }
0x22ba   : > { %14962 = vadd.xlane.f32.xlu1 %v14961_v37 }
0x22ee   : > { %v14924_v3 = vpop.xlane.xlu0 %14923 }
0x22f6   : > { %v14918_v14 = vpop.xlane.xlu0 %14917 }
0x22f7   : > { %19025 = vrcp.f32 %v14918_v14 }
0x22fa   : > { %v12913_v60 = vpop.permute.xlu0 %12912 }
0x22fb   : > { %v13480_v26 = vcombine.low %v23931_v1, %v12913_v60  ;;  %v13481_v13 = vcombine.high %v23931_v1, %v12913_v60 }
0x22fd   : > { %v13488_v18 = vrot.slane %v13480_v26, %v22239_v58  ;;  %v13495_v25 = vrot.slane %v13481_v13, %v22239_v58 }
0x22fe   : > { %v14927_v19 = vpop.xlane.xlu1 %14926 }
0x22ff   : > { %v13496_v8 = vcombine.low %v13472_v39, %v13488_v18  ;;  %v13497_v23 = vcombine.high %v13472_v39, %v13488_v18  ;;  %v13512_v7 = vcombine.low %v13479_v63, %v13495_v25  ;;  %v13513_v45 = vcombine.high %v13479_v63, %v13495_v25 }
0x2301   : > { %v13504_v1 = vrot.slane %v13496_v8, %v22243_v62  ;;  %v13511_v4 = vrot.slane %v13497_v23, %v22243_v62  ;;  %v13520_v51 = vrot.slane %v13512_v7, %v22243_v62  ;;  %v13527_v56 = vrot.slane %v13513_v45, %v22243_v62  ;;  %v19026_v18 = vpop.eup %19025 }
0x2302   : > { %v14921_v21 = vpop.xlane.xlu1 %14920 }
0x2303   : > { %v14416_v52 = vcombine.low %v13504_v1, %v13511_v4  ;;  %v17006_v17 = vcombine.high %v13504_v1, %v13511_v4  ;;  %v14432_v55 = vcombine.low %v13520_v51, %v13527_v56  ;;  %v17007_v9 = vcombine.high %v13520_v51, %v13527_v56 }
0x2304   : > { %19027 = vrcp.f32 %v14921_v21 }
0x2305   : > { %v14423_v6 = vrot.slane %v14416_v52, %v22239_v58  ;;  %v14431_v5 = vrot.slane %v17006_v17, %v22239_v58  ;;  %v14439_v15 = vrot.slane %v14432_v55, %v22239_v58  ;;  %v14447_v0 = vrot.slane %v17007_v9, %v22239_v58 }
0x2306   : > { %v12915_v22 = vpop.permute.xlu1 %12914  ;;  %19029 = vrcp.f32 %v14927_v19  ;;  %v14980_v17 = vmul.f32 %v19026_v18, %v23941_v12 }
0x2307   : > { %v13684_v31 = vcombine.low %v23647_v46, %v12915_v22  ;;  %v13685_v41 = vcombine.high %v23647_v46, %v12915_v22  ;;  %v14448_v54 = vcombine.low %v14423_v6, %v14431_v5  ;;  %v14464_v32 = vcombine.low %v14439_v15, %v14447_v0 }
0x2308   : > { %v14449_v38 = vcombine.high %v14423_v6, %v14431_v5  ;;  %v14465_v27 = vcombine.high %v14439_v15, %v14447_v0  ;;  %19031 = vrcp.f32 %v14924_v3 }
0x2309   : > { %v13692_v37 = vrot.slane %v13684_v31, %v22239_v58  ;;  %v13699_v14 = vrot.slane %v13685_v41, %v22239_v58  ;;  %v14456_v43 = vrot.slane %v14448_v54, %v22243_v62  ;;  %v14472_v60 = vrot.slane %v14464_v32, %v22243_v62 }
0x230a   : > { %v14463_v26 = vrot.slane %v14449_v38, %v22243_v62  ;;  %v14479_v46 = vrot.slane %v14465_v27, %v22243_v62 }
0x230b   : > { %v13700_v13 = vcombine.low %v13676_v35, %v13692_v37  ;;  %v13701_v39 = vcombine.high %v13676_v35, %v13692_v37  ;;  %v13716_v63 = vcombine.low %v13683_v50, %v13699_v14  ;;  %v13717_v25 = vcombine.high %v13683_v50, %v13699_v14 }
0x230c   : > { %v14480_v8 = vcombine.low %v14456_v43, %v14472_v60  ;;  %v14481_v23 = vcombine.high %v14456_v43, %v14472_v60  ;;  %v14482_v7 = vcombine.low %v14463_v26, %v14479_v46  ;;  %v14483_v21 = vcombine.high %v14463_v26, %v14479_v46 }
0x230d   : > { %v13708_v45 = vrot.slane %v13700_v13, %v22243_v62  ;;  %v13715_v1 = vrot.slane %v13701_v39, %v22243_v62  ;;  %v13724_v4 = vrot.slane %v13716_v63, %v22243_v62  ;;  %v13731_v56 = vrot.slane %v13717_v25, %v22243_v62 }
0x230e   : > { %v19028_v51 = vpop.eup %19027 }
0x230f   : > { %v14484_v19 = vcombine.low %v13708_v45, %v13715_v1  ;;  %v17008_v52 = vcombine.high %v13708_v45, %v13715_v1  ;;  %v14981_v55 = vmul.f32 %v19028_v51, %v23951_v2  ;;  %v14500_v9 = vcombine.low %v13724_v4, %v13731_v56 }
0x2310   : > { %v17009_v40 = vcombine.high %v13724_v4, %v13731_v56  ;;  %v19030_v12 = vpop.eup %19029 }
0x2311   : > { %v14491_v28 = vrot.slane %v14484_v19, %v22239_v58  ;;  %v14499_v6 = vrot.slane %v17008_v52, %v22239_v58  ;;  %v14996_v5 = vpack.c.bf16 %v14981_v55, %v14980_v17  ;;  %v14507_v15 = vrot.slane %v14500_v9, %v22239_v58 }
0x2312   : > { %v14515_v3 = vrot.slane %v17009_v40, %v22239_v58  ;;  %v19032_v50 = vpop.eup %19031  ;;  %v14983_v14 = vmul.f32 %v19030_v12, %v23945_v57  ;;  %v18817_v57 = vld [vmem:[%s24527_s21 + $0x40] sm:$0xff]  }
0x2313   : > { %17965 = vmatprep.mubr.msk.bf16.mxu0 %vm10933_vm1, %v14996_v5  ;;  %v14516_v0 = vcombine.low %v14491_v28, %v14499_v6  ;;  %v14517_v22 = vcombine.high %v14491_v28, %v14499_v6  ;;  %v14982_v13 = vmul.f32 %v19032_v50, %v23935_v16 }
0x2314   : > { %v14532_v31 = vcombine.low %v14507_v15, %v14515_v3  ;;  %v14533_v41 = vcombine.high %v14507_v15, %v14515_v3 }
0x2315   : > { %v14524_v2 = vrot.slane %v14516_v0, %v22243_v62  ;;  %v14531_v54 = vrot.slane %v14517_v22, %v22243_v62 }
0x2316   : > { %v14540_v32 = vrot.slane %v14532_v31, %v22243_v62  ;;  %v14547_v35 = vrot.slane %v14533_v41, %v22243_v62  ;;  %v14997_v62 = vpack.c.bf16 %v14983_v14, %v14982_v13  ;;  %v18822_v13 = vld [vmem:[%s24527_s21 + $0x68] sm:$0xff]  }
0x2318   : > { %v14548_v38 = vcombine.low %v14524_v2, %v14540_v32  ;;  %v14549_v27 = vcombine.high %v14524_v2, %v14540_v32  ;;  %v14550_v37 = vcombine.low %v14531_v54, %v14547_v35  ;;  %v14551_v58 = vcombine.high %v14531_v54, %v14547_v35 }
0x231a   : > { %v14569_v43 = vpack.c.bf16 %v14548_v38, %v14480_v8  ;;  %v14571_v60 = vpack.c.bf16 %v14549_v27, %v14481_v23  ;;  %v14573_v26 = vpack.c.bf16 %v14550_v37, %v14482_v7  ;;  %v24071_v46 = vpack.c.bf16 %v14551_v58, %v14483_v21  ;;  %v18820_v27 = vld [vmem:[%s24527_s21 + $0x58] sm:$0xff]   ;;  %v18821_v37 = vld [vmem:[%s24527_s21 + $0x60] sm:$0xff]  }
0x231c   : > { %17963 = vmatprep.subr.bf16.mxu0 %v14569_v43  ;;  %17971 = vmatprep.subr.bf16.mxu1 %v14571_v60 }
0x231d   : > { %17964 = vmatpush3.bf16.msra.mxu0 %v14569_v43  ;;  %17972 = vmatpush3.bf16.msra.mxu1 %v14571_v60 }
0x231e   : > { %17977 = vmatprep.subr.bf16.mxu0 %v23809_v53  ;;  %17985 = vmatprep.subr.bf16.mxu1 %v23811_v49 }
0x2320   : > { %17966 = vmatmul.mubr.msk.bf16.vlgmr.msra.gmra.mrb[52].mxu0 %vm10933_vm1, %v14997_v62 }
0x2321   : > { %17978 = vmatpush3.bf16.msra.mxu0 %v23809_v53 }
0x2322   : > { %17979 = vmatprep.subr.bf16.mxu0 %v14573_v26 }
0x2325   : > { %17980 = vmatpush3.bf16.msra.mxu0 %v14573_v26 }
0x2326   : > { %17993 = vmatprep.subr.bf16.mxu0 %v18817_v57 }
0x232b   : > { %v14930_v16 = vpop.xlane.xlu0 %14929 }
0x232f   : > { %v14936_v39 = vpop.xlane.xlu0 %14935 }
0x2333   : > { %v14939_v63 = vpop.xlane.xlu0 %14938 }
0x2334   : > { %19033 = vrcp.f32 %v14939_v63 }
0x2335   : > { %19035 = vrcp.f32 %v14930_v16 }
0x2336   : > { %19037 = vrcp.f32 %v14936_v39  ;;  %v18823_v39 = vld [vmem:[%s24527_s21 + $0x70] sm:$0xff]  }
0x2337   : > { %v14933_v18 = vpop.xlane.xlu1 %14932  ;;  %v14942_v25 = vpop.xlane.xlu0 %14941 }
0x2338   : > { %19039 = vrcp.f32 %v14933_v18 }
0x2339   : > { %19041 = vrcp.f32 %v14942_v25 }
0x233b   : > { %v14945_v8 = vpop.xlane.xlu1 %14944  ;;  %v14948_v23 = vpop.xlane.xlu0 %14947 }
0x233c   : > { %19043 = vrcp.f32 %v14945_v8 }
0x233d   : > { %19045 = vrcp.f32 %v14948_v23 }
0x233e   : > { %v19034_v53 = vpop.eup %19033 }
0x233f   : > { %v14951_v7 = vpop.xlane.xlu1 %14950  ;;  %v14954_v45 = vpop.xlane.xlu0 %14953  ;;  %v14987_v56 = vmul.f32 %v19034_v53, %v23981_v47 }
0x2340   : > { %v19036_v1 = vpop.eup %19035  ;;  %19047 = vrcp.f32 %v14951_v7  ;;  %v18824_v7 = vld [vmem:[%s24527_s21 + $0x78] sm:$0xff]  }
0x2341   : > { %v19038_v4 = vpop.eup %19037  ;;  %19049 = vrcp.f32 %v14954_v45  ;;  %v14984_v52 = vmul.f32 %v19036_v1, %v23970_v33 }
0x2342   : > { %v19040_v51 = vpop.eup %19039  ;;  %v14986_v9 = vmul.f32 %v19038_v4, %v23975_v24 }
0x2343   : > { %v14957_v21 = vpop.xlane.xlu1 %14956  ;;  %v14960_v19 = vpop.xlane.xlu0 %14959  ;;  %v14985_v17 = vmul.f32 %v19040_v51, %v23985_v48  ;;  %v18825_v51 = vld [vmem:[%s24529_s8 + $0x100] ss:$16 sps:$4 sm:$0xff]  }
0x2344   : > { %v19042_v55 = vpop.eup %19041  ;;  %19051 = vrcp.f32 %v14957_v21  ;;  %v14999_v6 = vpack.c.bf16 %v14987_v56, %v14986_v9  ;;  %v18827_v56 = vld [vmem:[%s24529_s8 + $0x104] ss:$16 sps:$4 sm:$0xff]   ;;  %v18828_v21 = vld [vmem:[%s24529_s8 + $0x108] ss:$16 sps:$4 sm:$0xff]  }
0x2345   : > { %v14998_v40 = vpack.c.bf16 %v14985_v17, %v14984_v52  ;;  %19053 = vrcp.f32 %v14960_v19  ;;  %v14988_v47 = vmul.f32 %v19042_v55, %v23989_v34  ;;  %v18830_v19 = vld [vmem:[%s24529_s8 + $0x10c] ss:$16 sps:$4 sm:$0xff]   ;;  %v18833_v52 = vld [vmem:[%s24529_s8 + $0x124] ss:$16 sps:$4 sm:$0xff]   ;;  %v18831_v55 = vld [vmem:[%s24529_s8 + $0x120] ss:$16 sps:$4 sm:$0xff]  }
0x2346   : > { %v19044_v28 = vpop.eup %19043  ;;  %v18836_v17 = vld [vmem:[%s24529_s8 + $0x12c] ss:$16 sps:$4 sm:$0xff]   ;;  %v18834_v9 = vld [vmem:[%s24529_s8 + $0x128] ss:$16 sps:$4 sm:$0xff]  }
0x2347   : > { %v14963_v5 = vpop.xlane.xlu1 %14962  ;;  %17973 = vmatprep.mubr.msk.bf16.mxu1 %vm10933_vm1, %v14998_v40  ;;  %v14989_v15 = vmul.f32 %v19044_v28, %v23997_v42  ;;  %v19046_v3 = vpop.eup %19045  ;;  %v18839_v40 = vld [vmem:[%s24529_s8 + $0x144] ss:$16 sps:$4 sm:$0xff]   ;;  %v18842_v28 = vld [vmem:[%s24529_s8 + $0x14c] ss:$16 sps:$4 sm:$0xff]  }
0x2348   : > { %19055 = vrcp.f32 %v14963_v5  ;;  %17974 = vmatmul.mubr.msk.bf16.vlgmr.msra.gmra.mrb[48].mxu1 %vm10933_vm1, %v14999_v6  ;;  %v14990_v48 = vmul.f32 %v19046_v3, %v23991_v59  ;;  %v18837_v6 = vld [vmem:[%s24529_s8 + $0x140] ss:$16 sps:$4 sm:$0xff]   ;;  %v18840_v5 = vld [vmem:[%s24529_s8 + $0x148] ss:$16 sps:$4 sm:$0xff]  }
0x2349   : > { %17986 = vmatpush3.bf16.msra.mxu1 %v23811_v49  ;;  %v15000_v33 = vpack.c.bf16 %v14989_v15, %v14988_v47 }
0x234a   : > { %v19048_v24 = vpop.eup %19047  ;;  %17987 = vmatprep.subr.bf16.mxu1 %v24071_v46 }
0x234b   : > { %v14991_v0 = vmul.f32 %v19048_v24, %v24003_v30  ;;  %17981 = vmatprep.mubr.msk.bf16.mxu0 %vm10933_vm1, %v15000_v33  ;;  %v19050_v22 = vpop.eup %19049 }
0x234c   : > { %v14992_v31 = vmul.f32 %v19050_v22, %v24005_v29  ;;  %v18818_v29 = vld [vmem:[%s24527_s21 + $0x48] sm:$0xff]  }
0x234d   : > { %17988 = vmatpush3.bf16.msra.mxu1 %v24071_v46  ;;  %v15001_v34 = vpack.c.bf16 %v14991_v0, %v14990_v48  ;;  %v24538_v0 = vld [vmem:[#allocation8_spill] sm:$0xff] }
0x234e   : > { %v19052_v42 = vpop.eup %19051  ;;  %15751 = vmatprep.subr.bf16.mxu1 %v18827_v56 }
0x234f   : > { %17982 = vmatmul.mubr.msk.bf16.vlgmr.msra.gmra.mrb[56].mxu0 %vm10933_vm1, %v15001_v34  ;;  %v14993_v49 = vmul.f32 %v19052_v42, %v24013_v20  ;;  %v19054_v41 = vpop.eup %19053  ;;  %v18819_v20 = vld [vmem:[%s24527_s21 + $0x50] sm:$0xff]   ;;  %v24539_v42 = vld [vmem:[#allocation9_spill] sm:$0xff] }
0x2350   : > { %17994 = vmatpush3.bf16.msra.mxu0 %v18817_v57  ;;  %v14994_v59 = vmul.f32 %v19054_v41, %v24007_v61  ;;  %v18843_v41 = vld [vmem:[%s24529_s8 + $0x160] ss:$16 sps:$4 sm:$0xff]  }
0x2351   : > { %v15002_v12 = vpack.c.bf16 %v14993_v49, %v14992_v31  ;;  %17995 = vmatprep.subr.bf16.mxu0 %v18818_v29 }
0x2352   : > { %v19056_v2 = vpop.eup %19055 }
0x2353   : > { %v14995_v30 = vmul.f32 %v19056_v2, %v24019_v44  ;;  %17989 = vmatprep.mubr.msk.bf16.mxu1 %vm10933_vm1, %v15002_v12  ;;  %v18845_v12 = vld [vmem:[%s24529_s8 + $0x164] ss:$16 sps:$4 sm:$0xff]   ;;  %v18846_v2 = vld [vmem:[%s24529_s8 + $0x168] ss:$16 sps:$4 sm:$0xff]  }
0x2354   : > { %17996 = vmatpush3.bf16.msra.mxu0 %v18818_v29  ;;  %v18852_v29 = vld [vmem:[%s24529_s8 + $0x188] ss:$16 sps:$4 sm:$0xff]  }
0x2355   : > { %v15003_v54 = vpack.c.bf16 %v14995_v30, %v14994_v59  ;;  %18001 = vmatprep.subr.bf16.mxu0 %v18819_v20  ;;  %v18848_v59 = vld [vmem:[%s24529_s8 + $0x16c] ss:$16 sps:$4 sm:$0xff]   ;;  %v18849_v30 = vld [vmem:[%s24529_s8 + $0x180] ss:$16 sps:$4 sm:$0xff]  }
0x2357   : > { %17990 = vmatmul.mubr.msk.bf16.vlgmr.msra.gmra.mrb[52].mxu1 %vm10933_vm1, %v15003_v54  ;;  %v18851_v54 = vld [vmem:[%s24529_s8 + $0x184] ss:$16 sps:$4 sm:$0xff]  }
0x2358   : > { %15783 = vmatprep.mubr.bf16.mxu1 %v24528_v36  ;;  %15752 = vmatpush1.bf16.msra.mxu1 %v18825_v51 }
0x2359   : > { %15753 = vmatprep.subr.bf16.mxu1 %v18833_v52 }
0x235c   : > { %15754 = vmatpush1.bf16.msra.mxu1 %v18831_v55 }
0x235d   : > { %15755 = vmatprep.subr.bf16.mxu1 %v18839_v40 }
0x2360   : > { %15756 = vmatpush1.bf16.msra.mxu1 %v18837_v6  ;;  %v18873_v6 = vld [vmem:[%s24531_s18 + $0xc0] sm:$0xff]  }
0x2361   : > { %15757 = vmatprep.subr.bf16.mxu1 %v18845_v12  ;;  %v18887_v12 = vld [vmem:[%s24531_s18 + $0xf8] sm:$0xff]  }
0x2364   : > { %15758 = vmatpush1.bf16.msra.mxu1 %v18843_v41  ;;  %v18886_v41 = vld [vmem:[%s24531_s18 + $0xb0] sm:$0xff]  }
0x2365   : > { %15759 = vmatprep.subr.bf16.mxu1 %v18851_v54 }
0x2368   : > { %15760 = vmatpush1.bf16.msra.mxu1 %v18849_v30 }
0x23f3   : > { %v17967_v61 = vpop.f32.mrb[52].mxu0 }
0x23f4   : > { %v15044_v44 = vpop.f32.mrb[53].mxu0 }
0x23f5   : > { %v17968_v32 = vpop.f32.mrb[54].mxu0 }
0x23f6   : > { %v15225_v35 = vpack.c.bf16 %v17968_v32, %v17967_v61  ;;  %v15047_v50 = vpop.f32.mrb[55].mxu0  ;;  %v18857_v61 = vld [vmem:[%s24529_s8 + $0x1a4] ss:$16 sps:$4 sm:$0xff]   ;;  %v18855_v32 = vld [vmem:[%s24529_s8 + $0x1a0] ss:$16 sps:$4 sm:$0xff]  }
0x23f7   : > { %v15224_v38 = vpack.c.bf16 %v15047_v50, %v15044_v44  ;;  %v18860_v44 = vld [vmem:[%s24529_s8 + $0x1ac] ss:$16 sps:$4 sm:$0xff]   ;;  %15761 = vmatprep.subr.bf16.mxu1 %v18857_v61  ;;  %v18863_v50 = vld [vmem:[%s24529_s8 + $0x1c4] ss:$16 sps:$4 sm:$0xff]  }
0x23f8   : > { %15762 = vmatpush1.bf16.msra.mxu1 %v18855_v32 }
0x23f9   : > { %17997 = vmatprep.mubr.msk.bf16.mxu0 %vm10933_vm1, %v15224_v38  ;;  %v18866_v38 = vld [vmem:[%s24529_s8 + $0x1cc] ss:$16 sps:$4 sm:$0xff]   ;;  %15763 = vmatprep.subr.bf16.mxu1 %v18863_v50 }
0x23fa   : > { %17998 = vmatmul.mubr.msk.bf16.vlgmr.msra.gmra.mrb[60].mxu0 %vm10933_vm1, %v15225_v35  ;;  %v18858_v35 = vld [vmem:[%s24529_s8 + $0x1a8] ss:$16 sps:$4 sm:$0xff]  }
0x23fb   : > { %18002 = vmatpush3.bf16.msra.mxu0 %v18819_v20  ;;  %v18854_v20 = vld [vmem:[%s24529_s8 + $0x18c] ss:$16 sps:$4 sm:$0xff]  }
0x23fc   : > { %18003 = vmatprep.subr.bf16.mxu0 %v18820_v27 }
0x23ff   : > { %18004 = vmatpush3.bf16.msra.mxu0 %v18820_v27  ;;  %v18861_v27 = vld [vmem:[%s24529_s8 + $0x1c0] ss:$16 sps:$4 sm:$0xff]  }
0x2400   : > { %18009 = vmatprep.subr.bf16.mxu0 %v18821_v37  ;;  %15764 = vmatpush1.bf16.msra.mxu1 %v18861_v27 }
0x241b   : > { %v17975_v58 = vpop.f32.mrb[48].mxu1 }
0x241c   : > { %v15099_v14 = vpop.f32.mrb[49].mxu1 }
0x241d   : > { %v17976_v43 = vpop.f32.mrb[50].mxu1 }
0x241e   : > { %v15227_v60 = vpack.c.bf16 %v17976_v43, %v17975_v58  ;;  %v15102_v26 = vpop.f32.mrb[51].mxu1  ;;  %v18869_v58 = vld [vmem:[%s24529_s8 + $0x1e4] ss:$16 sps:$4 sm:$0xff]   ;;  %v18867_v43 = vld [vmem:[%s24529_s8 + $0x1e0] ss:$16 sps:$4 sm:$0xff]  }
0x241f   : > { %v15226_v46 = vpack.c.bf16 %v15102_v26, %v15099_v14  ;;  %v18872_v14 = vld [vmem:[%s24529_s8 + $0x1ec] ss:$16 sps:$4 sm:$0xff]   ;;  %15765 = vmatprep.subr.bf16.mxu1 %v18869_v58 }
0x2420   : > { %15766 = vmatpush1.bf16.msra.mxu1 %v18867_v43 }
0x2421   : > { %18005 = vmatprep.mubr.msk.bf16.mxu0 %vm10933_vm1, %v15226_v46  ;;  %17533 = vmatprep.subr.bf16.mxu1 %v18873_v6 }
0x2422   : > { %v17983_v62 = vpop.f32.mrb[56].mxu0  ;;  %18006 = vmatmul.mubr.msk.bf16.vlgmr.msra.gmra.mrb[60].mxu0 %vm10933_vm1, %v15227_v60  ;;  %v18870_v60 = vld [vmem:[%s24529_s8 + $0x1e8] ss:$16 sps:$4 sm:$0xff]  }
0x2423   : > { %v15154_v57 = vpop.f32.mrb[57].mxu0  ;;  %18010 = vmatpush3.bf16.msra.mxu0 %v18821_v37  ;;  %v18864_v37 = vld [vmem:[%s24529_s8 + $0x1c8] ss:$16 sps:$4 sm:$0xff]  }
0x2424   : > { %v17984_v16 = vpop.f32.mrb[58].mxu0  ;;  %18011 = vmatprep.subr.bf16.mxu0 %v18822_v13 }
0x2425   : > { %v15229_v63 = vpack.c.bf16 %v17984_v16, %v17983_v62  ;;  %v15157_v18 = vpop.f32.mrb[59].mxu0 }
0x2426   : > { %v15228_v25 = vpack.c.bf16 %v15157_v18, %v15154_v57 }
0x2427   : > { %18012 = vmatpush3.bf16.msra.mxu0 %v18822_v13 }
0x2428   : > { %18013 = vmatprep.mubr.msk.bf16.mxu0 %vm10933_vm1, %v15228_v25  ;;  %18017 = vmatprep.subr.bf16.mxu0 %v18823_v39 }
0x242a   : > { %v17991_v8 = vpop.f32.mrb[52].mxu1 }
0x242b   : > { %v15209_v23 = vpop.f32.mrb[53].mxu1 }
0x242c   : > { %v17992_v53 = vpop.f32.mrb[54].mxu1 }
0x242d   : > { %v15231_v45 = vpack.c.bf16 %v17992_v53, %v17991_v8  ;;  %v15212_v1 = vpop.f32.mrb[55].mxu1 }
0x242e   : > { %v15230_v4 = vpack.c.bf16 %v15212_v1, %v15209_v23  ;;  %18014 = vmatmul.mubr.msk.bf16.vlgmr.msra.gmra.mrb[60].mxu0 %vm10933_vm1, %v15229_v63  ;;  %v17043_v1 = vld [vmem:[%s24530_s2 + $0x1] ss:$0 sm:$0xff] }
0x242f   : > { %18018 = vmatpush3.bf16.msra.mxu0 %v18823_v39 }
0x2430   : > { %18021 = vmatprep.mubr.msk.bf16.mxu0 %vm10933_vm1, %v15230_v4  ;;  %18019 = vmatprep.subr.bf16.mxu0 %v18824_v7 }
0x2433   : > { %18020 = vmatpush3.bf16.msra.mxu0 %v18824_v7 }
0x2434   : > { %15804 = vmatprep.subr.bf16.mxu0 %v18830_v19 }
0x243a   : > { %18022 = vmatmul.mubr.msk.bf16.vlgmr.msra.gmra.mrb[60].mxu0 %vm10933_vm1, %v15231_v45 }
0x243b   : > { %15836 = vmatprep.mubr.bf16.mxu0 %v24528_v36  ;;  %15805 = vmatpush1.bf16.msra.mxu0 %v18828_v21 }
0x243c   : > { %15806 = vmatprep.subr.bf16.mxu0 %v18836_v17 }
0x243f   : > { %15807 = vmatpush1.bf16.msra.mxu0 %v18834_v9 }
0x2440   : > { %15808 = vmatprep.subr.bf16.mxu0 %v18842_v28 }
0x2443   : > { %15809 = vmatpush1.bf16.msra.mxu0 %v18840_v5  ;;  %v18874_v5 = vld [vmem:[%s24531_s18 + $0x80] sm:$0xff]  }
0x2444   : > { %15810 = vmatprep.subr.bf16.mxu0 %v18848_v59 }
0x2447   : > { %15811 = vmatpush1.bf16.msra.mxu0 %v18846_v2  ;;  %v18888_v2 = vld [vmem:[%s24531_s18 + $0xb8] sm:$0xff]  }
0x2448   : > { %15812 = vmatprep.subr.bf16.mxu0 %v18854_v20 }
0x244b   : > { %15813 = vmatpush1.bf16.msra.mxu0 %v18852_v29 }
0x244c   : > { %15814 = vmatprep.subr.bf16.mxu0 %v18860_v44 }
0x244f   : > { %15815 = vmatpush1.bf16.msra.mxu0 %v18858_v35 }
0x2450   : > { %15816 = vmatprep.subr.bf16.mxu0 %v18866_v38 }
0x2453   : > { %15817 = vmatpush1.bf16.msra.mxu0 %v18864_v37 }
0x2454   : > { %15818 = vmatprep.subr.bf16.mxu0 %v18872_v14 }
0x2457   : > { %15819 = vmatpush1.bf16.msra.mxu0 %v18870_v60 }
0x250d   : > { %v18023_v47 = vpop.f32.mrb[60].mxu0 }
0x250e   : > { %v15485_v15 = vpop.f32.mrb[61].mxu0  ;;  %v24173_v48 = vadd.f32 %v18023_v47, %v23281_v11  ;;  %v18875_v47 = vld [vmem:[%s24531_s18 + $0xc8] sm:$0xff]  }
0x250f   : > { %v24170_v3 = vadd.f32 %v15485_v15, %v23271_v10  ;;  %v18024_v33 = vpop.f32.mrb[62].mxu0  ;;  %v18877_v15 = vld [vmem:[%s24531_s18 + $0xd0] sm:$0xff]  }
0x2510   : > { %v15488_v24 = vpop.f32.mrb[63].mxu0  ;;  %v24181_v31 = vadd.f32 %v18024_v33, %v24539_v42  ;;  %v15520_v10 = vmul.f32 %v24173_v48, %v24173_v48  ;;  %v18878_v33 = vld [vmem:[%s24531_s18 + $0x90] sm:$0xff]   ;;  %v18882_v42 = vld [vmem:[%s24531_s18 + $0xa0] sm:$0xff]  }
0x2511   : > { %v24176_v22 = vadd.f32 %v15488_v24, %v24538_v0  ;;  %v15518_v34 = vmul.f32 %v24170_v3, %v24170_v3  ;;  %v18879_v24 = vld [vmem:[%s24531_s18 + $0xd8] sm:$0xff]  }
0x2512   : > { %v15521_v11 = vmul.f32 %v24181_v31, %v24181_v31  ;;  %v18880_v0 = vld [vmem:[%s24531_s18 + $0x98] sm:$0xff]  }
0x2513   : > { %15522 = vadd.xlane.f32.xlu0 %v15518_v34  ;;  %v15519_v49 = vmul.f32 %v24176_v22, %v24176_v22  ;;  %v18881_v34 = vld [vmem:[%s24531_s18 + $0xe0] sm:$0xff]  }
0x2515   : > { %15524 = vadd.xlane.f32.xlu1 %v15519_v49  ;;  %v18883_v49 = vld [vmem:[%s24531_s18 + $0xe8] sm:$0xff]  }
0x2517   : > { %15526 = vadd.xlane.f32.xlu0 %v15520_v10  ;;  %v18884_v10 = vld [vmem:[%s24531_s18 + $0xa8] sm:$0xff]  }
0x2519   : > { %15528 = vadd.xlane.f32.xlu1 %v15521_v11  ;;  %v18885_v11 = vld [vmem:[%s24531_s18 + $0xf0] sm:$0xff]  }
0x25a0   : > { %v15523_v26 = vpop.xlane.xlu0 %15522 }
0x25a1   : > { %v15530_v46 = vmul.f32 0.0078125, %v15523_v26 }
0x25a2   : > { %v15525_v13 = vpop.xlane.xlu1 %15524 }
0x25a3   : > { %v15534_v62 = vadd.f32 1e-06, %v15530_v46  ;;  %v15531_v57 = vmul.f32 0.0078125, %v15525_v13 }
0x25a4   : > { %v15527_v16 = vpop.xlane.xlu0 %15526 }
0x25a5   : > { %19057 = vrsqrt.f32 %v15534_v62  ;;  %v15535_v39 = vadd.f32 1e-06, %v15531_v57  ;;  %v15532_v63 = vmul.f32 0.0078125, %v15527_v16 }
0x25a6   : > { %v15529_v18 = vpop.xlane.xlu1 %15528 }
0x25a7   : > { %19059 = vrsqrt.f32 %v15535_v39  ;;  %v15536_v25 = vadd.f32 1e-06, %v15532_v63  ;;  %v15533_v8 = vmul.f32 0.0078125, %v15529_v18 }
0x25a9   : > { %v15537_v23 = vadd.f32 1e-06, %v15533_v8  ;;  %19061 = vrsqrt.f32 %v15536_v25 }
0x25ab   : > { %19063 = vrsqrt.f32 %v15537_v23 }
0x25af   : > { %v19058_v53 = vpop.eup %19057 }
0x25b0   : > { %v15542_v7 = vmul.f32 %v19058_v53, %v24170_v3 }
0x25b1   : > { %v19060_v45 = vpop.eup %19059 }
0x25b2   : > { %v15543_v4 = vmul.f32 %v19060_v45, %v24176_v22  ;;  %v15552_v56 = vmul.f32 %v17043_v1, %v15542_v7 }
0x25b3   : > { %v19062_v51 = vpop.eup %19061 }
0x25b4   : > { %v15553_v21 = vmul.f32 %v17043_v1, %v15543_v4  ;;  %v15544_v55 = vmul.f32 %v19062_v51, %v24173_v48 }
0x25b5   : > { %v19064_v19 = vpop.eup %19063 }
0x25b6   : > { %v15589_v52 = vpack.c.bf16 %v15553_v21, %v15552_v56  ;;  %v15545_v17 = vmul.f32 %v19064_v19, %v24181_v31  ;;  %v15554_v40 = vmul.f32 %v17043_v1, %v15544_v55 }
0x25b8   : > { %15784 = vmatmul.mubr.bf16.vlgmr.msra.gmra.mrb[56].mxu1 %v15589_v52  ;;  %15837 = vmatmul.mubr.bf16.vlgmr.msra.gmra.mrb[64].mxu0 %v15589_v52  ;;  %v15555_v9 = vmul.f32 %v17043_v1, %v15545_v17 }
0x25b9   : > { %15793 = vmatprep.mubr.bf16.mxu1 %v24528_v36  ;;  %15846 = vmatprep.mubr.bf16.mxu0 %v24528_v36  ;;  %v18876_v36 = vld [vmem:[%s24531_s18 + $0x88] sm:$0xff]  }
0x25ba   : > { %v15590_v28 = vpack.c.bf16 %v15555_v9, %v15554_v40  ;;  %17534 = vmatpush3.bf16.msra.mxu1 %v18874_v5 }
0x25bb   : > { %17535 = vmatprep.subr.bf16.mxu1 %v18875_v47 }
0x25be   : > { %17536 = vmatpush3.bf16.msra.mxu1 %v18876_v36 }
0x25bf   : > { %17537 = vmatprep.subr.bf16.mxu1 %v18877_v15 }
0x25c0   : > { %15794 = vmatmul.mubr.bf16.gmra.mrb[60].mxu1 %v15590_v28  ;;  %15847 = vmatmul.mubr.bf16.gmra.mrb[68].mxu0 %v15590_v28 }
0x25c2   : > { %17538 = vmatpush3.bf16.msra.mxu1 %v18878_v33 }
0x25c3   : > { %17539 = vmatprep.subr.bf16.mxu1 %v18879_v24 }
0x25c6   : > { %17540 = vmatpush3.bf16.msra.mxu1 %v18880_v0 }
0x25c7   : > { %17541 = vmatprep.subr.bf16.mxu1 %v18881_v34 }
0x25ca   : > { %17542 = vmatpush3.bf16.msra.mxu1 %v18882_v42 }
0x25cb   : > { %17543 = vmatprep.subr.bf16.mxu1 %v18883_v49 }
0x25ce   : > { %17544 = vmatpush3.bf16.msra.mxu1 %v18884_v10 }
0x25cf   : > { %17545 = vmatprep.subr.bf16.mxu1 %v18885_v11 }
0x25d2   : > { %17546 = vmatpush3.bf16.msra.mxu1 %v18886_v41 }
0x25d3   : > { %17547 = vmatprep.subr.bf16.mxu1 %v18887_v12 }
0x25d6   : > { %17548 = vmatpush3.bf16.msra.mxu1 %v18888_v2 }
0x268b   : > { %v24306_v59 = vpop.f32.mrb[56].mxu1  ;;  %v24308_v30 = vpop.f32.mrb[64].mxu0 }
0x268c   : > { %v15857_v54 = vmul.f32 %v24306_v59, %v24306_v59  ;;  %v24312_v29 = vpop.f32.mrb[57].mxu1  ;;  %v24314_v20 = vpop.f32.mrb[65].mxu0 }
0x268d   : > { %v15858_v61 = vmul.f32 %v24312_v29, %v24312_v29  ;;  %v24318_v44 = vpop.f32.mrb[58].mxu1  ;;  %v24320_v32 = vpop.f32.mrb[66].mxu0 }
0x268e   : > { %v15865_v35 = vmul.f32 %v15857_v54, %v24306_v59  ;;  %v15859_v50 = vmul.f32 %v24318_v44, %v24318_v44  ;;  %v24325_v38 = vpop.f32.mrb[59].mxu1  ;;  %v24327_v27 = vpop.f32.mrb[67].mxu0 }
0x268f   : > { %v15866_v37 = vmul.f32 %v15858_v61, %v24312_v29  ;;  %v15860_v58 = vmul.f32 %v24325_v38, %v24325_v38 }
0x2690   : > { %v15873_v14 = vmul.f32 0.044715, %v15865_v35  ;;  %v15867_v43 = vmul.f32 %v15859_v50, %v24318_v44 }
0x2691   : > { %v15874_v60 = vmul.f32 0.044715, %v15866_v37  ;;  %v15868_v26 = vmul.f32 %v15860_v58, %v24325_v38 }
0x2692   : > { %v15881_v46 = vadd.f32 %v15873_v14, %v24306_v59  ;;  %v15875_v13 = vmul.f32 0.044715, %v15867_v43 }
0x2693   : > { %v15882_v62 = vadd.f32 %v15874_v60, %v24312_v29  ;;  %v15876_v57 = vmul.f32 0.044715, %v15868_v26  ;;  %v24336_v16 = vpop.f32.mrb[60].mxu1  ;;  %v24338_v39 = vpop.f32.mrb[68].mxu0 }
0x2694   : > { %v15889_v63 = vmul.f32 0.7978846, %v15881_v46  ;;  %v15883_v18 = vadd.f32 %v15875_v13, %v24318_v44  ;;  %v15861_v25 = vmul.f32 %v24336_v16, %v24336_v16  ;;  %v24343_v8 = vpop.f32.mrb[61].mxu1  ;;  %v24345_v23 = vpop.f32.mrb[69].mxu0 }
0x2695   : > { %v15890_v53 = vmul.f32 0.7978846, %v15882_v62  ;;  %v15884_v7 = vadd.f32 %v15876_v57, %v24325_v38  ;;  %v15862_v45 = vmul.f32 %v24343_v8, %v24343_v8  ;;  %v24350_v1 = vpop.f32.mrb[62].mxu1  ;;  %v24352_v4 = vpop.f32.mrb[70].mxu0 }
0x2696   : > { %19065 = vtanh.f32 %v15889_v63  ;;  %v15891_v51 = vmul.f32 0.7978846, %v15883_v18  ;;  %v15869_v56 = vmul.f32 %v15861_v25, %v24336_v16  ;;  %v15863_v21 = vmul.f32 %v24350_v1, %v24350_v1  ;;  %v24357_v19 = vpop.f32.mrb[63].mxu1  ;;  %v24359_v52 = vpop.f32.mrb[71].mxu0 }
0x2697   : > { %19067 = vtanh.f32 %v15890_v53  ;;  %v15892_v17 = vmul.f32 0.7978846, %v15884_v7  ;;  %v15870_v55 = vmul.f32 %v15862_v45, %v24343_v8  ;;  %v15864_v9 = vmul.f32 %v24357_v19, %v24357_v19 }
0x2698   : > { %19069 = vtanh.f32 %v15891_v51  ;;  %v15877_v40 = vmul.f32 0.044715, %v15869_v56  ;;  %v15871_v28 = vmul.f32 %v15863_v21, %v24350_v1 }
0x2699   : > { %19071 = vtanh.f32 %v15892_v17  ;;  %v15878_v6 = vmul.f32 0.044715, %v15870_v55  ;;  %v15872_v5 = vmul.f32 %v15864_v9, %v24357_v19 }
0x269a   : > { %v15885_v47 = vadd.f32 %v15877_v40, %v24336_v16  ;;  %v15879_v36 = vmul.f32 0.044715, %v15871_v28 }
0x269b   : > { %v15886_v15 = vadd.f32 %v15878_v6, %v24343_v8  ;;  %v15880_v33 = vmul.f32 0.044715, %v15872_v5 }
0x269c   : > { %v15893_v24 = vmul.f32 0.7978846, %v15885_v47  ;;  %v15887_v0 = vadd.f32 %v15879_v36, %v24350_v1 }
0x269d   : > { %v15894_v34 = vmul.f32 0.7978846, %v15886_v15  ;;  %v15888_v42 = vadd.f32 %v15880_v33, %v24357_v19 }
0x269e   : > { %19073 = vtanh.f32 %v15893_v24  ;;  %v15895_v49 = vmul.f32 0.7978846, %v15887_v0 }
0x269f   : > { %19075 = vtanh.f32 %v15894_v34  ;;  %v15896_v10 = vmul.f32 0.7978846, %v15888_v42 }
0x26a0   : > { %v19066_v11 = vpop.eup %19065  ;;  %19077 = vtanh.f32 %v15895_v49 }
0x26a1   : > { %v19068_v41 = vpop.eup %19067  ;;  %v15905_v12 = vadd.f32 1.0, %v19066_v11  ;;  %19079 = vtanh.f32 %v15896_v10 }
0x26a2   : > { %v19070_v2 = vpop.eup %19069  ;;  %v15906_v54 = vadd.f32 1.0, %v19068_v41 }
0x26a3   : > { %v19072_v61 = vpop.eup %19071  ;;  %v15913_v35 = vmul.f32 0.5, %v15905_v12  ;;  %v15907_v50 = vadd.f32 1.0, %v19070_v2 }
0x26a4   : > { %v15914_v37 = vmul.f32 0.5, %v15906_v54  ;;  %v15908_v58 = vadd.f32 1.0, %v19072_v61 }
0x26a5   : > { %v15921_v14 = vmul.f32 %v15913_v35, %v24306_v59  ;;  %v15915_v43 = vmul.f32 0.5, %v15907_v50 }
0x26a6   : > { %v15922_v60 = vmul.f32 %v15914_v37, %v24312_v29  ;;  %v15916_v26 = vmul.f32 0.5, %v15908_v58 }
0x26a7   : > { %v15929_v46 = vmul.f32 %v15921_v14, %v24308_v30  ;;  %v15923_v13 = vmul.f32 %v15915_v43, %v24318_v44 }
0x26a8   : > { %v19074_v62 = vpop.eup %19073  ;;  %v15930_v57 = vmul.f32 %v15922_v60, %v24314_v20  ;;  %v15924_v63 = vmul.f32 %v15916_v26, %v24325_v38  ;;  %v17156_v26 = vld [vmem:[%s24540_s24] ss:$0 sm:$0xff] }
0x26a9   : > { %v19076_v18 = vpop.eup %19075  ;;  %v15931_v25 = vmul.f32 %v15923_v13, %v24320_v32  ;;  %v15909_v53 = vadd.f32 1.0, %v19074_v62 }
0x26aa   : > { %v19078_v7 = vpop.eup %19077  ;;  %v15932_v59 = vmul.f32 %v15924_v63, %v24327_v27  ;;  %v15910_v45 = vadd.f32 1.0, %v19076_v18 }
0x26ab   : > { %v19080_v51 = vpop.eup %19079  ;;  %v15970_v29 = vpack.c.bf16 %v15931_v25, %v15929_v46  ;;  %v15917_v56 = vmul.f32 0.5, %v15909_v53  ;;  %v15911_v21 = vadd.f32 1.0, %v19078_v7 }
0x26ac   : > { %v15971_v30 = vpack.c.bf16 %v15932_v59, %v15930_v57  ;;  %v15918_v17 = vmul.f32 0.5, %v15910_v45  ;;  %v15912_v44 = vadd.f32 1.0, %v19080_v51 }
0x26ad   : > { %v15925_v55 = vmul.f32 %v15917_v56, %v24336_v16  ;;  %v15919_v20 = vmul.f32 0.5, %v15911_v21 }
0x26ae   : > { %v15926_v38 = vmul.f32 %v15918_v17, %v24343_v8  ;;  %v15920_v9 = vmul.f32 0.5, %v15912_v44  ;;  %16102 = vmatprep.mubr.bf16.mxu1 %v15971_v30 }
0x26af   : > { %v15933_v32 = vmul.f32 %v15925_v55, %v24338_v39  ;;  %v15927_v40 = vmul.f32 %v15919_v20, %v24350_v1  ;;  %16103 = vmatmul.mubr.bf16.vlgmr.msra.gmra.mrb[64].mxu1 %v15970_v29 }
0x26b0   : > { %v15934_v27 = vmul.f32 %v15926_v38, %v24345_v23  ;;  %v15928_v28 = vmul.f32 %v15920_v9, %v24357_v19 }
0x26b1   : > { %v15935_v6 = vmul.f32 %v15927_v40, %v24352_v4 }
0x26b2   : > { %v15936_v5 = vmul.f32 %v15928_v28, %v24359_v52 }
0x26b3   : > { %v15972_v47 = vpack.c.bf16 %v15935_v6, %v15933_v32 }
0x26b4   : > { %v15973_v16 = vpack.c.bf16 %v15936_v5, %v15934_v27 }
0x26b6   : > { %16110 = vmatprep.mubr.bf16.mxu1 %v15973_v16 }
0x26b7   : > { %16111 = vmatmul.mubr.bf16.gmra.mrb[68].mxu1 %v15972_v47 }
0x2782   : > { %v17549_v8 = vpop.f32.mrb[64].mxu1 }
0x2783   : > { %v17550_v36 = vpop.f32.mrb[65].mxu1 }
0x2784   : > { %v17551_v15 = vadd.f32 %v17550_v36, %v17549_v8  ;;  %v17552_v33 = vpop.f32.mrb[66].mxu1 }
0x2785   : > { %v17553_v39 = vpop.f32.mrb[67].mxu1 }
0x2786   : > { %v16119_v1 = vadd.f32 %v17551_v15, %v24170_v3  ;;  %v17554_v24 = vadd.f32 %v17553_v39, %v17552_v33 }
0x2788   : > { %v16120_v23 = vadd.f32 %v17554_v24, %v24176_v22  ;;  %v16124_v0 = vmul.f32 %v16119_v1, %v16119_v1 }
0x278a   : > { %16128 = vadd.xlane.f32.xlu0 %v16124_v0  ;;  %v17555_v19 = vpop.f32.mrb[68].mxu1  ;;  %v16125_v4 = vmul.f32 %v16120_v23, %v16120_v23 }
0x278b   : > { %v17556_v34 = vpop.f32.mrb[69].mxu1 }
0x278c   : > { %v17557_v52 = vadd.f32 %v17556_v34, %v17555_v19  ;;  %16130 = vadd.xlane.f32.xlu1 %v16125_v4  ;;  %v17558_v42 = vpop.f32.mrb[70].mxu1 }
0x278d   : > { %v17559_v49 = vpop.f32.mrb[71].mxu1 }
0x278e   : > { %v16121_v10 = vadd.f32 %v17557_v52, %v24173_v48  ;;  %v17560_v11 = vadd.f32 %v17559_v49, %v17558_v42 }
0x2790   : > { %v16122_v41 = vadd.f32 %v17560_v11, %v24181_v31  ;;  %v16126_v12 = vmul.f32 %v16121_v10, %v16121_v10 }
0x2792   : > { %16132 = vadd.xlane.f32.xlu0 %v16126_v12  ;;  %v16127_v3 = vmul.f32 %v16122_v41, %v16122_v41 }
0x2794   : > { %16134 = vadd.xlane.f32.xlu1 %v16127_v3 }
0x2817   : > { %v16129_v2 = vpop.xlane.xlu0 %16128 }
0x2818   : > { %v16136_v22 = vmul.f32 0.0078125, %v16129_v2 }
0x2819   : > { %v16131_v54 = vpop.xlane.xlu1 %16130 }
0x281a   : > { %v16140_v61 = vadd.f32 1e-06, %v16136_v22  ;;  %v16137_v35 = vmul.f32 0.0078125, %v16131_v54 }
0x281c   : > { %19081 = vrsqrt.f32 %v16140_v61  ;;  %v16141_v50 = vadd.f32 1e-06, %v16137_v35 }
0x281e   : > { %19083 = vrsqrt.f32 %v16141_v50 }
0x281f   : > { %v16133_v37 = vpop.xlane.xlu0 %16132 }
0x2820   : > { %v16138_v58 = vmul.f32 0.0078125, %v16133_v37 }
0x2821   : > { %v16135_v48 = vpop.xlane.xlu1 %16134 }
0x2822   : > { %v16142_v14 = vadd.f32 1e-06, %v16138_v58  ;;  %v16139_v43 = vmul.f32 0.0078125, %v16135_v48 }
0x2824   : > { %19085 = vrsqrt.f32 %v16142_v14  ;;  %v16143_v31 = vadd.f32 1e-06, %v16139_v43 }
0x2826   : > { %v19082_v60 = vpop.eup %19081  ;;  %19087 = vrsqrt.f32 %v16143_v31 }
0x2827   : > { %v16148_v46 = vmul.f32 %v19082_v60, %v16119_v1 }
0x2828   : > { %v19084_v13 = vpop.eup %19083 }
0x2829   : > { %v16158_v62 = vmul.f32 %v17156_v26, %v16148_v46  ;;  %v16149_v57 = vmul.f32 %v19084_v13, %v16120_v23 }
0x282b   : > { %16162 = vst [vmem:[%s19274_s3] sm:$0xff] %v16158_v62  ;;  %v16159_v63 = vmul.f32 %v17156_v26, %v16149_v57 }
0x282d   : > { %16163 = vst [vmem:[%s19274_s3 + $0x8] sm:$0xff] %v16159_v63 }
0x282e   : > { %v19086_v18 = vpop.eup %19085 }
0x282f   : > { %v16150_v25 = vmul.f32 %v19086_v18, %v16121_v10 }
0x2830   : > { %v19088_v53 = vpop.eup %19087 }
0x2831   : > { %v16160_v7 = vmul.f32 %v17156_v26, %v16150_v25  ;;  %v16151_v59 = vmul.f32 %v19088_v53, %v16122_v41 }
0x2833   : > { %16164 = vst [vmem:[%s19274_s3 + $0x10] sm:$0xff] %v16160_v7  ;;  %v16161_v45 = vmul.f32 %v17156_v26, %v16151_v59 }
0x2835   : > { %16165 = vst [vmem:[%s19274_s3 + $0x18] sm:$0xff] %v16161_v45 }
0x2836 PF: > { %s24541_s17 = sld [smem:[#allocation2_spill]] }
0x283c   : > { %s34_s5 = sadd.s32 1, %s24541_s17  }
0x283d   : > { %p31_p6 = scmp.ge.s32.totalorder %s34_s5, 4  }
0x283f   :  { %33 = sbr.rel (!%p31_p6) target bundleno = 18 (0x12), region = 172 }

</bundles_post_ra>
